<compile_context>
chip_gen: v5e
topology: v5e:2x2
jax: 0.10.0
libtpu: 0.0.40
codegen_flags: <defaults>
</compile_context>

<pallas_src>
import functools

import jax
import jax.numpy as jnp
from jax import lax
from jax.experimental import pallas as pl
from jax.experimental.pallas import tpu as pltpu


# ---------------------------------------------------------------------------
# Fused SPPF kernel: cv1 -> (maxpool5 x3, separable) -> cv2, per (batch, tile).
# ---------------------------------------------------------------------------
def _sppf_kernel(x_ref, w1_ref, b1_ref, w2_ref, b2_ref, o_ref,
                 pad_ref, acc_ref, *, H, Wp, W_valid, TH, WH, halo):
    # x_ref  : (H*Wp, C1)          flattened full-height NHWC slab (one batch elem)
    # o_ref  : (TH*Wp, C2)         flattened output row tile
    # pad_ref: ((WH+4)*Wp, C_)     H-padded stage buffer ("-inf" border rows)
    # acc_ref: (TH*Wp, C2) f32     cv2 accumulator
    C_ = pad_ref.shape[-1]
    dt = pad_ref.dtype
    n_rows = WH * Wp                     # flattened positions of the window
    base = 2 * Wp                        # interior start inside pad_ref

    if halo:
        h = pl.program_id(1)
        row0 = h * TH                    # first output row of this tile
        # Haloed row window [s, s+WH) clipped into the image; halo = 6 covers
        # the 13x13 receptive field of the 3 cascaded 5x5 pools.
        s = jnp.clip(row0 - 6, 0, H - WH)
        off = row0 - s                   # output rows within the window
        xw = x_ref[pl.ds(pl.multiple_of(s * Wp, 8), n_rows), :]
    else:
        xw = x_ref[...]

    # ---- cv1: SiLU(x @ w1 + b1), BatchNorm folded into w1/b1 ----------------
    y = jnp.dot(xw, w1_ref[...], preferred_element_type=jnp.float32) + b1_ref[...]
    y = y * jax.nn.sigmoid(y)
    y = y.astype(dt)

    # "Minus infinity" for the max pools (finite so nothing odd reaches the MXU).
    neg = float(jnp.finfo(dt).min)

    # Per-position column index (lane-dense, flattened layout).
    col = lax.broadcasted_iota(jnp.int32, (WH, Wp, C_), 1).reshape(n_rows, C_)
    if Wp != W_valid:                    # mask the columns added by W padding
        y = jnp.where(col < W_valid, y, neg)

    # Column-validity masks for the 4 W-direction shifted reads.  Masking at
    # row boundaries / true image edges is equivalent to -inf padding.
    w_shifts = ((-2, col >= 2), (-1, col >= 1),
                (1, col < Wp - 1), (2, col < Wp - 2))

    # Border rows (2 above, 2 below) for the H-direction shifted reads.
    border = jnp.full((2 * Wp, C_), neg, dt)
    pad_ref[0:base, :] = border
    pad_ref[base + n_rows:base + n_rows + 2 * Wp, :] = border

    def pool_w(v):
        # 5-tap max along W: center value + 4 column-shifted slices of the
        # buffer interior (which currently holds v), edge-masked.
        out = v
        for d, m in w_shifts:
            shifted = pad_ref[base + d:base + d + n_rows, :]
            out = jnp.where(m, jnp.maximum(out, shifted), out)
        return out

    def pool_h(r):
        # 5-tap max along H: whole-row shifts are plain leading-dim slices of
        # the padded buffer (which currently holds r); border rows = padding.
        out = r
        for d in (-2, -1, 1, 2):
            out = jnp.maximum(out, pad_ref[base + d * Wp:base + d * Wp + n_rows, :])
        return out

    def contrib(k, stage):
        # cv2 contribution of stage k against the k-th channel slice of w2.
        if halo:
            a = pad_ref[pl.ds(pl.multiple_of(base + off * Wp, 8), TH * Wp), :]
        else:
            a = stage                    # full height: TH == WH, offset 0
        return jnp.dot(a, w2_ref[k * C_:(k + 1) * C_, :],
                       preferred_element_type=jnp.float32)

    pad_ref[base:base + n_rows, :] = y   # stage 0 (cv1 output) into the buffer
    acc_ref[...] = contrib(0, y)

    # ---- three cascaded separable 5x5 / stride-1 / pad-2 max pools ----------
    v = y
    for k in (1, 2, 3):
        r = pool_w(v)                              # W direction
        pad_ref[base:base + n_rows, :] = r         # needed for H-dir slices
        t = pool_h(r)                              # H direction
        if halo or k < 3:                          # skip the y3 writeback
            pad_ref[base:base + n_rows, :] = t
        acc_ref[...] += contrib(k, t)
        v = t

    # ---- cv2 epilogue: bias + SiLU ------------------------------------------
    z = acc_ref[...] + b2_ref[...]
    z = z * jax.nn.sigmoid(z)
    o_ref[...] = z.astype(o_ref.dtype)


# ---------------------------------------------------------------------------
# Wrapper: padding, budget-driven tiling, pallas_call.
# ---------------------------------------------------------------------------
def sppf_pallas_nhwc(x_nhwc, w1, b1, w2, b2, *, force_row_tiles=None):
    """Fused SPPF on NHWC input.  w1:(C1,C_), w2:(4*C_,C2), b*: (Cout,)."""
    N, H, W, C1 = x_nhwc.shape
    C_ = w1.shape[1]
    C2 = w2.shape[1]
    assert w2.shape[0] == 4 * C_
    assert jnp.issubdtype(x_nhwc.dtype, jnp.floating), "SPPF kernel needs floats"
    itemsize = x_nhwc.dtype.itemsize

    # Pad W to a multiple of 8 so the flattened (rows*W, C) layout keeps every
    # reshape / row-slice sublane aligned; padded columns are masked in-kernel.
    Wp = (W + 7) // 8 * 8
    if Wp != W:
        x_nhwc = jnp.pad(x_nhwc, ((0, 0), (0, 0), (0, Wp - W), (0, 0)))

    # ---- budget-driven tile selection (prefer full height) -------------------
    try:
        info = pltpu.get_tpu_info()
        vmem_cap = int(getattr(info, "vmem_capacity_bytes", 0)) or (64 << 20)
    except Exception:
        vmem_cap = 64 << 20
    vmem_cap = max(vmem_cap, 32 << 20)
    budget = int(0.70 * vmem_cap)

    def vmem_estimate(th, wh):
        x_blk = 2 * H * Wp * C1 * itemsize                     # dbl-buffered slab
        w_blk = 2 * (C1 * C_ + C_ + 4 * C_ * C2 + C2) * w1.dtype.itemsize
        o_blk = 2 * th * Wp * C2 * itemsize
        padb = (wh + 4) * Wp * C_ * itemsize
        accb = th * Wp * C2 * 4
        live = 6 * wh * Wp * C_ * 4                            # in-flight values
        return x_blk + w_blk + o_blk + padb + accb + live

    TH, WH, NH, halo = H, H, 1, False
    if force_row_tiles is not None and force_row_tiles > 1:
        # e.g. force_row_tiles=2 on v7x at batch 1 to feed both TensorCores.
        assert H % force_row_tiles == 0
        NH = int(force_row_tiles)
        TH = H // NH
        WH = min(TH + 12, H)
        halo = True
    elif vmem_estimate(H, H) > budget:
        # Fallback: haloed row tiles (6-row recompute halo per side).
        # TODO(synk): if the full-height input slab alone exceeds VMEM, switch
        # x to memory_space=pl.ANY with manual haloed-row DMA instead.
        best = None
        for d in range(H - 1, 0, -1):
            if H % d:
                continue
            wh = min(d + 12, H)
            if vmem_estimate(d, wh) <= budget:
                best = (d, wh, H // d)
                break
        if best is None:
            best = (1, min(13, H), H)
        TH, WH, NH = best
        halo = True

    est = vmem_estimate(TH, WH)
    vmem_limit = int(min(0.9 * vmem_cap, max(32 << 20, 2 * est)))

    kernel = functools.partial(_sppf_kernel, H=H, Wp=Wp, W_valid=W,
                               TH=TH, WH=WH, halo=halo)

    x2 = x_nhwc.reshape(N, H * Wp, C1)
    out = pl.pallas_call(
        kernel,
        out_shape=jax.ShapeDtypeStruct((N, H * Wp, C2), x_nhwc.dtype),
        grid=(N, NH),
        in_specs=[
            # Full-height slab per batch element (block index constant along h).
            pl.BlockSpec((None, H * Wp, C1), lambda n, h: (n, 0, 0)),
            pl.BlockSpec((C1, C_), lambda n, h: (0, 0)),
            pl.BlockSpec((1, C_), lambda n, h: (0, 0)),
            pl.BlockSpec((4 * C_, C2), lambda n, h: (0, 0)),
            pl.BlockSpec((1, C2), lambda n, h: (0, 0)),
        ],
        out_specs=pl.BlockSpec((None, TH * Wp, C2), lambda n, h: (n, h, 0)),
        scratch_shapes=[
            pltpu.VMEM(((WH + 4) * Wp, C_), x_nhwc.dtype),   # H-padded stage buf
            pltpu.VMEM((TH * Wp, C2), jnp.float32),          # cv2 accumulator
        ],
        compiler_params=pltpu.CompilerParams(
            dimension_semantics=("parallel", "parallel"),
            vmem_limit_bytes=vmem_limit),
    )(x2, w1, b1.reshape(1, C_), w2, b2.reshape(1, C2))

    return out.reshape(N, H, Wp, C2)[:, :, :W, :]


# ---------------------------------------------------------------------------
# SPPF forward (PyTorch-equivalent): NCHW in / NCHW out like the nn.Module.
# ---------------------------------------------------------------------------
def sppf_forward(x_nchw, w1, b1, w2, b2, *, force_row_tiles=None):
    x = jnp.transpose(x_nchw, (0, 2, 3, 1))                       # NCHW -> NHWC
    out = sppf_pallas_nhwc(x, w1, b1, w2, b2, force_row_tiles=force_row_tiles)
    return jnp.transpose(out, (0, 3, 1, 2))                       # NHWC -> NCHW


sppf_forward_jit = jax.jit(sppf_forward, static_argnames=("force_row_tiles",))


# ---------------------------------------------------------------------------
# Parameter construction: fold BatchNorm (inference) into the 1x1 conv.
# ---------------------------------------------------------------------------
def make_folded_conv_params(key, cin, cout, eps=1e-3):
    kw, kg, kb, km, kv = jax.random.split(key, 5)
    w = jax.random.normal(kw, (cin, cout), jnp.float32) * 0.1      # 1x1 conv weight
    gamma = 1.0 + 0.1 * jax.random.normal(kg, (cout,), jnp.float32)
    beta = 0.1 * jax.random.normal(kb, (cout,), jnp.float32)
    mean = 0.1 * jax.random.normal(km, (cout,), jnp.float32)
    var = 1.0 + 0.1 * jax.random.uniform(kv, (cout,), jnp.float32)
    scale = gamma / jnp.sqrt(var + eps)
    return w * scale[None, :], beta - mean * scale


# ---------------------------------------------------------------------------
# Pure-JAX reference (correctness check for the Pallas path).
# ---------------------------------------------------------------------------
def _ref_sppf(x_nchw, w1, b1, w2, b2):
    x = jnp.transpose(x_nchw, (0, 2, 3, 1))

    def pw(v, w, b):
        y = jnp.einsum("nhwc,co->nhwo", v, w) + b
        return y * jax.nn.sigmoid(y)

    def mp5(v):
        return jax.lax.reduce_window(
            v, -jnp.inf, jax.lax.max,
            window_dimensions=(1, 5, 5, 1), window_strides=(1, 1, 1, 1),
            padding=((0, 0), (2, 2), (2, 2), (0, 0)))

    x = pw(x, w1, b1)
    y1 = mp5(x); y2 = mp5(y1); y3 = mp5(y2)
    out = pw(jnp.concatenate([x, y1, y2, y3], axis=-1), w2, b2)
    return jnp.transpose(out, (0, 3, 1, 2))


if __name__ == "__main__":
    key = jax.random.PRNGKey(0)

    def run_case(case_key, n, c1, c2, h, w, force_row_tiles=None):
        c_ = c1 // 2
        kx, k1, k2 = jax.random.split(case_key, 3)
        x = jax.random.normal(kx, (n, c1, h, w), jnp.float32)      # NCHW input
        w1, b1 = make_folded_conv_params(k1, c1, c_)               # cv1: c1 -> c_
        w2, b2 = make_folded_conv_params(k2, 4 * c_, c2)           # cv2: 4c_ -> c2
        out = sppf_forward_jit(x, w1, b1, w2, b2, force_row_tiles=force_row_tiles)
        out = jax.block_until_ready(out)
        ref = _ref_sppf(x, w1, b1, w2, b2)
        assert out.shape == (n, c2, h, w), out.shape
        err = float(jnp.max(jnp.abs(out - ref)))
        assert jnp.allclose(out, ref, rtol=1e-4, atol=1e-4), f"mismatch: {err}"

    ka, kb, kc = jax.random.split(key, 3)
    run_case(ka, 2, 4, 4, 16, 16)                       # full-height fast path
    run_case(kb, 1, 4, 4, 12, 12)                       # W=12 -> padded to 16
    run_case(kc, 1, 4, 4, 32, 16, force_row_tiles=4)    # haloed row-tile path
    print("KERNEL_OK")
</pallas_src>

<mosaic_0001>
module attributes {stable_mosaic.version = 11 : i64} {
  func.func @_sppf_kernel(%arg0: i32, %arg1: i32, %arg2: memref<1x256x4xf32, #tpu.memory_space<vmem>>, %arg3: memref<4x2xf32, #tpu.memory_space<vmem>>, %arg4: memref<1x2xf32, #tpu.memory_space<vmem>>, %arg5: memref<8x4xf32, #tpu.memory_space<vmem>>, %arg6: memref<1x4xf32, #tpu.memory_space<vmem>>, %arg7: memref<1x256x4xf32, #tpu.memory_space<vmem>>, %arg8: memref<320x2xf32, #tpu.memory_space<vmem>>, %arg9: memref<256x4xf32, #tpu.memory_space<vmem>>) attributes {dimension_semantics = [#tpu.dimension_semantics<parallel>, #tpu.dimension_semantics<parallel>], iteration_bounds = array<i64: 2, 1>, scalar_prefetch = 0 : i64, scratch_operands = 2 : i64, tpu.core_type = #tpu.core_type<tc>, window_params = [{transform_indices = @transform_0, window_bounds = array<i64: 1, 256, 4>}, {pipeline_mode = #tpu.pipeline_mode<synchronous>, transform_indices = @transform_1, window_bounds = array<i64: 4, 2>}, {pipeline_mode = #tpu.pipeline_mode<synchronous>, transform_indices = @transform_2, window_bounds = array<i64: 1, 2>}, {pipeline_mode = #tpu.pipeline_mode<synchronous>, transform_indices = @transform_3, window_bounds = array<i64: 8, 4>}, {pipeline_mode = #tpu.pipeline_mode<synchronous>, transform_indices = @transform_4, window_bounds = array<i64: 1, 4>}, {transform_indices = @transform_5, window_bounds = array<i64: 1, 256, 4>}]} {
    %c0 = arith.constant 0 : index
    %c0_0 = arith.constant 0 : index
    %c0_1 = arith.constant 0 : index
    %0 = vector.load %arg2[%c0, %c0_0, %c0_1] : memref<1x256x4xf32, #tpu.memory_space<vmem>>, vector<1x256x4xf32>
    %1 = vector.shape_cast %0 : vector<1x256x4xf32> to vector<256x4xf32>
    %c0_2 = arith.constant 0 : index
    %c0_3 = arith.constant 0 : index
    %2 = vector.load %arg3[%c0_2, %c0_3] : memref<4x2xf32, #tpu.memory_space<vmem>>, vector<4x2xf32>
    %cst = arith.constant dense<0.000000e+00> : vector<256x2xf32>
    %3 = tpu.matmul %1, %2, %cst {dimension_numbers = #tpu.dot_dimension_numbers<[1], [0], [0], [1], [0, 0, 1, 1], [], []>} : vector<256x4xf32>, vector<4x2xf32>, vector<256x2xf32> -> vector<256x2xf32>
    %c0_4 = arith.constant 0 : index
    %c0_5 = arith.constant 0 : index
    %4 = vector.load %arg4[%c0_4, %c0_5] : memref<1x2xf32, #tpu.memory_space<vmem>>, vector<1x2xf32>
    %5 = vector.broadcast %4 : vector<1x2xf32> to vector<256x2xf32>
    %6 = arith.addf %3, %5 : vector<256x2xf32>
    %7 = arith.negf %6 : vector<256x2xf32>
    %8 = math.exp %7 : vector<256x2xf32>
    %cst_6 = arith.constant 1.000000e+00 : f32
    %9 = vector.broadcast %cst_6 : f32 to vector<256x2xf32>
    %10 = arith.addf %9, %8 : vector<256x2xf32>
    %11 = arith.divf %9, %10 : vector<256x2xf32>
    %12 = arith.mulf %6, %11 : vector<256x2xf32>
    %13 = tpu.iota {dimensions = array<i32: 1>} : vector<16x16x2xi32>
    %14 = vector.shape_cast %13 : vector<16x16x2xi32> to vector<256x2xi32>
    %c2_i32 = arith.constant 2 : i32
    %15 = vector.broadcast %c2_i32 : i32 to vector<256x2xi32>
    %16 = arith.cmpi sge, %14, %15 : vector<256x2xi32>
    %c1_i32 = arith.constant 1 : i32
    %17 = vector.broadcast %c1_i32 : i32 to vector<256x2xi32>
    %18 = arith.cmpi sge, %14, %17 : vector<256x2xi32>
    %c15_i32 = arith.constant 15 : i32
    %19 = vector.broadcast %c15_i32 : i32 to vector<256x2xi32>
    %20 = arith.cmpi slt, %14, %19 : vector<256x2xi32>
    %c14_i32 = arith.constant 14 : i32
    %21 = vector.broadcast %c14_i32 : i32 to vector<256x2xi32>
    %22 = arith.cmpi slt, %14, %21 : vector<256x2xi32>
    %cst_7 = arith.constant -3.40282347E+38 : f32
    %23 = vector.broadcast %cst_7 : f32 to vector<32x2xf32>
    %c0_8 = arith.constant 0 : index
    %c0_9 = arith.constant 0 : index
    %24 = vector.load %arg8[%c0_8, %c0_9] : memref<320x2xf32, #tpu.memory_space<vmem>>, vector<32x2xf32>
    tpu.vector_store %arg8[%c0_8, %c0_9], %23 {strides = array<i32>} : memref<320x2xf32, #tpu.memory_space<vmem>>, vector<32x2xf32>,
    %c288 = arith.constant 288 : index
    %c0_10 = arith.constant 0 : index
    %25 = vector.load %arg8[%c288, %c0_10] : memref<320x2xf32, #tpu.memory_space<vmem>>, vector<32x2xf32>
    tpu.vector_store %arg8[%c288, %c0_10], %23 {strides = array<i32>} : memref<320x2xf32, #tpu.memory_space<vmem>>, vector<32x2xf32>,
    %c32 = arith.constant 32 : index
    %c0_11 = arith.constant 0 : index
    %26 = vector.load %arg8[%c32, %c0_11] : memref<320x2xf32, #tpu.memory_space<vmem>>, vector<256x2xf32>
    tpu.vector_store %arg8[%c32, %c0_11], %12 {strides = array<i32>} : memref<320x2xf32, #tpu.memory_space<vmem>>, vector<256x2xf32>,
    %c0_12 = arith.constant 0 : index
    %c0_13 = arith.constant 0 : index
    %27 = vector.load %arg5[%c0_12, %c0_13] : memref<8x4xf32, #tpu.memory_space<vmem>>, vector<2x4xf32>
    %cst_14 = arith.constant dense<0.000000e+00> : vector<256x4xf32>
    %28 = tpu.matmul %12, %27, %cst_14 {dimension_numbers = #tpu.dot_dimension_numbers<[1], [0], [0], [1], [0, 0, 1, 1], [], []>} : vector<256x2xf32>, vector<2x4xf32>, vector<256x4xf32> -> vector<256x4xf32>
    %c0_15 = arith.constant 0 : index
    %c0_16 = arith.constant 0 : index
    %29 = vector.load %arg9[%c0_15, %c0_16] : memref<256x4xf32, #tpu.memory_space<vmem>>, vector<256x4xf32>
    tpu.vector_store %arg9[%c0_15, %c0_16], %28 {strides = array<i32>} : memref<256x4xf32, #tpu.memory_space<vmem>>, vector<256x4xf32>,
    %c30 = arith.constant 30 : index
    %c0_17 = arith.constant 0 : index
    %30 = vector.load %arg8[%c30, %c0_17] : memref<320x2xf32, #tpu.memory_space<vmem>>, vector<256x2xf32>
    %31 = arith.maximumf %12, %30 : vector<256x2xf32>
    %32 = arith.select %16, %31, %12 : vector<256x2xi1>, vector<256x2xf32>
    %c31 = arith.constant 31 : index
    %c0_18 = arith.constant 0 : index
    %33 = vector.load %arg8[%c31, %c0_18] : memref<320x2xf32, #tpu.memory_space<vmem>>, vector<256x2xf32>
    %34 = arith.maximumf %32, %33 : vector<256x2xf32>
    %35 = arith.select %18, %34, %32 : vector<256x2xi1>, vector<256x2xf32>
    %c33 = arith.constant 33 : index
    %c0_19 = arith.constant 0 : index
    %36 = vector.load %arg8[%c33, %c0_19] : memref<320x2xf32, #tpu.memory_space<vmem>>, vector<256x2xf32>
    %37 = arith.maximumf %35, %36 : vector<256x2xf32>
    %38 = arith.select %20, %37, %35 : vector<256x2xi1>, vector<256x2xf32>
    %c34 = arith.constant 34 : index
    %c0_20 = arith.constant 0 : index
    %39 = vector.load %arg8[%c34, %c0_20] : memref<320x2xf32, #tpu.memory_space<vmem>>, vector<256x2xf32>
    %40 = arith.maximumf %38, %39 : vector<256x2xf32>
    %41 = arith.select %22, %40, %38 : vector<256x2xi1>, vector<256x2xf32>
    %c32_21 = arith.constant 32 : index
    %c0_22 = arith.constant 0 : index
    %42 = vector.load %arg8[%c32_21, %c0_22] : memref<320x2xf32, #tpu.memory_space<vmem>>, vector<256x2xf32>
    tpu.vector_store %arg8[%c32_21, %c0_22], %41 {strides = array<i32>} : memref<320x2xf32, #tpu.memory_space<vmem>>, vector<256x2xf32>,
    %c0_23 = arith.constant 0 : index
    %c0_24 = arith.constant 0 : index
    %43 = vector.load %arg8[%c0_23, %c0_24] : memref<320x2xf32, #tpu.memory_space<vmem>>, vector<256x2xf32>
    %44 = arith.maximumf %41, %43 : vector<256x2xf32>
    %c16 = arith.constant 16 : index
    %c0_25 = arith.constant 0 : index
    %45 = vector.load %arg8[%c16, %c0_25] : memref<320x2xf32, #tpu.memory_space<vmem>>, vector<256x2xf32>
    %46 = arith.maximumf %44, %45 : vector<256x2xf32>
    %c48 = arith.constant 48 : index
    %c0_26 = arith.constant 0 : index
    %47 = vector.load %arg8[%c48, %c0_26] : memref<320x2xf32, #tpu.memory_space<vmem>>, vector<256x2xf32>
    %48 = arith.maximumf %46, %47 : vector<256x2xf32>
    %c64 = arith.constant 64 : index
    %c0_27 = arith.constant 0 : index
    %49 = vector.load %arg8[%c64, %c0_27] : memref<320x2xf32, #tpu.memory_space<vmem>>, vector<256x2xf32>
    %50 = arith.maximumf %48, %49 : vector<256x2xf32>
    %c32_28 = arith.constant 32 : index
    %c0_29 = arith.constant 0 : index
    %51 = vector.load %arg8[%c32_28, %c0_29] : memref<320x2xf32, #tpu.memory_space<vmem>>, vector<256x2xf32>
    tpu.vector_store %arg8[%c32_28, %c0_29], %50 {strides = array<i32>} : memref<320x2xf32, #tpu.memory_space<vmem>>, vector<256x2xf32>,
    %c0_30 = arith.constant 0 : index
    %c0_31 = arith.constant 0 : index
    %52 = vector.load %arg9[%c0_30, %c0_31] : memref<256x4xf32, #tpu.memory_space<vmem>>, vector<256x4xf32>
    %c2 = arith.constant 2 : index
    %c0_32 = arith.constant 0 : index
    %53 = vector.load %arg5[%c2, %c0_32] : memref<8x4xf32, #tpu.memory_space<vmem>>, vector<2x4xf32>
    %cst_33 = arith.constant dense<0.000000e+00> : vector<256x4xf32>
    %54 = tpu.matmul %50, %53, %cst_33 {dimension_numbers = #tpu.dot_dimension_numbers<[1], [0], [0], [1], [0, 0, 1, 1], [], []>} : vector<256x2xf32>, vector<2x4xf32>, vector<256x4xf32> -> vector<256x4xf32>
    %55 = arith.addf %52, %54 : vector<256x4xf32>
    %c0_34 = arith.constant 0 : index
    %c0_35 = arith.constant 0 : index
    %56 = vector.load %arg9[%c0_34, %c0_35] : memref<256x4xf32, #tpu.memory_space<vmem>>, vector<256x4xf32>
    tpu.vector_store %arg9[%c0_34, %c0_35], %55 {strides = array<i32>} : memref<256x4xf32, #tpu.memory_space<vmem>>, vector<256x4xf32>,
    %c30_36 = arith.constant 30 : index
    %c0_37 = arith.constant 0 : index
    %57 = vector.load %arg8[%c30_36, %c0_37] : memref<320x2xf32, #tpu.memory_space<vmem>>, vector<256x2xf32>
    %58 = arith.maximumf %50, %57 : vector<256x2xf32>
    %59 = arith.select %16, %58, %50 : vector<256x2xi1>, vector<256x2xf32>
    %c31_38 = arith.constant 31 : index
    %c0_39 = arith.constant 0 : index
    %60 = vector.load %arg8[%c31_38, %c0_39] : memref<320x2xf32, #tpu.memory_space<vmem>>, vector<256x2xf32>
    %61 = arith.maximumf %59, %60 : vector<256x2xf32>
    %62 = arith.select %18, %61, %59 : vector<256x2xi1>, vector<256x2xf32>
    %c33_40 = arith.constant 33 : index
    %c0_41 = arith.constant 0 : index
    %63 = vector.load %arg8[%c33_40, %c0_41] : memref<320x2xf32, #tpu.memory_space<vmem>>, vector<256x2xf32>
    %64 = arith.maximumf %62, %63 : vector<256x2xf32>
    %65 = arith.select %20, %64, %62 : vector<256x2xi1>, vector<256x2xf32>
    %c34_42 = arith.constant 34 : index
    %c0_43 = arith.constant 0 : index
    %66 = vector.load %arg8[%c34_42, %c0_43] : memref<320x2xf32, #tpu.memory_space<vmem>>, vector<256x2xf32>
    %67 = arith.maximumf %65, %66 : vector<256x2xf32>
    %68 = arith.select %22, %67, %65 : vector<256x2xi1>, vector<256x2xf32>
    %c32_44 = arith.constant 32 : index
    %c0_45 = arith.constant 0 : index
    %69 = vector.load %arg8[%c32_44, %c0_45] : memref<320x2xf32, #tpu.memory_space<vmem>>, vector<256x2xf32>
    tpu.vector_store %arg8[%c32_44, %c0_45], %68 {strides = array<i32>} : memref<320x2xf32, #tpu.memory_space<vmem>>, vector<256x2xf32>,
    %c0_46 = arith.constant 0 : index
    %c0_47 = arith.constant 0 : index
    %70 = vector.load %arg8[%c0_46, %c0_47] : memref<320x2xf32, #tpu.memory_space<vmem>>, vector<256x2xf32>
    %71 = arith.maximumf %68, %70 : vector<256x2xf32>
    %c16_48 = arith.constant 16 : index
    %c0_49 = arith.constant 0 : index
    %72 = vector.load %arg8[%c16_48, %c0_49] : memref<320x2xf32, #tpu.memory_space<vmem>>, vector<256x2xf32>
    %73 = arith.maximumf %71, %72 : vector<256x2xf32>
    %c48_50 = arith.constant 48 : index
    %c0_51 = arith.constant 0 : index
    %74 = vector.load %arg8[%c48_50, %c0_51] : memref<320x2xf32, #tpu.memory_space<vmem>>, vector<256x2xf32>
    %75 = arith.maximumf %73, %74 : vector<256x2xf32>
    %c64_52 = arith.constant 64 : index
    %c0_53 = arith.constant 0 : index
    %76 = vector.load %arg8[%c64_52, %c0_53] : memref<320x2xf32, #tpu.memory_space<vmem>>, vector<256x2xf32>
    %77 = arith.maximumf %75, %76 : vector<256x2xf32>
    %c32_54 = arith.constant 32 : index
    %c0_55 = arith.constant 0 : index
    %78 = vector.load %arg8[%c32_54, %c0_55] : memref<320x2xf32, #tpu.memory_space<vmem>>, vector<256x2xf32>
    tpu.vector_store %arg8[%c32_54, %c0_55], %77 {strides = array<i32>} : memref<320x2xf32, #tpu.memory_space<vmem>>, vector<256x2xf32>,
    %c0_56 = arith.constant 0 : index
    %c0_57 = arith.constant 0 : index
    %79 = vector.load %arg9[%c0_56, %c0_57] : memref<256x4xf32, #tpu.memory_space<vmem>>, vector<256x4xf32>
    %c4 = arith.constant 4 : index
    %c0_58 = arith.constant 0 : index
    %80 = vector.load %arg5[%c4, %c0_58] : memref<8x4xf32, #tpu.memory_space<vmem>>, vector<2x4xf32>
    %cst_59 = arith.constant dense<0.000000e+00> : vector<256x4xf32>
    %81 = tpu.matmul %77, %80, %cst_59 {dimension_numbers = #tpu.dot_dimension_numbers<[1], [0], [0], [1], [0, 0, 1, 1], [], []>} : vector<256x2xf32>, vector<2x4xf32>, vector<256x4xf32> -> vector<256x4xf32>
    %82 = arith.addf %79, %81 : vector<256x4xf32>
    %c0_60 = arith.constant 0 : index
    %c0_61 = arith.constant 0 : index
    %83 = vector.load %arg9[%c0_60, %c0_61] : memref<256x4xf32, #tpu.memory_space<vmem>>, vector<256x4xf32>
    tpu.vector_store %arg9[%c0_60, %c0_61], %82 {strides = array<i32>} : memref<256x4xf32, #tpu.memory_space<vmem>>, vector<256x4xf32>,
    %c30_62 = arith.constant 30 : index
    %c0_63 = arith.constant 0 : index
    %84 = vector.load %arg8[%c30_62, %c0_63] : memref<320x2xf32, #tpu.memory_space<vmem>>, vector<256x2xf32>
    %85 = arith.maximumf %77, %84 : vector<256x2xf32>
    %86 = arith.select %16, %85, %77 : vector<256x2xi1>, vector<256x2xf32>
    %c31_64 = arith.constant 31 : index
    %c0_65 = arith.constant 0 : index
    %87 = vector.load %arg8[%c31_64, %c0_65] : memref<320x2xf32, #tpu.memory_space<vmem>>, vector<256x2xf32>
    %88 = arith.maximumf %86, %87 : vector<256x2xf32>
    %89 = arith.select %18, %88, %86 : vector<256x2xi1>, vector<256x2xf32>
    %c33_66 = arith.constant 33 : index
    %c0_67 = arith.constant 0 : index
    %90 = vector.load %arg8[%c33_66, %c0_67] : memref<320x2xf32, #tpu.memory_space<vmem>>, vector<256x2xf32>
    %91 = arith.maximumf %89, %90 : vector<256x2xf32>
    %92 = arith.select %20, %91, %89 : vector<256x2xi1>, vector<256x2xf32>
    %c34_68 = arith.constant 34 : index
    %c0_69 = arith.constant 0 : index
    %93 = vector.load %arg8[%c34_68, %c0_69] : memref<320x2xf32, #tpu.memory_space<vmem>>, vector<256x2xf32>
    %94 = arith.maximumf %92, %93 : vector<256x2xf32>
    %95 = arith.select %22, %94, %92 : vector<256x2xi1>, vector<256x2xf32>
    %c32_70 = arith.constant 32 : index
    %c0_71 = arith.constant 0 : index
    %96 = vector.load %arg8[%c32_70, %c0_71] : memref<320x2xf32, #tpu.memory_space<vmem>>, vector<256x2xf32>
    tpu.vector_store %arg8[%c32_70, %c0_71], %95 {strides = array<i32>} : memref<320x2xf32, #tpu.memory_space<vmem>>, vector<256x2xf32>,
    %c0_72 = arith.constant 0 : index
    %c0_73 = arith.constant 0 : index
    %97 = vector.load %arg8[%c0_72, %c0_73] : memref<320x2xf32, #tpu.memory_space<vmem>>, vector<256x2xf32>
    %98 = arith.maximumf %95, %97 : vector<256x2xf32>
    %c16_74 = arith.constant 16 : index
    %c0_75 = arith.constant 0 : index
    %99 = vector.load %arg8[%c16_74, %c0_75] : memref<320x2xf32, #tpu.memory_space<vmem>>, vector<256x2xf32>
    %100 = arith.maximumf %98, %99 : vector<256x2xf32>
    %c48_76 = arith.constant 48 : index
    %c0_77 = arith.constant 0 : index
    %101 = vector.load %arg8[%c48_76, %c0_77] : memref<320x2xf32, #tpu.memory_space<vmem>>, vector<256x2xf32>
    %102 = arith.maximumf %100, %101 : vector<256x2xf32>
    %c64_78 = arith.constant 64 : index
    %c0_79 = arith.constant 0 : index
    %103 = vector.load %arg8[%c64_78, %c0_79] : memref<320x2xf32, #tpu.memory_space<vmem>>, vector<256x2xf32>
    %104 = arith.maximumf %102, %103 : vector<256x2xf32>
    %c0_80 = arith.constant 0 : index
    %c0_81 = arith.constant 0 : index
    %105 = vector.load %arg9[%c0_80, %c0_81] : memref<256x4xf32, #tpu.memory_space<vmem>>, vector<256x4xf32>
    %c6 = arith.constant 6 : index
    %c0_82 = arith.constant 0 : index
    %106 = vector.load %arg5[%c6, %c0_82] : memref<8x4xf32, #tpu.memory_space<vmem>>, vector<2x4xf32>
    %cst_83 = arith.constant dense<0.000000e+00> : vector<256x4xf32>
    %107 = tpu.matmul %104, %106, %cst_83 {dimension_numbers = #tpu.dot_dimension_numbers<[1], [0], [0], [1], [0, 0, 1, 1], [], []>} : vector<256x2xf32>, vector<2x4xf32>, vector<256x4xf32> -> vector<256x4xf32>
    %108 = arith.addf %105, %107 : vector<256x4xf32>
    %c0_84 = arith.constant 0 : index
    %c0_85 = arith.constant 0 : index
    %109 = vector.load %arg9[%c0_84, %c0_85] : memref<256x4xf32, #tpu.memory_space<vmem>>, vector<256x4xf32>
    tpu.vector_store %arg9[%c0_84, %c0_85], %108 {strides = array<i32>} : memref<256x4xf32, #tpu.memory_space<vmem>>, vector<256x4xf32>,
    %c0_86 = arith.constant 0 : index
    %c0_87 = arith.constant 0 : index
    %110 = vector.load %arg9[%c0_86, %c0_87] : memref<256x4xf32, #tpu.memory_space<vmem>>, vector<256x4xf32>
    %c0_88 = arith.constant 0 : index
    %c0_89 = arith.constant 0 : index
    %111 = vector.load %arg6[%c0_88, %c0_89] : memref<1x4xf32, #tpu.memory_space<vmem>>, vector<1x4xf32>
    %112 = vector.broadcast %111 : vector<1x4xf32> to vector<256x4xf32>
    %113 = arith.addf %110, %112 : vector<256x4xf32>
    %114 = arith.negf %113 : vector<256x4xf32>
    %115 = math.exp %114 : vector<256x4xf32>
    %cst_90 = arith.constant 1.000000e+00 : f32
    %116 = vector.broadcast %cst_90 : f32 to vector<256x4xf32>
    %117 = arith.addf %116, %115 : vector<256x4xf32>
    %118 = arith.divf %116, %117 : vector<256x4xf32>
    %119 = arith.mulf %113, %118 : vector<256x4xf32>
    %c0_91 = arith.constant 0 : index
    %c0_92 = arith.constant 0 : index
    %c0_93 = arith.constant 0 : index
    %120 = vector.load %arg7[%c0_91, %c0_92, %c0_93] : memref<1x256x4xf32, #tpu.memory_space<vmem>>, vector<1x256x4xf32>
    %121 = vector.shape_cast %120 : vector<1x256x4xf32> to vector<256x4xf32>
    %122 = vector.shape_cast %119 : vector<256x4xf32> to vector<1x256x4xf32>
    tpu.vector_store %arg7[%c0_91, %c0_92, %c0_93], %122 {strides = array<i32>} : memref<1x256x4xf32, #tpu.memory_space<vmem>>, vector<1x256x4xf32>,
    return
  }
  func.func @transform_0(%arg0: i32, %arg1: i32) -> (i32, i32, i32) {
    %c0_i32 = arith.constant 0 : i32
    %c0_i32_0 = arith.constant 0 : i32
    %c0_i32_1 = arith.constant 0 : i32
    return %arg0, %c0_i32, %c0_i32_0 : i32, i32, i32
  }
  func.func @transform_1(%arg0: i32, %arg1: i32) -> (i32, i32) {
    %c0_i32 = arith.constant 0 : i32
    %c0_i32_0 = arith.constant 0 : i32
    %c0_i32_1 = arith.constant 0 : i32
    return %c0_i32, %c0_i32_0 : i32, i32
  }
  func.func @transform_2(%arg0: i32, %arg1: i32) -> (i32, i32) {
    %c0_i32 = arith.constant 0 : i32
    %c0_i32_0 = arith.constant 0 : i32
    %c0_i32_1 = arith.constant 0 : i32
    return %c0_i32, %c0_i32_0 : i32, i32
  }
  func.func @transform_3(%arg0: i32, %arg1: i32) -> (i32, i32) {
    %c0_i32 = arith.constant 0 : i32
    %c0_i32_0 = arith.constant 0 : i32
    %c0_i32_1 = arith.constant 0 : i32
    return %c0_i32, %c0_i32_0 : i32, i32
  }
  func.func @transform_4(%arg0: i32, %arg1: i32) -> (i32, i32) {
    %c0_i32 = arith.constant 0 : i32
    %c0_i32_0 = arith.constant 0 : i32
    %c0_i32_1 = arith.constant 0 : i32
    return %c0_i32, %c0_i32_0 : i32, i32
  }
  func.func @transform_5(%arg0: i32, %arg1: i32) -> (i32, i32, i32) {
    %c0_i32 = arith.constant 0 : i32
    %c0_i32_0 = arith.constant 0 : i32
    return %arg0, %arg1, %c0_i32 : i32, i32, i32
  }
}

</mosaic_0001>

<bundles_post_ra>
// kernel: sppf_forward.1
= control target key start
LH: loop header
LB: loop body
LE: loop exit
PB: predicated region body
PF: predicated region fallthrough
CT: control target
= control target key end

     0   :  { %s5591_s18 = smov 0   ;;  %s5593_s19 = smov 0   ;;  %s9555_s0 = inlined_call_operand.vmem [shape: f32[2,256,4], index: 0, kind: input, shape index: {}]   ;;  %s9556_s1 = inlined_call_operand.vmem [shape: f32[4,2], index: 1, kind: input, shape index: {}]   ;;  %s9557_s2 = inlined_call_operand.vmem [shape: f32[1,2], index: 2, kind: input, shape index: {}]   ;;  %s9558_s3 = inlined_call_operand.vmem [shape: f32[8,4], index: 3, kind: input, shape index: {}]   ;;  %s9559_s4 = inlined_call_operand.vmem [shape: f32[1,4], index: 4, kind: input, shape index: {}]   ;;  %s9560_s5 = inlined_call_operand.vmem [shape: f32[2,256,4], index: 5, kind: output, shape index: {}]  }
   0x1   :  { %s5595_s20 = smov 0  }
   0x2 LB: > { %s27_s21 = sadd.s32 1, %s5554_s19  ;;  %p5005_p0 = scmp.ge.s32.totalorder %s5558_s20, 1  ;;  %s5558_s20 = sphi %s5595_s20, %s15_s20   ;;  %s5554_s19 = sphi %s5593_s19, %s10003_s19   ;;  %s5550_s18 = sphi %s5591_s18, %s10002_s18  }
   0x3   : > { %p29_p1 = scmp.ge.s32.totalorder %s27_s21, 2  ;;  %p201_p2 = scmp.lt.s32.totalorder %s5558_s20, 3 }
   0x5   : > { %s10005_s21 = smov (%p29_p1, %s27_s21), 0  ;;  %p202_p3 = pnand %p5005_p0, %p201_p2 }
   0x7   : > { %205 = sbr.rel (%p202_p3) target bundleno = 890 (0x37a), region = 40 }
   0xc   : > { %v280_v0 = vld [vmem:[%s9556_s1] sm:$0xf]  ;;  %vm382_vm0 = vcmask 1043456   ;;  %p233_p4 = scmp.lt.s32.totalorder %s5550_s18, 1  ;;  %vm9590_vm1 = vcmask 31744   ;;  %vm1150_vm2 = vcmask 15360   ;;  %v1139_v61 = vlaneseq }
   0xd   : > { %5010 = vmatpush.msk.msra.mxu0 %vm382_vm0, %v280_v0  ;;  %5243 = vmatpush.msk.msra.mxu1 %vm382_vm0, %v280_v0  ;;  %v5689_v33 = vld [vmem:[%s9557_s2] ss:$0 sm:$0xff]  ;;  %v5560_v35 = vmov -3.4028235e+38  }
   0xe   : > { %5244 = vmatpush.msk.msra.mxu2 %vm382_vm0, %v280_v0  ;;  %s10007_s18 = smov (!%p233_p4, %s5550_s18), 1  ;;  %5245 = vmatpush.msk.msra.mxu3 %vm382_vm0, %v280_v0  ;;  %1154 = vst.msk [vmem:[#allocation2 + $0x18] sm:$0xff] %vm1150_vm2, %v5560_v35 }
   0xf   : > { %s5241_s24 = sshll.u32 %s10007_s18, 8  ;;  %1151 = vst.msk [vmem:[#allocation2] sm:$0xff] %vm1150_vm2, %v5560_v35 }
  0x10   : > { %s5620_s27 = scalar_lea.vmem %s9555_s0, %s5241_s24  ;;  %1152 = vst.msk [vmem:[#allocation2 + $0x8] sm:$0xff] %vm1150_vm2, %v5560_v35  ;;  %s9123_s23 = scalar_lea.vmem %s9560_s5, %s5241_s24 }
  0x11   : > { %v248_v1 = vld [vmem:[%s5620_s27] sm:$0xff]  ;;  %v249_v5 = vld [vmem:[%s5620_s27 + $0x8] sm:$0xff]  ;;  %v250_v9 = vld [vmem:[%s5620_s27 + $0x10] sm:$0xff]  ;;  %1153 = vst.msk [vmem:[#allocation2 + $0x10] sm:$0xff] %vm1150_vm2, %v5560_v35 }
  0x12   : > { %v256_v2 = vld [vmem:[%s5620_s27 + $0x40] sm:$0xff]  ;;  %5011 = vmatmul.msk.f32.vlgmr.msra.gmra.mxu0 %vm9590_vm1, %v248_v1  ;;  %v257_v6 = vld [vmem:[%s5620_s27 + $0x48] sm:$0xff]  ;;  %v258_v10 = vld [vmem:[%s5620_s27 + $0x50] sm:$0xff]  ;;  %1155 = vst.msk [vmem:[#allocation2 + $0x120] sm:$0xff] %vm1150_vm2, %v5560_v35 }
  0x13   : > { %v264_v3 = vld [vmem:[%s5620_s27 + $0x80] sm:$0xff]  ;;  %5019 = vmatmul.msk.f32.vlgmr.msra.gmra.mxu1 %vm9590_vm1, %v256_v2  ;;  %v265_v7 = vld [vmem:[%s5620_s27 + $0x88] sm:$0xff]  ;;  %v266_v11 = vld [vmem:[%s5620_s27 + $0x90] sm:$0xff]  ;;  %1156 = vst.msk [vmem:[#allocation2 + $0x128] sm:$0xff] %vm1150_vm2, %v5560_v35 }
  0x14   : > { %v272_v4 = vld [vmem:[%s5620_s27 + $0xc0] sm:$0xff]  ;;  %5027 = vmatmul.msk.f32.vlgmr.msra.gmra.mxu2 %vm9590_vm1, %v264_v3  ;;  %v273_v8 = vld [vmem:[%s5620_s27 + $0xc8] sm:$0xff]  ;;  %v274_v12 = vld [vmem:[%s5620_s27 + $0xd0] sm:$0xff]  ;;  %1157 = vst.msk [vmem:[#allocation2 + $0x130] sm:$0xff] %vm1150_vm2, %v5560_v35 }
  0x15   : > { %5035 = vmatmul.msk.f32.vlgmr.msra.gmra.mxu3 %vm9590_vm1, %v272_v4  ;;  %v251_v13 = vld [vmem:[%s5620_s27 + $0x18] sm:$0xff]  ;;  %v252_v17 = vld [vmem:[%s5620_s27 + $0x20] sm:$0xff]  ;;  %v253_v21 = vld [vmem:[%s5620_s27 + $0x28] sm:$0xff]  ;;  %1158 = vst.msk [vmem:[#allocation2 + $0x138] sm:$0xff] %vm1150_vm2, %v5560_v35 }
  0x16   : > { %v259_v14 = vld [vmem:[%s5620_s27 + $0x58] sm:$0xff]  ;;  %v260_v18 = vld [vmem:[%s5620_s27 + $0x60] sm:$0xff]  ;;  %v261_v22 = vld [vmem:[%s5620_s27 + $0x68] sm:$0xff] }
  0x17   : > { %v267_v15 = vld [vmem:[%s5620_s27 + $0x98] sm:$0xff]  ;;  %v268_v19 = vld [vmem:[%s5620_s27 + $0xa0] sm:$0xff]  ;;  %v269_v23 = vld [vmem:[%s5620_s27 + $0xa8] sm:$0xff] }
  0x18   : > { %v275_v16 = vld [vmem:[%s5620_s27 + $0xd8] sm:$0xff]  ;;  %v276_v20 = vld [vmem:[%s5620_s27 + $0xe0] sm:$0xff]  ;;  %v277_v24 = vld [vmem:[%s5620_s27 + $0xe8] sm:$0xff] }
  0x19   : > { %v254_v25 = vld [vmem:[%s5620_s27 + $0x30] sm:$0xff]  ;;  %v255_v29 = vld [vmem:[%s5620_s27 + $0x38] sm:$0xff] }
  0x1a   : > { %5012 = vmatmul.msk.f32.gmra.mxu0 %vm9590_vm1, %v249_v5  ;;  %v262_v26 = vld [vmem:[%s5620_s27 + $0x70] sm:$0xff]  ;;  %v263_v30 = vld [vmem:[%s5620_s27 + $0x78] sm:$0xff] }
  0x1b   : > { %5020 = vmatmul.msk.f32.gmra.mxu1 %vm9590_vm1, %v257_v6  ;;  %v270_v27 = vld [vmem:[%s5620_s27 + $0xb0] sm:$0xff]  ;;  %v271_v31 = vld [vmem:[%s5620_s27 + $0xb8] sm:$0xff] }
  0x1c   : > { %5028 = vmatmul.msk.f32.gmra.mxu2 %vm9590_vm1, %v265_v7  ;;  %v278_v28 = vld [vmem:[%s5620_s27 + $0xf0] sm:$0xff]  ;;  %v279_v32 = vld [vmem:[%s5620_s27 + $0xf8] sm:$0xff] }
  0x1d   : > { %5036 = vmatmul.msk.f32.gmra.mxu3 %vm9590_vm1, %v273_v8 }
  0x22   : > { %5013 = vmatmul.msk.f32.gmra.mxu0 %vm9590_vm1, %v250_v9 }
  0x23   : > { %5021 = vmatmul.msk.f32.gmra.mxu1 %vm9590_vm1, %v258_v10 }
  0x24   : > { %5029 = vmatmul.msk.f32.gmra.mxu2 %vm9590_vm1, %v266_v11 }
  0x25   : > { %5037 = vmatmul.msk.f32.gmra.mxu3 %vm9590_vm1, %v274_v12 }
  0x2a   : > { %5014 = vmatmul.msk.f32.gmra.mxu0 %vm9590_vm1, %v251_v13 }
  0x2b   : > { %5022 = vmatmul.msk.f32.gmra.mxu1 %vm9590_vm1, %v259_v14 }
  0x2c   : > { %5030 = vmatmul.msk.f32.gmra.mxu2 %vm9590_vm1, %v267_v15 }
  0x2d   : > { %5038 = vmatmul.msk.f32.gmra.mxu3 %vm9590_vm1, %v275_v16 }
  0x32   : > { %5015 = vmatmul.msk.f32.gmra.mxu0 %vm9590_vm1, %v252_v17 }
  0x33   : > { %5023 = vmatmul.msk.f32.gmra.mxu1 %vm9590_vm1, %v260_v18 }
  0x34   : > { %5031 = vmatmul.msk.f32.gmra.mxu2 %vm9590_vm1, %v268_v19 }
  0x35   : > { %5039 = vmatmul.msk.f32.gmra.mxu3 %vm9590_vm1, %v276_v20 }
  0x3a   : > { %5016 = vmatmul.msk.f32.gmra.mxu0 %vm9590_vm1, %v253_v21 }
  0x3b   : > { %5024 = vmatmul.msk.f32.gmra.mxu1 %vm9590_vm1, %v261_v22 }
  0x3c   : > { %5032 = vmatmul.msk.f32.gmra.mxu2 %vm9590_vm1, %v269_v23 }
  0x3d   : > { %5040 = vmatmul.msk.f32.gmra.mxu3 %vm9590_vm1, %v277_v24 }
  0x42   : > { %5017 = vmatmul.msk.f32.gmra.mxu0 %vm9590_vm1, %v254_v25 }
  0x43   : > { %5025 = vmatmul.msk.f32.gmra.mxu1 %vm9590_vm1, %v262_v26 }
  0x44   : > { %5033 = vmatmul.msk.f32.gmra.mxu2 %vm9590_vm1, %v270_v27 }
  0x45   : > { %5041 = vmatmul.msk.f32.gmra.mxu3 %vm9590_vm1, %v278_v28 }
  0x4a   : > { %5018 = vmatmul.msk.f32.gmra.mxu0 %vm9590_vm1, %v255_v29 }
  0x4b   : > { %5026 = vmatmul.msk.f32.gmra.mxu1 %vm9590_vm1, %v263_v30 }
  0x4c   : > { %5034 = vmatmul.msk.f32.gmra.mxu2 %vm9590_vm1, %v271_v31 }
  0x4d   : > { %5042 = vmatmul.msk.f32.gmra.mxu3 %vm9590_vm1, %v279_v32 }
  0x8f   : > { %v403_v34 = vpop.f32.mrf.mxu0 }
  0x90   : > { %v427_v36 = vpop.f32.mrf.mxu1  ;;  %v5693_v37 = vadd.f32 %v5689_v33, %v403_v34 }
  0x91   : > { %v5697_v38 = vadd.f32 %v5689_v33, %v427_v36 }
  0x92   : > { %v5043_v39 = vmul.f32 -1.442695, %v5693_v37 }
  0x93   : > { %v5051_v40 = vmul.f32 -1.442695, %v5697_v38 }
  0x94   : > { %5273 = vpow2.f32 %v5043_v39 }
  0x95   : > { %5275 = vpow2.f32 %v5051_v40 }
  0x97   : > { %v406_v41 = vpop.f32.mrf.mxu0  ;;  %v451_v45 = vpop.f32.mrf.mxu2 }
  0x98   : > { %v430_v42 = vpop.f32.mrf.mxu1  ;;  %v5708_v43 = vadd.f32 %v5689_v33, %v406_v41  ;;  %v5716_v52 = vadd.f32 %v5689_v33, %v451_v45  ;;  %v475_v13 = vpop.f32.mrf.mxu3 }
  0x99   : > { %v5711_v44 = vadd.f32 %v5689_v33, %v430_v42  ;;  %v5738_v16 = vadd.f32 %v5689_v33, %v475_v13 }
  0x9a   : > { %v5274_v46 = vpop.eup %5273  ;;  %v5044_v47 = vmul.f32 -1.442695, %v5708_v43  ;;  %v5059_v56 = vmul.f32 -1.442695, %v5716_v52 }
  0x9b   : > { %v5276_v48 = vpop.eup %5275  ;;  %v595_v49 = vadd.f32 1.0, %v5274_v46  ;;  %v5052_v50 = vmul.f32 -1.442695, %v5711_v44  ;;  %v5067_v31 = vmul.f32 -1.442695, %v5738_v16 }
  0x9c   : > { %v603_v51 = vadd.f32 1.0, %v5276_v48  ;;  %5277 = vpow2.f32 %v5044_v47 }
  0x9d   : > { %5279 = vrcp.f32 %v595_v49  ;;  %vm632_vm3 = vweird.f32 %v595_v49  ;;  %v636_v2 = vand.u32 2147483647, %v595_v49  ;;  %v638_v5 = vand.u32 2147483648, %v595_v49 }
  0x9e   : > { %5281 = vrcp.f32 %v603_v51  ;;  %vm752_vm4 = vweird.f32 %v603_v51  ;;  %v758_v9 = vand.u32 2147483648, %v603_v51  ;;  %v756_v12 = vand.u32 2147483647, %v603_v51 }
  0x9f   : > { %5283 = vpow2.f32 %v5052_v50  ;;  %v409_v53 = vpop.f32.mrf.mxu0  ;;  %v454_v63 = vpop.f32.mrf.mxu2  ;;  %vm5740_vm7 = vcmp.eq.f32.partialorder %v636_v2, 8.507059e+37  ;;  %v639_v19 = vor.u32 1.1754944e-38, %v638_v5 }
  0xa0   : > { %v433_v54 = vpop.f32.mrf.mxu1  ;;  %v5719_v55 = vadd.f32 %v5689_v33, %v409_v53  ;;  %5285 = vpow2.f32 %v5059_v56  ;;  %v5729_v3 = vadd.f32 %v5689_v33, %v454_v63  ;;  %v759_v24 = vor.u32 1.1754944e-38, %v758_v9 }
  0xa1   : > { %v5723_v57 = vadd.f32 %v5689_v33, %v433_v54  ;;  %vm757_vm10 = vcmp.eq.f32.partialorder %v756_v12, 8.507059e+37 }
  0xa2   : > { %v5278_v58 = vpop.eup %5277  ;;  %v5045_v59 = vmul.f32 -1.442695, %v5719_v55  ;;  %v5060_v14 = vmul.f32 -1.442695, %v5729_v3 }
  0xa3   : > { %v5280_v60 = vpop.eup %5279  ;;  %v5726_v62 = vadd.f32 1.0, %v5278_v58  ;;  %v5053_v7 = vmul.f32 -1.442695, %v5723_v57 }
  0xa4   : > { %v5282_v0 = vpop.eup %5281  ;;  %v628_v1 = vmul.f32 %v5280_v60, %v595_v49  ;;  %5287 = vpow2.f32 %v5045_v59  ;;  %vm633_vm6 = vweird.f32 %v5280_v60 }
  0xa5   : > { %v5284_v4 = vpop.eup %5283  ;;  %v748_v6 = vmul.f32 %v5282_v0, %v603_v51  ;;  %5289 = vrcp.f32 %v5726_v62  ;;  %vm753_vm5 = vweird.f32 %v5282_v0  ;;  %vm634_vm9 = vmor %vm632_vm3, %vm633_vm6  ;;  %vm647_vm11 = vweird.f32 %v5726_v62 }
  0xa6   : > { %v629_v8 = vsub.f32 1.0, %v628_v1  ;;  %v5733_v10 = vadd.f32 1.0, %v5284_v4  ;;  %v5286_v17 = vpop.eup %5285  ;;  %vm5746_vm8 = vmor %vm752_vm4, %vm753_vm5  ;;  %v651_v28 = vand.u32 2147483647, %v5726_v62  ;;  %v653_v30 = vand.u32 2147483648, %v5726_v62 }
  0xa7   : > { %v749_v11 = vsub.f32 1.0, %v748_v6  ;;  %v5750_v25 = vadd.f32 1.0, %v5286_v17  ;;  %v5814_v13 = vpop.f32.mrf.mxu0 }
  0xa8   : > { %v630_v15 = vmul.f32 %v5280_v60, %v629_v8  ;;  %5291 = vrcp.f32 %v5733_v10  ;;  %v771_v42 = vand.u32 2147483647, %v5733_v10  ;;  %v773_v45 = vand.u32 2147483648, %v5733_v10 }
  0xa9   : > { %v750_v20 = vmul.f32 %v5282_v0, %v749_v11  ;;  %5293 = vpow2.f32 %v5053_v7  ;;  %vm5774_vm12 = vcmp.eq.f32.partialorder %v651_v28, 8.507059e+37  ;;  %vm767_vm14 = vweird.f32 %v5733_v10 }
  0xaa   : > { %v5288_v21 = vpop.eup %5287  ;;  %v631_v22 = vadd.f32 %v5280_v60, %v630_v15  ;;  %5295 = vpow2.f32 %v5060_v14  ;;  %v654_v56 = vor.u32 1.1754944e-38, %v653_v30  ;;  %vm5787_vm0 = vcmp.eq.f32.partialorder %v771_v42, 8.507059e+37 }
  0xab   : > { %v5290_v26 = vpop.eup %5289  ;;  %v751_v27 = vadd.f32 %v5282_v0, %v750_v20  ;;  %5297 = vrcp.f32 %v5750_v25  ;;  %v5764_v36 = vadd.f32 1.0, %v5288_v21  ;;  %v774_v59 = vor.u32 1.1754944e-38, %v773_v45 }
  0xac   : > { %v635_v29 = vsel %vm634_vm9, %v5280_v60, %v631_v22  ;;  %v643_v35 = vmul.f32 %v5290_v26, %v5726_v62  ;;  %vm648_vm13 = vweird.f32 %v5290_v26  ;;  %5299 = vpow2.f32 %v5067_v31 }
  0xad   : > { %v640_v32 = vsel %vm5740_vm7, %v639_v19, %v635_v29  ;;  %v755_v34 = vsel %vm5746_vm8, %v5282_v0, %v751_v27  ;;  %5301 = vrcp.f32 %v5764_v36  ;;  %vm872_vm3 = vweird.f32 %v5750_v25  ;;  %vm649_vm4 = vmor %vm647_vm11, %vm648_vm13 }
  0xae   : > { %v5292_v39 = vpop.eup %5291  ;;  %v5767_v40 = vmul.f32 %v640_v32, %v5693_v37  ;;  %v760_v41 = vsel %vm757_vm10, %v759_v24, %v755_v34  ;;  %v644_v48 = vsub.f32 1.0, %v643_v35  ;;  %v876_v2 = vand.u32 2147483647, %v5750_v25 }
  0xaf   : > { %v5294_v46 = vpop.eup %5293  ;;  %v5772_v47 = vmul.f32 %v760_v41, %v5697_v38  ;;  %v763_v50 = vmul.f32 %v5292_v39, %v5733_v10  ;;  %vm768_vm15 = vweird.f32 %v5292_v39  ;;  %v878_v4 = vand.u32 2147483648, %v5750_v25 }
  0xb0   : > { %v5296_v51 = vpop.eup %5295  ;;  %1159 = vst.msk [vmem:[#allocation2 + $0x20] sm:$0xff] %vm1150_vm2, %v5767_v40  ;;  %v645_v37 = vmul.f32 %v5290_v26, %v644_v48  ;;  %v5791_v60 = vadd.f32 1.0, %v5294_v46  ;;  %vm5803_vm5 = vmor %vm767_vm14, %vm768_vm15  ;;  %v666_v6 = vand.u32 2147483647, %v5764_v36  ;;  %v668_v10 = vand.u32 2147483648, %v5764_v36  ;;  %v457_v46 = vpop.f32.mrf.mxu2 }
  0xb1   : > { %1167 = vst.msk [vmem:[#allocation2 + $0x60] sm:$0xff] %vm1150_vm2, %v5772_v47  ;;  %v764_v38 = vsub.f32 1.0, %v763_v50  ;;  %v5784_v53 = vadd.f32 1.0, %v5296_v51  ;;  %v5298_v54 = vpop.eup %5297  ;;  %v879_v21 = vor.u32 1.1754944e-38, %v878_v4  ;;  %vm877_vm8 = vcmp.eq.f32.partialorder %v876_v2, 8.507059e+37  ;;  %v436_v50 = vpop.f32.mrf.mxu1 }
  0xb2   : > { %v868_v63 = vmul.f32 %v5298_v54, %v5750_v25  ;;  %v646_v0 = vadd.f32 %v5290_v26, %v645_v37  ;;  %vm873_vm6 = vweird.f32 %v5298_v54  ;;  %v5300_v9 = vpop.eup %5299  ;;  %vm662_vm10 = vweird.f32 %v5764_v36  ;;  %v478_v4 = vpop.f32.mrf.mxu3 }
  0xb3   : > { %v765_v1 = vmul.f32 %v5292_v39, %v764_v38  ;;  %5303 = vrcp.f32 %v5784_v53  ;;  %v891_v12 = vand.u32 2147483647, %v5784_v53  ;;  %v5302_v14 = vpop.eup %5301  ;;  %v5821_v19 = vadd.f32 1.0, %v5300_v9  ;;  %vm5825_vm7 = vmor %vm872_vm3, %vm873_vm6 }
  0xb4   : > { %v869_v7 = vsub.f32 1.0, %v868_v63  ;;  %v650_v62 = vsel %vm649_vm4, %v5290_v26, %v646_v0  ;;  %5305 = vrcp.f32 %v5791_v60  ;;  %v893_v23 = vand.u32 2147483648, %v5784_v53  ;;  %v415_v63 = vpop.f32.mrf.mxu0 }
  0xb5   : > { %v766_v8 = vadd.f32 %v5292_v39, %v765_v1  ;;  %v655_v11 = vsel %vm5774_vm12, %v654_v56, %v650_v62  ;;  %5307 = vrcp.f32 %v5821_v19  ;;  %vm887_vm9 = vweird.f32 %v5784_v53 }
  0xb6   : > { %v870_v15 = vmul.f32 %v5298_v54, %v869_v7  ;;  %v5817_v17 = vmul.f32 %v655_v11, %v5708_v43  ;;  %v658_v43 = vmul.f32 %v5302_v14, %v5764_v36  ;;  %vm5841_vm11 = vcmp.eq.f32.partialorder %v666_v6, 8.507059e+37 }
  0xb7   : > { %v770_v18 = vsel %vm5803_vm5, %v5292_v39, %v766_v8  ;;  %vm5850_vm12 = vcmp.eq.f32.partialorder %v891_v12, 8.507059e+37  ;;  %v669_v31 = vor.u32 1.1754944e-38, %v668_v10  ;;  %v894_v35 = vor.u32 1.1754944e-38, %v893_v23 }
  0xb8   : > { %v775_v22 = vsel %vm5787_vm0, %v774_v59, %v770_v18  ;;  %v871_v24 = vadd.f32 %v5298_v54, %v870_v15  ;;  %1160 = vst.msk [vmem:[#allocation2 + $0x28] sm:$0xff] %vm1150_vm2, %v5817_v17  ;;  %v659_v27 = vsub.f32 1.0, %v658_v43  ;;  %vm663_vm13 = vweird.f32 %v5302_v14 }
  0xb9   : > { %v5836_v26 = vmul.f32 %v775_v22, %v5711_v44  ;;  %v5304_v25 = vpop.eup %5303  ;;  %v996_v48 = vand.u32 2147483647, %v5821_v19  ;;  %vm782_vm15 = vweird.f32 %v5791_v60  ;;  %vm664_vm3 = vmor %vm662_vm10, %vm663_vm13  ;;  %v786_v38 = vand.u32 2147483647, %v5791_v60 }
  0xba   : > { %v875_v29 = vsel %vm5825_vm7, %v5298_v54, %v871_v24  ;;  %v883_v44 = vmul.f32 %v5304_v25, %v5784_v53  ;;  %v5306_v32 = vpop.eup %5305  ;;  %v660_v39 = vmul.f32 %v5302_v14, %v659_v27  ;;  %vm888_vm14 = vweird.f32 %v5304_v25 }
  0xbb   : > { %1168 = vst.msk [vmem:[#allocation2 + $0x68] sm:$0xff] %vm1150_vm2, %v5836_v26  ;;  %v880_v34 = vsel %vm877_vm8, %v879_v21, %v875_v29  ;;  %v778_v45 = vmul.f32 %v5306_v32, %v5791_v60  ;;  %vm783_vm0 = vweird.f32 %v5306_v32  ;;  %v5308_v51 = vpop.eup %5307  ;;  %v788_v54 = vand.u32 2147483648, %v5791_v60  ;;  %vm5872_vm5 = vmor %vm887_vm9, %vm888_vm14  ;;  %v439_v29 = vpop.f32.mrf.mxu1 }
  0xbc   : > { %v5855_v41 = vmul.f32 %v880_v34, %v5716_v52  ;;  %v884_v42 = vsub.f32 1.0, %v883_v44  ;;  %v661_v49 = vadd.f32 %v5302_v14, %v660_v39  ;;  %v988_v56 = vmul.f32 %v5308_v51, %v5821_v19  ;;  %vm5884_vm7 = vmor %vm782_vm15, %vm783_vm0  ;;  %v1437_v44 = vld [vmem:[#allocation2 + $0x1e] sm:$0xff]  ;;  %v418_v34 = vpop.f32.mrf.mxu0 }
  0xbd   : > { %v779_v52 = vsub.f32 1.0, %v778_v45  ;;  %vm992_vm4 = vweird.f32 %v5821_v19  ;;  %v998_v58 = vand.u32 2147483648, %v5821_v19  ;;  %vm993_vm6 = vweird.f32 %v5308_v51 }
  0xbe   : > { %1175 = vst.msk [vmem:[#allocation2 + $0xa0] sm:$0xff] %vm1150_vm2, %v5855_v41  ;;  %v885_v37 = vmul.f32 %v5304_v25, %v884_v42  ;;  %v665_v36 = vsel %vm664_vm3, %v5302_v14, %v661_v49  ;;  %v989_v5 = vsub.f32 1.0, %v988_v56  ;;  %v789_v7 = vor.u32 1.1754944e-38, %v788_v54  ;;  %vm5908_vm10 = vmor %vm992_vm4, %vm993_vm6 }
  0xbf   : > { %v670_v1 = vsel %vm5841_vm11, %v669_v31, %v665_v36  ;;  %v780_v2 = vmul.f32 %v5306_v32, %v779_v52  ;;  %v5889_v62 = vadd.f32 %v5689_v33, %v478_v4  ;;  %vm5891_vm8 = vcmp.eq.f32.partialorder %v996_v48, 8.507059e+37 }
  0xc0   : > { %v886_v0 = vadd.f32 %v5304_v25, %v885_v37  ;;  %v5879_v6 = vmul.f32 %v670_v1, %v5719_v55  ;;  %vm787_vm9 = vcmp.eq.f32.partialorder %v786_v38, 8.507059e+37  ;;  %v990_v11 = vmul.f32 %v5308_v51, %v989_v5  ;;  %v5983_v1 = vld [vmem:[#allocation2 + $0x1f] sm:$0xff] }
  0xc1   : > { %v781_v55 = vadd.f32 %v5306_v32, %v780_v2  ;;  %v5068_v12 = vmul.f32 -1.442695, %v5889_v62  ;;  %v5903_v10 = vadd.f32 %v5689_v33, %v457_v46  ;;  %v999_v15 = vor.u32 1.1754944e-38, %v998_v58 }
  0xc2   : > { %v890_v9 = vsel %vm5872_vm5, %v5304_v25, %v886_v0  ;;  %1161 = vst.msk [vmem:[#allocation2 + $0x30] sm:$0xff] %vm1150_vm2, %v5879_v6  ;;  %v5919_v21 = vadd.f32 %v5689_v33, %v5814_v13  ;;  %v991_v22 = vadd.f32 %v5308_v51, %v990_v11  ;;  %v5929_v24 = vadd.f32 %v5689_v33, %v436_v50  ;;  %v460_v25 = vpop.f32.mrf.mxu2  ;;  %v1542_v8 = vld [vmem:[#allocation2 + $0x67] sm:$0xff] }
  0xc3   : > { %v895_v60 = vsel %vm5850_vm12, %v894_v35, %v890_v9  ;;  %v785_v20 = vsel %vm5884_vm7, %v5306_v32, %v781_v55  ;;  %5309 = vpow2.f32 %v5068_v12  ;;  %v5061_v19 = vmul.f32 -1.442695, %v5903_v10  ;;  %v442_v53 = vpop.f32.mrf.mxu1 }
  0xc4   : > { %v5913_v18 = vmul.f32 %v895_v60, %v5729_v3  ;;  %v790_v23 = vsel %vm787_vm9, %v789_v7, %v785_v20  ;;  %v5046_v3 = vmul.f32 -1.442695, %v5919_v21  ;;  %v5932_v13 = vshrl.u32 %v1139_v61, 7  ;;  %v481_v20 = vpop.f32.mrf.mxu3 }
  0xc5   : > { %v5925_v43 = vmul.f32 %v790_v23, %v5723_v57  ;;  %v995_v27 = vsel %vm5908_vm10, %v5308_v51, %v991_v22  ;;  %5311 = vpow2.f32 %v5061_v19  ;;  %v5937_v28 = vadd.f32 %v5689_v33, %v460_v25  ;;  %v1191_v57 = vld [vmem:[%s9558_s3] sm:$0x3] }
  0xc6   : > { %9644 = vst [vmem:[#allocation4_spill] sm:$0xff] %v5913_v18  ;;  %v1000_v30 = vsel %vm5891_vm8, %v999_v15, %v995_v27  ;;  %5313 = vpow2.f32 %v5046_v3  ;;  %v5054_v61 = vmul.f32 -1.442695, %v5929_v24  ;;  %v5948_v31 = vadd.f32 %v5689_v33, %v415_v63 }
  0xc7   : > { %1176 = vst.msk [vmem:[#allocation2 + $0xa8] sm:$0xff] %vm1150_vm2, %v5913_v18  ;;  %v5951_v32 = vmul.f32 %v1000_v30, %v5738_v16  ;;  %vm1288_vm11 = vcmask 1041408   ;;  %v5954_v39 = vadd.f32 %v5689_v33, %v439_v29  ;;  %v1469_v45 = vmax.f32 %v5767_v40, %v1437_v44  ;;  %v1446_v16 = vld [vmem:[#allocation2 + $0x66] sm:$0xff] }
  0xc8   : > { %9645 = vst [vmem:[#allocation5_spill] sm:$0xff] %v5925_v43  ;;  %5315 = vpow2.f32 %v5054_v61  ;;  %5075 = vmatpush.msk.msrb.mxu1 %vm1288_vm11, %v1191_v57  ;;  %v5062_v46 = vmul.f32 -1.442695, %v5937_v28  ;;  %vm1142_vm12 = vcmp.ge.s32.totalorder %v5932_v13, 2  ;;  %v5047_v49 = vmul.f32 -1.442695, %v5948_v31 }
  0xc9   : > { %1169 = vst.msk [vmem:[#allocation2 + $0x70] sm:$0xff] %vm1150_vm2, %v5925_v43  ;;  %v1439_v35 = vld [vmem:[#allocation2 + $0x2e] sm:$0xff]  ;;  %v5310_v42 = vpop.eup %5309  ;;  %5076 = vmatmul.msk.f32.vlgmr.msrb.gmra.mxu1 %vm1150_vm2, %v5767_v40  ;;  %v5968_v50 = vadd.f32 %v5689_v33, %v418_v34  ;;  %v5055_v38 = vmul.f32 -1.442695, %v5954_v39  ;;  %v5976_v54 = vsel %vm1142_vm12, %v1469_v45, %v5767_v40  ;;  %v1478_v56 = vmax.f32 %v5836_v26, %v1446_v16 }
  0xca   : > { %9646 = vst [vmem:[#allocation6_spill] sm:$0xff] %v5951_v32  ;;  %v5964_v48 = vadd.f32 1.0, %v5310_v42  ;;  %v1471_v37 = vmax.f32 %v5879_v6, %v1439_v35  ;;  %v5980_v63 = vadd.s32 8, %v5932_v13  ;;  %v1565_v7 = vmax.f32 %v5976_v54, %v5983_v1  ;;  %v6002_v12 = vld [vmem:[#allocation2 + $0x2f] sm:$0xff] }
  0xcb   : > { %1183 = vst.msk [vmem:[#allocation2 + $0xe0] sm:$0xff] %vm1150_vm2, %v5951_v32  ;;  %v5312_v51 = vpop.eup %5311  ;;  %v5048_v0 = vmul.f32 -1.442695, %v5968_v50  ;;  %v6000_v11 = vmax.f32 %v1478_v56, %v1542_v8  ;;  %v6013_v19 = vadd.f32 %v5689_v33, %v481_v20  ;;  %v6016_v3 = vadd.f32 %v5689_v33, %v442_v53 }
  0xcc   : > { %v5314_v52 = vpop.eup %5313  ;;  %5317 = vrcp.f32 %v5964_v48  ;;  %v5988_v2 = vsel %vm1142_vm12, %v1471_v37, %v5879_v6  ;;  %v5991_v4 = vadd.f32 1.0, %v5312_v51  ;;  %v1011_v14 = vand.u32 2147483647, %v5964_v48 }
  0xcd   : > { %5319 = vpow2.f32 %v5062_v46  ;;  %v5993_v5 = vadd.f32 1.0, %v5314_v52  ;;  %v1013_v15 = vand.u32 2147483648, %v5964_v48  ;;  %v1567_v23 = vmax.f32 %v5988_v2, %v6002_v12 }
  0xce   : > { %v1454_v58 = vld [vmem:[#allocation2 + $0xa6] sm:$0xff]  ;;  %v5316_v36 = vpop.eup %5315  ;;  %5321 = vpow2.f32 %v5047_v49  ;;  %vm1007_vm13 = vweird.f32 %v5964_v48  ;;  %v906_v30 = vand.u32 2147483647, %v5991_v4  ;;  %v908_v61 = vand.u32 2147483648, %v5991_v4 }
  0xcf   : > { %v1486_v9 = vmax.f32 %v5913_v18, %v1454_v58  ;;  %v5998_v55 = vadd.f32 1.0, %v5316_v36  ;;  %5323 = vpow2.f32 %v5055_v38  ;;  %v1550_v60 = vld [vmem:[#allocation2 + $0xa7] sm:$0xff]  ;;  %vm6032_vm15 = vcmp.eq.f32.partialorder %v1011_v14, 8.507059e+37 }
  0xd0   : > { %v1447_v59 = vld [vmem:[#allocation2 + $0x6e] sm:$0xff]  ;;  %5325 = vrcp.f32 %v5991_v4  ;;  %v1014_v45 = vor.u32 1.1754944e-38, %v1013_v15  ;;  %vm902_vm0 = vweird.f32 %v5991_v4  ;;  %v5069_v49 = vmul.f32 -1.442695, %v6013_v19 }
  0xd1   : > { %v1479_v40 = vmax.f32 %v5925_v43, %v1447_v59  ;;  %5077 = vmatmul.msk.f32.gmra.mxu1 %vm1150_vm2, %v5817_v17  ;;  %5327 = vrcp.f32 %v5993_v5  ;;  %v6025_v44 = vmax.f32 %v1486_v9, %v1550_v60  ;;  %v6030_v34 = vld [vmem:[#allocation2 + $0x6f] sm:$0xff]  ;;  %vm677_vm3 = vweird.f32 %v5993_v5 }
  0xd2   : > { %v5318_v22 = vpop.eup %5317  ;;  %5329 = vpow2.f32 %v5048_v0  ;;  %v681_v38 = vand.u32 2147483647, %v5993_v5  ;;  %vm6053_vm5 = vcmp.eq.f32.partialorder %v906_v30, 8.507059e+37  ;;  %v683_v60 = vand.u32 2147483648, %v5993_v5 }
  0xd3   : > { %v5320_v25 = vpop.eup %5319  ;;  %v6021_v27 = vsel %vm1142_vm12, %v1479_v40, %v5925_v43  ;;  %v1003_v29 = vmul.f32 %v5318_v22, %v5964_v48  ;;  %5331 = vrcp.f32 %v5998_v55  ;;  %vm1008_vm14 = vweird.f32 %v5318_v22 }
  0xd4   : > { %v5322_v57 = vpop.eup %5321  ;;  %v1575_v16 = vmax.f32 %v6021_v27, %v6030_v34  ;;  %v6040_v51 = vadd.f32 1.0, %v5320_v25  ;;  %vm6048_vm4 = vmor %vm1007_vm13, %vm1008_vm14  ;;  %v909_v40 = vor.u32 1.1754944e-38, %v908_v61  ;;  %5333 = vpow2.f32 %v5069_v49 }
  0xd5   : > { %v1004_v35 = vsub.f32 1.0, %v1003_v29  ;;  %v5324_v46 = vpop.eup %5323  ;;  %v6044_v56 = vadd.f32 1.0, %v5322_v57  ;;  %vm797_vm7 = vweird.f32 %v5998_v55  ;;  %v801_v15 = vand.u32 2147483647, %v5998_v55 }
  0xd6   : > { %v5326_v37 = vpop.eup %5325  ;;  %5335 = vrcp.f32 %v6040_v51  ;;  %vm1144_vm8 = vcmp.ge.s32.totalorder %v5932_v13, 1  ;;  %v803_v30 = vand.u32 2147483648, %v5998_v55  ;;  %vm6083_vm14 = vcmp.eq.f32.partialorder %v681_v38, 8.507059e+37 }
  0xd7   : > { %v1005_v52 = vmul.f32 %v5318_v22, %v1004_v35  ;;  %v5328_v58 = vpop.eup %5327  ;;  %v898_v36 = vmul.f32 %v5326_v37, %v5991_v4  ;;  %vm903_vm6 = vweird.f32 %v5326_v37  ;;  %5337 = vrcp.f32 %v6044_v56 }
  0xd8   : > { %v6057_v53 = vpop.eup %5329  ;;  %v673_v9 = vmul.f32 %v5328_v58, %v5993_v5  ;;  %vm678_vm9 = vweird.f32 %v5328_v58  ;;  %vm6079_vm10 = vmor %vm902_vm0, %vm903_vm6  ;;  %vm692_vm6 = vweird.f32 %v6044_v56 }
  0xd9   : > { %v1006_v8 = vadd.f32 %v5318_v22, %v1005_v52  ;;  %5078 = vmatmul.msk.f32.gmra.mxu1 %vm1150_vm2, %v5879_v6  ;;  %v5332_v48 = vpop.eup %5331  ;;  %v899_v14 = vsub.f32 1.0, %v898_v36  ;;  %vm6096_vm0 = vmor %vm677_vm3, %vm678_vm9  ;;  %vm917_vm3 = vweird.f32 %v6040_v51  ;;  %v463_v36 = vpop.f32.mrf.mxu2 }
  0xda   : > { %v674_v25 = vsub.f32 1.0, %v673_v9  ;;  %v793_v29 = vmul.f32 %v5332_v48, %v5998_v55  ;;  %vm798_vm13 = vweird.f32 %v5332_v48  ;;  %v5334_v52 = vpop.eup %5333 }
  0xdb   : > { %v1010_v20 = vsel %vm6048_vm4, %v5318_v22, %v1006_v8  ;;  %v900_v57 = vmul.f32 %v5326_v37, %v899_v14  ;;  %v6100_v9 = vadd.f32 1.0, %v5334_v52  ;;  %vm6108_vm4 = vmor %vm797_vm7, %vm798_vm13 }
  0xdc   : > { %v1015_v6 = vsel %vm6032_vm15, %v1014_v45, %v1010_v20  ;;  %v675_v22 = vmul.f32 %v5328_v58, %v674_v25  ;;  %v794_v49 = vsub.f32 1.0, %v793_v29  ;;  %v684_v45 = vor.u32 1.1754944e-38, %v683_v60 }
  0xdd   : > { %v6075_v61 = vmul.f32 %v1015_v6, %v5889_v62  ;;  %v901_v59 = vadd.f32 %v5326_v37, %v900_v57  ;;  %vm6087_vm15 = vcmp.eq.f32.partialorder %v801_v15, 8.507059e+37  ;;  %v5336_v62 = vpop.eup %5335  ;;  %v6102_v60 = vadd.f32 1.0, %v5324_v46 }
  0xde   : > { %v676_v4 = vadd.f32 %v5328_v58, %v675_v22  ;;  %v795_v38 = vmul.f32 %v5332_v48, %v794_v49  ;;  %v804_v20 = vor.u32 1.1754944e-38, %v803_v30  ;;  %v913_v5 = vmul.f32 %v5336_v62, %v6040_v51  ;;  %v6114_v25 = vpop.eup %5337 }
  0xdf   : > { %9653 = vst [vmem:[#allocation7_spill] sm:$0xff] %v6075_v61  ;;  %v905_v14 = vsel %vm6079_vm10, %v5326_v37, %v901_v59  ;;  %5339 = vrcp.f32 %v6100_v9  ;;  %v921_v57 = vand.u32 2147483647, %v6040_v51  ;;  %v923_v30 = vand.u32 2147483648, %v6040_v51 }
  0xe0   : > { %1184 = vst.msk [vmem:[#allocation2 + $0xe8] sm:$0xff] %vm1150_vm2, %v6075_v61  ;;  %v910_v46 = vsel %vm6053_vm5, %v909_v40, %v905_v14  ;;  %v680_v29 = vsel %vm6096_vm0, %v5328_v58, %v676_v4  ;;  %v796_v37 = vadd.f32 %v5332_v48, %v795_v38  ;;  %v914_v58 = vsub.f32 1.0, %v913_v5 }
  0xe1   : > { %v6122_v55 = vmul.f32 %v910_v46, %v5903_v10  ;;  %v685_v6 = vsel %vm6083_vm14, %v684_v45, %v680_v29  ;;  %vm918_vm5 = vweird.f32 %v5336_v62  ;;  %v6139_v10 = vsel %vm1144_vm8, %v1567_v23, %v5988_v2 }
  0xe2   : > { %v6129_v35 = vmul.f32 %v685_v6, %v5919_v21  ;;  %v800_v0 = vsel %vm6108_vm4, %v5332_v48, %v796_v37  ;;  %v6147_v21 = vsel %vm1144_vm8, %v1575_v16, %v6021_v27  ;;  %v688_v12 = vmul.f32 %v6114_v25, %v6044_v56  ;;  %v484_v27 = vpop.f32.mrf.mxu3  ;;  %vm6166_vm7 = vmor %vm917_vm3, %vm918_vm5 }
  0xe3   : > { %9664 = vst [vmem:[#allocation8_spill] sm:$0xff] %v6122_v55  ;;  %v805_v40 = vsel %vm6087_vm15, %v804_v20, %v800_v0  ;;  %v915_v23 = vmul.f32 %v5336_v62, %v914_v58  ;;  %5341 = vrcp.f32 %v6102_v60  ;;  %v924_v16 = vor.u32 1.1754944e-38, %v923_v30 }
  0xe4   : > { %1177 = vst.msk [vmem:[#allocation2 + $0xb0] sm:$0xff] %vm1150_vm2, %v6122_v55  ;;  %v6158_v2 = vmul.f32 %v805_v40, %v5929_v24  ;;  %5079 = vmatmul.msk.f32.gmra.mxu1 %vm1150_vm2, %v6129_v35  ;;  %v689_v48 = vsub.f32 1.0, %v688_v12  ;;  %v696_v24 = vand.u32 2147483647, %v6044_v56  ;;  %v6172_v22 = vadd.f32 %v5689_v33, %v484_v27 }
  0xe5   : > { %1162 = vst.msk [vmem:[#allocation2 + $0x38] sm:$0xff] %vm1150_vm2, %v6129_v35  ;;  %v6174_v49 = vpop.eup %5339  ;;  %vm1022_vm9 = vweird.f32 %v6100_v9  ;;  %v916_v52 = vadd.f32 %v5336_v62, %v915_v23  ;;  %vm922_vm10 = vcmp.eq.f32.partialorder %v921_v57, 8.507059e+37  ;;  %v698_v51 = vand.u32 2147483648, %v6044_v56 }
  0xe6   : > { %9665 = vst [vmem:[#allocation9_spill] sm:$0xff] %v6158_v2  ;;  %v1018_v59 = vmul.f32 %v6174_v49, %v6100_v9  ;;  %v1026_v42 = vand.u32 2147483647, %v6100_v9  ;;  %v690_v45 = vmul.f32 %v6114_v25, %v689_v48  ;;  %vm693_vm13 = vweird.f32 %v6114_v25  ;;  %v1438_v48 = vld [vmem:[#allocation2 + $0x26] sm:$0xff] }
  0xe7   : > { %1170 = vst.msk [vmem:[#allocation2 + $0x78] sm:$0xff] %vm1150_vm2, %v6158_v2  ;;  %v1028_v4 = vand.u32 2147483648, %v6100_v9  ;;  %v920_v8 = vsel %vm6166_vm7, %v5336_v62, %v916_v52  ;;  %v5070_v38 = vmul.f32 -1.442695, %v6172_v22  ;;  %v6190_v14 = vadd.f32 %v5689_v33, %v463_v36  ;;  %vm694_vm15 = vmor %vm692_vm6, %vm693_vm13  ;;  %v6235_v36 = vld [vmem:[#allocation2 + $0x2a] sm:$0xff] }
  0xe8   : > { %v1019_v15 = vsub.f32 1.0, %v1018_v59  ;;  %vm1023_vm14 = vweird.f32 %v6174_v49  ;;  %v925_v20 = vsel %vm922_vm10, %v924_v16, %v920_v8  ;;  %v691_v5 = vadd.f32 %v6114_v25, %v690_v45  ;;  %v6233_v45 = vld [vmem:[#allocation2 + $0x29] sm:$0xff] }
  0xe9   : > { %v6194_v46 = vpop.eup %5341  ;;  %v6197_v37 = vmul.f32 %v925_v20, %v5937_v28  ;;  %vm697_vm0 = vcmp.eq.f32.partialorder %v696_v24, 8.507059e+37  ;;  %v699_v62 = vor.u32 1.1754944e-38, %v698_v51  ;;  %5343 = vpow2.f32 %v5070_v38  ;;  %vm6213_vm5 = vmor %vm1022_vm9, %vm1023_vm14 }
  0xea   : > { %vm1147_vm4 = vcmp.lt.s32.totalorder %v5980_v63, 15  ;;  %v1020_v30 = vmul.f32 %v6174_v49, %v1019_v15  ;;  %vm6204_vm3 = vcmp.eq.f32.partialorder %v1026_v42, 8.507059e+37  ;;  %v695_v28 = vsel %vm694_vm15, %v6114_v25, %v691_v5 }
  0xeb   : > { %v1455_v29 = vld [vmem:[#allocation2 + $0xae] sm:$0xff]  ;;  %9668 = vst [vmem:[#allocation10_spill] sm:$0xff] %v6197_v37  ;;  %v1029_v40 = vor.u32 1.1754944e-38, %v1028_v4  ;;  %v700_v12 = vsel %vm697_vm0, %v699_v62, %v695_v28  ;;  %v808_v23 = vmul.f32 %v6194_v46, %v6102_v60  ;;  %vm812_vm6 = vweird.f32 %v6102_v60 }
  0xec   : > { %v1487_v6 = vmax.f32 %v6122_v55, %v1455_v29  ;;  %v1551_v57 = vld [vmem:[#allocation2 + $0xaf] sm:$0xff]  ;;  %1178 = vst.msk [vmem:[#allocation2 + $0xb8] sm:$0xff] %vm1150_vm2, %v6197_v37  ;;  %v1021_v34 = vadd.f32 %v6174_v49, %v1020_v30  ;;  %v5063_v16 = vmul.f32 -1.442695, %v6190_v14  ;;  %v816_v51 = vand.u32 2147483647, %v6102_v60 }
  0xed   : > { %v1631_v58 = vld [vmem:[#allocation2 + $0x31] sm:$0xff]  ;;  %v818_v59 = vand.u32 2147483648, %v6102_v60  ;;  %v6231_v42 = vadd.f32 1.0, %v6057_v53  ;;  %v6244_v15 = vmul.f32 %v700_v12, %v5948_v31  ;;  %vm813_vm7 = vweird.f32 %v6194_v46  ;;  %v1646_v56 = vld [vmem:[#allocation2 + $0xa9] sm:$0xff] }
  0xee   : > { %v1519_v25 = vsel %vm1142_vm12, %v1487_v6, %v6122_v55  ;;  %v1663_v9 = vmax.f32 %v6139_v10, %v1631_v58  ;;  %v1639_v27 = vld [vmem:[#allocation2 + $0x71] sm:$0xff]  ;;  %v1638_v10 = vld [vmem:[#allocation2 + $0x69] sm:$0xff]  ;;  %v1025_v38 = vsel %vm6213_vm5, %v6174_v49, %v1021_v34  ;;  %5345 = vpow2.f32 %v5063_v16  ;;  %vm6280_vm9 = vmor %vm812_vm6, %vm813_vm7 }
  0xef   : > { %v1583_v24 = vmax.f32 %v1519_v25, %v1551_v57  ;;  %v1727_v52 = vld [vmem:[#allocation2 + $0x32] sm:$0xff]  ;;  %v1671_v8 = vmax.f32 %v6147_v21, %v1639_v27  ;;  %v5344_v20 = vpop.eup %5343  ;;  %v1030_v6 = vsel %vm6204_vm3, %v1029_v40, %v1025_v38  ;;  %v809_v21 = vsub.f32 1.0, %v808_v23  ;;  %v6255_v57 = vld [vmem:[#allocation2 + $0x6a] sm:$0xff]  ;;  %5080 = vmatmul.msk.f32.gmra.mxu1 %vm1150_vm2, %v6244_v15  ;;  %1163 = vst.msk [vmem:[#allocation2 + $0x40] sm:$0xff] %vm1150_vm2, %v6244_v15 }
  0xf0   : > { %v6237_v4 = vmax.f32 %v1663_v9, %v1727_v52  ;;  %v6248_v5 = vld [vmem:[#allocation2 + $0x36] sm:$0xff]  ;;  %v1462_v49 = vld [vmem:[#allocation2 + $0xe6] sm:$0xff]  ;;  %v6262_v30 = vmul.f32 %v1030_v6, %v6013_v19  ;;  %v6264_v28 = vadd.f32 1.0, %v5344_v20  ;;  %v1470_v0 = vmax.f32 %v5817_v17, %v1438_v48  ;;  %v487_v19 = vpop.f32.mrf.mxu3 }
  0xf1   : > { %v1615_v53 = vsel %vm1144_vm8, %v1583_v24, %v1519_v25  ;;  %v6250_v29 = vld [vmem:[#allocation2 + $0x37] sm:$0xff]  ;;  %v1670_v58 = vmax.f32 %v6000_v11, %v1638_v10  ;;  %v810_v23 = vmul.f32 %v6194_v46, %v809_v21  ;;  %5347 = vrcp.f32 %v6231_v42  ;;  %v1534_v52 = vld [vmem:[#allocation2 + $0x27] sm:$0xff]  ;;  %v466_v21 = vpop.f32.mrf.mxu2 }
  0xf2   : > { %v1735_v62 = vld [vmem:[#allocation2 + $0x72] sm:$0xff]  ;;  %1823 = vst.msk [vmem:[#allocation2 + $0x30] sm:$0xff] %vm1150_vm2, %v6237_v4  ;;  %v819_v9 = vor.u32 1.1754944e-38, %v818_v59  ;;  %5349 = vrcp.f32 %v6264_v28  ;;  %v5056_v27 = vmul.f32 -1.442695, %v6016_v3  ;;  %v6287_v34 = vadd.f32 %v5689_v33, %v487_v19 }
  0xf3   : > { %v6259_v31 = vmax.f32 %v1671_v8, %v1735_v62  ;;  %9674 = vst [vmem:[#allocation12_spill] sm:$0xff] %v6262_v30  ;;  %v1448_v40 = vld [vmem:[#allocation2 + $0x76] sm:$0xff]  ;;  %v811_v24 = vadd.f32 %v6194_v46, %v810_v23  ;;  %vm817_vm10 = vcmp.eq.f32.partialorder %v816_v51, 8.507059e+37  ;;  %v6298_v60 = vsel %vm1144_vm8, %v1565_v7, %v5976_v54  ;;  %v1558_v51 = vld [vmem:[#allocation2 + $0xe7] sm:$0xff] }
  0xf4   : > { %v1544_v12 = vld [vmem:[#allocation2 + $0x77] sm:$0xff]  ;;  %1185 = vst.msk [vmem:[#allocation2 + $0xf0] sm:$0xff] %vm1150_vm2, %v6262_v30  ;;  %v1494_v33 = vmax.f32 %v6075_v61, %v1462_v49  ;;  %v1678_v59 = vmax.f32 %v6025_v44, %v1646_v56  ;;  %v6302_v10 = vmax.f32 %v1470_v0, %v1534_v52  ;;  %v6307_v8 = vsel %vm1147_vm4, %v1670_v58, %v6000_v11  ;;  %v5346_v1 = vpop.eup %5345  ;;  %v6314_v7 = vld [vmem:[#allocation2 + $0xaa] sm:$0xff] }
  0xf5   : > { %9673 = vst [vmem:[#allocation11_spill] sm:$0xff] %v6259_v31  ;;  %v1647_v25 = vld [vmem:[#allocation2 + $0xb1] sm:$0xff]  ;;  %v815_v54 = vsel %vm6280_vm9, %v6194_v46, %v811_v24  ;;  %v1472_v20 = vmax.f32 %v6129_v35, %v6248_v5  ;;  %5351 = vpow2.f32 %v5056_v27  ;;  %v5071_v11 = vmul.f32 -1.442695, %v6287_v34  ;;  %v6336_v5 = vld [vmem:[%s9557_s2] ss:$0 sm:$0xff] }
  0xf6   : > { %1831 = vst.msk [vmem:[#allocation2 + $0x70] sm:$0xff] %vm1150_vm2, %v6259_v31  ;;  %v1679_v16 = vmax.f32 %v1615_v53, %v1647_v25  ;;  %v1743_v48 = vld [vmem:[#allocation2 + $0xb2] sm:$0xff]  ;;  %v820_v6 = vsel %vm817_vm10, %v819_v9, %v815_v54  ;;  %v1480_v0 = vmax.f32 %v6158_v2, %v1448_v40  ;;  %v6331_v35 = vadd.f32 1.0, %v5346_v1  ;;  %v1441_v19 = vld [vmem:[#allocation2 + $0x3e] sm:$0xff] }
  0xf7   : > { %v6318_v53 = vld [vmem:[#allocation2 + $0xb6] sm:$0xff]  ;;  %v6323_v49 = vpop.eup %5347  ;;  %v6329_v46 = vmul.f32 %v820_v6, %v5954_v39  ;;  %v6339_v58 = vadd.f32 %v6336_v5, %v466_v21  ;;  %v6343_v23 = vmax.f32 %v1494_v33, %v1558_v51  ;;  %v6348_v39 = vsel %vm1147_vm4, %v1678_v59, %v6025_v44  ;;  %v421_v51 = vpop.f32.mrf.mxu0 }
  0xf8   : > { %v6309_v38 = vmax.f32 %v1679_v16, %v1743_v48  ;;  %v6320_v62 = vld [vmem:[#allocation2 + $0xb7] sm:$0xff]  ;;  %v5350_v56 = vpop.eup %5349  ;;  %v1041_v25 = vand.u32 2147483647, %v6264_v28  ;;  %v1043_v9 = vand.u32 2147483648, %v6264_v28  ;;  %v703_v27 = vmul.f32 %v6323_v49, %v6231_v42 }
  0xf9   : > { %9678 = vst [vmem:[#allocation14_spill] sm:$0xff] %v6329_v46  ;;  %v1033_v17 = vmul.f32 %v5350_v56, %v6264_v28  ;;  %5353 = vpow2.f32 %v5071_v11  ;;  %v1568_v16 = vmax.f32 %v1472_v20, %v6250_v29  ;;  %v1473_v44 = vmax.f32 %v6244_v15, %v1441_v19  ;;  %v1632_v6 = vld [vmem:[#allocation2 + $0x39] sm:$0xff] }
  0xfa   : > { %9677 = vst [vmem:[#allocation13_spill] sm:$0xff] %v6309_v38  ;;  %5355 = vrcp.f32 %v6331_v35  ;;  %v713_v24 = vand.u32 2147483648, %v6231_v42  ;;  %v6361_v52 = vmax.f32 %v1480_v0, %v1544_v12  ;;  %vm707_vm13 = vweird.f32 %v6231_v42 }
  0xfb   : > { %1839 = vst.msk [vmem:[#allocation2 + $0xb0] sm:$0xff] %vm1150_vm2, %v6309_v38  ;;  %v1463_v48 = vld [vmem:[#allocation2 + $0xee] sm:$0xff]  ;;  %v711_v33 = vand.u32 2147483647, %v6231_v42  ;;  %v5064_v59 = vmul.f32 -1.442695, %v6339_v58  ;;  %v5352_v54 = vpop.eup %5351  ;;  %vm1037_vm14 = vweird.f32 %v6264_v28  ;;  %vm1038_vm15 = vweird.f32 %v5350_v56 }
  0xfc   : > { %1171 = vst.msk [vmem:[#allocation2 + $0x80] sm:$0xff] %vm1150_vm2, %v6329_v46  ;;  %v1495_v1 = vmax.f32 %v6262_v30, %v1463_v48  ;;  %v1034_v29 = vsub.f32 1.0, %v1033_v17  ;;  %vm6370_vm0 = vcmp.eq.f32.partialorder %v1041_v25, 8.507059e+37  ;;  %v1044_v11 = vor.u32 1.1754944e-38, %v1043_v9  ;;  %vm6380_vm3 = vmor %vm1037_vm14, %vm1038_vm15  ;;  %v6503_v18 = vld [vmem:[#allocation2 + $0xea] sm:$0xff] }
  0xfd   : > { %v704_v21 = vsub.f32 1.0, %v703_v27  ;;  %v1505_v0 = vsel %vm1142_vm12, %v1473_v44, %v6244_v15  ;;  %v714_v48 = vor.u32 1.1754944e-38, %v713_v24  ;;  %v6378_v17 = vadd.f32 %v6336_v5, %v421_v51  ;;  %v1559_v44 = vld [vmem:[#allocation2 + $0xef] sm:$0xff]  ;;  %v1537_v24 = vld [vmem:[#allocation2 + $0x3f] sm:$0xff]  ;;  %9695 = vst [vmem:[#allocation17_spill] sm:$0xff] %v6503_v18 }
  0xfe   : > { %v1035_v19 = vmul.f32 %v5350_v56, %v1034_v29  ;;  %vm708_vm5 = vweird.f32 %v6323_v49  ;;  %v6386_v9 = vadd.f32 1.0, %v5352_v54  ;;  %5357 = vpow2.f32 %v5064_v59 }
  0xff   : > { %v5354_v28 = vpop.eup %5353  ;;  %v705_v25 = vmul.f32 %v6323_v49, %v704_v21  ;;  %v1527_v15 = vsel %vm1142_vm12, %v1495_v1, %v6262_v30  ;;  %v1664_v51 = vmax.f32 %v1568_v16, %v1632_v6  ;;  %vm932_vm6 = vweird.f32 %v6331_v35  ;;  %v445_v6 = vpop.f32.mrf.mxu1  ;;  %vm709_vm9 = vmor %vm707_vm13, %vm708_vm5 }
 0x100   : > { %v5356_v27 = vpop.eup %5355  ;;  %v1036_v29 = vadd.f32 %v5350_v56, %v1035_v19  ;;  %v1569_v20 = vmax.f32 %v1505_v0, %v1537_v24  ;;  %v936_v21 = vand.u32 2147483647, %v6331_v35  ;;  %v938_v54 = vand.u32 2147483648, %v6331_v35 }
 0x101   : > { %v928_v61 = vmul.f32 %v5356_v27, %v6331_v35  ;;  %v706_v55 = vadd.f32 %v6323_v49, %v705_v25  ;;  %5359 = vrcp.f32 %v6386_v9  ;;  %v6399_v1 = vadd.f32 1.0, %v5354_v28 }
 0x102   : > { %v1040_v59 = vsel %vm6380_vm3, %v5350_v56, %v1036_v29  ;;  %v1591_v19 = vmax.f32 %v1527_v15, %v1559_v44  ;;  %vm933_vm7 = vweird.f32 %v5356_v27  ;;  %vm712_vm10 = vcmp.eq.f32.partialorder %v711_v33, 8.507059e+37 }
 0x103   : > { %v1045_v24 = vsel %vm6370_vm0, %v1044_v11, %v1040_v59  ;;  %v929_v30 = vsub.f32 1.0, %v928_v61  ;;  %v710_v40 = vsel %vm709_vm9, %v6323_v49, %v706_v55  ;;  %v5049_v28 = vmul.f32 -1.442695, %v6378_v17  ;;  %v1449_v61 = vld [vmem:[#allocation2 + $0x7e] sm:$0xff]  ;;  %vm6423_vm13 = vmor %vm932_vm6, %vm933_vm7  ;;  %v490_v49 = vpop.f32.mrf.mxu3 }
 0x104   : > { %v6408_v56 = vmul.f32 %v1045_v24, %v6172_v22  ;;  %v5358_v25 = vpop.eup %5357  ;;  %v6414_v12 = vsel %vm1147_vm4, %v1664_v51, %v1568_v16  ;;  %v715_v44 = vsel %vm712_vm10, %v714_v48, %v710_v40  ;;  %v6417_v29 = vadd.f32 %v6336_v5, %v445_v6 }
 0x105   : > { %v930_v11 = vmul.f32 %v5356_v27, %v929_v30  ;;  %vm6427_vm14 = vcmp.eq.f32.partialorder %v936_v21, 8.507059e+37  ;;  %v939_v42 = vor.u32 1.1754944e-38, %v938_v54  ;;  %v6432_v30 = vmul.f32 %v715_v44, %v5968_v50 }
 0x106   : > { %9683 = vst [vmem:[#allocation15_spill] sm:$0xff] %v6408_v56  ;;  %5361 = vrcp.f32 %v6399_v1  ;;  %v1623_v16 = vsel %vm1144_vm8, %v1591_v19, %v1527_v15  ;;  %v6439_v35 = vsel %vm1144_vm8, %v1569_v20, %v1505_v0  ;;  %v6442_v48 = vadd.f32 %v6336_v5, %v490_v49  ;;  %v6452_v20 = vld [vmem:[#allocation2 + $0x79] sm:$0xff] }
 0x107   : > { %1186 = vst.msk [vmem:[#allocation2 + $0xf8] sm:$0xff] %vm1150_vm2, %v6408_v56  ;;  %v931_v33 = vadd.f32 %v5356_v27, %v930_v11  ;;  %v5360_v51 = vpop.eup %5359  ;;  %v1481_v21 = vmax.f32 %v6329_v46, %v1449_v61  ;;  %v831_v50 = vand.u32 2147483647, %v6386_v9  ;;  %v6448_v54 = vadd.f32 1.0, %v5358_v25  ;;  %5081 = vmatmul.msk.f32.gmra.mxu1 %vm1150_vm2, %v6432_v30 }
 0x108   : > { %1164 = vst.msk [vmem:[#allocation2 + $0x48] sm:$0xff] %vm1150_vm2, %v6432_v30  ;;  %5363 = vpow2.f32 %v5049_v28  ;;  %v823_v15 = vmul.f32 %v5360_v51, %v6386_v9  ;;  %v833_v59 = vand.u32 2147483648, %v6386_v9  ;;  %v5057_v6 = vmul.f32 -1.442695, %v6417_v29 }
 0x109   : > { %v935_v0 = vsel %vm6423_vm13, %v5356_v27, %v931_v33  ;;  %v1056_v24 = vand.u32 2147483647, %v6399_v1  ;;  %v1058_v40 = vand.u32 2147483648, %v6399_v1  ;;  %5365 = vrcp.f32 %v6448_v54 }
 0x10a   : > { %v940_v19 = vsel %vm6427_vm14, %v939_v42, %v935_v0  ;;  %v824_v25 = vsub.f32 1.0, %v823_v15  ;;  %vm827_vm15 = vweird.f32 %v6386_v9  ;;  %vm828_vm0 = vweird.f32 %v5360_v51  ;;  %v1654_v9 = vld [vmem:[#allocation2 + $0xe9] sm:$0xff] }
 0x10b   : > { %v6465_v28 = vmul.f32 %v940_v19, %v6190_v14  ;;  %v6473_v61 = vsel %vm1142_vm12, %v1481_v21, %v6329_v46  ;;  %v1672_v11 = vmax.f32 %v6361_v52, %v6452_v20  ;;  %vm6477_vm3 = vcmp.eq.f32.partialorder %v831_v50, 8.507059e+37  ;;  %vm6490_vm6 = vmor %vm827_vm15, %vm828_vm0 }
 0x10c   : > { %v6468_v27 = vpop.eup %5361  ;;  %vm1052_vm5 = vweird.f32 %v6399_v1  ;;  %v825_v55 = vmul.f32 %v5360_v51, %v824_v25  ;;  %5367 = vpow2.f32 %v5057_v6  ;;  %v5072_v42 = vmul.f32 -1.442695, %v6442_v48 }
 0x10d   : > { %9688 = vst [vmem:[#allocation16_spill] sm:$0xff] %v6465_v28  ;;  %v1048_v22 = vmul.f32 %v6468_v27, %v6399_v1  ;;  %v834_v20 = vor.u32 1.1754944e-38, %v833_v59  ;;  %vm6494_vm7 = vcmp.eq.f32.partialorder %v1056_v24, 8.507059e+37  ;;  %v1059_v15 = vor.u32 1.1754944e-38, %v1058_v40 }
 0x10e   : > { %v1655_v14 = vld [vmem:[#allocation2 + $0xf1] sm:$0xff]  ;;  %1179 = vst.msk [vmem:[#allocation2 + $0xc0] sm:$0xff] %vm1150_vm2, %v6465_v28  ;;  %v5364_v49 = vpop.eup %5363  ;;  %v826_v6 = vadd.f32 %v5360_v51, %v825_v55  ;;  %vm1053_vm9 = vweird.f32 %v6468_v27  ;;  %vm947_vm10 = vweird.f32 %v6448_v54  ;;  %v951_v24 = vand.u32 2147483647, %v6448_v54 }
 0x10f   : > { %v1687_v33 = vmax.f32 %v1623_v16, %v1655_v14  ;;  %v1751_v21 = vld [vmem:[#allocation2 + $0xf2] sm:$0xff]  ;;  %v1633_v19 = vld [vmem:[#allocation2 + $0x41] sm:$0xff]  ;;  %v1049_v25 = vsub.f32 1.0, %v1048_v22  ;;  %v6499_v16 = vadd.f32 1.0, %v5364_v49  ;;  %v6501_v14 = vpop.eup %5365  ;;  %5369 = vpow2.f32 %v5072_v42  ;;  %vm6531_vm13 = vmor %vm1052_vm5, %vm1053_vm9 }
 0x110   : > { %v1665_v59 = vmax.f32 %v6439_v35, %v1633_v19  ;;  %v6510_v40 = vld [vmem:[#allocation2 + $0xf6] sm:$0xff]  ;;  %v1729_v22 = vld [vmem:[#allocation2 + $0x42] sm:$0xff]  ;;  %v830_v49 = vsel %vm6490_vm6, %v5360_v51, %v826_v6  ;;  %v953_v42 = vand.u32 2147483648, %v6448_v54  ;;  %vm948_vm14 = vweird.f32 %v6501_v14  ;;  %v424_v51 = vpop.f32.mrf.mxu0 }
 0x111   : > { %v6505_v38 = vmax.f32 %v1687_v33, %v1751_v21  ;;  %v6512_v55 = vld [vmem:[#allocation2 + $0xf7] sm:$0xff]  ;;  %v1050_v46 = vmul.f32 %v6468_v27, %v1049_v25  ;;  %v943_v33 = vmul.f32 %v6501_v14, %v6448_v54  ;;  %v835_v19 = vsel %vm6477_vm3, %v834_v20, %v830_v49  ;;  %v1545_v6 = vld [vmem:[#allocation2 + $0x7f] sm:$0xff]  ;;  %vm6578_vm15 = vmor %vm947_vm10, %vm948_vm14 }
 0x112   : > { %v6519_v21 = vld [vmem:[#allocation2 + $0x3a] sm:$0xff]  ;;  %v6523_v35 = vmax.f32 %v1665_v59, %v1729_v22  ;;  %5371 = vrcp.f32 %v6499_v16  ;;  %v5368_v50 = vpop.eup %5367  ;;  %v6537_v25 = vld [vmem:[#allocation2 + $0x46] sm:$0xff]  ;;  %v6542_v44 = vmul.f32 %v835_v19, %v6016_v3  ;;  %v469_v22 = vpop.f32.mrf.mxu2  ;;  %v9700_v18 = vmax.f32 %v6197_v37, %v6318_v53 }
 0x113   : > { %9696 = vst [vmem:[#allocation18_spill] sm:$0xff] %v6505_v38  ;;  %v6539_v59 = vld [vmem:[#allocation2 + $0x47] sm:$0xff]  ;;  %v1051_v20 = vadd.f32 %v6468_v27, %v1050_v46  ;;  %v944_v1 = vsub.f32 1.0, %v943_v33  ;;  %v1577_v3 = vmax.f32 %v6473_v61, %v1545_v6  ;;  %v6563_v33 = vsel %vm1147_vm4, %v1672_v11, %v6361_v52 }
 0x114   : > { %1847 = vst.msk [vmem:[#allocation2 + $0xf0] sm:$0xff] %vm1150_vm2, %v6505_v38  ;;  %v1686_v38 = vmax.f32 %v6343_v23, %v1654_v9  ;;  %v6553_v2 = vmax.f32 %v9700_v18, %v6320_v62  ;;  %v954_v11 = vor.u32 1.1754944e-38, %v953_v42  ;;  %v6582_v6 = vadd.f32 1.0, %v5368_v50 }
 0x115   : > { %9699 = vst [vmem:[#allocation19_spill] sm:$0xff] %v6542_v44  ;;  %v1457_v19 = vld [vmem:[#allocation2 + $0xbe] sm:$0xff]  ;;  %v1055_v18 = vsel %vm6531_vm13, %v6468_v27, %v1051_v20  ;;  %v945_v53 = vmul.f32 %v6501_v14, %v944_v1  ;;  %v5370_v27 = vpop.eup %5369  ;;  %vm6590_vm0 = vcmp.eq.f32.partialorder %v951_v24, 8.507059e+37  ;;  %v6595_v54 = vadd.f32 %v6336_v5, %v469_v22 }
 0x116   : > { %1825 = vst.msk [vmem:[#allocation2 + $0x40] sm:$0xff] %vm1150_vm2, %v6523_v35  ;;  %v1489_v62 = vmax.f32 %v6465_v28, %v1457_v19  ;;  %v1060_v9 = vsel %vm6494_vm7, %v1059_v15, %v1055_v18  ;;  %v6584_v20 = vld [vmem:[#allocation2 + $0x7a] sm:$0xff]  ;;  %v6600_v42 = vsel %vm1147_vm4, %v1686_v38, %v6343_v23  ;;  %5373 = vrcp.f32 %v6582_v6 }
 0x117   : > { %1172 = vst.msk [vmem:[#allocation2 + $0x88] sm:$0xff] %vm1150_vm2, %v6542_v44  ;;  %v6587_v1 = vmul.f32 %v1060_v9, %v6287_v34  ;;  %v946_v0 = vadd.f32 %v6501_v14, %v945_v53  ;;  %v1609_v34 = vsel %vm1144_vm8, %v1577_v3, %v6473_v61  ;;  %v1629_v24 = vld [vmem:[#allocation2 + $0x21] sm:$0xff]  ;;  %v6617_v61 = vadd.f32 %v6336_v5, %v424_v51  ;;  %v448_v3 = vpop.f32.mrf.mxu1 }
 0x118   : > { %v5372_v19 = vpop.eup %5371  ;;  %9706 = vst [vmem:[#allocation21_spill] sm:$0xff] %v6600_v42  ;;  %v1521_v18 = vsel %vm1142_vm12, %v1489_v62, %v6465_v28  ;;  %vm722_vm3 = vweird.f32 %v6499_v16  ;;  %v1553_v52 = vld [vmem:[#allocation2 + $0xbf] sm:$0xff]  ;;  %v6630_v51 = vadd.f32 1.0, %v5370_v27  ;;  %v5065_v49 = vmul.f32 -1.442695, %v6595_v54  ;;  %v493_v27 = vpop.f32.mrf.mxu3 }
 0x119   : > { %9703 = vst [vmem:[#allocation20_spill] sm:$0xff] %v6587_v1  ;;  %v950_v38 = vsel %vm6578_vm15, %v6501_v14, %v946_v0  ;;  %v718_v23 = vmul.f32 %v5372_v19, %v6499_v16  ;;  %v726_v62 = vand.u32 2147483647, %v6499_v16  ;;  %v728_v46 = vand.u32 2147483648, %v6499_v16 }
 0x11a   : > { %1187 = vst.msk [vmem:[#allocation2 + $0x100] sm:$0xff] %vm1150_vm2, %v6587_v1  ;;  %v955_v9 = vsel %vm6590_vm0, %v954_v11, %v950_v38  ;;  %v6636_v53 = vadd.f32 %v6336_v5, %v448_v3  ;;  %v1661_v11 = vmax.f32 %v6298_v60, %v1629_v24  ;;  %vm723_vm5 = vweird.f32 %v5372_v19  ;;  %v472_v38 = vpop.f32.mrf.mxu2  ;;  %v1725_v60 = vld [vmem:[#allocation2 + $0x22] sm:$0xff] }
 0x11b   : > { %v6628_v14 = vmul.f32 %v955_v9, %v6339_v58  ;;  %v719_v0 = vsub.f32 1.0, %v718_v23  ;;  %5375 = vrcp.f32 %v6630_v51  ;;  %v1585_v9 = vmax.f32 %v1521_v18, %v1553_v52  ;;  %vm724_vm6 = vmor %vm722_vm3, %vm723_vm5 }
 0x11c   : > { %v6642_v23 = vpop.eup %5373  ;;  %v846_v28 = vand.u32 2147483647, %v6582_v6  ;;  %5377 = vpow2.f32 %v5065_v49  ;;  %v6646_v3 = vadd.f32 %v6336_v5, %v493_v27  ;;  %vm727_vm7 = vcmp.eq.f32.partialorder %v726_v62, 8.507059e+37 }
 0x11d   : > { %9707 = vst [vmem:[#allocation22_spill] sm:$0xff] %v6628_v14  ;;  %v720_v58 = vmul.f32 %v5372_v19, %v719_v0  ;;  %v838_v24 = vmul.f32 %v6642_v23, %v6582_v6  ;;  %v848_v0 = vand.u32 2147483648, %v6582_v6  ;;  %v729_v49 = vor.u32 1.1754944e-38, %v728_v46 }
 0x11e   : > { %v1641_v50 = vld [vmem:[#allocation2 + $0x81] sm:$0xff]  ;;  %1180 = vst.msk [vmem:[#allocation2 + $0xc8] sm:$0xff] %vm1150_vm2, %v6628_v14  ;;  %vm1149_vm9 = vcmp.lt.s32.totalorder %v5980_v63, 14  ;;  %v6664_v52 = vmax.f32 %v1661_v11, %v1725_v60  ;;  %vm842_vm10 = vweird.f32 %v6582_v6  ;;  %vm843_vm13 = vweird.f32 %v6642_v23 }
 0x11f   : > { %v1673_v15 = vmax.f32 %v1609_v34, %v1641_v50  ;;  %v1737_v22 = vld [vmem:[#allocation2 + $0x82] sm:$0xff]  ;;  %v721_v50 = vadd.f32 %v5372_v19, %v720_v58  ;;  %v839_v27 = vsub.f32 1.0, %v838_v24  ;;  %v1617_v16 = vsel %vm1144_vm8, %v1585_v9, %v1521_v18  ;;  %vm6691_vm0 = vmor %vm842_vm10, %vm843_vm13 }
 0x120   : > { %v6653_v37 = vld [vmem:[#allocation2 + $0x86] sm:$0xff]  ;;  %vm6672_vm14 = vcmp.eq.f32.partialorder %v846_v28, 8.507059e+37  ;;  %v5050_v11 = vmul.f32 -1.442695, %v6617_v61  ;;  %vm1067_vm15 = vweird.f32 %v6630_v51  ;;  %1821 = vst.msk [vmem:[#allocation2 + $0x20] sm:$0xff] %vm1150_vm2, %v6664_v52  ;;  %v1648_v28 = vld [vmem:[#allocation2 + $0xb9] sm:$0xff] }
 0x121   : > { %v6648_v34 = vmax.f32 %v1673_v15, %v1737_v22  ;;  %v6655_v14 = vld [vmem:[#allocation2 + $0x87] sm:$0xff]  ;;  %v6662_v22 = vadd.f32 %v6336_v5, %v472_v38  ;;  %v1465_v15 = vld [vmem:[#allocation2 + $0xfe] sm:$0xff]  ;;  %v725_v58 = vsel %vm724_vm6, %v5372_v19, %v721_v50  ;;  %v6677_v38 = vpop.eup %5375  ;;  %v840_v19 = vmul.f32 %v6642_v23, %v839_v27 }
 0x122   : > { %v730_v46 = vsel %vm727_vm7, %v729_v49, %v725_v58  ;;  %v849_v50 = vor.u32 1.1754944e-38, %v848_v0  ;;  %v5378_v18 = vpop.eup %5377  ;;  %v1497_v9 = vmax.f32 %v6587_v1, %v1465_v15  ;;  %v1063_v0 = vmul.f32 %v6677_v38, %v6630_v51 }
 0x123   : > { %9708 = vst [vmem:[#allocation23_spill] sm:$0xff] %v6648_v34  ;;  %v6680_v60 = vmul.f32 %v730_v46, %v6378_v17  ;;  %v1071_v49 = vand.u32 2147483647, %v6630_v51  ;;  %v1073_v58 = vand.u32 2147483648, %v6630_v51  ;;  %v841_v15 = vadd.f32 %v6642_v23, %v840_v19  ;;  %v6757_v51 = vld [vmem:[#allocation2 + $0x61] sm:$0xff] }
 0x124   : > { %1833 = vst.msk [vmem:[#allocation2 + $0x80] sm:$0xff] %vm1150_vm2, %v6648_v34  ;;  %v6702_v42 = vadd.f32 1.0, %v5378_v18  ;;  %v5058_v6 = vmul.f32 -1.442695, %v6636_v53  ;;  %v1064_v34 = vsub.f32 1.0, %v1063_v0  ;;  %vm1068_vm3 = vweird.f32 %v6677_v38  ;;  %v1561_v0 = vld [vmem:[#allocation2 + $0xff] sm:$0xff] }
 0x125   : > { %v1649_v24 = vld [vmem:[#allocation2 + $0xc1] sm:$0xff]  ;;  %1165 = vst.msk [vmem:[#allocation2 + $0x50] sm:$0xff] %vm1150_vm2, %v6680_v60  ;;  %5082 = vmatmul.msk.f32.gmra.mxu1 %vm1150_vm2, %v6680_v60  ;;  %5379 = vpow2.f32 %v5050_v11  ;;  %v5073_v31 = vmul.f32 -1.442695, %v6646_v3  ;;  %v845_v19 = vsel %vm6691_vm0, %v6642_v23, %v841_v15  ;;  %v1529_v18 = vsel %vm1142_vm12, %v1497_v9, %v6587_v1  ;;  %vm6744_vm5 = vmor %vm1067_vm15, %vm1068_vm3 }
 0x126   : > { %v1681_v27 = vmax.f32 %v1617_v16, %v1649_v24  ;;  %v1745_v46 = vld [vmem:[#allocation2 + $0xc2] sm:$0xff]  ;;  %v1680_v16 = vmax.f32 %v6553_v2, %v1648_v28  ;;  %v6710_v24 = vld [vmem:[#allocation2 + $0xba] sm:$0xff]  ;;  %5381 = vrcp.f32 %v6702_v42  ;;  %v850_v28 = vsel %vm6672_vm14, %v849_v50, %v845_v19  ;;  %v496_v50 = vpop.f32.mrf.mxu3 }
 0x127   : > { %v6721_v11 = vld [vmem:[#allocation2 + $0xc6] sm:$0xff]  ;;  %v9716_v23 = vmax.f32 %v6408_v56, %v6510_v40  ;;  %v6738_v9 = vmul.f32 %v850_v28, %v6417_v29  ;;  %v1074_v62 = vor.u32 1.1754944e-38, %v1073_v58  ;;  %5383 = vpow2.f32 %v5058_v6 }
 0x128   : > { %v6712_v43 = vmax.f32 %v1681_v27, %v1745_v46  ;;  %9714 = vst [vmem:[#allocation25_spill] sm:$0xff] %v6721_v11  ;;  %v6723_v32 = vld [vmem:[#allocation2 + $0xc7] sm:$0xff]  ;;  %v1065_v27 = vmul.f32 %v6677_v38, %v1064_v34  ;;  %v5066_v46 = vmul.f32 -1.442695, %v6662_v22  ;;  %v9720_v40 = vmax.f32 %v6432_v30, %v6537_v25 }
 0x129   : > { %9715 = vst [vmem:[#allocation26_spill] sm:$0xff] %v6723_v32  ;;  %v6733_v17 = vmax.f32 %v9716_v23, %v6512_v55  ;;  %vm6753_vm6 = vcmp.eq.f32.partialorder %v1071_v49, 8.507059e+37  ;;  %5385 = vpow2.f32 %v5073_v31  ;;  %v6759_v19 = vld [vmem:[#allocation2 + $0x62] sm:$0xff]  ;;  %v6764_v58 = vsel %vm1147_vm4, %v1680_v16, %v6553_v2 }
 0x12a   : > { %9713 = vst [vmem:[#allocation24_spill] sm:$0xff] %v6712_v43  ;;  %v1570_v55 = vmax.f32 %v9720_v40, %v6539_v59  ;;  %v1066_v15 = vadd.f32 %v6677_v38, %v1065_v27  ;;  %v1482_v30 = vmax.f32 %v6542_v44, %v6653_v37  ;;  %v1593_v25 = vmax.f32 %v1529_v18, %v1561_v0  ;;  %v6770_v59 = vld [vmem:[#allocation2] sm:$0xff] }
 0x12b   : > { %1841 = vst.msk [vmem:[#allocation2 + $0xc0] sm:$0xff] %vm1150_vm2, %v6712_v43  ;;  %v9724_v31 = vmax.f32 %v6307_v8, %v6255_v57  ;;  %v5380_v6 = vpop.eup %5379  ;;  %v966_v0 = vand.u32 2147483647, %v6702_v42  ;;  %5387 = vpow2.f32 %v5066_v46  ;;  %v6785_v28 = vadd.f32 %v6336_v5, %v496_v50  ;;  %v6946_v32 = vld [vmem:[#allocation2 + $0x20] sm:$0xff] }
 0x12c   : > { %9717 = vst [vmem:[#allocation27_spill] sm:$0xff] %v6738_v9  ;;  %v1443_v2 = vld [vmem:[#allocation2 + $0x4e] sm:$0xff]  ;;  %v1070_v37 = vsel %vm6744_vm5, %v6677_v38, %v1066_v15  ;;  %v5382_v57 = vpop.eup %5381  ;;  %v968_v23 = vand.u32 2147483648, %v6702_v42  ;;  %v6793_v40 = vadd.f32 1.0, %v5380_v6  ;;  %v1885_v46 = vmax.f32 %v6664_v52, %v6770_v59 }
 0x12d   : > { %1173 = vst.msk [vmem:[#allocation2 + $0x90] sm:$0xff] %vm1150_vm2, %v6738_v9  ;;  %v6778_v49 = vsel %vm1149_vm9, %v9724_v31, %v6307_v8  ;;  %v1634_v16 = vld [vmem:[#allocation2 + $0x49] sm:$0xff]  ;;  %v1475_v8 = vmax.f32 %v6680_v60, %v1443_v2  ;;  %v1075_v27 = vsel %vm6753_vm6, %v1074_v62, %v1070_v37  ;;  %v958_v5 = vmul.f32 %v5382_v57, %v6702_v42  ;;  %v5384_v50 = vpop.eup %5383 }
 0x12e   : > { %9723 = vst [vmem:[#allocation28_spill] sm:$0xff] %v6770_v59  ;;  %v1666_v38 = vmax.f32 %v1570_v55, %v1634_v16  ;;  %v6796_v34 = vmul.f32 %v1075_v27, %v6442_v48  ;;  %v1578_v15 = vmax.f32 %v1482_v30, %v6655_v14  ;;  %v6804_v29 = vsel %vm1144_vm8, %v1593_v25, %v1529_v18  ;;  %v6808_v62 = vld [vmem:[#allocation2 + $0x10] sm:$0xff] }
 0x12f   : > { %1830 = vst.msk [vmem:[#allocation2 + $0x68] sm:$0xff] %vm1150_vm2, %v6778_v49  ;;  %vm962_vm7 = vweird.f32 %v6702_v42  ;;  %5389 = vrcp.f32 %v6793_v40  ;;  %v5386_v48 = vpop.eup %5385  ;;  %v1507_v31 = vsel %vm1142_vm12, %v1475_v8, %v6680_v60  ;;  %v959_v52 = vsub.f32 1.0, %v958_v5  ;;  %v6824_v2 = vld [vmem:[#allocation2 + $0x30] sm:$0xff] }
 0x130   : > { %9725 = vst [vmem:[#allocation29_spill] sm:$0xff] %v6796_v34  ;;  %vm963_vm10 = vweird.f32 %v5382_v57  ;;  %v5074_v14 = vmul.f32 -1.442695, %v6785_v28  ;;  %vm6816_vm13 = vcmp.eq.f32.partialorder %v966_v0, 8.507059e+37  ;;  %v969_v30 = vor.u32 1.1754944e-38, %v968_v23  ;;  %v1539_v60 = vld [vmem:[#allocation2 + $0x4f] sm:$0xff] }
 0x131   : > { %1188 = vst.msk [vmem:[#allocation2 + $0x108] sm:$0xff] %vm1150_vm2, %v6796_v34  ;;  %v6820_v25 = vadd.f32 1.0, %v5384_v50  ;;  %v6822_v6 = vadd.f32 1.0, %v5386_v48  ;;  %v5388_v16 = vpop.eup %5387  ;;  %v6828_v37 = vsel %vm1147_vm4, %v1666_v38, %v1570_v55  ;;  %v960_v5 = vmul.f32 %v5382_v57, %v959_v52  ;;  %vm6838_vm14 = vmor %vm962_vm7, %vm963_vm10  ;;  %v6850_v42 = vld [vmem:[#allocation2 + $0x4a] sm:$0xff] }
 0x132   : > { %v6831_v0 = vmax.f32 %v1885_v46, %v6808_v62  ;;  %v1662_v23 = vmax.f32 %v6302_v10, %v6233_v45  ;;  %v1571_v50 = vmax.f32 %v1507_v31, %v1539_v60  ;;  %v741_v55 = vand.u32 2147483647, %v6793_v40 }
 0x133   : > { %v743_v38 = vand.u32 2147483648, %v6793_v40  ;;  %5391 = vrcp.f32 %v6820_v25  ;;  %v961_v52 = vadd.f32 %v5382_v57, %v960_v5  ;;  %vm737_vm15 = vweird.f32 %v6793_v40 }
 0x134   : > { %v1451_v8 = vld [vmem:[#allocation2 + $0x8e] sm:$0xff]  ;;  %5393 = vpow2.f32 %v5074_v14  ;;  %v1955_v45 = vmax.f32 %v6831_v0, %v6824_v2  ;;  %v6854_v56 = vadd.f32 1.0, %v5388_v16  ;;  %v6869_v16 = vsel %vm1147_vm4, %v1662_v23, %v6302_v10 }
 0x135   : > { %v1642_v27 = vld [vmem:[#allocation2 + $0x89] sm:$0xff]  ;;  %v1483_v46 = vmax.f32 %v6738_v9, %v1451_v8  ;;  %v6848_v60 = vpop.eup %5389  ;;  %5395 = vrcp.f32 %v6822_v6  ;;  %v2085_v8 = vld [vmem:[%s9558_s3 + $0x2] sm:$0x3]  ;;  %v965_v5 = vsel %vm6838_vm14, %v5382_v57, %v961_v52  ;;  %vm6877_vm0 = vcmp.eq.f32.partialorder %v741_v55, 8.507059e+37 }
 0x136   : > { %v1674_v1 = vmax.f32 %v1578_v15, %v1642_v27  ;;  %v733_v0 = vmul.f32 %v6848_v60, %v6793_v40  ;;  %5108 = vmatpush.msk.msrb.mxu2 %vm1288_vm11, %v2085_v8  ;;  %v6873_v27 = vsel %vm1144_vm8, %v1571_v50, %v1507_v31  ;;  %v970_v14 = vsel %vm6816_vm13, %v969_v30, %v965_v5  ;;  %v6893_v30 = vld [vmem:[#allocation2 + $0xf9] sm:$0xff] }
 0x137   : > { %v744_v48 = vor.u32 1.1754944e-38, %v743_v38  ;;  %v6884_v52 = vsel %vm1142_vm12, %v1483_v46, %v6738_v9  ;;  %v6888_v31 = vmul.f32 %v970_v14, %v6595_v54  ;;  %vm857_vm3 = vweird.f32 %v6820_v25  ;;  %v6903_v54 = vld [vmem:[#allocation2 + $0x8f] sm:$0xff] }
 0x138   : > { %v1657_v43 = vld [vmem:[#allocation2 + $0x101] sm:$0xff]  ;;  %v6897_v50 = vsel %vm1147_vm4, %v1674_v1, %v1578_v15  ;;  %v734_v55 = vsub.f32 1.0, %v733_v0  ;;  %v861_v38 = vand.u32 2147483647, %v6820_v25  ;;  %5397 = vrcp.f32 %v6854_v56  ;;  %v6917_v0 = vld [vmem:[#allocation2 + $0x8a] sm:$0xff] }
 0x139   : > { %v1689_v10 = vmax.f32 %v6804_v29, %v1657_v43  ;;  %v1753_v23 = vld [vmem:[#allocation2 + $0x102] sm:$0xff]  ;;  %9732 = vst [vmem:[#allocation30_spill] sm:$0xff] %v6888_v31  ;;  %v6891_v18 = vpop.eup %5391  ;;  %v6901_v29 = vld [vmem:[#allocation2 + $0xfa] sm:$0xff]  ;;  %v863_v1 = vand.u32 2147483648, %v6820_v25  ;;  %vm1082_vm5 = vweird.f32 %v6822_v6  ;;  %vm738_vm6 = vweird.f32 %v6848_v60 }
 0x13a   : > { %v5394_v43 = vpop.eup %5393  ;;  %9733 = vst [vmem:[#allocation31_spill] sm:$0xff] %v6901_v29  ;;  %v853_v8 = vmul.f32 %v6891_v18, %v6820_v25  ;;  %v6913_v15 = vld [vmem:[#allocation2 + $0x40] sm:$0xff]  ;;  %v735_v29 = vmul.f32 %v6848_v60, %v734_v55  ;;  %v1086_v34 = vand.u32 2147483647, %v6822_v6  ;;  %vm858_vm7 = vweird.f32 %v6891_v18  ;;  %vm739_vm10 = vmor %vm737_vm15, %vm738_vm6 }
 0x13b   : > { %v6905_v46 = vmax.f32 %v1689_v10, %v1753_v23  ;;  %1181 = vst.msk [vmem:[#allocation2 + $0xd0] sm:$0xff] %vm1150_vm2, %v6888_v31  ;;  %v5396_v14 = vpop.eup %5395  ;;  %v6919_v10 = vld [vmem:[#allocation2 + $0x106] sm:$0xff]  ;;  %v6934_v55 = vadd.f32 1.0, %v5394_v43  ;;  %v6937_v59 = vmax.f32 %v1955_v45, %v6913_v15  ;;  %vm6942_vm13 = vcmp.eq.f32.partialorder %v861_v38, 8.507059e+37  ;;  %vm6953_vm1 = vmor %vm857_vm3, %vm858_vm7 }
 0x13c   : > { %9735 = vst [vmem:[#allocation33_spill] sm:$0xff] %v6919_v10  ;;  %v6921_v23 = vld [vmem:[#allocation2 + $0x107] sm:$0xff]  ;;  %v854_v44 = vsub.f32 1.0, %v853_v8  ;;  %v1078_v5 = vmul.f32 %v5396_v14, %v6822_v6  ;;  %v736_v10 = vadd.f32 %v6848_v60, %v735_v29  ;;  %vm1083_vm14 = vweird.f32 %v5396_v14 }
 0x13d   : > { %9734 = vst [vmem:[#allocation32_spill] sm:$0xff] %v6905_v46  ;;  %v864_v40 = vor.u32 1.1754944e-38, %v863_v1  ;;  %vm6957_vm15 = vcmp.eq.f32.partialorder %v1086_v34, 8.507059e+37  ;;  %5399 = vrcp.f32 %v6934_v55  ;;  %5109 = vmatmul.msk.f32.vlgmr.msrb.gmra.mxu2 %vm1150_vm2, %v6937_v59  ;;  %vm6977_vm3 = vmor %vm1082_vm5, %vm1083_vm14  ;;  %v1101_v8 = vand.u32 2147483647, %v6934_v55 }
 0x13e   : > { %9736 = vst [vmem:[#allocation34_spill] sm:$0xff] %v6921_v23  ;;  %v1088_v23 = vand.u32 2147483648, %v6822_v6  ;;  %v855_v9 = vmul.f32 %v6891_v18, %v854_v44  ;;  %v6948_v29 = vpop.eup %5397  ;;  %v740_v43 = vsel %vm739_vm10, %v6848_v60, %v736_v10  ;;  %vm1097_vm7 = vweird.f32 %v6934_v55 }
 0x13f   : > { %1849 = vst.msk [vmem:[#allocation2 + $0x100] sm:$0xff] %vm1150_vm2, %v6905_v46  ;;  %v1079_v46 = vsub.f32 1.0, %v1078_v5  ;;  %v745_v25 = vsel %vm6877_vm0, %v744_v48, %v740_v43  ;;  %v973_v34 = vmul.f32 %v6948_v29, %v6854_v56  ;;  %vm977_vm0 = vweird.f32 %v6854_v56 }
 0x140   : > { %2021 = vst.msk [vmem:[#allocation2 + $0x20] sm:$0xff] %vm1150_vm2, %v6937_v59  ;;  %v856_v60 = vadd.f32 %v6891_v18, %v855_v9  ;;  %v6972_v5 = vmul.f32 %v745_v25, %v6617_v61  ;;  %v1089_v11 = vor.u32 1.1754944e-38, %v1088_v23  ;;  %v983_v9 = vand.u32 2147483648, %v6854_v56 }
 0x141   : > { %v1080_v38 = vmul.f32 %v5396_v14, %v1079_v46  ;;  %v1758_v46 = vmax.f32 %v6869_v16, %v6235_v36  ;;  %v974_v43 = vsub.f32 1.0, %v973_v34  ;;  %vm978_vm5 = vweird.f32 %v6948_v29 }
 0x142   : > { %v1459_v1 = vld [vmem:[#allocation2 + $0xce] sm:$0xff]  ;;  %v860_v48 = vsel %vm6953_vm1, %v6891_v18, %v856_v60  ;;  %1166 = vst.msk [vmem:[#allocation2 + $0x58] sm:$0xff] %vm1150_vm2, %v6972_v5  ;;  %v981_v25 = vand.u32 2147483647, %v6854_v56  ;;  %5083 = vmatmul.msk.f32.gmra.mxu1 %vm1150_vm2, %v6972_v5  ;;  %v984_v34 = vor.u32 1.1754944e-38, %v983_v9  ;;  %vm7021_vm1 = vmor %vm977_vm0, %vm978_vm5  ;;  %v9750_v56 = vmax.f32 %v6414_v12, %v6519_v21 }
 0x143   : > { %v1491_v57 = vmax.f32 %v6888_v31, %v1459_v1  ;;  %v1081_v61 = vadd.f32 %v5396_v14, %v1080_v38  ;;  %v1555_v6 = vld [vmem:[#allocation2 + $0xcf] sm:$0xff]  ;;  %v865_v23 = vsel %vm6942_vm13, %v864_v40, %v860_v48  ;;  %v7006_v40 = vpop.eup %5399  ;;  %v975_v38 = vmul.f32 %v6948_v29, %v974_v43 }
 0x144   : > { %v7001_v36 = vmul.f32 %v865_v23, %v6636_v53  ;;  %v1103_v1 = vand.u32 2147483648, %v6934_v55  ;;  %v1790_v44 = vsel %vm1149_vm9, %v1758_v46, %v6869_v16  ;;  %vm7031_vm6 = vcmp.eq.f32.partialorder %v981_v25, 8.507059e+37 }
 0x145   : > { %v1523_v18 = vsel %vm1142_vm12, %v1491_v57, %v6888_v31  ;;  %v1085_v45 = vsel %vm6977_vm3, %v5396_v14, %v1081_v61  ;;  %v976_v10 = vadd.f32 %v6948_v29, %v975_v38  ;;  %v7041_v9 = vsel %vm1149_vm9, %v9750_v56, %v6414_v12  ;;  %1822 = vst.msk [vmem:[#allocation2 + $0x28] sm:$0xff] %vm1150_vm2, %v1790_v44  ;;  %v7052_v61 = vld [vmem:[#allocation2 + $0x8] sm:$0xff]  ;;  %v7102_v38 = vld [vmem:[#allocation2 + $0x18] sm:$0xff] }
 0x146   : > { %v1090_v60 = vsel %vm6957_vm15, %v1089_v11, %v1085_v45  ;;  %v1587_v48 = vmax.f32 %v1523_v18, %v1555_v6  ;;  %1174 = vst.msk [vmem:[#allocation2 + $0x98] sm:$0xff] %vm1150_vm2, %v7001_v36  ;;  %v1093_v11 = vmul.f32 %v7006_v40, %v6934_v55  ;;  %v9751_v57 = vmax.f32 %v6828_v37, %v6850_v42 }
 0x147   : > { %v7015_v53 = vmul.f32 %v1090_v60, %v6646_v3  ;;  %v9752_v21 = vmax.f32 %v6884_v52, %v6903_v54  ;;  %vm7065_vm10 = vcmp.eq.f32.partialorder %v1101_v8, 8.507059e+37  ;;  %v980_v46 = vsel %vm7021_vm1, %v6948_v29, %v976_v10  ;;  %1824 = vst.msk [vmem:[#allocation2 + $0x38] sm:$0xff] %vm1150_vm2, %v7041_v9 }
 0x148   : > { %v7049_v16 = vsel %vm1149_vm9, %v9751_v57, %v6828_v37  ;;  %v1094_v42 = vsub.f32 1.0, %v1093_v11  ;;  %vm1098_vm13 = vweird.f32 %v7006_v40  ;;  %v7073_v54 = vor.u32 1.1754944e-38, %v1103_v1 }
 0x149   : > { %9745 = vst [vmem:[#allocation35_spill] sm:$0xff] %v7015_v53  ;;  %v7060_v12 = vsel %vm1144_vm8, %v9752_v21, %v6884_v52  ;;  %v9755_v52 = vmax.f32 %v6563_v33, %v6584_v20  ;;  %v7087_v23 = vsel %vm1144_vm8, %v1587_v48, %v1523_v18  ;;  %v1444_v29 = vld [vmem:[#allocation2 + $0x56] sm:$0xff]  ;;  %v1445_v43 = vld [vmem:[#allocation2 + $0x5e] sm:$0xff]  ;;  %v985_v25 = vsel %vm7031_vm6, %v984_v34, %v980_v46  ;;  %vm7120_vm14 = vmor %vm1097_vm7, %vm1098_vm13 }
 0x14a   : > { %1189 = vst.msk [vmem:[#allocation2 + $0x110] sm:$0xff] %vm1150_vm2, %v7015_v53  ;;  %v1095_v45 = vmul.f32 %v7006_v40, %v1094_v42  ;;  %v1886_v20 = vmax.f32 %v1790_v44, %v7052_v61  ;;  %v1476_v8 = vmax.f32 %v6972_v5, %v1444_v29  ;;  %v1635_v60 = vld [vmem:[#allocation2 + $0x51] sm:$0xff]  ;;  %v7098_v18 = vmul.f32 %v985_v25, %v6662_v22  ;;  %v7112_v5 = vld [vmem:[#allocation2 + $0xa1] sm:$0xff]  ;;  %v1636_v46 = vld [vmem:[#allocation2 + $0x59] sm:$0xff] }
 0x14b   : > { %v7083_v6 = vsel %vm1149_vm9, %v9755_v52, %v6563_v33  ;;  %1826 = vst.msk [vmem:[#allocation2 + $0x48] sm:$0xff] %vm1150_vm2, %v7049_v16  ;;  %v1477_v33 = vmax.f32 %v5772_v47, %v1445_v43  ;;  %5084 = vmatmul.msk.f32.gmra.mxu1 %vm1150_vm2, %v5772_v47  ;;  %v9757_v34 = vmax.f32 %v6897_v50, %v6917_v0  ;;  %v1540_v48 = vld [vmem:[#allocation2 + $0x57] sm:$0xff]  ;;  %v1541_v14 = vld [vmem:[#allocation2 + $0x5f] sm:$0xff] }
 0x14c   : > { %9756 = vst [vmem:[#allocation36_spill] sm:$0xff] %v7098_v18  ;;  %v1667_v22 = vmax.f32 %v6873_v27, %v1635_v60  ;;  %v1096_v11 = vadd.f32 %v7006_v40, %v1095_v45  ;;  %v1888_v0 = vmax.f32 %v7041_v9, %v7102_v38  ;;  %v1572_v10 = vmax.f32 %v1476_v8, %v1540_v48  ;;  %v1731_v3 = vld [vmem:[#allocation2 + $0x52] sm:$0xff]  ;;  %v1741_v42 = vld [vmem:[#allocation2 + $0xa2] sm:$0xff]  ;;  %v1732_v44 = vld [vmem:[#allocation2 + $0x5a] sm:$0xff] }
 0x14d   : > { %v7110_v1 = vsel %vm1149_vm9, %v9757_v34, %v6897_v50  ;;  %v1887_v50 = vmax.f32 %v6237_v4, %v6808_v62  ;;  %1832 = vst.msk [vmem:[#allocation2 + $0x78] sm:$0xff] %vm1150_vm2, %v7083_v6  ;;  %v1509_v27 = vsel %vm1142_vm12, %v1477_v33, %v5772_v47  ;;  %v1452_v55 = vld [vmem:[#allocation2 + $0x96] sm:$0xff]  ;;  %v1453_v56 = vld [vmem:[#allocation2 + $0x9e] sm:$0xff]  ;;  %v1889_v4 = vmax.f32 %v6523_v35, %v6946_v32  ;;  %v7253_v9 = vld [vmem:[#allocation2 + $0xca] sm:$0xff] }
 0x14e   : > { %1182 = vst.msk [vmem:[#allocation2 + $0xd8] sm:$0xff] %vm1150_vm2, %v7098_v18  ;;  %v9760_v57 = vmax.f32 %v6348_v39, %v6314_v7  ;;  %v1573_v47 = vmax.f32 %v1509_v27, %v1541_v14  ;;  %v7145_v52 = vmax.f32 %v1667_v22, %v1731_v3  ;;  %v1484_v29 = vmax.f32 %v7001_v36, %v1452_v55  ;;  %v1643_v25 = vld [vmem:[#allocation2 + $0x91] sm:$0xff]  ;;  %v1549_v34 = vld [vmem:[#allocation2 + $0x9f] sm:$0xff] }
 0x14f   : > { %v1485_v43 = vmax.f32 %v5855_v41, %v1453_v56  ;;  %1834 = vst.msk [vmem:[#allocation2 + $0x88] sm:$0xff] %vm1150_vm2, %v7110_v1  ;;  %v1668_v35 = vmax.f32 %v1572_v10, %v1636_v46  ;;  %v1548_v45 = vld [vmem:[#allocation2 + $0x97] sm:$0xff]  ;;  %v1675_v7 = vmax.f32 %v7060_v12, %v1643_v25  ;;  %v7156_v33 = vmax.f32 %v1886_v20, %v7102_v38  ;;  %v3010_v56 = vld [vmem:[%s9558_s3 + $0x4] sm:$0x3] }
 0x150   : > { %v7143_v21 = vsel %vm1149_vm9, %v9760_v57, %v6348_v39  ;;  %v1100_v39 = vsel %vm7120_vm14, %v7006_v40, %v1096_v11  ;;  %v1605_v60 = vsel %vm1144_vm8, %v1573_v47, %v1509_v27  ;;  %1827 = vst.msk [vmem:[#allocation2 + $0x50] sm:$0xff] %vm1150_vm2, %v7145_v52  ;;  %v1580_v48 = vmax.f32 %v1484_v29, %v1548_v45  ;;  %v1739_v14 = vld [vmem:[#allocation2 + $0x92] sm:$0xff] }
 0x151   : > { %v1467_v8 = vld [vmem:[#allocation2 + $0x10e] sm:$0xff]  ;;  %1838 = vst.msk [vmem:[#allocation2 + $0xa8] sm:$0xff] %vm1150_vm2, %v7143_v21  ;;  %v1517_v12 = vsel %vm1142_vm12, %v1485_v43, %v5855_v41  ;;  %v1669_v22 = vmax.f32 %v1605_v60, %v6757_v51  ;;  %v1700_v11 = vsel %vm1147_vm4, %v1668_v35, %v1572_v10  ;;  %v1644_v3 = vld [vmem:[#allocation2 + $0x99] sm:$0xff]  ;;  %v7171_v55 = vmax.f32 %v1675_v7, %v1739_v14 }
 0x152   : > { %v1499_v40 = vmax.f32 %v7015_v53, %v1467_v8  ;;  %v1563_v20 = vld [vmem:[#allocation2 + $0x10f] sm:$0xff]  ;;  %v1581_v27 = vmax.f32 %v1517_v12, %v1549_v34  ;;  %v1764_v57 = vmax.f32 %v1700_v11, %v1732_v44  ;;  %v1676_v47 = vmax.f32 %v1580_v48, %v1644_v3  ;;  %5141 = vmatpush.msk.msrb.mxu3 %vm1288_vm11, %v3010_v56  ;;  %v1740_v43 = vld [vmem:[#allocation2 + $0x9a] sm:$0xff] }
 0x153   : > { %v1921_v51 = vmax.f32 %v1887_v50, %v6946_v32  ;;  %v7182_v10 = vmax.f32 %v1669_v22, %v6759_v19  ;;  %1835 = vst.msk [vmem:[#allocation2 + $0x90] sm:$0xff] %vm1150_vm2, %v7171_v55  ;;  %v1105_v35 = vsel %vm7065_vm10, %v7073_v54, %v1100_v39  ;;  %v7191_v45 = vld [vmem:[#allocation2 + $0x38] sm:$0xff]  ;;  %v3903_v32 = vld [vmem:[%s9558_s3 + $0x6] sm:$0x3]  ;;  %5085 = vmatmul.msk.f32.gmra.mxu1 %vm1150_vm2, %v5836_v26  ;;  %v7215_v14 = vld [vmem:[#allocation2 + $0x48] sm:$0xff] }
 0x154   : > { %v1531_v46 = vsel %vm1142_vm12, %v1499_v40, %v7015_v53  ;;  %v1613_v29 = vsel %vm1144_vm8, %v1581_v27, %v1517_v12  ;;  %v7198_v19 = vsel %vm1149_vm9, %v1764_v57, %v1700_v11  ;;  %v1708_v7 = vsel %vm1147_vm4, %v1676_v47, %v1580_v48  ;;  %v1858_v48 = vld [vmem:[#allocation2 + $0x28] sm:$0xff]  ;;  %5174 = vmatpush.msk.msrb.mxu0 %vm1288_vm11, %v3903_v32 }
 0x155   : > { %v1595_v25 = vmax.f32 %v1531_v46, %v1563_v20  ;;  %v1677_v50 = vmax.f32 %v1613_v29, %v7112_v5  ;;  %v1460_v8 = vld [vmem:[#allocation2 + $0xd6] sm:$0xff]  ;;  %v1461_v60 = vld [vmem:[#allocation2 + $0xde] sm:$0xff]  ;;  %v7206_v37 = vmax.f32 %v1889_v4, %v6824_v2  ;;  %1828 = vst.msk [vmem:[#allocation2 + $0x58] sm:$0xff] %vm1150_vm2, %v7198_v19  ;;  %v1772_v54 = vmax.f32 %v1708_v7, %v1740_v43 }
 0x156   : > { %v1556_v12 = vld [vmem:[#allocation2 + $0xd7] sm:$0xff]  ;;  %v1492_v5 = vmax.f32 %v7098_v18, %v1460_v8  ;;  %v1957_v40 = vmax.f32 %v1921_v51, %v6913_v15  ;;  %1829 = vst.msk [vmem:[#allocation2 + $0x60] sm:$0xff] %vm1150_vm2, %v7182_v10  ;;  %v1557_v22 = vld [vmem:[#allocation2 + $0xdf] sm:$0xff]  ;;  %v7225_v3 = vmul.f32 %v1105_v35, %v6785_v28  ;;  %v1956_v47 = vmax.f32 %v7156_v33, %v7191_v45 }
 0x157   : > { %v7212_v39 = vsel %vm1144_vm8, %v1595_v25, %v1531_v46  ;;  %v1651_v34 = vld [vmem:[#allocation2 + $0xd1] sm:$0xff]  ;;  %v7220_v26 = vmax.f32 %v1677_v50, %v1741_v42  ;;  %v1652_v11 = vld [vmem:[#allocation2 + $0xd9] sm:$0xff]  ;;  %v7229_v56 = vsel %vm1149_vm9, %v1772_v54, %v1708_v7  ;;  %v1653_v51 = vld [vmem:[#allocation2 + $0xe1] sm:$0xff]  ;;  %v1890_v8 = vmax.f32 %v7049_v16, %v1858_v48 }
 0x158   : > { %v9761_v4 = vld [vmem:[#allocation6_spill] sm:$0xff]  ;;  %v1683_v44 = vmax.f32 %v7087_v23, %v1651_v34  ;;  %9762 = vst [vmem:[#allocation37_spill] sm:$0xff] %v7225_v3  ;;  %v1588_v57 = vmax.f32 %v1492_v5, %v1556_v12  ;;  %v1922_v23 = vmax.f32 %v1888_v0, %v1858_v48  ;;  %v2362_v46 = vld [vmem:[#allocation2 + $0x1e] sm:$0xff]  ;;  %v7258_v50 = vmax.f32 %v1956_v47, %v7215_v14  ;;  %v7304_v47 = vld [vmem:[#allocation2 + $0x68] sm:$0xff] }
 0x159   : > { %v1493_v20 = vmax.f32 %v9761_v4, %v1461_v60  ;;  %v1747_v27 = vld [vmem:[#allocation2 + $0xd2] sm:$0xff]  ;;  %1836 = vst.msk [vmem:[#allocation2 + $0x98] sm:$0xff] %vm1150_vm2, %v7229_v56  ;;  %v7251_v25 = vld [vmem:[#allocation2 + $0xc9] sm:$0xff]  ;;  %v1748_v32 = vld [vmem:[#allocation2 + $0xda] sm:$0xff]  ;;  %v1891_v60 = vmax.f32 %v7145_v52, %v6824_v2  ;;  %v2394_v12 = vmax.f32 %v6937_v59, %v2362_v46  ;;  %v1893_v2 = vmax.f32 %v7182_v10, %v6913_v15 }
 0x15a   : > { %v7233_v42 = vld [vmem:[#allocation2 + $0x50] sm:$0xff]  ;;  %v7244_v29 = vmax.f32 %v1683_v44, %v1747_v27  ;;  %1837 = vst.msk [vmem:[#allocation2 + $0xa0] sm:$0xff] %vm1150_vm2, %v7220_v26  ;;  %v1684_v35 = vmax.f32 %v1588_v57, %v1652_v11  ;;  %v1958_v7 = vmax.f32 %v1922_v23, %v7215_v14  ;;  %v1749_v54 = vld [vmem:[#allocation2 + $0xe2] sm:$0xff]  ;;  %5110 = vmatmul.msk.f32.gmra.mxu2 %vm1150_vm2, %v7258_v50  ;;  %vm9778_vm11 = vcmask 31744  }
 0x15b   : > { %v1525_v28 = vsel %vm1142_vm12, %v1493_v20, %v9761_v4  ;;  %v7247_v33 = vmax.f32 %v1957_v40, %v7233_v42  ;;  %v1959_v43 = vmax.f32 %v7206_v37, %v7233_v42  ;;  %v1892_v37 = vmax.f32 %v7198_v19, %v7191_v45  ;;  %1190 = vst.msk [vmem:[#allocation2 + $0x118] sm:$0xff] %vm1150_vm2, %v7225_v3  ;;  %v9764_v19 = vld [vmem:[#allocation5_spill] sm:$0xff]  ;;  %v2458_v46 = vld [vmem:[#allocation2 + $0x1f] sm:$0xff]  ;;  %vm9782_vm15 = vmmov %vm9778_vm11 }
 0x15c   : > { %9763 = vst [vmem:[#allocation38_spill] sm:$0xff] %v7244_v29  ;;  %v1589_v0 = vmax.f32 %v1525_v28, %v1557_v22  ;;  %v1716_v34 = vsel %vm1147_vm4, %v1684_v35, %v1588_v57  ;;  %5086 = vmatmul.msk.f32.gmra.mxu1 %vm1150_vm2, %v9764_v19  ;;  %v1864_v48 = vld [vmem:[#allocation2 + $0x58] sm:$0xff]  ;;  %v1924_v40 = vmax.f32 %v1890_v8, %v7191_v45  ;;  %vm9784_vm3 = vmmov %vm9778_vm11 }
 0x15d   : > { %1843 = vst.msk [vmem:[#allocation2 + $0xd0] sm:$0xff] %vm1150_vm2, %v7244_v29  ;;  %v1780_v52 = vmax.f32 %v1716_v34, %v1748_v32  ;;  %v7286_v20 = vmax.f32 %v1958_v7, %v1864_v48  ;;  %v7288_v22 = vld [vmem:[#allocation2 + $0x60] sm:$0xff]  ;;  %v1925_v10 = vmax.f32 %v1891_v60, %v6913_v15  ;;  %v2426_v11 = vsel %vm1142_vm12, %v2394_v12, %v6937_v59  ;;  %v7318_v35 = vld [vmem:[#allocation2 + $0x78] sm:$0xff]  ;;  %vm9787_vm0 = vmmov %vm9784_vm3 }
 0x15e   : > { %v1621_v5 = vsel %vm1144_vm8, %v1589_v0, %v1525_v28  ;;  %2022 = vst.msk [vmem:[#allocation2 + $0x28] sm:$0xff] %vm1150_vm2, %v7258_v50  ;;  %v1926_v44 = vmax.f32 %v1892_v37, %v7215_v14  ;;  %v7302_v57 = vmax.f32 %v1959_v43, %v7288_v22  ;;  %v1960_v23 = vmax.f32 %v1924_v40, %v1864_v48  ;;  %v7316_v0 = vld [vmem:[#allocation2 + $0x70] sm:$0xff]  ;;  %v9767_v7 = vld [vmem:[#allocation11_spill] sm:$0xff]  ;;  %vm9793_vm5 = vmmov %vm9787_vm0 }
 0x15f   : > { %v1685_v16 = vmax.f32 %v1621_v5, %v1653_v51  ;;  %2023 = vst.msk [vmem:[#allocation2 + $0x30] sm:$0xff] %vm1150_vm2, %v7247_v33  ;;  %v7299_v45 = vsel %vm1149_vm9, %v1780_v52, %v1716_v34  ;;  %v1961_v59 = vmax.f32 %v1925_v10, %v7288_v22  ;;  %v2490_v15 = vmax.f32 %v2426_v11, %v2458_v46  ;;  %v7337_v5 = vld [vmem:[#allocation2 + $0x80] sm:$0xff]  ;;  %v9768_v52 = vld [vmem:[#allocation23_spill] sm:$0xff]  ;;  %vm9796_vm1 = vmmov %vm9787_vm0 }
 0x160   : > { %9766 = vst [vmem:[#allocation39_spill] sm:$0xff] %v7299_v45  ;;  %v1962_v51 = vmax.f32 %v1926_v44, %v7304_v47  ;;  %v1927_v28 = vmax.f32 %v1893_v2, %v7233_v42  ;;  %v7314_v43 = vmax.f32 %v1960_v23, %v7304_v47  ;;  %v1894_v32 = vmax.f32 %v6778_v49, %v7215_v14  ;;  %v7355_v44 = vld [vmem:[#allocation2 + $0x88] sm:$0xff]  ;;  %vm9810_vm6 = vmmov %vm9787_vm0 }
 0x161   : > { %v7295_v27 = vmax.f32 %v1685_v16, %v1749_v54  ;;  %1844 = vst.msk [vmem:[#allocation2 + $0xd8] sm:$0xff] %vm1150_vm2, %v7299_v45  ;;  %v1895_v8 = vmax.f32 %v9767_v7, %v7233_v42  ;;  %v1896_v60 = vmax.f32 %v7083_v6, %v1864_v48  ;;  %v7328_v12 = vmax.f32 %v1961_v59, %v7316_v0  ;;  %v7357_v23 = vld [vmem:[#allocation2 + $0x109] sm:$0xff]  ;;  %vm9822_vm7 = vmmov %vm9787_vm0 }
 0x162   : > { %2024 = vst.msk [vmem:[#allocation2 + $0x38] sm:$0xff] %vm1150_vm2, %v7286_v20  ;;  %v7332_v37 = vsel %vm1144_vm8, %v2490_v15, %v2426_v11  ;;  %v7335_v54 = vmax.f32 %v1962_v51, %v7318_v35  ;;  %v1963_v49 = vmax.f32 %v1927_v28, %v7316_v0  ;;  %v1468_v14 = vld [vmem:[#allocation2 + $0x116] sm:$0xff]  ;;  %v1928_v34 = vmax.f32 %v1894_v32, %v1864_v48  ;;  %v9769_v15 = vld [vmem:[#allocation9_spill] sm:$0xff]  ;;  %vm9826_vm10 = vmmov %vm9787_vm0 }
 0x163   : > { %9765 = vst [vmem:[#allocation5_spill] sm:$0xff] %v7295_v27  ;;  %v1564_v42 = vld [vmem:[#allocation2 + $0x117] sm:$0xff]  ;;  %v1929_v2 = vmax.f32 %v1895_v8, %v7288_v22  ;;  %v1930_v16 = vmax.f32 %v1896_v60, %v7304_v47  ;;  %v1897_v19 = vmax.f32 %v9768_v52, %v7288_v22  ;;  %v1500_v40 = vmax.f32 %v7225_v3, %v1468_v14  ;;  %v7366_v32 = vld [vmem:[#allocation2 + $0x10a] sm:$0xff]  ;;  %vm9829_vm13 = vmmov %vm9787_vm0 }
 0x164   : > { %1845 = vst.msk [vmem:[#allocation2 + $0xe0] sm:$0xff] %vm1150_vm2, %v7295_v27  ;;  %v1659_v6 = vld [vmem:[#allocation2 + $0x111] sm:$0xff]  ;;  %5111 = vmatmul.msk.f32.gmra.mxu2 %vm1150_vm2, %v7247_v33  ;;  %v7353_v48 = vmax.f32 %v1963_v49, %v7337_v5  ;;  %v1660_v46 = vld [vmem:[#allocation2 + $0x119] sm:$0xff]  ;;  %5087 = vmatmul.msk.f32.gmra.mxu1 %vm1150_vm2, %v9769_v15  ;;  %v9773_v3 = vld [vmem:[#allocation21_spill] sm:$0xff] }
 0x165   : > { %2025 = vst.msk [vmem:[#allocation2 + $0x40] sm:$0xff] %vm1150_vm2, %v7302_v57  ;;  %v1691_v10 = vmax.f32 %v7212_v39, %v1659_v6  ;;  %v1755_v11 = vld [vmem:[#allocation2 + $0x112] sm:$0xff]  ;;  %v2363_v22 = vld [vmem:[#allocation2 + $0x26] sm:$0xff]  ;;  %v1964_v39 = vmax.f32 %v1928_v34, %v7318_v35  ;;  %v1965_v51 = vmax.f32 %v1929_v2, %v7337_v5  ;;  %v1966_v28 = vmax.f32 %v1930_v16, %v7355_v44  ;;  %vm9835_vm14 = vmmov %vm9787_vm0 }
 0x166   : > { %2026 = vst.msk [vmem:[#allocation2 + $0x48] sm:$0xff] %vm1150_vm2, %v7314_v43  ;;  %v2364_v59 = vld [vmem:[#allocation2 + $0x2e] sm:$0xff]  ;;  %v1596_v7 = vmax.f32 %v1500_v40, %v1564_v42  ;;  %v2395_v60 = vmax.f32 %v7258_v50, %v2363_v22  ;;  %v7376_v6 = vld [vmem:[#allocation2 + $0x98] sm:$0xff]  ;;  %v2554_v52 = vld [vmem:[#allocation2 + $0x21] sm:$0xff]  ;;  %v1931_v40 = vmax.f32 %v1897_v19, %v7316_v0 }
 0x167   : > { %2027 = vst.msk [vmem:[#allocation2 + $0x50] sm:$0xff] %vm1150_vm2, %v7328_v12  ;;  %v7368_v8 = vmax.f32 %v1691_v10, %v1755_v11  ;;  %v2396_v49 = vmax.f32 %v7247_v33, %v2364_v59  ;;  %v7374_v14 = vld [vmem:[#allocation2 + $0x90] sm:$0xff]  ;;  %v2459_v34 = vld [vmem:[#allocation2 + $0x27] sm:$0xff]  ;;  %v7381_v42 = vmax.f32 %v1964_v39, %v7355_v44  ;;  %v7387_v16 = vmax.f32 %v1966_v28, %v7376_v6  ;;  %v1756_v11 = vld [vmem:[#allocation2 + $0x11a] sm:$0xff] }
 0x168   : > { %9770 = vst [vmem:[#allocation11_spill] sm:$0xff] %v7366_v32  ;;  %v2555_v2 = vld [vmem:[#allocation2 + $0x29] sm:$0xff]  ;;  %v7384_v50 = vmax.f32 %v1965_v51, %v7374_v14  ;;  %v1692_v10 = vmax.f32 %v1596_v7, %v1660_v46  ;;  %v2491_v22 = vmax.f32 %v2395_v60, %v2459_v34  ;;  %v2586_v39 = vmax.f32 %v7332_v37, %v2554_v52 }
 0x169   : > { %9771 = vst [vmem:[#allocation23_spill] sm:$0xff] %v7368_v8  ;;  %v2428_v59 = vsel %vm1142_vm12, %v2396_v49, %v7247_v33  ;;  %v2460_v15 = vld [vmem:[#allocation2 + $0x2f] sm:$0xff]  ;;  %v2650_v27 = vld [vmem:[#allocation2 + $0x22] sm:$0xff]  ;;  %v1967_v60 = vmax.f32 %v1931_v40, %v7374_v14  ;;  %v2461_v40 = vld [vmem:[#allocation2 + $0x37] sm:$0xff] }
 0x16a   : > { %2028 = vst.msk [vmem:[#allocation2 + $0x58] sm:$0xff] %vm1150_vm2, %v7335_v54  ;;  %v2492_v19 = vmax.f32 %v2428_v59, %v2460_v15  ;;  %v2365_v46 = vld [vmem:[#allocation2 + $0x36] sm:$0xff]  ;;  %v1724_v33 = vsel %vm1147_vm4, %v1692_v10, %v1596_v7  ;;  %v7406_v34 = vmax.f32 %v2586_v39, %v2650_v27  ;;  %v2587_v52 = vmax.f32 %v2491_v22, %v2555_v2 }
 0x16b   : > { %2029 = vst.msk [vmem:[#allocation2 + $0x60] sm:$0xff] %vm1150_vm2, %v7353_v48  ;;  %v2556_v4 = vld [vmem:[#allocation2 + $0x31] sm:$0xff]  ;;  %v2397_v37 = vmax.f32 %v7286_v20, %v2365_v46  ;;  %v1688_v15 = vmax.f32 %v6733_v17, %v6893_v30  ;;  %v1788_v53 = vmax.f32 %v1724_v33, %v1756_v11  ;;  %v1309_v11 = vpop.f32.mrf.mxu1 }
 0x16c   : > { %1851 = vst.msk [vmem:[#allocation2 + $0x110] sm:$0xff] %vm1150_vm2, %v7368_v8  ;;  %v2366_v49 = vld [vmem:[#allocation2 + $0x3e] sm:$0xff]  ;;  %v2524_v28 = vsel %vm1144_vm8, %v2492_v19, %v2428_v59  ;;  %5112 = vmatmul.msk.f32.gmra.mxu2 %vm1150_vm2, %v7286_v20  ;;  %v2652_v10 = vld [vmem:[#allocation2 + $0x32] sm:$0xff] }
 0x16d   : > { %2030 = vst.msk [vmem:[#allocation2 + $0x68] sm:$0xff] %vm1150_vm2, %v7381_v42  ;;  %v2398_v8 = vmax.f32 %v7302_v57, %v2366_v49  ;;  %v2367_v7 = vld [vmem:[#allocation2 + $0x46] sm:$0xff]  ;;  %v2493_v27 = vmax.f32 %v2397_v37, %v2461_v40  ;;  %v2588_v2 = vmax.f32 %v2524_v28, %v2556_v4  ;;  %v7426_v19 = vsel %vm1149_vm9, %v1788_v53, %v1724_v33  ;;  %v9775_v46 = vld [vmem:[#allocation14_spill] sm:$0xff]  ;;  %v2557_v20 = vld [vmem:[#allocation2 + $0x39] sm:$0xff] }
 0x16e   : > { %2031 = vst.msk [vmem:[#allocation2 + $0x70] sm:$0xff] %vm1150_vm2, %v7384_v50  ;;  %v2462_v39 = vld [vmem:[#allocation2 + $0x3f] sm:$0xff]  ;;  %v2399_v30 = vmax.f32 %v7314_v43, %v2367_v7  ;;  %5088 = vmatmul.msk.f32.gmra.mxu1 %vm1150_vm2, %v9775_v46  ;;  %v2463_v28 = vld [vmem:[#allocation2 + $0x47] sm:$0xff]  ;;  %v2619_v49 = vsel %vm1147_vm4, %v2587_v52, %v2491_v22  ;;  %v9777_v45 = vld [vmem:[#allocation22_spill] sm:$0xff] }
 0x16f   : > { %2032 = vst.msk [vmem:[#allocation2 + $0x78] sm:$0xff] %vm1150_vm2, %v7387_v16  ;;  %v7422_v59 = vld [vmem:[#allocation2 + $0xa0] sm:$0xff]  ;;  %v2430_v4 = vsel %vm1142_vm12, %v2398_v8, %v7302_v57  ;;  %v2368_v37 = vld [vmem:[#allocation2 + $0x4e] sm:$0xff]  ;;  %v7440_v33 = vmax.f32 %v2588_v2, %v2652_v10  ;;  %v2589_v46 = vmax.f32 %v2493_v27, %v2557_v20  ;;  %v7450_v2 = vsel %vm1147_vm4, %v1688_v15, %v6733_v17 }
 0x170   : > { %2746 = vst.msk [vmem:[#allocation2 + $0x20] sm:$0xff] %vm1150_vm2, %v7406_v34  ;;  %v7436_v40 = vmax.f32 %v1967_v60, %v7422_v59  ;;  %v2651_v53 = vld [vmem:[#allocation2 + $0x2a] sm:$0xff]  ;;  %v2494_v7 = vmax.f32 %v2430_v4, %v2462_v39  ;;  %v2495_v18 = vmax.f32 %v2399_v30, %v2463_v28  ;;  %v2400_v29 = vmax.f32 %v7328_v12, %v2368_v37  ;;  %v2653_v30 = vld [vmem:[#allocation2 + $0x3a] sm:$0xff] }
 0x171   : > { %9774 = vst [vmem:[#allocation9_spill] sm:$0xff] %v7426_v19  ;;  %v2369_v32 = vld [vmem:[#allocation2 + $0x56] sm:$0xff]  ;;  %v9776_v8 = vld [vmem:[#allocation25_spill] sm:$0xff]  ;;  %v2683_v60 = vmax.f32 %v2619_v49, %v2651_v53  ;;  %v2621_v39 = vsel %vm1147_vm4, %v2589_v46, %v2493_v27 }
 0x172   : > { %1852 = vst.msk [vmem:[#allocation2 + $0x118] sm:$0xff] %vm1150_vm2, %v7426_v19  ;;  %v1490_v31 = vmax.f32 %v9777_v45, %v9776_v8  ;;  %v2559_v51 = vld [vmem:[#allocation2 + $0x49] sm:$0xff]  ;;  %v2401_v22 = vmax.f32 %v7335_v54, %v2369_v32  ;;  %v2370_v52 = vld [vmem:[#allocation2 + $0x5e] sm:$0xff]  ;;  %v2526_v10 = vsel %vm1144_vm8, %v2494_v7, %v2430_v4  ;;  %v2432_v17 = vsel %vm1142_vm12, %v2400_v29, %v7328_v12 }
 0x173   : > { %1405 = vst.msk [vmem:[#allocation3] sm:$0xff] %vm9778_vm11, %v1309_v11  ;;  %v2558_v32 = vld [vmem:[#allocation2 + $0x41] sm:$0xff]  ;;  %v2591_v20 = vmax.f32 %v2495_v18, %v2559_v51  ;;  %v2465_v28 = vld [vmem:[#allocation2 + $0x57] sm:$0xff]  ;;  %v2685_v11 = vmax.f32 %v2621_v39, %v2653_v30  ;;  %v2464_v15 = vld [vmem:[#allocation2 + $0x4f] sm:$0xff]  ;;  %v2715_v51 = vsel %vm1149_vm9, %v2683_v60, %v2619_v49  ;;  %v2402_v46 = vmax.f32 %v7353_v48, %v2370_v52 }
 0x174   : > { %2748 = vst.msk [vmem:[#allocation2 + $0x30] sm:$0xff] %vm1150_vm2, %v7440_v33  ;;  %v2590_v37 = vmax.f32 %v2526_v10, %v2558_v32  ;;  %v2497_v53 = vmax.f32 %v2401_v22, %v2465_v28  ;;  %v2654_v8 = vld [vmem:[#allocation2 + $0x42] sm:$0xff]  ;;  %v2496_v4 = vmax.f32 %v2432_v17, %v2464_v15  ;;  %v2655_v7 = vld [vmem:[#allocation2 + $0x4a] sm:$0xff]  ;;  %5113 = vmatmul.msk.f32.gmra.mxu2 %vm1150_vm2, %v7302_v57  ;;  %v2561_v15 = vld [vmem:[#allocation2 + $0x59] sm:$0xff] }
 0x175   : > { %2033 = vst.msk [vmem:[#allocation2 + $0x80] sm:$0xff] %vm1150_vm2, %v7436_v40  ;;  %v2623_v27 = vsel %vm1147_vm4, %v2591_v20, %v2495_v18  ;;  %v9779_v10 = vld [vmem:[#allocation26_spill] sm:$0xff]  ;;  %v7473_v29 = vsel %vm1149_vm9, %v2685_v11, %v2621_v39  ;;  %v2371_v28 = vld [vmem:[#allocation2 + $0x66] sm:$0xff]  ;;  %v2434_v52 = vsel %vm1142_vm12, %v2402_v46, %v7353_v48  ;;  %v1312_v39 = vpop.f32.mrf.mxu1  ;;  %v9781_v11 = vld [vmem:[#allocation19_spill] sm:$0xff] }
 0x176   : > { %v7469_v30 = vmax.f32 %v1490_v31, %v9779_v10  ;;  %v7475_v22 = vmax.f32 %v2590_v37, %v2654_v8  ;;  %v2687_v32 = vmax.f32 %v2623_v27, %v2655_v7  ;;  %2747 = vst.msk [vmem:[#allocation2 + $0x28] sm:$0xff] %vm1150_vm2, %v2715_v51  ;;  %v2528_v31 = vsel %vm1144_vm8, %v2496_v4, %v2432_v17  ;;  %v9780_v18 = vld [vmem:[#allocation28_spill] sm:$0xff]  ;;  %v2560_v60 = vld [vmem:[#allocation2 + $0x51] sm:$0xff]  ;;  %vm9840_vm11 = vmmov %vm9787_vm0 }
 0x177   : > { %2749 = vst.msk [vmem:[#allocation2 + $0x38] sm:$0xff] %vm1150_vm2, %v7473_v29  ;;  %v2810_v49 = vmax.f32 %v7406_v34, %v9780_v18  ;;  %v2372_v20 = vld [vmem:[#allocation2 + $0x6e] sm:$0xff]  ;;  %5089 = vmatmul.msk.f32.gmra.mxu1 %vm1150_vm2, %v9781_v11  ;;  %v2592_v37 = vmax.f32 %v2528_v31, %v2560_v60  ;;  %v2812_v34 = vmax.f32 %v7440_v33, %v6808_v62  ;;  %v2466_v17 = vld [vmem:[#allocation2 + $0x5f] sm:$0xff]  ;;  %v2373_v8 = vld [vmem:[#allocation2 + $0x76] sm:$0xff] }
 0x178   : > { %2750 = vst.msk [vmem:[#allocation2 + $0x40] sm:$0xff] %vm1150_vm2, %v7475_v22  ;;  %v7495_v57 = vsel %vm1149_vm9, %v2687_v32, %v2623_v27  ;;  %v2656_v4 = vld [vmem:[#allocation2 + $0x52] sm:$0xff]  ;;  %v2811_v7 = vmax.f32 %v2715_v51, %v7052_v61  ;;  %v2498_v46 = vmax.f32 %v2434_v52, %v2466_v17  ;;  %v2593_v10 = vmax.f32 %v2497_v53, %v2561_v15  ;;  %v2562_v11 = vld [vmem:[#allocation2 + $0x61] sm:$0xff] }
 0x179   : > { %2751 = vst.msk [vmem:[#allocation2 + $0x48] sm:$0xff] %vm1150_vm2, %v7495_v57  ;;  %v2403_v18 = vmax.f32 %v7381_v42, %v2371_v28  ;;  %v7503_v27 = vmax.f32 %v2592_v37, %v2656_v4  ;;  %v2467_v32 = vld [vmem:[#allocation2 + $0x67] sm:$0xff]  ;;  %v2813_v33 = vmax.f32 %v7473_v29, %v7102_v38  ;;  %v2404_v31 = vmax.f32 %v7384_v50, %v2372_v20  ;;  %v2657_v28 = vld [vmem:[#allocation2 + $0x5a] sm:$0xff] }
 0x17a   : > { %1406 = vst.msk [vmem:[#allocation3 + $0x8] sm:$0xff] %vm9782_vm15, %v1312_v39  ;;  %v1898_v60 = vmax.f32 %v7110_v1, %v7304_v47  ;;  %v2530_v61 = vsel %vm1144_vm8, %v2498_v46, %v2434_v52  ;;  %v2625_v51 = vsel %vm1147_vm4, %v2593_v10, %v2497_v53  ;;  %v2405_v39 = vmax.f32 %v7387_v16, %v2373_v8  ;;  %v2782_v17 = vld [vmem:[#allocation2 + $0x20] sm:$0xff]  ;;  %v2468_v52 = vld [vmem:[#allocation2 + $0x6f] sm:$0xff]  ;;  %vm9845_vm15 = vmmov %vm9787_vm0 }
 0x17b   : > { %v7511_v19 = vld [vmem:[#allocation2 + $0x30] sm:$0xff]  ;;  %v2499_v37 = vmax.f32 %v2403_v18, %v2467_v32  ;;  %v2844_v29 = vmax.f32 %v2810_v49, %v6808_v62  ;;  %2752 = vst.msk [vmem:[#allocation2 + $0x50] sm:$0xff] %vm1150_vm2, %v7503_v27  ;;  %v2689_v20 = vmax.f32 %v2625_v51, %v2657_v28  ;;  %v2594_v1 = vmax.f32 %v2530_v61, %v2562_v11  ;;  %v2658_v4 = vld [vmem:[#allocation2 + $0x62] sm:$0xff] }
 0x17c   : > { %v2436_v47 = vsel %vm1142_vm12, %v2404_v31, %v7384_v50  ;;  %v2845_v15 = vmax.f32 %v2811_v7, %v7102_v38  ;;  %v2846_v53 = vmax.f32 %v2812_v34, %v2782_v17  ;;  %v2814_v46 = vmax.f32 %v7475_v22, %v2782_v17  ;;  %v2563_v10 = vld [vmem:[#allocation2 + $0x69] sm:$0xff]  ;;  %v2469_v61 = vld [vmem:[#allocation2 + $0x77] sm:$0xff]  ;;  %5114 = vmatmul.msk.f32.gmra.mxu2 %vm1150_vm2, %v7314_v43 }
 0x17d   : > { %v2500_v8 = vmax.f32 %v2436_v47, %v2468_v52  ;;  %v2880_v62 = vmax.f32 %v2844_v29, %v7511_v19  ;;  %v2783_v49 = vld [vmem:[#allocation2 + $0x28] sm:$0xff]  ;;  %v7531_v11 = vsel %vm1149_vm9, %v2689_v20, %v2625_v51  ;;  %v7533_v32 = vmax.f32 %v2594_v1, %v2658_v4  ;;  %v1315_v7 = vpop.f32.mrf.mxu1  ;;  %v9783_v17 = vld [vmem:[#allocation27_spill] sm:$0xff] }
 0x17e   : > { %v7527_v18 = vld [vmem:[#allocation2 + $0x38] sm:$0xff]  ;;  %v2595_v31 = vmax.f32 %v2499_v37, %v2563_v10  ;;  %2753 = vst.msk [vmem:[#allocation2 + $0x58] sm:$0xff] %vm1150_vm2, %v7531_v11  ;;  %v2847_v34 = vmax.f32 %v2813_v33, %v2783_v49  ;;  %v2501_v28 = vmax.f32 %v2405_v39, %v2469_v61  ;;  %v1682_v33 = vmax.f32 %v7469_v30, %v7251_v25  ;;  %v2659_v4 = vld [vmem:[#allocation2 + $0x6a] sm:$0xff] }
 0x17f   : > { %v7537_v38 = vld [vmem:[#allocation2 + $0x40] sm:$0xff]  ;;  %v2881_v22 = vmax.f32 %v2845_v15, %v7527_v18  ;;  %5090 = vmatmul.msk.f32.gmra.mxu1 %vm1150_vm2, %v9783_v17  ;;  %2754 = vst.msk [vmem:[#allocation2 + $0x60] sm:$0xff] %vm1150_vm2, %v7533_v32  ;;  %v2532_v20 = vsel %vm1144_vm8, %v2500_v8, %v2436_v47  ;;  %v1932_v52 = vmax.f32 %v1898_v60, %v7318_v35  ;;  %v2564_v8 = vld [vmem:[#allocation2 + $0x71] sm:$0xff] }
 0x180   : > { %v7545_v51 = vmax.f32 %v2880_v62, %v7537_v38  ;;  %v7547_v29 = vld [vmem:[#allocation2 + $0x48] sm:$0xff]  ;;  %v2882_v43 = vmax.f32 %v2846_v53, %v7537_v38  ;;  %v2374_v1 = vld [vmem:[#allocation2 + $0x7e] sm:$0xff]  ;;  %1407 = vst.msk [vmem:[#allocation3 + $0x10] sm:$0xff] %vm9784_vm3, %v1315_v7  ;;  %v1899_v15 = vmax.f32 %v7171_v55, %v7316_v0  ;;  %v2848_v47 = vmax.f32 %v2814_v46, %v7511_v19  ;;  %vm9846_vm3 = vmmov %vm9787_vm0 }
 0x181   : > { %v7557_v39 = vmax.f32 %v2881_v22, %v7547_v29  ;;  %v2883_v25 = vmax.f32 %v2847_v34, %v7547_v29  ;;  %v2627_v53 = vsel %vm1147_vm4, %v2595_v31, %v2499_v37  ;;  %v2565_v10 = vld [vmem:[#allocation2 + $0x79] sm:$0xff]  ;;  %v2596_v0 = vmax.f32 %v2532_v20, %v2564_v8  ;;  %v9785_v22 = vld [vmem:[#allocation33_spill] sm:$0xff] }
 0x182   : > { %2946 = vst.msk [vmem:[#allocation2 + $0x20] sm:$0xff] %vm1150_vm2, %v7545_v51  ;;  %5142 = vmatmul.msk.f32.vlgmr.msrb.gmra.mxu3 %vm1150_vm2, %v7545_v51  ;;  %v7571_v60 = vld [vmem:[#allocation2 + $0x50] sm:$0xff]  ;;  %v2691_v55 = vmax.f32 %v2627_v53, %v2659_v4  ;;  %v2406_v62 = vmax.f32 %v7436_v40, %v2374_v1  ;;  %v2597_v61 = vmax.f32 %v2501_v28, %v2565_v10  ;;  %v9786_v46 = vld [vmem:[#allocation29_spill] sm:$0xff]  ;;  %v2661_v4 = vld [vmem:[#allocation2 + $0x7a] sm:$0xff] }
 0x183   : > { %2947 = vst.msk [vmem:[#allocation2 + $0x28] sm:$0xff] %vm1150_vm2, %v7557_v39  ;;  %v1498_v7 = vmax.f32 %v9786_v46, %v9785_v22  ;;  %v7579_v34 = vmax.f32 %v2882_v43, %v7571_v60  ;;  %v2815_v37 = vmax.f32 %v7495_v57, %v2783_v49  ;;  %v2884_v31 = vmax.f32 %v2848_v47, %v7571_v60 }
 0x184   : > { %v7586_v17 = vsel %vm1147_vm4, %v1682_v33, %v7469_v30  ;;  %v7590_v20 = vsel %vm1149_vm9, %v2691_v55, %v2627_v53  ;;  %v2629_v1 = vsel %vm1147_vm4, %v2597_v61, %v2501_v28  ;;  %v1968_v43 = vmax.f32 %v1932_v52, %v7376_v6  ;;  %v2660_v33 = vld [vmem:[#allocation2 + $0x72] sm:$0xff]  ;;  %5115 = vmatmul.msk.f32.gmra.mxu2 %vm1150_vm2, %v7328_v12  ;;  %v2470_v55 = vld [vmem:[#allocation2 + $0x7f] sm:$0xff] }
 0x185   : > { %2948 = vst.msk [vmem:[#allocation2 + $0x30] sm:$0xff] %vm1150_vm2, %v7579_v34  ;;  %v7597_v57 = vld [vmem:[#allocation2 + $0x58] sm:$0xff]  ;;  %v2849_v49 = vmax.f32 %v2815_v37, %v7527_v18  ;;  %v2816_v30 = vmax.f32 %v7503_v27, %v7511_v19  ;;  %v2438_v47 = vsel %vm1142_vm12, %v2406_v62, %v7436_v40  ;;  %v2693_v53 = vmax.f32 %v2629_v1, %v2661_v4  ;;  %v1318_v8 = vpop.f32.mrf.mxu1  ;;  %v7628_v62 = vld [vmem:[#allocation2 + $0xa8] sm:$0xff]  ;;  %v9790_v37 = vld [vmem:[#allocation34_spill] sm:$0xff] }
 0x186   : > { %v7607_v28 = vld [vmem:[#allocation2 + $0x60] sm:$0xff]  ;;  %v7610_v52 = vmax.f32 %v2883_v25, %v7597_v57  ;;  %2755 = vst.msk [vmem:[#allocation2 + $0x68] sm:$0xff] %vm1150_vm2, %v7590_v20  ;;  %v7614_v10 = vmax.f32 %v2596_v0, %v2660_v33  ;;  %v1933_v19 = vmax.f32 %v1899_v15, %v7337_v5  ;;  %v2817_v27 = vmax.f32 %v7531_v11, %v7527_v18  ;;  %v9789_v61 = vld [vmem:[#allocation31_spill] sm:$0xff] }
 0x187   : > { %5091 = vmatmul.msk.f32.gmra.mxu1 %vm1150_vm2, %v7001_v36  ;;  %v7622_v12 = vmax.f32 %v2884_v31, %v7607_v28  ;;  %v7625_v25 = vmax.f32 %v2816_v30, %v7537_v38  ;;  %1408 = vst.msk [vmem:[#allocation3 + $0x18] sm:$0xff] %vm9787_vm0, %v1318_v8  ;;  %v2502_v15 = vmax.f32 %v2438_v47, %v2470_v55 }
 0x188   : > { %2949 = vst.msk [vmem:[#allocation2 + $0x38] sm:$0xff] %vm1150_vm2, %v7610_v52  ;;  %v7634_v36 = vsel %vm1149_vm9, %v2693_v53, %v2629_v1  ;;  %v7637_v18 = vmax.f32 %v1968_v43, %v7628_v62  ;;  %v1969_v11 = vmax.f32 %v1933_v19, %v7422_v59  ;;  %v7643_v31 = vmax.f32 %v1498_v7, %v9790_v37  ;;  %v7650_v1 = vld [vmem:[#allocation2 + $0xb0] sm:$0xff] }
 0x189   : > { %v3287_v0 = vld [vmem:[#allocation2 + $0x1e] sm:$0xff]  ;;  %2950 = vst.msk [vmem:[#allocation2 + $0x40] sm:$0xff] %vm1150_vm2, %v7622_v12  ;;  %v1778_v43 = vmax.f32 %v7586_v17, %v7253_v9  ;;  %v2885_v53 = vmax.f32 %v2849_v49, %v7597_v57 }
 0x18a   : > { %9788 = vst [vmem:[#allocation21_spill] sm:$0xff] %v7637_v18  ;;  %v3319_v4 = vmax.f32 %v7545_v51, %v3287_v0  ;;  %5143 = vmatmul.msk.f32.gmra.mxu3 %vm1150_vm2, %v7557_v39  ;;  %v3288_v30 = vld [vmem:[#allocation2 + $0x26] sm:$0xff]  ;;  %v7659_v7 = vmax.f32 %v1969_v11, %v7650_v1  ;;  %v7665_v0 = vmax.f32 %v2817_v27, %v7547_v29 }
 0x18b   : > { %v3320_v33 = vmax.f32 %v7557_v39, %v3288_v30  ;;  %2756 = vst.msk [vmem:[#allocation2 + $0x70] sm:$0xff] %vm1150_vm2, %v7614_v10  ;;  %v3383_v19 = vld [vmem:[#allocation2 + $0x1f] sm:$0xff]  ;;  %v3384_v55 = vld [vmem:[#allocation2 + $0x27] sm:$0xff] }
 0x18c   : > { %9791 = vst [vmem:[#allocation14_spill] sm:$0xff] %v7659_v7  ;;  %v3351_v8 = vsel %vm1142_vm12, %v3319_v4, %v7545_v51  ;;  %v3289_v37 = vld [vmem:[#allocation2 + $0x2e] sm:$0xff]  ;;  %v2886_v51 = vmax.f32 %v7625_v25, %v7607_v28  ;;  %v7677_v4 = vsel %vm1144_vm8, %v2502_v15, %v2438_v47  ;;  %v1900_v47 = vmax.f32 %v7229_v56, %v7318_v35 }
 0x18d   : > { %2757 = vst.msk [vmem:[#allocation2 + $0x78] sm:$0xff] %vm1150_vm2, %v7634_v36  ;;  %v3415_v49 = vmax.f32 %v3351_v8, %v3383_v19  ;;  %v3416_v11 = vmax.f32 %v3320_v33, %v3384_v55  ;;  %v3480_v27 = vld [vmem:[#allocation2 + $0x29] sm:$0xff]  ;;  %v3321_v30 = vmax.f32 %v7579_v34, %v3289_v37  ;;  %v9792_v33 = vmax.f32 %v6764_v58, %v6710_v24  ;;  %v3479_v24 = vld [vmem:[#allocation2 + $0x21] sm:$0xff]  ;;  %v1321_v39 = vpop.f32.mrf.mxu1 }
 0x18e   : > { %2034 = vst.msk [vmem:[#allocation2 + $0x88] sm:$0xff] %vm1150_vm2, %v7637_v18  ;;  %v7682_v22 = vld [vmem:[#allocation2 + $0x68] sm:$0xff]  ;;  %v1901_v15 = vmax.f32 %v7220_v26, %v7337_v5  ;;  %5116 = vmatmul.msk.f32.gmra.mxu2 %vm1150_vm2, %v7335_v54  ;;  %v1902_v5 = vmax.f32 %v7143_v21, %v7355_v44 }
 0x18f   : > { %2035 = vst.msk [vmem:[#allocation2 + $0x90] sm:$0xff] %vm1150_vm2, %v7659_v7  ;;  %v7692_v25 = vsel %vm1149_vm9, %v9792_v33, %v6764_v58  ;;  %v3447_v19 = vsel %vm1144_vm8, %v3415_v49, %v3351_v8  ;;  %v3512_v55 = vmax.f32 %v3416_v11, %v3480_v27  ;;  %v7703_v37 = vmax.f32 %v2885_v53, %v7682_v22  ;;  %v3385_v56 = vld [vmem:[#allocation2 + $0x2f] sm:$0xff] }
 0x190   : > { %v7708_v58 = vsel %vm1149_vm9, %v1778_v43, %v7586_v17  ;;  %5092 = vmatmul.msk.f32.gmra.mxu1 %vm1150_vm2, %v5855_v41  ;;  %v3353_v26 = vsel %vm1142_vm12, %v3321_v30, %v7579_v34  ;;  %v3290_v35 = vld [vmem:[#allocation2 + $0x36] sm:$0xff]  ;;  %v3511_v54 = vmax.f32 %v3447_v19, %v3479_v24  ;;  %1409 = vst.msk [vmem:[#allocation3 + $0x20] sm:$0xff] %vm9793_vm5, %v1321_v39  ;;  %v3575_v41 = vld [vmem:[#allocation2 + $0x22] sm:$0xff]  ;;  %v3576_v43 = vld [vmem:[#allocation2 + $0x2a] sm:$0xff] }
 0x191   : > { %v3417_v53 = vmax.f32 %v3353_v26, %v3385_v56  ;;  %v3322_v8 = vmax.f32 %v7610_v52, %v3290_v35  ;;  %v2887_v17 = vmax.f32 %v7665_v0, %v7682_v22  ;;  %2951 = vst.msk [vmem:[#allocation2 + $0x48] sm:$0xff] %vm1150_vm2, %v7703_v37  ;;  %v3544_v49 = vsel %vm1147_vm4, %v3512_v55, %v3416_v11  ;;  %v3386_v39 = vld [vmem:[#allocation2 + $0x37] sm:$0xff]  ;;  %vm9854_vm5 = vmmov %vm9787_vm0 }
 0x192   : > { %5144 = vmatmul.msk.f32.gmra.mxu3 %vm1150_vm2, %v7579_v34  ;;  %v3291_v27 = vld [vmem:[#allocation2 + $0x3e] sm:$0xff]  ;;  %v7727_v21 = vmax.f32 %v3511_v54, %v3575_v41  ;;  %v7729_v30 = vld [vmem:[#allocation2 + $0x70] sm:$0xff]  ;;  %v3608_v33 = vmax.f32 %v3544_v49, %v3576_v43  ;;  %1840 = vst.msk [vmem:[#allocation2 + $0xb8] sm:$0xff] %vm1150_vm2, %v7692_v25  ;;  %v1934_v0 = vmax.f32 %v1900_v47, %v7355_v44 }
 0x193   : > { %v3449_v19 = vsel %vm1144_vm8, %v3417_v53, %v3353_v26  ;;  %v3418_v24 = vmax.f32 %v3322_v8, %v3386_v39  ;;  %v3481_v11 = vld [vmem:[#allocation2 + $0x31] sm:$0xff]  ;;  %v3323_v55 = vmax.f32 %v7622_v12, %v3291_v27  ;;  %v7738_v34 = vmax.f32 %v2886_v51, %v7729_v30  ;;  %1842 = vst.msk [vmem:[#allocation2 + $0xc8] sm:$0xff] %vm1150_vm2, %v7708_v58  ;;  %v3482_v35 = vld [vmem:[#allocation2 + $0x39] sm:$0xff]  ;;  %v9794_v51 = vld [vmem:[#allocation13_spill] sm:$0xff] }
 0x194   : > { %v7740_v56 = vld [vmem:[#allocation2 + $0x78] sm:$0xff]  ;;  %v3513_v54 = vmax.f32 %v3449_v19, %v3481_v11  ;;  %3671 = vst.msk [vmem:[#allocation2 + $0x20] sm:$0xff] %vm1150_vm2, %v7727_v21  ;;  %v7748_v44 = vsel %vm1149_vm9, %v3608_v33, %v3544_v49  ;;  %v7751_v26 = vmax.f32 %v1901_v15, %v7374_v14  ;;  %v1903_v53 = vmax.f32 %v9794_v51, %v7374_v14 }
 0x195   : > { %v2375_v47 = vld [vmem:[#allocation2 + $0x86] sm:$0xff]  ;;  %v3514_v8 = vmax.f32 %v3418_v24, %v3482_v35  ;;  %v3577_v41 = vld [vmem:[#allocation2 + $0x32] sm:$0xff]  ;;  %v3355_v43 = vsel %vm1142_vm12, %v3323_v55, %v7622_v12  ;;  %2952 = vst.msk [vmem:[#allocation2 + $0x50] sm:$0xff] %vm1150_vm2, %v7738_v34  ;;  %v7761_v49 = vmax.f32 %v2887_v17, %v7740_v56  ;;  %v7764_v27 = vmax.f32 %v1902_v5, %v7376_v6  ;;  %v3578_v55 = vld [vmem:[#allocation2 + $0x3a] sm:$0xff]  ;;  %v1324_v5 = vpop.f32.mrf.mxu1 }
 0x196   : > { %v3387_v39 = vld [vmem:[#allocation2 + $0x3f] sm:$0xff]  ;;  %v7766_v15 = vmax.f32 %v3513_v54, %v3577_v41  ;;  %3672 = vst.msk [vmem:[#allocation2 + $0x28] sm:$0xff] %vm1150_vm2, %v7748_v44  ;;  %v2407_v14 = vmax.f32 %v7637_v18, %v2375_v47  ;;  %v1970_v11 = vmax.f32 %v1934_v0, %v7628_v62  ;;  %5117 = vmatmul.msk.f32.gmra.mxu2 %vm1150_vm2, %v7353_v48  ;;  %v2471_v35 = vld [vmem:[#allocation2 + $0x87] sm:$0xff] }
 0x197   : > { %v3419_v33 = vmax.f32 %v3355_v43, %v3387_v39  ;;  %v2566_v19 = vld [vmem:[#allocation2 + $0x81] sm:$0xff]  ;;  %v3546_v17 = vsel %vm1147_vm4, %v3514_v8, %v3418_v24  ;;  %2953 = vst.msk [vmem:[#allocation2 + $0x58] sm:$0xff] %vm1150_vm2, %v7761_v49  ;;  %v2376_v51 = vld [vmem:[#allocation2 + $0x8e] sm:$0xff]  ;;  %v7780_v47 = vmax.f32 %v1903_v53, %v7422_v59  ;;  %v5533_v18 = vld [vmem:[#allocation2 + $0x18] sm:$0xff] }
 0x198   : > { %v2598_v54 = vmax.f32 %v7677_v4, %v2566_v19  ;;  %v9795_v41 = vld [vmem:[#allocation4_spill] sm:$0xff]  ;;  %v3610_v0 = vmax.f32 %v3546_v17, %v3578_v55  ;;  %3673 = vst.msk [vmem:[#allocation2 + $0x30] sm:$0xff] %vm1150_vm2, %v7766_v15  ;;  %v1971_v4 = vmax.f32 %v7751_v26, %v7650_v1  ;;  %v2503_v9 = vmax.f32 %v2407_v14, %v2471_v35 }
 0x199   : > { %5093 = vmatmul.msk.f32.gmra.mxu1 %vm1150_vm2, %v9795_v41  ;;  %v3451_v48 = vsel %vm1144_vm8, %v3419_v33, %v3355_v43  ;;  %v3483_v24 = vld [vmem:[#allocation2 + $0x41] sm:$0xff]  ;;  %1410 = vst.msk [vmem:[#allocation3 + $0x28] sm:$0xff] %vm9796_vm1, %v1324_v5  ;;  %v7794_v55 = vld [vmem:[#allocation2 + $0xb8] sm:$0xff]  ;;  %v2408_v14 = vmax.f32 %v7659_v7, %v2376_v51  ;;  %v2567_v5 = vld [vmem:[#allocation2 + $0x89] sm:$0xff] }
 0x19a   : > { %v3292_v8 = vld [vmem:[#allocation2 + $0x46] sm:$0xff]  ;;  %v3515_v19 = vmax.f32 %v3451_v48, %v3483_v24  ;;  %5145 = vmatmul.msk.f32.gmra.mxu3 %vm1150_vm2, %v7610_v52  ;;  %v7802_v33 = vsel %vm1149_vm9, %v3610_v0, %v3546_v17  ;;  %v7807_v35 = vmax.f32 %v1970_v11, %v7794_v55  ;;  %v2599_v0 = vmax.f32 %v2503_v9, %v2567_v5  ;;  %vm9857_vm1 = vmmov %vm9787_vm0 }
 0x19b   : > { %v2662_v39 = vld [vmem:[#allocation2 + $0x82] sm:$0xff]  ;;  %v3324_v53 = vmax.f32 %v7703_v37, %v3292_v8  ;;  %3674 = vst.msk [vmem:[#allocation2 + $0x38] sm:$0xff] %vm1150_vm2, %v7802_v33  ;;  %v2820_v11 = vmax.f32 %v7614_v10, %v7571_v60  ;;  %v2663_v5 = vld [vmem:[#allocation2 + $0x8a] sm:$0xff] }
 0x19c   : > { %v7792_v41 = vmax.f32 %v2598_v54, %v2662_v39  ;;  %v7796_v43 = vld [vmem:[#allocation2 + $0xc0] sm:$0xff]  ;;  %9797 = vst [vmem:[#allocation25_spill] sm:$0xff] %v7807_v35  ;;  %v9798_v54 = vmax.f32 %v7533_v32, %v7537_v38  ;;  %v3484_v32 = vld [vmem:[#allocation2 + $0x49] sm:$0xff]  ;;  %v2440_v38 = vsel %vm1142_vm12, %v2408_v14, %v7659_v7 }
 0x19d   : > { %v3579_v26 = vld [vmem:[#allocation2 + $0x42] sm:$0xff]  ;;  %v7840_v10 = vmax.f32 %v1971_v4, %v7796_v43  ;;  %v2472_v14 = vld [vmem:[#allocation2 + $0x8f] sm:$0xff]  ;;  %2036 = vst.msk [vmem:[#allocation2 + $0x98] sm:$0xff] %vm1150_vm2, %v7807_v35 }
 0x19e   : > { %v3388_v48 = vld [vmem:[#allocation2 + $0x47] sm:$0xff]  ;;  %v7813_v52 = vmax.f32 %v9798_v54, %v7571_v60  ;;  %v7815_v39 = vmax.f32 %v3515_v19, %v3579_v26  ;;  %2758 = vst.msk [vmem:[#allocation2 + $0x80] sm:$0xff] %vm1150_vm2, %v7792_v41  ;;  %v1972_v19 = vmax.f32 %v7764_v27, %v7794_v55  ;;  %v2821_v60 = vmax.f32 %v7634_v36, %v7597_v57  ;;  %v7844_v26 = vld [vmem:[#allocation2 + $0x10] sm:$0xff] }
 0x19f   : > { %v5530_v24 = vld [vmem:[#allocation2] sm:$0xff]  ;;  %v3420_v17 = vmax.f32 %v3324_v53, %v3388_v48  ;;  %9800 = vst [vmem:[#allocation22_spill] sm:$0xff] %v7840_v10  ;;  %v7842_v53 = vld [vmem:[#allocation2 + $0xc8] sm:$0xff]  ;;  %v2631_v27 = vsel %vm1147_vm4, %v2599_v0, %v2503_v9  ;;  %v7851_v54 = vld [vmem:[#allocation2 + $0xd0] sm:$0xff]  ;;  %v1904_v36 = vmax.f32 %v7692_v25, %v7376_v6  ;;  %5118 = vmatmul.msk.f32.gmra.mxu2 %vm1150_vm2, %v7381_v42 }
 0x1a0   : > { %v3735_v8 = vmax.f32 %v7727_v21, %v5530_v24  ;;  %v9799_v21 = vmax.f32 %v7590_v20, %v7547_v29  ;;  %v3293_v24 = vld [vmem:[#allocation2 + $0x4e] sm:$0xff]  ;;  %3675 = vst.msk [vmem:[#allocation2 + $0x40] sm:$0xff] %vm1150_vm2, %v7815_v39  ;;  %v2888_v42 = vmax.f32 %v7813_v52, %v7729_v30  ;;  %v7871_v46 = vmax.f32 %v1972_v19, %v7842_v53 }
 0x1a1   : > { %v3325_v29 = vmax.f32 %v7738_v34, %v3293_v24  ;;  %v3516_v20 = vmax.f32 %v3420_v17, %v3484_v32  ;;  %9801 = vst [vmem:[#allocation26_spill] sm:$0xff] %v7851_v54  ;;  %v7859_v4 = vld [vmem:[#allocation2 + $0x30] sm:$0xff]  ;;  %v2504_v24 = vmax.f32 %v2440_v38, %v2472_v14  ;;  %v2695_v32 = vmax.f32 %v2631_v27, %v2663_v5  ;;  %v5532_v19 = vld [vmem:[#allocation2 + $0x8] sm:$0xff] }
 0x1a2   : > { %v7823_v51 = vmax.f32 %v9799_v21, %v7597_v57  ;;  %v3769_v48 = vmax.f32 %v3735_v8, %v7844_v26  ;;  %v1973_v57 = vmax.f32 %v7780_v47, %v7796_v43  ;;  %v3389_v8 = vld [vmem:[#allocation2 + $0x4f] sm:$0xff]  ;;  %v9802_v47 = vld [vmem:[#allocation8_spill] sm:$0xff]  ;;  %9803 = vst [vmem:[#allocation28_spill] sm:$0xff] %v7871_v46  ;;  %5146 = vmatmul.msk.f32.gmra.mxu3 %vm1150_vm2, %v7622_v12 }
 0x1a3   : > { %v3357_v9 = vsel %vm1142_vm12, %v3325_v29, %v7738_v34  ;;  %v3548_v0 = vsel %vm1147_vm4, %v3516_v20, %v3420_v17  ;;  %v3580_v21 = vld [vmem:[#allocation2 + $0x4a] sm:$0xff]  ;;  %5094 = vmatmul.msk.f32.gmra.mxu1 %vm1150_vm2, %v9802_v47  ;;  %v7878_v17 = vsel %vm1149_vm9, %v2695_v32, %v2631_v27  ;;  %2037 = vst.msk [vmem:[#allocation2 + $0xa0] sm:$0xff] %vm1150_vm2, %v7840_v10  ;;  %v3294_v14 = vld [vmem:[#allocation2 + $0x56] sm:$0xff] }
 0x1a4   : > { %v3421_v6 = vmax.f32 %v3357_v9, %v3389_v8  ;;  %v3612_v25 = vmax.f32 %v3548_v0, %v3580_v21  ;;  %v3805_v7 = vmax.f32 %v3769_v48, %v7859_v4  ;;  %v7883_v20 = vmax.f32 %v1973_v57, %v7851_v54  ;;  %v3485_v5 = vld [vmem:[#allocation2 + $0x51] sm:$0xff]  ;;  %2759 = vst.msk [vmem:[#allocation2 + $0x88] sm:$0xff] %vm1150_vm2, %v7878_v17 }
 0x1a5   : > { %v3736_v48 = vmax.f32 %v7748_v44, %v5532_v19  ;;  %v7898_v12 = vld [vmem:[#allocation2 + $0x80] sm:$0xff]  ;;  %v2536_v8 = vsel %vm1144_vm8, %v2504_v24, %v2440_v38  ;;  %v1938_v21 = vmax.f32 %v1904_v36, %v7628_v62  ;;  %v7911_v47 = vmax.f32 %v2821_v60, %v7682_v22  ;;  %2038 = vst.msk [vmem:[#allocation2 + $0xa8] sm:$0xff] %vm1150_vm2, %v7871_v46  ;;  %v2377_v36 = vld [vmem:[#allocation2 + $0x96] sm:$0xff] }
 0x1a6   : > { %9804 = vst [vmem:[#allocation19_spill] sm:$0xff] %v7883_v20  ;;  %v7889_v52 = vsel %vm1149_vm9, %v3612_v25, %v3548_v0  ;;  %v3453_v27 = vsel %vm1144_vm8, %v3421_v6, %v3357_v9  ;;  %v9805_v0 = vld [vmem:[#allocation24_spill] sm:$0xff]  ;;  %v7908_v9 = vmax.f32 %v2820_v11, %v7607_v28  ;;  %v2889_v6 = vmax.f32 %v7823_v51, %v7740_v56  ;;  %v3581_v25 = vld [vmem:[#allocation2 + $0x52] sm:$0xff] }
 0x1a7   : > { %3676 = vst.msk [vmem:[#allocation2 + $0x48] sm:$0xff] %vm1150_vm2, %v7889_v52  ;;  %v3517_v57 = vmax.f32 %v3453_v27, %v3485_v5  ;;  %v1905_v44 = vmax.f32 %v9805_v0, %v7422_v59  ;;  %v7905_v32 = vld [vmem:[#allocation2 + $0x40] sm:$0xff]  ;;  %v7916_v19 = vmax.f32 %v2888_v42, %v7898_v12  ;;  %v3326_v11 = vmax.f32 %v7761_v49, %v3294_v14  ;;  %v2568_v24 = vld [vmem:[#allocation2 + $0x91] sm:$0xff] }
 0x1a8   : > { %v3839_v59 = vmax.f32 %v3805_v7, %v7905_v32  ;;  %2039 = vst.msk [vmem:[#allocation2 + $0xb0] sm:$0xff] %vm1150_vm2, %v7883_v20  ;;  %v7926_v60 = vld [vmem:[#allocation2 + $0xd8] sm:$0xff]  ;;  %v1327_v7 = vpop.f32.mrf.mxu1  ;;  %v2409_v5 = vmax.f32 %v7807_v35, %v2377_v36  ;;  %v7934_v14 = vld [vmem:[#allocation2 + $0xe0] sm:$0xff]  ;;  %v1974_v0 = vmax.f32 %v1938_v21, %v7842_v53  ;;  %5119 = vmatmul.msk.f32.gmra.mxu2 %vm1150_vm2, %v7384_v50  ;;  %v9809_v35 = vld [vmem:[#allocation10_spill] sm:$0xff] }
 0x1a9   : > { %v7921_v38 = vmax.f32 %v3517_v57, %v3581_v25  ;;  %v1939_v51 = vmax.f32 %v1905_v44, %v7650_v1  ;;  %v7929_v42 = vld [vmem:[#allocation2 + $0x38] sm:$0xff]  ;;  %2954 = vst.msk [vmem:[#allocation2 + $0x60] sm:$0xff] %vm1150_vm2, %v7916_v19  ;;  %v2600_v57 = vmax.f32 %v2536_v8, %v2568_v24  ;;  %v9807_v25 = vld [vmem:[#allocation17_spill] sm:$0xff]  ;;  %v3770_v36 = vmax.f32 %v3736_v48, %v5533_v18 }
 0x1aa   : > { %v3390_v27 = vld [vmem:[#allocation2 + $0x57] sm:$0xff]  ;;  %v9808_v29 = vmax.f32 %v9773_v3, %v9807_v25  ;;  %5175 = vmatmul.msk.f32.vlgmr.msrb.gmra.mxu0 %vm1150_vm2, %v3839_v59  ;;  %v3737_v8 = vmax.f32 %v7766_v15, %v7844_v26  ;;  %1411 = vst.msk [vmem:[#allocation3 + $0x30] sm:$0xff] %vm9810_vm6, %v1327_v7  ;;  %v7961_v59 = vmax.f32 %v1974_v0, %v7926_v60  ;;  %vm9858_vm6 = vmmov %vm9787_vm0 }
 0x1ab   : > { %9806 = vst [vmem:[#allocation27_spill] sm:$0xff] %v7921_v38  ;;  %v2473_v21 = vld [vmem:[#allocation2 + $0x97] sm:$0xff]  ;;  %v1975_v25 = vmax.f32 %v1939_v51, %v7851_v54  ;;  %5095 = vmatmul.msk.f32.gmra.mxu1 %vm1150_vm2, %v9809_v35  ;;  %v3806_v15 = vmax.f32 %v3770_v36, %v7929_v42  ;;  %v2822_v26 = vmax.f32 %v7792_v41, %v7607_v28  ;;  %v7966_v51 = vld [vmem:[#allocation2 + $0x88] sm:$0xff]  ;;  %v2474_v36 = vld [vmem:[#allocation2 + $0x9f] sm:$0xff] }
 0x1ac   : > { %v7943_v44 = vsel %vm1149_vm9, %v9808_v29, %v9773_v3  ;;  %3677 = vst.msk [vmem:[#allocation2 + $0x50] sm:$0xff] %vm1150_vm2, %v7921_v38  ;;  %v2664_v24 = vld [vmem:[#allocation2 + $0x92] sm:$0xff]  ;;  %v7955_v3 = vld [vmem:[#allocation2 + $0x20] sm:$0xff]  ;;  %v2505_v29 = vmax.f32 %v2409_v5, %v2473_v21  ;;  %5147 = vmatmul.msk.f32.gmra.mxu3 %vm1150_vm2, %v7703_v37  ;;  %v3422_v7 = vmax.f32 %v3326_v11, %v3390_v27  ;;  %v7976_v5 = vld [vmem:[#allocation2 + $0x28] sm:$0xff] }
 0x1ad   : > { %v2378_v50 = vld [vmem:[#allocation2 + $0x9e] sm:$0xff]  ;;  %v7958_v48 = vmax.f32 %v2600_v57, %v2664_v24  ;;  %v7970_v38 = vmax.f32 %v1975_v25, %v7934_v14  ;;  %1846 = vst.msk [vmem:[#allocation2 + $0xe8] sm:$0xff] %vm1150_vm2, %v7943_v44  ;;  %v7979_v57 = vmax.f32 %v2889_v6, %v7966_v51  ;;  %v3771_v41 = vmax.f32 %v3737_v8, %v7955_v3  ;;  %v2379_v37 = vld [vmem:[#allocation2 + $0xa6] sm:$0xff] }
 0x1ae   : > { %v2569_v54 = vld [vmem:[#allocation2 + $0x99] sm:$0xff]  ;;  %v2410_v35 = vmax.f32 %v7840_v10, %v2378_v50  ;;  %v3738_v0 = vmax.f32 %v7802_v33, %v5533_v18  ;;  %2040 = vst.msk [vmem:[#allocation2 + $0xb8] sm:$0xff] %vm1150_vm2, %v7961_v59  ;;  %v1906_v6 = vmax.f32 %v7708_v58, %v7628_v62  ;;  %v7995_v11 = vmax.f32 %v2822_v26, %v7729_v30 }
 0x1af   : > { %9811 = vst [vmem:[#allocation33_spill] sm:$0xff] %v7970_v38  ;;  %v2601_v28 = vmax.f32 %v2505_v29, %v2569_v54  ;;  %v7992_v54 = vld [vmem:[#allocation2 + $0x48] sm:$0xff]  ;;  %v2665_v33 = vld [vmem:[#allocation2 + $0x9a] sm:$0xff]  ;;  %v2411_v8 = vmax.f32 %v7871_v46, %v2379_v37  ;;  %v2890_v62 = vmax.f32 %v7908_v9, %v7898_v12  ;;  %v3807_v9 = vmax.f32 %v3771_v41, %v7905_v32 }
 0x1b0   : > { %2760 = vst.msk [vmem:[#allocation2 + $0x90] sm:$0xff] %vm1150_vm2, %v7958_v48  ;;  %v2442_v21 = vsel %vm1142_vm12, %v2410_v35, %v7840_v10  ;;  %v2380_v24 = vld [vmem:[#allocation2 + $0xae] sm:$0xff]  ;;  %v3840_v25 = vmax.f32 %v3806_v15, %v7992_v54  ;;  %v3295_v58 = vld [vmem:[#allocation2 + $0x5e] sm:$0xff]  ;;  %v8006_v26 = vmax.f32 %v3738_v0, %v7976_v5  ;;  %5120 = vmatmul.msk.f32.gmra.mxu2 %vm1150_vm2, %v7387_v16 }
 0x1b1   : > { %2955 = vst.msk [vmem:[#allocation2 + $0x68] sm:$0xff] %vm1150_vm2, %v7979_v57  ;;  %v2633_v18 = vsel %vm1147_vm4, %v2601_v28, %v2505_v29  ;;  %v2506_v27 = vmax.f32 %v2442_v21, %v2474_v36  ;;  %v3486_v50 = vld [vmem:[#allocation2 + $0x59] sm:$0xff]  ;;  %v3327_v29 = vmax.f32 %v7916_v19, %v3295_v58  ;;  %v2570_v37 = vld [vmem:[#allocation2 + $0xa1] sm:$0xff]  ;;  %v2412_v15 = vmax.f32 %v7883_v20, %v2380_v24 }
 0x1b2   : > { %v2697_v35 = vmax.f32 %v2633_v18, %v2665_v33  ;;  %2041 = vst.msk [vmem:[#allocation2 + $0xc0] sm:$0xff] %vm1150_vm2, %v7970_v38  ;;  %v3518_v28 = vmax.f32 %v3422_v7, %v3486_v50  ;;  %5176 = vmatmul.msk.f32.gmra.mxu0 %vm1150_vm2, %v3840_v25  ;;  %v2475_v33 = vld [vmem:[#allocation2 + $0xa7] sm:$0xff]  ;;  %v1940_v58 = vmax.f32 %v1906_v6, %v7794_v55  ;;  %v3582_v24 = vld [vmem:[#allocation2 + $0x5a] sm:$0xff] }
 0x1b3   : > { %v2538_v36 = vsel %vm1144_vm8, %v2506_v27, %v2442_v21  ;;  %v9812_v50 = vld [vmem:[#allocation16_spill] sm:$0xff]  ;;  %v3359_v21 = vsel %vm1142_vm12, %v3327_v29, %v7916_v19  ;;  %v2507_v41 = vmax.f32 %v2411_v8, %v2475_v33  ;;  %v8037_v29 = vld [vmem:[#allocation2 + $0x50] sm:$0xff]  ;;  %v2444_v8 = vsel %vm1142_vm12, %v2412_v15, %v7883_v20 }
 0x1b4   : > { %v8020_v0 = vsel %vm1149_vm9, %v2697_v35, %v2633_v18  ;;  %5096 = vmatmul.msk.f32.gmra.mxu1 %vm1150_vm2, %v9812_v50  ;;  %v3391_v27 = vld [vmem:[#allocation2 + $0x5f] sm:$0xff]  ;;  %v3550_v16 = vsel %vm1147_vm4, %v3518_v28, %v3422_v7  ;;  %v2602_v6 = vmax.f32 %v2538_v36, %v2570_v37  ;;  %v1976_v50 = vmax.f32 %v1940_v58, %v7926_v60  ;;  %v2476_v33 = vld [vmem:[#allocation2 + $0xaf] sm:$0xff] }
 0x1b5   : > { %2761 = vst.msk [vmem:[#allocation2 + $0x98] sm:$0xff] %vm1150_vm2, %v8020_v0  ;;  %v3423_v18 = vmax.f32 %v3359_v21, %v3391_v27  ;;  %v3614_v25 = vmax.f32 %v3550_v16, %v3582_v24  ;;  %v2666_v46 = vld [vmem:[#allocation2 + $0xa2] sm:$0xff]  ;;  %5148 = vmatmul.msk.f32.gmra.mxu3 %vm1150_vm2, %v7738_v34  ;;  %v2823_v7 = vmax.f32 %v7878_v17, %v7682_v22  ;;  %v2381_v36 = vld [vmem:[#allocation2 + $0xb6] sm:$0xff] }
 0x1b6   : > { %v9813_v37 = vld [vmem:[#allocation38_spill] sm:$0xff]  ;;  %v2891_v27 = vmax.f32 %v7911_v47, %v7966_v51  ;;  %v8057_v24 = vmax.f32 %v2602_v6, %v2666_v46  ;;  %v3841_v20 = vmax.f32 %v3807_v9, %v8037_v29  ;;  %v8062_v10 = vld [vmem:[#allocation2 + $0xe8] sm:$0xff]  ;;  %v2413_v46 = vmax.f32 %v7961_v59, %v2381_v36 }
 0x1b7   : > { %v8032_v35 = vld [vmem:[#allocation2 + $0x90] sm:$0xff]  ;;  %v1907_v58 = vmax.f32 %v9813_v37, %v7650_v1  ;;  %v8051_v34 = vsel %vm1149_vm9, %v3614_v25, %v3550_v16  ;;  %v3455_v17 = vsel %vm1144_vm8, %v3423_v18, %v3359_v21  ;;  %v2508_v37 = vmax.f32 %v2444_v8, %v2476_v33 }
 0x1b8   : > { %v8042_v28 = vmax.f32 %v2890_v62, %v8032_v35  ;;  %v3296_v22 = vld [vmem:[#allocation2 + $0x66] sm:$0xff]  ;;  %3678 = vst.msk [vmem:[#allocation2 + $0x58] sm:$0xff] %vm1150_vm2, %v8051_v34  ;;  %v8070_v9 = vmax.f32 %v1976_v50, %v8062_v10  ;;  %v3739_v33 = vmax.f32 %v7815_v39, %v7955_v3  ;;  %5121 = vmatmul.msk.f32.gmra.mxu2 %vm1150_vm2, %v7436_v40 }
 0x1b9   : > { %v3487_v62 = vld [vmem:[#allocation2 + $0x61] sm:$0xff]  ;;  %v2571_v15 = vld [vmem:[#allocation2 + $0xa9] sm:$0xff]  ;;  %v3328_v21 = vmax.f32 %v7979_v57, %v3296_v22  ;;  %2762 = vst.msk [vmem:[#allocation2 + $0xa0] sm:$0xff] %vm1150_vm2, %v8057_v24  ;;  %v3808_v50 = vmax.f32 %v8006_v26, %v7992_v54  ;;  %v2824_v3 = vmax.f32 %v7958_v48, %v7729_v30  ;;  %v2572_v26 = vld [vmem:[#allocation2 + $0xb1] sm:$0xff] }
 0x1ba   : > { %v3519_v1 = vmax.f32 %v3455_v17, %v3487_v62  ;;  %v2603_v16 = vmax.f32 %v2507_v41, %v2571_v15  ;;  %v2382_v25 = vld [vmem:[#allocation2 + $0xbe] sm:$0xff]  ;;  %2956 = vst.msk [vmem:[#allocation2 + $0x70] sm:$0xff] %vm1150_vm2, %v8042_v28  ;;  %v2540_v17 = vsel %vm1144_vm8, %v2508_v37, %v2444_v8  ;;  %v2667_v36 = vld [vmem:[#allocation2 + $0xaa] sm:$0xff]  ;;  %5177 = vmatmul.msk.f32.gmra.mxu0 %vm1150_vm2, %v3841_v20 }
 0x1bb   : > { %v3583_v47 = vld [vmem:[#allocation2 + $0x62] sm:$0xff]  ;;  %v2414_v18 = vmax.f32 %v7970_v38, %v2382_v25  ;;  %9814 = vst [vmem:[#allocation31_spill] sm:$0xff] %v8070_v9  ;;  %v2477_v8 = vld [vmem:[#allocation2 + $0xb7] sm:$0xff]  ;;  %v2604_v37 = vmax.f32 %v2540_v17, %v2572_v26 }
 0x1bc   : > { %v8072_v6 = vmax.f32 %v3519_v1, %v3583_v47  ;;  %v2635_v22 = vsel %vm1147_vm4, %v2603_v16, %v2507_v41  ;;  %v3392_v62 = vld [vmem:[#allocation2 + $0x67] sm:$0xff]  ;;  %v8087_v39 = vld [vmem:[#allocation2 + $0x98] sm:$0xff]  ;;  %2042 = vst.msk [vmem:[#allocation2 + $0xc8] sm:$0xff] %vm1150_vm2, %v8070_v9  ;;  %5097 = vmatmul.msk.f32.gmra.mxu1 %vm1150_vm2, %v9777_v45  ;;  %v2509_v20 = vmax.f32 %v2413_v46, %v2477_v8 }
 0x1bd   : > { %v2699_v15 = vmax.f32 %v2635_v22, %v2667_v36  ;;  %v8098_v40 = vmax.f32 %v2891_v27, %v8087_v39  ;;  %v1941_v41 = vmax.f32 %v1907_v58, %v7796_v43  ;;  %v3424_v1 = vmax.f32 %v3328_v21, %v3392_v62  ;;  %v2573_v48 = vld [vmem:[#allocation2 + $0xb9] sm:$0xff]  ;;  %5149 = vmatmul.msk.f32.gmra.mxu3 %vm1150_vm2, %v7761_v49 }
 0x1be   : > { %3679 = vst.msk [vmem:[#allocation2 + $0x60] sm:$0xff] %vm1150_vm2, %v8072_v6  ;;  %v2446_v45 = vsel %vm1142_vm12, %v2414_v18, %v7970_v38  ;;  %v8111_v27 = vmax.f32 %v3739_v33, %v7859_v4  ;;  %v2892_v58 = vmax.f32 %v7995_v11, %v8032_v35  ;;  %v2605_v16 = vmax.f32 %v2509_v20, %v2573_v48  ;;  %v2668_v25 = vld [vmem:[#allocation2 + $0xb2] sm:$0xff]  ;;  %v2478_v49 = vld [vmem:[#allocation2 + $0xbf] sm:$0xff] }
 0x1bf   : > { %v8103_v30 = vsel %vm1149_vm9, %v2699_v15, %v2635_v22  ;;  %2957 = vst.msk [vmem:[#allocation2 + $0x78] sm:$0xff] %vm1150_vm2, %v8098_v40  ;;  %v8117_v47 = vld [vmem:[#allocation2 + $0x58] sm:$0xff]  ;;  %v2857_v21 = vmax.f32 %v2823_v7, %v7740_v56  ;;  %v8121_v46 = vmax.f32 %v2824_v3, %v7898_v12  ;;  %v8125_v18 = vmax.f32 %v2604_v37, %v2668_v25  ;;  %v9817_v37 = vld [vmem:[#allocation21_spill] sm:$0xff] }
 0x1c0   : > { %2763 = vst.msk [vmem:[#allocation2 + $0xa8] sm:$0xff] %vm1150_vm2, %v8103_v30  ;;  %v9815_v11 = vmax.f32 %v7450_v2, %v9789_v61  ;;  %v2825_v7 = vmax.f32 %v8020_v0, %v7740_v56  ;;  %v2637_v36 = vsel %vm1147_vm4, %v2605_v16, %v2509_v20  ;;  %v2669_v62 = vld [vmem:[#allocation2 + $0xba] sm:$0xff]  ;;  %v2510_v3 = vmax.f32 %v2446_v45, %v2478_v49 }
 0x1c1   : > { %v3297_v17 = vld [vmem:[#allocation2 + $0x6e] sm:$0xff]  ;;  %v1977_v15 = vmax.f32 %v1941_v41, %v7934_v14  ;;  %v3842_v61 = vmax.f32 %v3808_v50, %v8117_v47  ;;  %v8144_v26 = vld [vmem:[#allocation2 + $0xa0] sm:$0xff]  ;;  %v2701_v48 = vmax.f32 %v2637_v36, %v2669_v62  ;;  %2764 = vst.msk [vmem:[#allocation2 + $0xb0] sm:$0xff] %vm1150_vm2, %v8125_v18  ;;  %v9816_v56 = vmax.f32 %v7643_v31, %v7357_v23 }
 0x1c2   : > { %v8133_v33 = vsel %vm1149_vm9, %v9815_v11, %v7450_v2  ;;  %v3488_v22 = vld [vmem:[#allocation2 + $0x69] sm:$0xff]  ;;  %v3329_v2 = vmax.f32 %v8042_v28, %v3297_v17  ;;  %v3809_v50 = vmax.f32 %v8111_v27, %v8037_v29  ;;  %v3740_v20 = vmax.f32 %v7889_v52, %v7976_v5  ;;  %5122 = vmatmul.msk.f32.gmra.mxu2 %vm1150_vm2, %v9817_v37 }
 0x1c3   : > { %1848 = vst.msk [vmem:[#allocation2 + $0xf8] sm:$0xff] %vm1150_vm2, %v8133_v33  ;;  %v3520_v8 = vmax.f32 %v3424_v1, %v3488_v22  ;;  %v8154_v0 = vsel %vm1147_vm4, %v9816_v56, %v7643_v31  ;;  %v8161_v41 = vmax.f32 %v2892_v58, %v8144_v26  ;;  %5178 = vmatmul.msk.f32.gmra.mxu0 %vm1150_vm2, %v3842_v61  ;;  %v3393_v31 = vld [vmem:[#allocation2 + $0x6f] sm:$0xff]  ;;  %v9820_v61 = vld [vmem:[#allocation39_spill] sm:$0xff] }
 0x1c4   : > { %v3361_v23 = vsel %vm1142_vm12, %v3329_v2, %v8042_v28  ;;  %v3584_v27 = vld [vmem:[#allocation2 + $0x6a] sm:$0xff]  ;;  %v2893_v25 = vmax.f32 %v2857_v21, %v8087_v39  ;;  %v8177_v11 = vmax.f32 %v2825_v7, %v7966_v51  ;;  %v8190_v21 = vsel %vm1149_vm9, %v2701_v48, %v2637_v36  ;;  %v9821_v56 = vld [vmem:[#allocation11_spill] sm:$0xff] }
 0x1c5   : > { %v3552_v16 = vsel %vm1147_vm4, %v3520_v8, %v3424_v1  ;;  %v8172_v52 = vld [vmem:[#allocation2 + $0xf0] sm:$0xff]  ;;  %v3425_v58 = vmax.f32 %v3361_v23, %v3393_v31  ;;  %v8182_v22 = vld [vmem:[#allocation2 + $0x60] sm:$0xff]  ;;  %v2894_v1 = vmax.f32 %v8121_v46, %v8144_v26  ;;  %2958 = vst.msk [vmem:[#allocation2 + $0x80] sm:$0xff] %vm1150_vm2, %v8161_v41  ;;  %v2542_v7 = vsel %vm1144_vm8, %v2510_v3, %v2446_v45  ;;  %v1330_v31 = vpop.f32.mrf.mxu1 }
 0x1c6   : > { %v9818_v5 = vld [vmem:[#allocation30_spill] sm:$0xff]  ;;  %v3616_v49 = vmax.f32 %v3552_v16, %v3584_v27  ;;  %v8180_v17 = vmax.f32 %v1977_v15, %v8172_v52  ;;  %v1908_v15 = vmax.f32 %v9820_v61, %v7794_v55  ;;  %5150 = vmatmul.msk.f32.gmra.mxu3 %vm1150_vm2, %v7916_v19  ;;  %2765 = vst.msk [vmem:[#allocation2 + $0xb8] sm:$0xff] %vm1150_vm2, %v8190_v21  ;;  %v2383_v45 = vld [vmem:[#allocation2 + $0xc6] sm:$0xff] }
 0x1c7   : > { %5098 = vmatmul.msk.f32.gmra.mxu1 %vm1150_vm2, %v9818_v5  ;;  %v3298_v62 = vld [vmem:[#allocation2 + $0x76] sm:$0xff]  ;;  %v3457_v2 = vsel %vm1144_vm8, %v3425_v58, %v3361_v23  ;;  %v8205_v48 = vld [vmem:[#allocation2 + $0xa8] sm:$0xff]  ;;  %v1786_v37 = vmax.f32 %v8154_v0, %v9821_v56  ;;  %v3843_v23 = vmax.f32 %v3809_v50, %v8182_v22  ;;  %v3774_v27 = vmax.f32 %v3740_v20, %v7929_v42 }
 0x1c8   : > { %9819 = vst [vmem:[#allocation34_spill] sm:$0xff] %v8180_v17  ;;  %v3489_v46 = vld [vmem:[#allocation2 + $0x71] sm:$0xff]  ;;  %v8202_v8 = vsel %vm1149_vm9, %v3616_v49, %v3552_v16  ;;  %v3330_v36 = vmax.f32 %v8098_v40, %v3298_v62  ;;  %v8212_v3 = vmax.f32 %v2893_v25, %v8205_v48  ;;  %v2574_v49 = vld [vmem:[#allocation2 + $0xc1] sm:$0xff]  ;;  %v2415_v50 = vmax.f32 %v8070_v9, %v2383_v45 }
 0x1c9   : > { %v3521_v55 = vmax.f32 %v3457_v2, %v3489_v46  ;;  %3680 = vst.msk [vmem:[#allocation2 + $0x68] sm:$0xff] %vm1150_vm2, %v8202_v8  ;;  %v3394_v19 = vld [vmem:[#allocation2 + $0x77] sm:$0xff]  ;;  %v2606_v61 = vmax.f32 %v2542_v7, %v2574_v49  ;;  %v2053_v2 = vld [vmem:[#allocation3] sm:$0xff]  ;;  %v2202_v46 = vpop.f32.mrf.mxu2  ;;  %v2826_v20 = vmax.f32 %v8057_v24, %v7898_v12 }
 0x1ca   : > { %v3585_v16 = vld [vmem:[#allocation2 + $0x72] sm:$0xff]  ;;  %v3426_v5 = vmax.f32 %v3330_v36, %v3394_v19  ;;  %2043 = vst.msk [vmem:[#allocation2 + $0xd0] sm:$0xff] %vm1150_vm2, %v8180_v17  ;;  %v2895_v36 = vmax.f32 %v8177_v11, %v8205_v48  ;;  %v2670_v19 = vld [vmem:[#allocation2 + $0xc2] sm:$0xff]  ;;  %v2298_v24 = vadd.f32 %v2202_v46, %v2053_v2 }
 0x1cb   : > { %v8218_v58 = vld [vmem:[#allocation2 + $0xb0] sm:$0xff]  ;;  %1412 = vst.msk [vmem:[#allocation3 + $0x38] sm:$0xff] %vm9822_vm7, %v1330_v31  ;;  %v8223_v25 = vmax.f32 %v3521_v55, %v3585_v16  ;;  %v1942_v55 = vmax.f32 %v1908_v15, %v7842_v53  ;;  %5179 = vmatmul.msk.f32.gmra.mxu0 %vm1150_vm2, %v3843_v23  ;;  %v8243_v7 = vmax.f32 %v2606_v61, %v2670_v19  ;;  %v8245_v11 = vld [vmem:[#allocation2 + $0xf8] sm:$0xff]  ;;  %v9825_v45 = vld [vmem:[#allocation36_spill] sm:$0xff] }
 0x1cc   : > { %v8226_v62 = vmax.f32 %v2894_v1, %v8218_v58  ;;  %2959 = vst.msk [vmem:[#allocation2 + $0x88] sm:$0xff] %vm1150_vm2, %v8212_v3  ;;  %v9823_v56 = vld [vmem:[#allocation14_spill] sm:$0xff]  ;;  %v9824_v1 = vld [vmem:[#allocation27_spill] sm:$0xff]  ;;  %v3810_v15 = vmax.f32 %v3774_v27, %v8117_v47  ;;  %v2479_v23 = vld [vmem:[#allocation2 + $0xc7] sm:$0xff] }
 0x1cd   : > { %5123 = vmatmul.msk.f32.gmra.mxu2 %vm1150_vm2, %v9823_v56  ;;  %3681 = vst.msk [vmem:[#allocation2 + $0x70] sm:$0xff] %vm1150_vm2, %v8223_v25  ;;  %v3741_v12 = vmax.f32 %v9824_v1, %v7859_v4  ;;  %v3299_v31 = vld [vmem:[#allocation2 + $0x7e] sm:$0xff]  ;;  %v1978_v49 = vmax.f32 %v1942_v55, %v8062_v10  ;;  %v8256_v4 = vsel %vm1149_vm9, %v1786_v37, %v8154_v0  ;;  %v9827_v19 = vld [vmem:[#allocation5_spill] sm:$0xff]  ;;  %vm9862_vm7 = vmmov %vm9787_vm0 }
 0x1ce   : > { %v3490_v16 = vld [vmem:[#allocation2 + $0x79] sm:$0xff]  ;;  %2960 = vst.msk [vmem:[#allocation2 + $0x90] sm:$0xff] %vm1150_vm2, %v8226_v62  ;;  %v3331_v61 = vmax.f32 %v8161_v41, %v3299_v31  ;;  %v2511_v27 = vmax.f32 %v2415_v50, %v2479_v23  ;;  %v1909_v56 = vmax.f32 %v9827_v19, %v7796_v43  ;;  %5151 = vmatmul.msk.f32.gmra.mxu3 %vm1150_vm2, %v7979_v57  ;;  %v9830_v19 = vld [vmem:[#allocation26_spill] sm:$0xff] }
 0x1cf   : > { %5099 = vmatmul.msk.f32.gmra.mxu1 %vm1150_vm2, %v9825_v45  ;;  %2330 = vst.msk [vmem:[#allocation3] sm:$0xff] %vm9826_vm10, %v2298_v24  ;;  %v3522_v2 = vmax.f32 %v3426_v5, %v3490_v16  ;;  %v8260_v46 = vld [vmem:[#allocation2 + $0xb8] sm:$0xff]  ;;  %v2860_v1 = vmax.f32 %v2826_v20, %v8032_v35  ;;  %v8275_v37 = vmax.f32 %v1978_v49, %v8245_v11  ;;  %vm9863_vm10 = vmmov %vm9787_vm0 }
 0x1d0   : > { %v8266_v55 = vld [vmem:[#allocation2 + $0x68] sm:$0xff]  ;;  %v8270_v0 = vmax.f32 %v2895_v36, %v8260_v46  ;;  %2766 = vst.msk [vmem:[#allocation2 + $0xc0] sm:$0xff] %vm1150_vm2, %v8243_v7  ;;  %v3775_v50 = vmax.f32 %v3741_v12, %v7905_v32  ;;  %v3363_v43 = vsel %vm1142_vm12, %v3331_v61, %v8161_v41  ;;  %v3395_v57 = vld [vmem:[#allocation2 + $0x7f] sm:$0xff]  ;;  %v1333_v36 = vpop.f32.mrf.mxu1  ;;  %v3742_v23 = vmax.f32 %v8051_v34, %v7929_v42 }
 0x1d1   : > { %9828 = vst [vmem:[#allocation13_spill] sm:$0xff] %v8275_v37  ;;  %v3554_v24 = vsel %vm1147_vm4, %v3522_v2, %v3426_v5  ;;  %v3586_v20 = vld [vmem:[#allocation2 + $0x7a] sm:$0xff]  ;;  %v2384_v45 = vld [vmem:[#allocation2 + $0xce] sm:$0xff]  ;;  %v3427_v31 = vmax.f32 %v3363_v43, %v3395_v57  ;;  %v3844_v61 = vmax.f32 %v3810_v15, %v8266_v55  ;;  %v1943_v9 = vmax.f32 %v1909_v56, %v9830_v19 }
 0x1d2   : > { %1850 = vst.msk [vmem:[#allocation2 + $0x108] sm:$0xff] %vm1150_vm2, %v8256_v4  ;;  %v3618_v16 = vmax.f32 %v3554_v24, %v3586_v20  ;;  %v2416_v12 = vmax.f32 %v8180_v17, %v2384_v45  ;;  %v2575_v49 = vld [vmem:[#allocation2 + $0xc9] sm:$0xff]  ;;  %v1910_v57 = vmax.f32 %v7943_v44, %v7842_v53  ;;  %v2896_v45 = vmax.f32 %v2860_v1, %v8218_v58 }
 0x1d3   : > { %2961 = vst.msk [vmem:[#allocation2 + $0x98] sm:$0xff] %vm1150_vm2, %v8270_v0  ;;  %v3300_v5 = vld [vmem:[#allocation2 + $0x86] sm:$0xff]  ;;  %v2607_v2 = vmax.f32 %v2511_v27, %v2575_v49  ;;  %v3459_v42 = vsel %vm1144_vm8, %v3427_v31, %v3363_v43  ;;  %5180 = vmatmul.msk.f32.gmra.mxu0 %vm1150_vm2, %v3844_v61  ;;  %v3811_v53 = vmax.f32 %v3775_v50, %v8182_v22 }
 0x1d4   : > { %1413 = vst.msk [vmem:[#allocation3 + $0x40] sm:$0xff] %vm9829_vm13, %v1333_v36  ;;  %v8299_v34 = vsel %vm1149_vm9, %v3618_v16, %v3554_v24  ;;  %v3491_v20 = vld [vmem:[#allocation2 + $0x81] sm:$0xff]  ;;  %v3332_v15 = vmax.f32 %v8212_v3, %v3300_v5  ;;  %v2448_v1 = vsel %vm1142_vm12, %v2416_v12, %v8180_v17  ;;  %v9832_v24 = vld [vmem:[#allocation6_spill] sm:$0xff]  ;;  %v2827_v16 = vmax.f32 %v8103_v30, %v7966_v51  ;;  %vm9866_vm13 = vmmov %vm9787_vm0 }
 0x1d5   : > { %2044 = vst.msk [vmem:[#allocation2 + $0xd8] sm:$0xff] %vm1150_vm2, %v8275_v37  ;;  %v9831_v36 = vld [vmem:[#allocation25_spill] sm:$0xff]  ;;  %v3523_v56 = vmax.f32 %v3459_v42, %v3491_v20  ;;  %v8316_v31 = vld [vmem:[#allocation2 + $0x70] sm:$0xff]  ;;  %v8321_v5 = vld [vmem:[#allocation2 + $0x100] sm:$0xff]  ;;  %v2639_v38 = vsel %vm1147_vm4, %v2607_v2, %v2511_v27  ;;  %v1979_v51 = vmax.f32 %v1943_v9, %v8172_v52  ;;  %v1944_v30 = vmax.f32 %v1910_v57, %v7926_v60 }
 0x1d6   : > { %5124 = vmatmul.msk.f32.gmra.mxu2 %vm1150_vm2, %v9831_v36  ;;  %3682 = vst.msk [vmem:[#allocation2 + $0x78] sm:$0xff] %vm1150_vm2, %v8299_v34  ;;  %v3396_v44 = vld [vmem:[#allocation2 + $0x87] sm:$0xff]  ;;  %v9833_v42 = vld [vmem:[#allocation18_spill] sm:$0xff]  ;;  %5152 = vmatmul.msk.f32.gmra.mxu3 %vm1150_vm2, %v8042_v28  ;;  %v3845_v27 = vmax.f32 %v3811_v53, %v8316_v31  ;;  %v8343_v9 = vmax.f32 %v3742_v23, %v7992_v54 }
 0x1d7   : > { %v3301_v43 = vld [vmem:[#allocation2 + $0x8e] sm:$0xff]  ;;  %5100 = vmatmul.msk.f32.gmra.mxu1 %vm1150_vm2, %v9832_v24  ;;  %v3587_v49 = vld [vmem:[#allocation2 + $0x82] sm:$0xff]  ;;  %v3428_v61 = vmax.f32 %v3332_v15, %v3396_v44  ;;  %v1911_v20 = vmax.f32 %v9833_v42, %v9830_v19  ;;  %v8353_v53 = vmax.f32 %v1979_v51, %v8321_v5  ;;  %v1980_v23 = vmax.f32 %v1944_v30, %v8245_v11 }
 0x1d8   : > { %v3333_v50 = vmax.f32 %v8226_v62, %v3301_v43  ;;  %v8325_v36 = vmax.f32 %v3523_v56, %v3587_v49  ;;  %v3492_v12 = vld [vmem:[#allocation2 + $0x89] sm:$0xff]  ;;  %v8327_v17 = vld [vmem:[#allocation2 + $0xc0] sm:$0xff]  ;;  %v8365_v51 = vmax.f32 %v2827_v16, %v8087_v39  ;;  %v3743_v30 = vmax.f32 %v8072_v6, %v7905_v32 }
 0x1d9   : > { %v2480_v24 = vld [vmem:[#allocation2 + $0xcf] sm:$0xff]  ;;  %v3524_v44 = vmax.f32 %v3428_v61, %v3492_v12  ;;  %v8339_v56 = vmax.f32 %v2896_v45, %v8327_v17  ;;  %v1336_v12 = vpop.f32.mrf.mxu1  ;;  %v2828_v16 = vmax.f32 %v8125_v18, %v8032_v35  ;;  %2045 = vst.msk [vmem:[#allocation2 + $0xe0] sm:$0xff] %vm1150_vm2, %v8353_v53 }
 0x1da   : > { %9834 = vst [vmem:[#allocation4_spill] sm:$0xff] %v8325_v36  ;;  %v3365_v19 = vsel %vm1142_vm12, %v3333_v50, %v8226_v62  ;;  %v3397_v15 = vld [vmem:[#allocation2 + $0x8f] sm:$0xff]  ;;  %v2512_v43 = vmax.f32 %v2448_v1, %v2480_v24  ;;  %v3398_v6 = vld [vmem:[#allocation2 + $0x97] sm:$0xff] }
 0x1db   : > { %v2671_v49 = vld [vmem:[#allocation2 + $0xca] sm:$0xff]  ;;  %3683 = vst.msk [vmem:[#allocation2 + $0x80] sm:$0xff] %vm1150_vm2, %v8325_v36  ;;  %v3429_v28 = vmax.f32 %v3365_v19, %v3397_v15  ;;  %v3302_v2 = vld [vmem:[#allocation2 + $0x96] sm:$0xff]  ;;  %v3556_v50 = vsel %vm1147_vm4, %v3524_v44, %v3428_v61  ;;  %v1945_v36 = vmax.f32 %v1911_v20, %v7934_v14  ;;  %5181 = vmatmul.msk.f32.gmra.mxu0 %vm1150_vm2, %v3845_v27 }
 0x1dc   : > { %v2703_v57 = vmax.f32 %v2639_v38, %v2671_v49  ;;  %v3588_v42 = vld [vmem:[#allocation2 + $0x8a] sm:$0xff]  ;;  %2962 = vst.msk [vmem:[#allocation2 + $0xa0] sm:$0xff] %vm1150_vm2, %v8339_v56  ;;  %v3334_v45 = vmax.f32 %v8270_v0, %v3302_v2  ;;  %v2385_v44 = vld [vmem:[#allocation2 + $0xd6] sm:$0xff] }
 0x1dd   : > { %v3461_v24 = vsel %vm1144_vm8, %v3429_v28, %v3365_v19  ;;  %v3493_v15 = vld [vmem:[#allocation2 + $0x91] sm:$0xff]  ;;  %v3620_v49 = vmax.f32 %v3556_v50, %v3588_v42  ;;  %1414 = vst.msk [vmem:[#allocation3 + $0x48] sm:$0xff] %vm9835_vm14, %v1336_v12  ;;  %v2544_v19 = vsel %vm1144_vm8, %v2512_v43, %v2448_v1  ;;  %v8371_v28 = vld [vmem:[#allocation2 + $0x108] sm:$0xff]  ;;  %v2417_v35 = vmax.f32 %v8275_v37, %v2385_v44  ;;  %vm9867_vm14 = vmmov %vm9787_vm0 }
 0x1de   : > { %v8360_v61 = vsel %vm1149_vm9, %v2703_v57, %v2639_v38  ;;  %v3525_v2 = vmax.f32 %v3461_v24, %v3493_v15  ;;  %v9836_v42 = vld [vmem:[#allocation22_spill] sm:$0xff]  ;;  %v3812_v38 = vmax.f32 %v8343_v9, %v8266_v55  ;;  %v9837_v1 = vld [vmem:[#allocation7_spill] sm:$0xff]  ;;  %v3430_v27 = vmax.f32 %v3334_v45, %v3398_v6  ;;  %5153 = vmatmul.msk.f32.gmra.mxu3 %vm1150_vm2, %v8098_v40  ;;  %v9839_v40 = vld [vmem:[#allocation32_spill] sm:$0xff] }
 0x1df   : > { %5125 = vmatmul.msk.f32.gmra.mxu2 %vm1150_vm2, %v9836_v42  ;;  %v3589_v20 = vld [vmem:[#allocation2 + $0x92] sm:$0xff]  ;;  %v8382_v32 = vsel %vm1149_vm9, %v3620_v49, %v3556_v50  ;;  %2767 = vst.msk [vmem:[#allocation2 + $0xc8] sm:$0xff] %vm1150_vm2, %v8360_v61  ;;  %5101 = vmatmul.msk.f32.gmra.mxu1 %vm1150_vm2, %v9837_v1  ;;  %v8398_v50 = vmax.f32 %v1980_v23, %v8371_v28 }
 0x1e0   : > { %v8388_v43 = vmax.f32 %v3525_v2, %v3589_v20  ;;  %3684 = vst.msk [vmem:[#allocation2 + $0x88] sm:$0xff] %vm1150_vm2, %v8382_v32  ;;  %v2576_v18 = vld [vmem:[#allocation2 + $0xd1] sm:$0xff]  ;;  %v1981_v12 = vmax.f32 %v1945_v36, %v8321_v5  ;;  %v1912_v24 = vmax.f32 %v8133_v33, %v7926_v60  ;;  %v8406_v45 = vmax.f32 %v3743_v30, %v8037_v29 }
 0x1e1   : > { %v8393_v9 = vld [vmem:[#allocation2 + $0x110] sm:$0xff]  ;;  %v2608_v57 = vmax.f32 %v2544_v19, %v2576_v18  ;;  %9838 = vst [vmem:[#allocation8_spill] sm:$0xff] %v8398_v50  ;;  %v3744_v15 = vmax.f32 %v8202_v8, %v7992_v54  ;;  %v2897_v23 = vmax.f32 %v8365_v51, %v8260_v46  ;;  %v1913_v54 = vmax.f32 %v9839_v40, %v7934_v14  ;;  %v8423_v33 = vld [vmem:[#allocation2 + $0x78] sm:$0xff]  ;;  %v1339_v6 = vpop.f32.mrf.mxu1 }
 0x1e2   : > { %3685 = vst.msk [vmem:[#allocation2 + $0x90] sm:$0xff] %vm1150_vm2, %v8388_v43  ;;  %v2672_v49 = vld [vmem:[#allocation2 + $0xd2] sm:$0xff]  ;;  %v8419_v60 = vmax.f32 %v1981_v12, %v8393_v9  ;;  %v1946_v51 = vmax.f32 %v1912_v24, %v8062_v10  ;;  %v1914_v42 = vmax.f32 %v8256_v4, %v8062_v10  ;;  %v3846_v20 = vmax.f32 %v3812_v38, %v8423_v33  ;;  %v9841_v12 = vld [vmem:[#allocation28_spill] sm:$0xff] }
 0x1e3   : > { %v3303_v36 = vld [vmem:[#allocation2 + $0x9e] sm:$0xff]  ;;  %v8414_v2 = vmax.f32 %v2608_v57, %v2672_v49  ;;  %2046 = vst.msk [vmem:[#allocation2 + $0xe8] sm:$0xff] %vm1150_vm2, %v8398_v50  ;;  %v2862_v1 = vmax.f32 %v2828_v16, %v8144_v26  ;;  %v8435_v14 = vmax.f32 %v3744_v15, %v8117_v47  ;;  %v3813_v49 = vmax.f32 %v8406_v45, %v8316_v31  ;;  %v2205_v16 = vpop.f32.mrf.mxu2 }
 0x1e4   : > { %v3494_v44 = vld [vmem:[#allocation2 + $0x99] sm:$0xff]  ;;  %v3335_v8 = vmax.f32 %v8339_v56, %v3303_v36  ;;  %1415 = vst.msk [vmem:[#allocation3 + $0x50] sm:$0xff] %vm9840_vm11, %v1339_v6  ;;  %v1982_v38 = vmax.f32 %v1946_v51, %v8371_v28  ;;  %5182 = vmatmul.msk.f32.gmra.mxu0 %vm1150_vm2, %v3846_v20  ;;  %vm9869_vm11 = vmmov %vm9787_vm0 }
 0x1e5   : > { %v3526_v30 = vmax.f32 %v3430_v27, %v3494_v44  ;;  %v2481_v19 = vld [vmem:[#allocation2 + $0xd7] sm:$0xff]  ;;  %2047 = vst.msk [vmem:[#allocation2 + $0xf0] sm:$0xff] %vm1150_vm2, %v8419_v60  ;;  %v2898_v51 = vmax.f32 %v2862_v1, %v8327_v17  ;;  %v3399_v20 = vld [vmem:[#allocation2 + $0x9f] sm:$0xff] }
 0x1e6   : > { %v2513_v18 = vmax.f32 %v2417_v35, %v2481_v19  ;;  %2768 = vst.msk [vmem:[#allocation2 + $0xd0] sm:$0xff] %vm1150_vm2, %v8414_v2  ;;  %v3590_v4 = vld [vmem:[#allocation2 + $0x9a] sm:$0xff]  ;;  %v3367_v35 = vsel %vm1142_vm12, %v3335_v8, %v8339_v56  ;;  %v8450_v15 = vld [vmem:[#allocation2 + $0xc8] sm:$0xff]  ;;  %v1947_v8 = vmax.f32 %v1913_v54, %v8172_v52  ;;  %v1948_v19 = vmax.f32 %v1914_v42, %v8245_v11 }
 0x1e7   : > { %v3558_v10 = vsel %vm1147_vm4, %v3526_v30, %v3430_v27  ;;  %5126 = vmatmul.msk.f32.gmra.mxu2 %vm1150_vm2, %v9841_v12  ;;  %v9842_v27 = vld [vmem:[#allocation12_spill] sm:$0xff]  ;;  %v8459_v36 = vmax.f32 %v2897_v23, %v8450_v15  ;;  %v1952_v30 = vld [vmem:[#allocation2 + $0x118] sm:$0xff]  ;;  %5154 = vmatmul.msk.f32.gmra.mxu3 %vm1150_vm2, %v8161_v41  ;;  %v3431_v54 = vmax.f32 %v3367_v35, %v3399_v20 }
 0x1e8   : > { %v3622_v24 = vmax.f32 %v3558_v10, %v3590_v4  ;;  %5102 = vmatmul.msk.f32.gmra.mxu1 %vm1150_vm2, %v9842_v27  ;;  %v2386_v44 = vld [vmem:[#allocation2 + $0xde] sm:$0xff]  ;;  %v2054_v27 = vld [vmem:[#allocation3 + $0x8] sm:$0xff]  ;;  %v8473_v57 = vmax.f32 %v1982_v38, %v1952_v30 }
 0x1e9   : > { %v2577_v40 = vld [vmem:[#allocation2 + $0xd9] sm:$0xff]  ;;  %v2418_v4 = vmax.f32 %v8353_v53, %v2386_v44  ;;  %v2299_v44 = vadd.f32 %v2205_v16, %v2054_v27  ;;  %2963 = vst.msk [vmem:[#allocation2 + $0xa8] sm:$0xff] %vm1150_vm2, %v8459_v36 }
 0x1ea   : > { %v8466_v6 = vsel %vm1149_vm9, %v3622_v24, %v3558_v10  ;;  %v2482_v45 = vld [vmem:[#allocation2 + $0xdf] sm:$0xff]  ;;  %v2609_v12 = vmax.f32 %v2513_v18, %v2577_v40  ;;  %v2483_v1 = vld [vmem:[#allocation2 + $0xe7] sm:$0xff]  ;;  %2048 = vst.msk [vmem:[#allocation2 + $0xf8] sm:$0xff] %vm1150_vm2, %v8473_v57 }
 0x1eb   : > { %9843 = vst [vmem:[#allocation24_spill] sm:$0xff] %v8466_v6  ;;  %v2673_v23 = vld [vmem:[#allocation2 + $0xda] sm:$0xff]  ;;  %v2387_v42 = vld [vmem:[#allocation2 + $0xe6] sm:$0xff]  ;;  %v2450_v40 = vsel %vm1142_vm12, %v2418_v4, %v8353_v53  ;;  %v1984_v4 = vmax.f32 %v1948_v19, %v1952_v30 }
 0x1ec   : > { %3686 = vst.msk [vmem:[#allocation2 + $0x98] sm:$0xff] %vm1150_vm2, %v8466_v6  ;;  %v9844_v10 = vld [vmem:[#allocation23_spill] sm:$0xff]  ;;  %v2641_v41 = vsel %vm1147_vm4, %v2609_v12, %v2513_v18  ;;  %v2419_v20 = vmax.f32 %v8398_v50, %v2387_v42  ;;  %v8485_v6 = vld [vmem:[#allocation2 + $0x128] sm:$0xff]  ;;  %v8487_v38 = vld [vmem:[#allocation2 + $0x80] sm:$0xff]  ;;  %v1342_v12 = vpop.f32.mrf.mxu1  ;;  %v2830_v42 = vmax.f32 %v8243_v7, %v8144_v26 }
 0x1ed   : > { %v1915_v24 = vmax.f32 %v9844_v10, %v8172_v52  ;;  %v8489_v37 = vld [vmem:[#allocation2 + $0xd0] sm:$0xff]  ;;  %v2514_v52 = vmax.f32 %v2450_v40, %v2482_v45  ;;  %v2705_v16 = vmax.f32 %v2641_v41, %v2673_v23  ;;  %v2578_v27 = vld [vmem:[#allocation2 + $0xe1] sm:$0xff]  ;;  %v1983_v10 = vmax.f32 %v1947_v8, %v8393_v9  ;;  %2331 = vst.msk [vmem:[#allocation3 + $0x8] sm:$0xff] %vm9845_vm15, %v2299_v44  ;;  %vm9871_vm15 = vmmov %vm9787_vm0 }
 0x1ee   : > { %v3847_v18 = vmax.f32 %v3813_v49, %v8487_v38  ;;  %v8499_v50 = vmax.f32 %v2898_v51, %v8489_v37  ;;  %v2515_v45 = vmax.f32 %v2419_v20, %v2483_v1  ;;  %v8501_v23 = vld [vmem:[#allocation2 + $0x120] sm:$0xff]  ;;  %1416 = vst.msk [vmem:[#allocation3 + $0x58] sm:$0xff] %vm9846_vm3, %v1342_v12  ;;  %v3814_v9 = vmax.f32 %v8435_v14, %v8423_v33  ;;  %v2388_v26 = vld [vmem:[#allocation2 + $0xee] sm:$0xff]  ;;  %v9848_v51 = vld [vmem:[#allocation19_spill] sm:$0xff] }
 0x1ef   : > { %v2546_v30 = vsel %vm1144_vm8, %v2514_v52, %v2450_v40  ;;  %v8510_v49 = vsel %vm1149_vm9, %v2705_v16, %v2641_v41  ;;  %v2674_v8 = vld [vmem:[#allocation2 + $0xe2] sm:$0xff]  ;;  %v8513_v19 = vmax.f32 %v1983_v10, %v8501_v23  ;;  %5127 = vmatmul.msk.f32.gmra.mxu2 %vm1150_vm2, %v9848_v51  ;;  %v3463_v14 = vsel %vm1144_vm8, %v3431_v54, %v3367_v35  ;;  %v9850_v40 = vld [vmem:[#allocation15_spill] sm:$0xff]  ;;  %v2055_v16 = vld [vmem:[#allocation3 + $0x10] sm:$0xff] }
 0x1f0   : > { %v2579_v7 = vld [vmem:[#allocation2 + $0xe9] sm:$0xff]  ;;  %5183 = vmatmul.msk.f32.gmra.mxu0 %vm1150_vm2, %v3847_v18  ;;  %2964 = vst.msk [vmem:[#allocation2 + $0xb0] sm:$0xff] %vm1150_vm2, %v8499_v50  ;;  %v2610_v1 = vmax.f32 %v2546_v30, %v2578_v27  ;;  %v8523_v44 = vmax.f32 %v1984_v4, %v8485_v6  ;;  %5103 = vmatmul.msk.f32.gmra.mxu1 %vm1150_vm2, %v9850_v40  ;;  %vm9872_vm3 = vmmov %vm9787_vm0 }
 0x1f1   : > { %9847 = vst [vmem:[#allocation17_spill] sm:$0xff] %v8513_v19  ;;  %v2420_v41 = vmax.f32 %v8419_v60, %v2388_v26  ;;  %v2611_v20 = vmax.f32 %v2515_v45, %v2579_v7  ;;  %v1949_v52 = vmax.f32 %v1915_v24, %v8321_v5  ;;  %v8531_v35 = vld [vmem:[#allocation2 + $0x88] sm:$0xff]  ;;  %v9851_v54 = vmax.f32 %v8190_v21, %v8087_v39  ;;  %v2208_v24 = vpop.f32.mrf.mxu2 }
 0x1f2   : > { %9849 = vst [vmem:[#allocation10_spill] sm:$0xff] %v8523_v44  ;;  %v9852_v10 = vmax.f32 %v8223_v25, %v8037_v29  ;;  %v8544_v18 = vmax.f32 %v2830_v42, %v8218_v58  ;;  %v8546_v12 = vmax.f32 %v2610_v1, %v2674_v8  ;;  %v2675_v5 = vld [vmem:[#allocation2 + $0xea] sm:$0xff]  ;;  %5155 = vmatmul.msk.f32.gmra.mxu3 %vm1150_vm2, %v8212_v3  ;;  %v3495_v25 = vld [vmem:[#allocation2 + $0xa1] sm:$0xff] }
 0x1f3   : > { %2769 = vst.msk [vmem:[#allocation2 + $0xd8] sm:$0xff] %vm1150_vm2, %v8510_v49  ;;  %v2863_v27 = vmax.f32 %v9851_v54, %v8205_v48  ;;  %v3746_v39 = vmax.f32 %v8299_v34, %v8117_v47  ;;  %v2831_v29 = vmax.f32 %v8360_v61, %v8205_v48  ;;  %v3304_v21 = vld [vmem:[#allocation2 + $0xa6] sm:$0xff]  ;;  %v2452_v42 = vsel %vm1142_vm12, %v2420_v41, %v8419_v60  ;;  %v2484_v30 = vld [vmem:[#allocation2 + $0xef] sm:$0xff] }
 0x1f4   : > { %v8541_v4 = vmax.f32 %v9852_v10, %v8182_v22  ;;  %2049 = vst.msk [vmem:[#allocation2 + $0x100] sm:$0xff] %vm1150_vm2, %v8513_v19  ;;  %v2643_v8 = vsel %vm1147_vm4, %v2611_v20, %v2515_v45  ;;  %v2300_v26 = vadd.f32 %v2208_v24, %v2055_v16  ;;  %v3527_v7 = vmax.f32 %v3463_v14, %v3495_v25  ;;  %v2389_v47 = vld [vmem:[#allocation2 + $0xf6] sm:$0xff]  ;;  %v9853_v48 = vld [vmem:[#allocation9_spill] sm:$0xff]  ;;  %v1345_v20 = vpop.f32.mrf.mxu1 }
 0x1f5   : > { %v3336_v3 = vmax.f32 %v8459_v36, %v3304_v21  ;;  %2770 = vst.msk [vmem:[#allocation2 + $0xe0] sm:$0xff] %vm1150_vm2, %v8546_v12  ;;  %v8564_v34 = vld [vmem:[#allocation2 + $0x130] sm:$0xff]  ;;  %v1916_v61 = vmax.f32 %v9853_v48, %v8245_v11  ;;  %v3848_v51 = vmax.f32 %v3814_v9, %v8531_v35  ;;  %v2899_v1 = vmax.f32 %v2863_v27, %v8450_v15  ;;  %v3400_v40 = vld [vmem:[#allocation2 + $0xa7] sm:$0xff] }
 0x1f6   : > { %v3591_v41 = vld [vmem:[#allocation2 + $0xa2] sm:$0xff]  ;;  %v2707_v45 = vmax.f32 %v2643_v8, %v2675_v5  ;;  %2050 = vst.msk [vmem:[#allocation2 + $0x108] sm:$0xff] %vm1150_vm2, %v8523_v44  ;;  %v1985_v14 = vmax.f32 %v1949_v52, %v8501_v23  ;;  %v2516_v10 = vmax.f32 %v2452_v42, %v2484_v30  ;;  %v2421_v11 = vmax.f32 %v8473_v57, %v2389_v47  ;;  %v2485_v52 = vld [vmem:[#allocation2 + $0xf7] sm:$0xff] }
 0x1f7   : > { %2332 = vst.msk [vmem:[#allocation3 + $0x10] sm:$0xff] %vm9787_vm0, %v2300_v26  ;;  %v8574_v16 = vmax.f32 %v3527_v7, %v3591_v41  ;;  %v3432_v54 = vmax.f32 %v3336_v3, %v3400_v40  ;;  %v8579_v9 = vmax.f32 %v3746_v39, %v8266_v55  ;;  %v8582_v27 = vmax.f32 %v2831_v29, %v8260_v46  ;;  %v3305_v5 = vld [vmem:[#allocation2 + $0xae] sm:$0xff]  ;;  %v9855_v26 = vld [vmem:[#allocation20_spill] sm:$0xff] }
 0x1f8   : > { %1417 = vst.msk [vmem:[#allocation3 + $0x60] sm:$0xff] %vm9854_vm5, %v1345_v20  ;;  %v3496_v24 = vld [vmem:[#allocation2 + $0xa9] sm:$0xff]  ;;  %v8586_v23 = vsel %vm1149_vm9, %v2707_v45, %v2643_v8  ;;  %v8589_v21 = vmax.f32 %v1985_v14, %v8564_v34  ;;  %5128 = vmatmul.msk.f32.gmra.mxu2 %vm1150_vm2, %v7961_v59  ;;  %5184 = vmatmul.msk.f32.gmra.mxu0 %vm1150_vm2, %v3848_v51  ;;  %v2056_v8 = vld [vmem:[#allocation3 + $0x18] sm:$0xff]  ;;  %v9856_v41 = vld [vmem:[#allocation4_spill] sm:$0xff] }
 0x1f9   : > { %3687 = vst.msk [vmem:[#allocation2 + $0xa0] sm:$0xff] %vm1150_vm2, %v8574_v16  ;;  %v3337_v39 = vmax.f32 %v8499_v50, %v3305_v5  ;;  %v3528_v29 = vmax.f32 %v3432_v54, %v3496_v24  ;;  %v1950_v30 = vmax.f32 %v1916_v61, %v8371_v28  ;;  %5104 = vmatmul.msk.f32.gmra.mxu1 %vm1150_vm2, %v9855_v26  ;;  %v3592_v48 = vld [vmem:[#allocation2 + $0xaa] sm:$0xff]  ;;  %v2676_v24 = vld [vmem:[#allocation2 + $0xf2] sm:$0xff]  ;;  %vm9875_vm5 = vmmov %vm9787_vm0 }
 0x1fa   : > { %v8597_v25 = vld [vmem:[#allocation2 + $0xd8] sm:$0xff]  ;;  %v3815_v7 = vmax.f32 %v8541_v4, %v8487_v38  ;;  %v2900_v59 = vmax.f32 %v8544_v18, %v8489_v37  ;;  %2771 = vst.msk [vmem:[#allocation2 + $0xe8] sm:$0xff] %vm1150_vm2, %v8586_v23  ;;  %v2548_v4 = vsel %vm1144_vm8, %v2516_v10, %v2452_v42  ;;  %v2517_v61 = vmax.f32 %v2421_v11, %v2485_v52  ;;  %v8622_v40 = vld [vmem:[#allocation2 + $0x90] sm:$0xff] }
 0x1fb   : > { %v8607_v3 = vmax.f32 %v2899_v1, %v8597_v25  ;;  %v3369_v28 = vsel %vm1142_vm12, %v3337_v39, %v8499_v50  ;;  %v3560_v47 = vsel %vm1147_vm4, %v3528_v29, %v3432_v54  ;;  %v2580_v51 = vld [vmem:[#allocation2 + $0xf1] sm:$0xff]  ;;  %v2390_v18 = vld [vmem:[#allocation2 + $0xfe] sm:$0xff]  ;;  %2051 = vst.msk [vmem:[#allocation2 + $0x110] sm:$0xff] %vm1150_vm2, %v8589_v21  ;;  %v2211_v1 = vpop.f32.mrf.mxu2  ;;  %5156 = vmatmul.msk.f32.gmra.mxu3 %vm1150_vm2, %v8226_v62 }
 0x1fc   : > { %v3747_v45 = vmax.f32 %v9856_v41, %v8182_v22  ;;  %v2832_v14 = vmax.f32 %v8414_v2, %v8218_v58  ;;  %v3401_v20 = vld [vmem:[#allocation2 + $0xaf] sm:$0xff]  ;;  %v3624_v42 = vmax.f32 %v3560_v47, %v3592_v48  ;;  %v2581_v54 = vld [vmem:[#allocation2 + $0xf9] sm:$0xff]  ;;  %v2301_v10 = vadd.f32 %v2211_v1, %v2056_v8  ;;  %v1348_v26 = vpop.f32.mrf.mxu1 }
 0x1fd   : > { %2965 = vst.msk [vmem:[#allocation2 + $0xb8] sm:$0xff] %vm1150_vm2, %v8607_v3  ;;  %v3433_v11 = vmax.f32 %v3369_v28, %v3401_v20  ;;  %v2901_v5 = vmax.f32 %v8582_v27, %v8597_v25  ;;  %v8632_v62 = vld [vmem:[#allocation2 + $0xe0] sm:$0xff]  ;;  %v1986_v22 = vmax.f32 %v1950_v30, %v8485_v6  ;;  %v2612_v39 = vmax.f32 %v2548_v4, %v2580_v51  ;;  %v8643_v8 = vld [vmem:[#allocation2 + $0x138] sm:$0xff] }
 0x1fe   : > { %v2391_v52 = vld [vmem:[#allocation2 + $0x106] sm:$0xff]  ;;  %v8637_v58 = vsel %vm1149_vm9, %v3624_v42, %v3560_v47  ;;  %v8640_v2 = vmax.f32 %v2900_v59, %v8632_v62  ;;  %v2422_v29 = vmax.f32 %v8513_v19, %v2390_v18  ;;  %2333 = vst.msk [vmem:[#allocation3 + $0x18] sm:$0xff] %vm9857_vm1, %v2301_v10  ;;  %v3849_v27 = vmax.f32 %v3815_v7, %v8622_v40  ;;  %vm9876_vm1 = vmmov %vm9787_vm0 }
 0x1ff   : > { %v2613_v48 = vmax.f32 %v2517_v61, %v2581_v54  ;;  %v2423_v30 = vmax.f32 %v8523_v44, %v2391_v52  ;;  %1418 = vst.msk [vmem:[#allocation3 + $0x68] sm:$0xff] %vm9858_vm6, %v1348_v26  ;;  %v8649_v47 = vmax.f32 %v2612_v39, %v2676_v24  ;;  %v2486_v4 = vld [vmem:[#allocation2 + $0xff] sm:$0xff]  ;;  %v2487_v51 = vld [vmem:[#allocation2 + $0x107] sm:$0xff]  ;;  %v8658_v7 = vmax.f32 %v3747_v45, %v8316_v31  ;;  %vm9877_vm6 = vmmov %vm9787_vm0 }
 0x200   : > { %v2454_v59 = vsel %vm1142_vm12, %v2422_v29, %v8513_v19  ;;  %v9859_v18 = vld [vmem:[#allocation33_spill] sm:$0xff]  ;;  %5185 = vmatmul.msk.f32.gmra.mxu0 %vm1150_vm2, %v3849_v27  ;;  %v3465_v1 = vsel %vm1144_vm8, %v3433_v11, %v3369_v28  ;;  %3688 = vst.msk [vmem:[#allocation2 + $0xa8] sm:$0xff] %vm1150_vm2, %v8637_v58  ;;  %v8667_v20 = vmax.f32 %v1986_v22, %v8643_v8  ;;  %v8671_v54 = vld [vmem:[#allocation2 + $0x98] sm:$0xff]  ;;  %v2057_v26 = vld [vmem:[#allocation3 + $0x20] sm:$0xff] }
 0x201   : > { %5129 = vmatmul.msk.f32.gmra.mxu2 %vm1150_vm2, %v9859_v18  ;;  %v8664_v41 = vld [vmem:[#allocation2 + $0xe8] sm:$0xff]  ;;  %v3816_v45 = vmax.f32 %v8579_v9, %v8531_v35  ;;  %v8676_v10 = vmax.f32 %v2832_v14, %v8327_v17  ;;  %2966 = vst.msk [vmem:[#allocation2 + $0xc0] sm:$0xff] %vm1150_vm2, %v8640_v2  ;;  %v2677_v11 = vld [vmem:[#allocation2 + $0xfa] sm:$0xff]  ;;  %v2518_v39 = vmax.f32 %v2454_v59, %v2486_v4 }
 0x202   : > { %9860 = vst [vmem:[#allocation16_spill] sm:$0xff] %v8667_v20  ;;  %v9861_v42 = vld [vmem:[#allocation29_spill] sm:$0xff]  ;;  %v8681_v28 = vmax.f32 %v2901_v5, %v8664_v41  ;;  %v2645_v9 = vsel %vm1147_vm4, %v2613_v48, %v2517_v61  ;;  %v2519_v29 = vmax.f32 %v2423_v30, %v2487_v51  ;;  %v2833_v5 = vmax.f32 %v8510_v49, %v8260_v46 }
 0x203   : > { %5105 = vmatmul.msk.f32.gmra.mxu1 %vm1150_vm2, %v9861_v42  ;;  %v2392_v24 = vld [vmem:[#allocation2 + $0x10e] sm:$0xff]  ;;  %2772 = vst.msk [vmem:[#allocation2 + $0xf0] sm:$0xff] %vm1150_vm2, %v8649_v47  ;;  %v2582_v14 = vld [vmem:[#allocation2 + $0x101] sm:$0xff]  ;;  %v2214_v18 = vpop.f32.mrf.mxu2  ;;  %5157 = vmatmul.msk.f32.gmra.mxu3 %vm1150_vm2, %v8270_v0  ;;  %v2709_v19 = vmax.f32 %v2645_v9, %v2677_v11  ;;  %v3850_v49 = vmax.f32 %v3816_v45, %v8671_v54 }
 0x204   : > { %v3306_v52 = vld [vmem:[#allocation2 + $0xb6] sm:$0xff]  ;;  %v2424_v27 = vmax.f32 %v8589_v21, %v2392_v24  ;;  %2967 = vst.msk [vmem:[#allocation2 + $0xc8] sm:$0xff] %vm1150_vm2, %v8681_v28  ;;  %v2678_v4 = vld [vmem:[#allocation2 + $0x102] sm:$0xff]  ;;  %v2302_v48 = vadd.f32 %v2214_v18, %v2057_v26  ;;  %v2550_v24 = vsel %vm1144_vm8, %v2518_v39, %v2454_v59  ;;  %v1351_v26 = vpop.f32.mrf.mxu1  ;;  %v2834_v59 = vmax.f32 %v8546_v12, %v8327_v17  ;;  %v2679_v18 = vld [vmem:[#allocation2 + $0x10a] sm:$0xff] }
 0x205   : > { %v3497_v22 = vld [vmem:[#allocation2 + $0xb1] sm:$0xff]  ;;  %v3338_v44 = vmax.f32 %v8607_v3, %v3306_v52  ;;  %v2583_v61 = vld [vmem:[#allocation2 + $0x109] sm:$0xff]  ;;  %2052 = vst.msk [vmem:[#allocation2 + $0x118] sm:$0xff] %vm1150_vm2, %v8667_v20  ;;  %v2902_v11 = vmax.f32 %v8676_v10, %v8632_v62  ;;  %v8712_v39 = vsel %vm1149_vm9, %v2709_v19, %v2645_v9  ;;  %v3817_v17 = vmax.f32 %v8658_v7, %v8622_v40 }
 0x206   : > { %v3529_v42 = vmax.f32 %v3465_v1, %v3497_v22  ;;  %v3402_v30 = vld [vmem:[#allocation2 + $0xb7] sm:$0xff]  ;;  %v2456_v0 = vsel %vm1142_vm12, %v2424_v27, %v8589_v21  ;;  %v2488_v46 = vld [vmem:[#allocation2 + $0x10f] sm:$0xff]  ;;  %v2614_v22 = vmax.f32 %v2550_v24, %v2582_v14  ;;  %2334 = vst.msk [vmem:[#allocation3 + $0x20] sm:$0xff] %vm9862_vm7, %v2302_v48  ;;  %v2615_v27 = vmax.f32 %v2519_v29, %v2583_v61  ;;  %v8736_v48 = vld [vmem:[#allocation2 + $0xa0] sm:$0xff] }
 0x207   : > { %v3593_v51 = vld [vmem:[#allocation2 + $0xb2] sm:$0xff]  ;;  %v3434_v52 = vmax.f32 %v3338_v44, %v3402_v30  ;;  %1419 = vst.msk [vmem:[#allocation3 + $0x70] sm:$0xff] %vm9863_vm10, %v1351_v26  ;;  %v3748_v44 = vmax.f32 %v8382_v32, %v8266_v55  ;;  %v2520_v14 = vmax.f32 %v2456_v0, %v2488_v46  ;;  %v2867_v10 = vmax.f32 %v2833_v5, %v8450_v15  ;;  %v2058_v7 = vld [vmem:[#allocation3 + $0x28] sm:$0xff]  ;;  %vm9878_vm7 = vmmov %vm9787_vm0 }
 0x208   : > { %v8703_v1 = vmax.f32 %v3529_v42, %v3593_v51  ;;  %v8717_v45 = vmax.f32 %v2614_v22, %v2678_v4  ;;  %v9864_v42 = vld [vmem:[#allocation31_spill] sm:$0xff]  ;;  %5186 = vmatmul.msk.f32.gmra.mxu0 %vm1150_vm2, %v3850_v49  ;;  %v2647_v55 = vsel %vm1147_vm4, %v2615_v27, %v2519_v29  ;;  %2773 = vst.msk [vmem:[#allocation2 + $0xf8] sm:$0xff] %vm1150_vm2, %v8712_v39  ;;  %vm9879_vm10 = vmmov %vm9787_vm0 }
 0x209   : > { %5130 = vmatmul.msk.f32.gmra.mxu2 %vm1150_vm2, %v9864_v42  ;;  %v3307_v19 = vld [vmem:[#allocation2 + $0xbe] sm:$0xff]  ;;  %v2868_v30 = vmax.f32 %v2834_v59, %v8489_v37  ;;  %v2711_v5 = vmax.f32 %v2647_v55, %v2679_v18  ;;  %v8747_v46 = vmax.f32 %v3748_v44, %v8423_v33 }
 0x20a   : > { %3689 = vst.msk [vmem:[#allocation2 + $0xb0] sm:$0xff] %vm1150_vm2, %v8703_v1  ;;  %v3498_v12 = vld [vmem:[#allocation2 + $0xb9] sm:$0xff]  ;;  %v3339_v9 = vmax.f32 %v8640_v2, %v3307_v19  ;;  %v8732_v61 = vld [vmem:[#allocation2 + $0xf0] sm:$0xff] }
 0x20b   : > { %v9865_v32 = vld [vmem:[#allocation35_spill] sm:$0xff]  ;;  %v3530_v4 = vmax.f32 %v3434_v52, %v3498_v12  ;;  %v3308_v51 = vld [vmem:[#allocation2 + $0xc6] sm:$0xff]  ;;  %v8740_v29 = vmax.f32 %v2902_v11, %v8732_v61  ;;  %2774 = vst.msk [vmem:[#allocation2 + $0x100] sm:$0xff] %vm1150_vm2, %v8717_v45  ;;  %v2217_v24 = vpop.f32.mrf.mxu2  ;;  %5158 = vmatmul.msk.f32.gmra.mxu3 %vm1150_vm2, %v8339_v56  ;;  %v2552_v11 = vsel %vm1144_vm8, %v2520_v14, %v2456_v0 }
 0x20c   : > { %5106 = vmatmul.msk.f32.gmra.mxu1 %vm1150_vm2, %v9865_v32  ;;  %v3371_v49 = vsel %vm1142_vm12, %v3339_v9, %v8640_v2  ;;  %v3403_v22 = vld [vmem:[#allocation2 + $0xbf] sm:$0xff]  ;;  %v2393_v27 = vld [vmem:[#allocation2 + $0x116] sm:$0xff]  ;;  %v2303_v18 = vadd.f32 %v2217_v24, %v2058_v7  ;;  %v3340_v56 = vmax.f32 %v8681_v28, %v3308_v51  ;;  %v3851_v32 = vmax.f32 %v3817_v17, %v8736_v48  ;;  %v1354_v7 = vpop.f32.mrf.mxu1 }
 0x20d   : > { %v3562_v26 = vsel %vm1147_vm4, %v3530_v4, %v3434_v52  ;;  %v3594_v59 = vld [vmem:[#allocation2 + $0xba] sm:$0xff]  ;;  %v3435_v42 = vmax.f32 %v3371_v49, %v3403_v22  ;;  %2968 = vst.msk [vmem:[#allocation2 + $0xd0] sm:$0xff] %vm1150_vm2, %v8740_v29  ;;  %v2584_v12 = vld [vmem:[#allocation2 + $0x111] sm:$0xff]  ;;  %v2835_v52 = vmax.f32 %v8586_v23, %v8450_v15  ;;  %v2903_v9 = vmax.f32 %v2867_v10, %v8664_v41  ;;  %v3127_v4 = vpop.f32.mrf.mxu3  ;;  %v3404_v10 = vld [vmem:[#allocation2 + $0xc7] sm:$0xff] }
 0x20e   : > { %v3626_v19 = vmax.f32 %v3562_v26, %v3594_v59  ;;  %v2489_v44 = vld [vmem:[#allocation2 + $0x117] sm:$0xff]  ;;  %v2425_v0 = vmax.f32 %v8667_v20, %v2393_v27  ;;  %2335 = vst.msk [vmem:[#allocation3 + $0x28] sm:$0xff] %vm9866_vm13, %v2303_v18  ;;  %v2978_v14 = vld [vmem:[#allocation3] sm:$0xff]  ;;  %v2904_v22 = vmax.f32 %v2868_v30, %v8732_v61  ;;  %v8774_v15 = vsel %vm1149_vm9, %v2711_v5, %v2647_v55  ;;  %vm9881_vm13 = vmmov %vm9787_vm0 }
 0x20f   : > { %v3467_v51 = vsel %vm1144_vm8, %v3435_v42, %v3371_v49  ;;  %v3499_v17 = vld [vmem:[#allocation2 + $0xc1] sm:$0xff]  ;;  %v3223_v23 = vadd.f32 %v3127_v4, %v2978_v14  ;;  %1420 = vst.msk [vmem:[#allocation3 + $0x78] sm:$0xff] %vm9867_vm14, %v1354_v7  ;;  %v2585_v18 = vld [vmem:[#allocation2 + $0x119] sm:$0xff]  ;;  %v2616_v20 = vmax.f32 %v2552_v11, %v2584_v12  ;;  %v9868_v49 = vld [vmem:[#allocation34_spill] sm:$0xff]  ;;  %v3436_v30 = vmax.f32 %v3340_v56, %v3404_v10 }
 0x210   : > { %v8769_v24 = vsel %vm1149_vm9, %v3626_v19, %v3562_v26  ;;  %v3531_v59 = vmax.f32 %v3467_v51, %v3499_v17  ;;  %v2521_v27 = vmax.f32 %v2425_v0, %v2489_v44  ;;  %5187 = vmatmul.msk.f32.gmra.mxu0 %vm1150_vm2, %v3851_v32  ;;  %v3595_v26 = vld [vmem:[#allocation2 + $0xc2] sm:$0xff]  ;;  %v8782_v55 = vld [vmem:[#allocation2 + $0xf8] sm:$0xff]  ;;  %v3749_v11 = vmax.f32 %v8388_v43, %v8316_v31  ;;  %v2059_v43 = vld [vmem:[#allocation3 + $0x30] sm:$0xff] }
 0x211   : > { %5131 = vmatmul.msk.f32.gmra.mxu2 %vm1150_vm2, %v9868_v49  ;;  %3690 = vst.msk [vmem:[#allocation2 + $0xb8] sm:$0xff] %vm1150_vm2, %v8769_v24  ;;  %v2680_v5 = vld [vmem:[#allocation2 + $0x112] sm:$0xff]  ;;  %v9870_v42 = vld [vmem:[#allocation37_spill] sm:$0xff]  ;;  %v8792_v44 = vmax.f32 %v2903_v9, %v8782_v55  ;;  %v3818_v56 = vmax.f32 %v8747_v46, %v8671_v54  ;;  %v2869_v32 = vmax.f32 %v2835_v52, %v8597_v25  ;;  %v2681_v31 = vld [vmem:[#allocation2 + $0x11a] sm:$0xff] }
 0x212   : > { %3255 = vst.msk [vmem:[#allocation3] sm:$0xff] %vm9869_vm11, %v3223_v23  ;;  %v8789_v19 = vmax.f32 %v3531_v59, %v3595_v26  ;;  %v8794_v12 = vld [vmem:[#allocation2 + $0x100] sm:$0xff]  ;;  %v2617_v14 = vmax.f32 %v2521_v27, %v2585_v18  ;;  %v2712_v7 = vmax.f32 %v2616_v20, %v2680_v5  ;;  %v8813_v23 = vld [vmem:[#allocation2 + $0xa8] sm:$0xff]  ;;  %v2836_v10 = vmax.f32 %v8649_v47, %v8489_v37  ;;  %vm9882_vm14 = vmmov %vm9787_vm0 }
 0x213   : > { %v8800_v0 = vmax.f32 %v2904_v22, %v8794_v12  ;;  %2775 = vst.msk [vmem:[#allocation2 + $0x108] sm:$0xff] %vm1150_vm2, %v8774_v15  ;;  %v2220_v4 = vpop.f32.mrf.mxu2  ;;  %5159 = vmatmul.msk.f32.gmra.mxu3 %vm1150_vm2, %v8459_v36  ;;  %v3783_v36 = vmax.f32 %v3749_v11, %v8487_v38  ;;  %v3852_v18 = vmax.f32 %v3818_v56, %v8813_v23  ;;  %v2979_v49 = vld [vmem:[#allocation3 + $0x8] sm:$0xff]  ;;  %vm9883_vm11 = vmmov %vm9787_vm0 }
 0x214   : > { %5107 = vmatmul.msk.f32.gmra.mxu1 %vm1150_vm2, %v9870_v42  ;;  %3691 = vst.msk [vmem:[#allocation2 + $0xc0] sm:$0xff] %vm1150_vm2, %v8789_v19  ;;  %v3309_v9 = vld [vmem:[#allocation2 + $0xce] sm:$0xff]  ;;  %v2304_v52 = vadd.f32 %v2220_v4, %v2059_v43  ;;  %v2649_v22 = vsel %vm1147_vm4, %v2617_v14, %v2521_v27  ;;  %v2840_v59 = vmax.f32 %v2712_v7, %v8732_v61  ;;  %v1357_v27 = vpop.f32.mrf.mxu1 }
 0x215   : > { %v3500_v46 = vld [vmem:[#allocation2 + $0xc9] sm:$0xff]  ;;  %v3341_v51 = vmax.f32 %v8740_v29, %v3309_v9  ;;  %2969 = vst.msk [vmem:[#allocation2 + $0xd8] sm:$0xff] %vm1150_vm2, %v8792_v44  ;;  %v2713_v20 = vmax.f32 %v2649_v22, %v2681_v31  ;;  %v3130_v26 = vpop.f32.mrf.mxu3  ;;  %v2905_v11 = vmax.f32 %v2869_v32, %v8782_v55  ;;  %v2837_v56 = vmax.f32 %v8712_v39, %v8597_v25  ;;  %v9874_v9 = vld [vmem:[#allocation24_spill] sm:$0xff] }
 0x216   : > { %v3532_v17 = vmax.f32 %v3436_v30, %v3500_v46  ;;  %2970 = vst.msk [vmem:[#allocation2 + $0xe0] sm:$0xff] %vm1150_vm2, %v8800_v0  ;;  %v3405_v42 = vld [vmem:[#allocation2 + $0xcf] sm:$0xff]  ;;  %v3224_v14 = vadd.f32 %v3130_v26, %v2979_v49  ;;  %v3750_v46 = vmax.f32 %v9874_v9, %v8423_v33  ;;  %v8840_v32 = vld [vmem:[#allocation2 + $0x120] sm:$0xff]  ;;  %v2874_v33 = vmax.f32 %v2840_v59, %v8794_v12 }
 0x217   : > { %2336 = vst.msk [vmem:[#allocation3 + $0x30] sm:$0xff] %vm9871_vm15, %v2304_v52  ;;  %v3373_v5 = vsel %vm1142_vm12, %v3341_v51, %v8740_v29  ;;  %v3596_v47 = vld [vmem:[#allocation2 + $0xca] sm:$0xff]  ;;  %v2870_v52 = vmax.f32 %v2836_v10, %v8632_v62  ;;  %v2838_v49 = vmax.f32 %v8717_v45, %v8632_v62  ;;  %v2871_v59 = vmax.f32 %v2837_v56, %v8664_v41  ;;  %vm9885_vm15 = vmmov %vm9787_vm0 }
 0x218   : > { %v3564_v37 = vsel %vm1147_vm4, %v3532_v17, %v3436_v30  ;;  %1421 = vst.msk [vmem:[#allocation3 + $0x80] sm:$0xff] %vm9872_vm3, %v1357_v27  ;;  %v3437_v31 = vmax.f32 %v3373_v5, %v3405_v42  ;;  %v9873_v4 = vld [vmem:[#allocation13_spill] sm:$0xff]  ;;  %5188 = vmatmul.msk.f32.gmra.mxu0 %vm1150_vm2, %v3852_v18  ;;  %v2745_v30 = vsel %vm1149_vm9, %v2713_v20, %v2649_v22  ;;  %v2060_v22 = vld [vmem:[#allocation3 + $0x38] sm:$0xff]  ;;  %vm9887_vm3 = vmmov %vm9787_vm0 }
 0x219   : > { %v3628_v43 = vmax.f32 %v3564_v37, %v3596_v47  ;;  %5132 = vmatmul.msk.f32.gmra.mxu2 %vm1150_vm2, %v9873_v4  ;;  %2776 = vst.msk [vmem:[#allocation2 + $0x110] sm:$0xff] %vm1150_vm2, %v2712_v7  ;;  %v3819_v17 = vmax.f32 %v3783_v36, %v8736_v48  ;;  %v2839_v36 = vmax.f32 %v8774_v15, %v8664_v41 }
 0x21a   : > { %3256 = vst.msk [vmem:[#allocation3 + $0x8] sm:$0xff] %vm9787_vm0, %v3224_v14  ;;  %v3469_v25 = vsel %vm1144_vm8, %v3437_v31, %v3373_v5  ;;  %v8850_v51 = vld [vmem:[#allocation2 + $0x108] sm:$0xff]  ;;  %v3784_v62 = vmax.f32 %v3750_v46, %v8531_v35  ;;  %v2906_v15 = vmax.f32 %v2870_v52, %v8794_v12  ;;  %v2980_v31 = vld [vmem:[#allocation3 + $0x10] sm:$0xff]  ;;  %v2872_v12 = vmax.f32 %v2838_v49, %v8732_v61 }
 0x21b   : > { %v8848_v39 = vsel %vm1149_vm9, %v3628_v43, %v3564_v37  ;;  %v8857_v7 = vmax.f32 %v2905_v11, %v8850_v51  ;;  %v2223_v10 = vpop.f32.mrf.mxu2  ;;  %5160 = vmatmul.msk.f32.gmra.mxu3 %vm1150_vm2, %v8499_v50  ;;  %2777 = vst.msk [vmem:[#allocation2 + $0x118] sm:$0xff] %vm1150_vm2, %v2745_v30  ;;  %v2910_v50 = vmax.f32 %v2874_v33, %v8840_v32  ;;  %v8871_v37 = vld [vmem:[#allocation2 + $0xb0] sm:$0xff] }
 0x21c   : > { %3692 = vst.msk [vmem:[#allocation2 + $0xc8] sm:$0xff] %vm1150_vm2, %v8848_v39  ;;  %v3310_v20 = vld [vmem:[#allocation2 + $0xd6] sm:$0xff]  ;;  %v2305_v26 = vadd.f32 %v2223_v10, %v2060_v22  ;;  %v2841_v11 = vmax.f32 %v2745_v30, %v8782_v55  ;;  %v3853_v14 = vmax.f32 %v3819_v17, %v8871_v37  ;;  %v1360_v56 = vpop.f32.mrf.mxu1  ;;  %v2907_v17 = vmax.f32 %v2871_v59, %v8850_v51 }
 0x21d   : > { %v3501_v18 = vld [vmem:[#allocation2 + $0xd1] sm:$0xff]  ;;  %v3311_v5 = vld [vmem:[#allocation2 + $0xde] sm:$0xff]  ;;  %v3342_v42 = vmax.f32 %v8792_v44, %v3310_v20  ;;  %2971 = vst.msk [vmem:[#allocation2 + $0xe8] sm:$0xff] %vm1150_vm2, %v8857_v7  ;;  %v3133_v43 = vpop.f32.mrf.mxu3  ;;  %v8882_v46 = vmax.f32 %v2910_v50, %v8564_v34  ;;  %v2873_v61 = vmax.f32 %v2839_v36, %v8782_v55  ;;  %v3820_v49 = vmax.f32 %v3784_v62, %v8813_v23 }
 0x21e   : > { %v3533_v27 = vmax.f32 %v3469_v25, %v3501_v18  ;;  %v3406_v45 = vld [vmem:[#allocation2 + $0xd7] sm:$0xff]  ;;  %v3343_v41 = vmax.f32 %v8800_v0, %v3311_v5  ;;  %2337 = vst.msk [vmem:[#allocation3 + $0x38] sm:$0xff] %vm9875_vm5, %v2305_v26  ;;  %v3225_v25 = vadd.f32 %v3133_v43, %v2980_v31  ;;  %v3407_v52 = vld [vmem:[#allocation2 + $0xdf] sm:$0xff]  ;;  %v2875_v20 = vmax.f32 %v2841_v11, %v8850_v51  ;;  %vm9892_vm5 = vmmov %vm9787_vm0 }
 0x21f   : > { %v3597_v47 = vld [vmem:[#allocation2 + $0xd2] sm:$0xff]  ;;  %v3438_v9 = vmax.f32 %v3342_v42, %v3406_v45  ;;  %1422 = vst.msk [vmem:[#allocation3 + $0x88] sm:$0xff] %vm9876_vm1, %v1360_v56  ;;  %v2061_v36 = vld [vmem:[#allocation3 + $0x40] sm:$0xff]  ;;  %v3755_v63 = vmax.f32 %v8789_v19, %v8736_v48 }
 0x220   : > { %v8879_v4 = vmax.f32 %v3533_v27, %v3597_v47  ;;  %v3375_v30 = vsel %vm1142_vm12, %v3343_v41, %v8800_v0  ;;  %v3502_v33 = vld [vmem:[#allocation2 + $0xd9] sm:$0xff]  ;;  %5189 = vmatmul.msk.f32.gmra.mxu0 %vm1150_vm2, %v3853_v14  ;;  %v2876_v10 = vld [vmem:[#allocation2 + $0x110] sm:$0xff]  ;;  %3257 = vst.msk [vmem:[#allocation3 + $0x10] sm:$0xff] %vm9877_vm6, %v3225_v25  ;;  %v2911_v14 = vmax.f32 %v2875_v20, %v8485_v6  ;;  %v2062_v20 = vld [vmem:[#allocation3 + $0x48] sm:$0xff] }
 0x221   : > { %5133 = vmatmul.msk.f32.gmra.mxu2 %vm1150_vm2, %v8353_v53  ;;  %v3439_v34 = vmax.f32 %v3375_v30, %v3407_v52  ;;  %v3534_v22 = vmax.f32 %v3438_v9, %v3502_v33  ;;  %v8898_v18 = vmax.f32 %v2906_v15, %v2876_v10  ;;  %v3751_v53 = vmax.f32 %v8574_v16, %v8487_v38  ;;  %v3598_v27 = vld [vmem:[#allocation2 + $0xda] sm:$0xff] }
 0x222   : > { %3693 = vst.msk [vmem:[#allocation2 + $0xd0] sm:$0xff] %vm1150_vm2, %v8879_v4  ;;  %v2877_v55 = vld [vmem:[#allocation2 + $0x118] sm:$0xff]  ;;  %v2908_v38 = vmax.f32 %v2872_v12, %v2876_v10  ;;  %v3789_v19 = vmax.f32 %v3755_v63, %v8871_v37 }
 0x223   : > { %v3471_v59 = vsel %vm1144_vm8, %v3439_v34, %v3375_v30  ;;  %v3566_v26 = vsel %vm1147_vm4, %v3534_v22, %v3438_v9  ;;  %2976 = vst.msk [vmem:[#allocation2 + $0x110] sm:$0xff] %vm1150_vm2, %v8882_v46  ;;  %v2226_v51 = vpop.f32.mrf.mxu2  ;;  %5161 = vmatmul.msk.f32.gmra.mxu3 %vm1150_vm2, %v8607_v3  ;;  %v8911_v16 = vmax.f32 %v2907_v17, %v2877_v55  ;;  %v8916_v41 = vld [vmem:[#allocation2 + $0xb8] sm:$0xff]  ;;  %v9880_v17 = vld [vmem:[#allocation8_spill] sm:$0xff] }
 0x224   : > { %v3630_v5 = vmax.f32 %v3566_v26, %v3598_v27  ;;  %v3312_v42 = vld [vmem:[#allocation2 + $0xe6] sm:$0xff]  ;;  %v2306_v62 = vadd.f32 %v2226_v51, %v2061_v36  ;;  %v2909_v47 = vmax.f32 %v2873_v61, %v2877_v55  ;;  %2972 = vst.msk [vmem:[#allocation2 + $0xf0] sm:$0xff] %vm1150_vm2, %v8898_v18  ;;  %v3854_v31 = vmax.f32 %v3820_v49, %v8916_v41  ;;  %v2981_v43 = vld [vmem:[#allocation3 + $0x18] sm:$0xff]  ;;  %v1363_v9 = vpop.f32.mrf.mxu1 }
 0x225   : > { %v3503_v50 = vld [vmem:[#allocation2 + $0xe1] sm:$0xff]  ;;  %v3344_v15 = vmax.f32 %v8857_v7, %v3312_v42  ;;  %2973 = vst.msk [vmem:[#allocation2 + $0xf8] sm:$0xff] %vm1150_vm2, %v8911_v16  ;;  %v3136_v56 = vpop.f32.mrf.mxu3  ;;  %v3785_v25 = vmax.f32 %v3751_v53, %v8622_v40  ;;  %v8932_v33 = vmax.f32 %v2908_v38, %v8840_v32  ;;  %v3752_v61 = vmax.f32 %v8637_v58, %v8531_v35 }
 0x226   : > { %v3535_v45 = vmax.f32 %v3471_v59, %v3503_v50  ;;  %v8920_v11 = vsel %vm1149_vm9, %v3630_v5, %v3566_v26  ;;  %v3599_v3 = vld [vmem:[#allocation2 + $0xe2] sm:$0xff]  ;;  %2338 = vst.msk [vmem:[#allocation3 + $0x40] sm:$0xff] %vm9878_vm7, %v2306_v62  ;;  %v3226_v30 = vadd.f32 %v3136_v56, %v2981_v43  ;;  %v8940_v34 = vmax.f32 %v2909_v47, %v8485_v6 }
 0x227   : > { %1423 = vst.msk [vmem:[#allocation3 + $0x90] sm:$0xff] %vm9879_vm10, %v1363_v9  ;;  %v3408_v52 = vld [vmem:[#allocation2 + $0xe7] sm:$0xff]  ;;  %v8946_v32 = vmax.f32 %v2911_v14, %v8643_v8  ;;  %v3821_v10 = vmax.f32 %v3785_v25, %v8871_v37  ;;  %v4020_v27 = vpop.f32.mrf.mxu0  ;;  %v3786_v36 = vmax.f32 %v3752_v61, %v8671_v54  ;;  %v3753_v47 = vmax.f32 %v8703_v1, %v8622_v40  ;;  %v8986_v40 = vld [vmem:[%s9559_s4] ss:$0 sm:$0xff] }
 0x228   : > { %v8928_v12 = vmax.f32 %v3535_v45, %v3599_v3  ;;  %5190 = vmatmul.msk.f32.gmra.mxu0 %vm1150_vm2, %v3854_v31  ;;  %3694 = vst.msk [vmem:[#allocation2 + $0xd8] sm:$0xff] %vm1150_vm2, %v8920_v11  ;;  %v3440_v22 = vmax.f32 %v3344_v15, %v3408_v52  ;;  %v3871_v26 = vld [vmem:[#allocation3] sm:$0xff] }
 0x229   : > { %5134 = vmatmul.msk.f32.gmra.mxu2 %vm1150_vm2, %v9880_v17  ;;  %3258 = vst.msk [vmem:[#allocation3 + $0x18] sm:$0xff] %vm9881_vm13, %v3226_v30  ;;  %v8958_v55 = vld [vmem:[#allocation2 + $0xc0] sm:$0xff]  ;;  %v4116_v51 = vadd.f32 %v4020_v27, %v3871_v26  ;;  %v3822_v1 = vmax.f32 %v3786_v36, %v8916_v41  ;;  %v8994_v52 = vmax.f32 %v3753_v47, %v8736_v48  ;;  %vm9893_vm13 = vmmov %vm9787_vm0 }
 0x22a   : > { %3695 = vst.msk [vmem:[#allocation2 + $0xe0] sm:$0xff] %vm1150_vm2, %v8928_v12  ;;  %v3855_v5 = vmax.f32 %v3821_v10, %v8958_v55 }
 0x22b   : > { %v2229_v49 = vpop.f32.mrf.mxu2  ;;  %5162 = vmatmul.msk.f32.gmra.mxu3 %vm1150_vm2, %v8640_v2  ;;  %2974 = vst.msk [vmem:[#allocation2 + $0x100] sm:$0xff] %vm1150_vm2, %v8932_v33  ;;  %v3313_v6 = vld [vmem:[#allocation2 + $0xee] sm:$0xff] }
 0x22c   : > { %v3504_v53 = vld [vmem:[#allocation2 + $0xe9] sm:$0xff]  ;;  %v2307_v59 = vadd.f32 %v2229_v49, %v2062_v20  ;;  %2975 = vst.msk [vmem:[#allocation2 + $0x108] sm:$0xff] %vm1150_vm2, %v8940_v34  ;;  %v3314_v35 = vld [vmem:[#allocation2 + $0xf6] sm:$0xff]  ;;  %v3345_v58 = vmax.f32 %v8898_v18, %v3313_v6 }
 0x22d   : > { %v3536_v8 = vmax.f32 %v3440_v22, %v3504_v53  ;;  %2977 = vst.msk [vmem:[#allocation2 + $0x118] sm:$0xff] %vm1150_vm2, %v8946_v32  ;;  %v3346_v2 = vmax.f32 %v8911_v16, %v3314_v35  ;;  %v3409_v50 = vld [vmem:[#allocation2 + $0xef] sm:$0xff]  ;;  %v3410_v38 = vld [vmem:[#allocation2 + $0xf7] sm:$0xff] }
 0x22e   : > { %2339 = vst.msk [vmem:[#allocation3 + $0x48] sm:$0xff] %vm9882_vm14, %v2307_v59  ;;  %v3377_v42 = vsel %vm1142_vm12, %v3345_v58, %v8898_v18  ;;  %v3600_v45 = vld [vmem:[#allocation2 + $0xea] sm:$0xff]  ;;  %v3601_v30 = vld [vmem:[#allocation2 + $0xf2] sm:$0xff]  ;;  %vm9894_vm14 = vmmov %vm9787_vm0 }
 0x22f   : > { %v3568_v62 = vsel %vm1147_vm4, %v3536_v8, %v3440_v22  ;;  %v3441_v15 = vmax.f32 %v3377_v42, %v3409_v50  ;;  %v3442_v3 = vmax.f32 %v3346_v2, %v3410_v38  ;;  %4148 = vst.msk [vmem:[#allocation3] sm:$0xff] %vm9883_vm11, %v4116_v51  ;;  %v3505_v43 = vld [vmem:[#allocation2 + $0xf1] sm:$0xff]  ;;  %v9001_v8 = vld [vmem:[#allocation2 + $0xc8] sm:$0xff]  ;;  %vm9895_vm11 = vmmov %vm9787_vm0 }
 0x230   : > { %v3632_v14 = vmax.f32 %v3568_v62, %v3600_v45  ;;  %5191 = vmatmul.msk.f32.gmra.mxu0 %vm1150_vm2, %v3855_v5  ;;  %v3856_v5 = vmax.f32 %v3822_v1, %v9001_v8 }
 0x231   : > { %5135 = vmatmul.msk.f32.gmra.mxu2 %vm1150_vm2, %v8419_v60  ;;  %v3473_v31 = vsel %vm1144_vm8, %v3441_v15, %v3377_v42 }
 0x232   : > { %v8981_v56 = vsel %vm1149_vm9, %v3632_v14, %v3568_v62  ;;  %v3315_v9 = vld [vmem:[#allocation2 + $0xfe] sm:$0xff]  ;;  %v3537_v60 = vmax.f32 %v3473_v31, %v3505_v43  ;;  %v3823_v62 = vmax.f32 %v8994_v52, %v8958_v55  ;;  %v2063_v43 = vld [vmem:[#allocation3 + $0x50] sm:$0xff] }
 0x233   : > { %v3506_v25 = vld [vmem:[#allocation2 + $0xf9] sm:$0xff]  ;;  %3696 = vst.msk [vmem:[#allocation2 + $0xe8] sm:$0xff] %vm1150_vm2, %v8981_v56  ;;  %5163 = vmatmul.msk.f32.gmra.mxu3 %vm1150_vm2, %v8681_v28  ;;  %v3316_v17 = vld [vmem:[#allocation2 + $0x106] sm:$0xff]  ;;  %v3317_v22 = vld [vmem:[#allocation2 + $0x10e] sm:$0xff]  ;;  %v3347_v61 = vmax.f32 %v8932_v33, %v3315_v9  ;;  %v3754_v28 = vmax.f32 %v8769_v24, %v8671_v54  ;;  %v2232_v1 = vpop.f32.mrf.mxu2 }
 0x234   : > { %v3412_v10 = vld [vmem:[#allocation2 + $0x107] sm:$0xff]  ;;  %v3538_v20 = vmax.f32 %v3442_v3, %v3506_v25  ;;  %v3318_v49 = vld [vmem:[#allocation2 + $0x116] sm:$0xff]  ;;  %v3348_v6 = vmax.f32 %v8940_v34, %v3316_v17  ;;  %v3349_v53 = vmax.f32 %v8882_v46, %v3317_v22  ;;  %v8999_v58 = vmax.f32 %v3537_v60, %v3601_v30  ;;  %v3411_v36 = vld [vmem:[#allocation2 + $0xff] sm:$0xff]  ;;  %v3139_v25 = vpop.f32.mrf.mxu3 }
 0x235   : > { %v3413_v59 = vld [vmem:[#allocation2 + $0x10f] sm:$0xff]  ;;  %v3414_v35 = vld [vmem:[#allocation2 + $0x117] sm:$0xff]  ;;  %v3350_v26 = vmax.f32 %v8946_v32, %v3318_v49  ;;  %v3379_v27 = vsel %vm1142_vm12, %v3347_v61, %v8932_v33  ;;  %v2982_v9 = vld [vmem:[#allocation3 + $0x20] sm:$0xff]  ;;  %v2308_v17 = vadd.f32 %v2232_v1, %v2063_v43  ;;  %v1366_v61 = vpop.f32.mrf.mxu1 }
 0x236   : > { %v3508_v2 = vld [vmem:[#allocation2 + $0x109] sm:$0xff]  ;;  %v3570_v51 = vsel %vm1147_vm4, %v3538_v20, %v3442_v3  ;;  %v3381_v42 = vsel %vm1142_vm12, %v3349_v53, %v8882_v46  ;;  %v3443_v50 = vmax.f32 %v3379_v27, %v3411_v36  ;;  %v3444_v38 = vmax.f32 %v3348_v6, %v3412_v10  ;;  %v3602_v54 = vld [vmem:[#allocation2 + $0xfa] sm:$0xff]  ;;  %3697 = vst.msk [vmem:[#allocation2 + $0xf0] sm:$0xff] %vm1150_vm2, %v8999_v58  ;;  %v3509_v15 = vld [vmem:[#allocation2 + $0x111] sm:$0xff]  ;;  %v4023_v20 = vpop.f32.mrf.mxu0 }
 0x237   : > { %v4180_v24 = vld [vmem:[#allocation3] sm:$0xff]  ;;  %v3445_v45 = vmax.f32 %v3381_v42, %v3413_v59  ;;  %v3446_v47 = vmax.f32 %v3350_v26, %v3414_v35  ;;  %v3634_v14 = vmax.f32 %v3570_v51, %v3602_v54  ;;  %v3227_v22 = vadd.f32 %v3139_v25, %v2982_v9  ;;  %v3872_v10 = vld [vmem:[#allocation3 + $0x8] sm:$0xff]  ;;  %vm9884_vm12 = vmmov %vm9787_vm0  ;;  %2340 = vst.msk [vmem:[#allocation3 + $0x50] sm:$0xff] %vm9885_vm15, %v2308_v17 }
 0x238   : > { %v3510_v3 = vld [vmem:[#allocation2 + $0x119] sm:$0xff]  ;;  %v9020_v31 = vadd.f32 %v8986_v40, %v4180_v24  ;;  %5192 = vmatmul.msk.f32.gmra.mxu0 %vm1150_vm2, %v3856_v5  ;;  %v3475_v60 = vsel %vm1144_vm8, %v3443_v50, %v3379_v27  ;;  %v3507_v30 = vld [vmem:[#allocation2 + $0x101] sm:$0xff]  ;;  %v3540_v52 = vmax.f32 %v3444_v38, %v3508_v2  ;;  %v3604_v53 = vld [vmem:[#allocation2 + $0x10a] sm:$0xff]  ;;  %1424 = vst.msk [vmem:[#allocation3 + $0x98] sm:$0xff] %vm9884_vm12, %v1366_v61 }
 0x239   : > { %5136 = vmatmul.msk.f32.gmra.mxu2 %vm1150_vm2, %v8473_v57  ;;  %v3477_v49 = vsel %vm1144_vm8, %v3445_v45, %v3381_v42  ;;  %v3539_v6 = vmax.f32 %v3475_v60, %v3507_v30  ;;  %v4117_v57 = vadd.f32 %v4023_v20, %v3872_v10  ;;  %v3542_v26 = vmax.f32 %v3446_v47, %v3510_v3  ;;  %v3603_v27 = vld [vmem:[#allocation2 + $0x102] sm:$0xff]  ;;  %v3605_v36 = vld [vmem:[#allocation2 + $0x112] sm:$0xff]  ;;  %v3606_v2 = vld [vmem:[#allocation2 + $0x11a] sm:$0xff] }
 0x23a   : > { %v5207_v59 = vmul.f32 -1.442695, %v9020_v31  ;;  %v3541_v35 = vmax.f32 %v3477_v49, %v3509_v15  ;;  %v3572_v13 = vsel %vm1147_vm4, %v3540_v52, %v3444_v38  ;;  %v9040_v42 = vsel %vm1149_vm9, %v3634_v14, %v3570_v51  ;;  %vm9886_vm8 = vmmov %vm9787_vm0  ;;  %v9046_v24 = vld [vmem:[#allocation2 + $0xd0] sm:$0xff]  ;;  %v9888_v3 = vld [vmem:[#allocation17_spill] sm:$0xff] }
 0x23b   : > { %5164 = vmatmul.msk.f32.gmra.mxu3 %vm1150_vm2, %v8740_v29  ;;  %v9036_v5 = vmax.f32 %v3539_v6, %v3603_v27  ;;  %3259 = vst.msk [vmem:[#allocation3 + $0x20] sm:$0xff] %vm9886_vm8, %v3227_v22  ;;  %v3574_v50 = vsel %vm1147_vm4, %v3542_v26, %v3446_v47  ;;  %v3636_v54 = vmax.f32 %v3572_v13, %v3604_v53  ;;  %v9078_v1 = vld [vmem:[#allocation2 + $0xd8] sm:$0xff]  ;;  %v2235_v60 = vpop.f32.mrf.mxu2  ;;  %v2983_v30 = vld [vmem:[#allocation3 + $0x28] sm:$0xff]  ;;  %v3873_v10 = vld [vmem:[#allocation3 + $0x10] sm:$0xff] }
 0x23c   : > { %5401 = vpow2.f32 %v5207_v59  ;;  %4149 = vst.msk [vmem:[#allocation3 + $0x8] sm:$0xff] %vm9887_vm3, %v4117_v57  ;;  %v9048_v29 = vmax.f32 %v3541_v35, %v3605_v36  ;;  %v3638_v38 = vmax.f32 %v3574_v50, %v3606_v2  ;;  %v3857_v45 = vmax.f32 %v3823_v62, %v9046_v24  ;;  %v2064_v25 = vld [vmem:[#allocation3 + $0x58] sm:$0xff]  ;;  %v3142_v52 = vpop.f32.mrf.mxu3  ;;  %vm9889_vm4 = vmmov %vm9787_vm0  ;;  %v9890_v6 = vld [vmem:[#allocation10_spill] sm:$0xff] }
 0x23d   : > { %v3788_v15 = vmax.f32 %v3754_v28, %v8813_v23  ;;  %v9054_v51 = vsel %vm1149_vm9, %v3636_v54, %v3572_v13  ;;  %3698 = vst.msk [vmem:[#allocation2 + $0xf8] sm:$0xff] %vm1150_vm2, %v9040_v42  ;;  %v2309_v17 = vadd.f32 %v2235_v60, %v2064_v25  ;;  %v3228_v22 = vadd.f32 %v3142_v52, %v2983_v30  ;;  %v1369_v61 = vpop.f32.mrf.mxu1  ;;  %v9098_v26 = vld [vmem:[#allocation2 + $0xe0] sm:$0xff]  ;;  %v9116_v25 = vld [vmem:[#allocation2 + $0xe8] sm:$0xff]  ;;  %v3874_v60 = vld [vmem:[#allocation3 + $0x18] sm:$0xff] }
 0x23e   : > { %v9060_v47 = vsel %vm1149_vm9, %v3638_v38, %v3574_v50  ;;  %3699 = vst.msk [vmem:[#allocation2 + $0x100] sm:$0xff] %vm1150_vm2, %v9036_v5  ;;  %vm9891_vm9 = vmmov %vm9787_vm0  ;;  %v3756_v53 = vmax.f32 %v8848_v39, %v8813_v23  ;;  %v3825_v59 = vmax.f32 %v3789_v19, %v9046_v24  ;;  %v3757_v38 = vmax.f32 %v8879_v4, %v8871_v37 }
 0x23f   : > { %3700 = vst.msk [vmem:[#allocation2 + $0x108] sm:$0xff] %vm1150_vm2, %v9054_v51  ;;  %v3824_v62 = vmax.f32 %v3788_v15, %v9001_v8  ;;  %vm9897_vm12 = vmmov %vm9787_vm0 }
 0x240   : > { %5193 = vmatmul.msk.f32.gmra.mxu0 %vm1150_vm2, %v3857_v45  ;;  %3701 = vst.msk [vmem:[#allocation2 + $0x110] sm:$0xff] %vm1150_vm2, %v9048_v29  ;;  %v3790_v27 = vmax.f32 %v3756_v53, %v8916_v41  ;;  %v3859_v2 = vmax.f32 %v3825_v59, %v9098_v26  ;;  %vm9898_vm15 = vmmov %vm9787_vm0  ;;  %v9145_v59 = vld [vmem:[#allocation2 + $0xf0] sm:$0xff] }
 0x241   : > { %5137 = vmatmul.msk.f32.gmra.mxu2 %vm1150_vm2, %v9888_v3  ;;  %3702 = vst.msk [vmem:[#allocation2 + $0x118] sm:$0xff] %vm1150_vm2, %v9060_v47  ;;  %v3858_v48 = vmax.f32 %v3824_v62, %v9078_v1  ;;  %v2065_v62 = vld [vmem:[#allocation3 + $0x60] sm:$0xff] }
 0x242   : > { %v5402_v28 = vpop.eup %5401  ;;  %1425 = vst.msk [vmem:[#allocation3 + $0xa0] sm:$0xff] %vm9889_vm4, %v1369_v61 }
 0x243   : > { %v4344_v14 = vadd.f32 1.0, %v5402_v28  ;;  %5165 = vmatmul.msk.f32.gmra.mxu3 %vm1150_vm2, %v8792_v44  ;;  %v4181_v43 = vld [vmem:[#allocation3 + $0x8] sm:$0xff]  ;;  %v4026_v44 = vpop.f32.mrf.mxu0  ;;  %2341 = vst.msk [vmem:[#allocation3 + $0x58] sm:$0xff] %vm9891_vm9, %v2309_v17  ;;  %v2238_v63 = vpop.f32.mrf.mxu2 }
 0x244   : > { %v9081_v9 = vadd.f32 %v8986_v40, %v4181_v43  ;;  %v4118_v49 = vadd.f32 %v4026_v44, %v3873_v10  ;;  %3260 = vst.msk [vmem:[#allocation3 + $0x28] sm:$0xff] %vm9787_vm0, %v3228_v22  ;;  %v3145_v43 = vpop.f32.mrf.mxu3  ;;  %v2310_v4 = vadd.f32 %v2238_v63, %v2065_v62  ;;  %v9896_v10 = vld [vmem:[#allocation16_spill] sm:$0xff] }
 0x245   : > { %5403 = vrcp.f32 %v4344_v14  ;;  %v4387_v23 = vand.u32 2147483648, %v4344_v14  ;;  %v4385_v50 = vand.u32 2147483647, %v4344_v14  ;;  %vm4381_vm6 = vweird.f32 %v4344_v14  ;;  %v3875_v63 = vld [vmem:[#allocation3 + $0x20] sm:$0xff] }
 0x246   : > { %v5208_v20 = vmul.f32 -1.442695, %v9081_v9  ;;  %4150 = vst.msk [vmem:[#allocation3 + $0x10] sm:$0xff] %vm9892_vm5, %v4118_v49  ;;  %vm9899_vm5 = vmmov %vm9787_vm0 }
 0x247   : > { %v4388_v3 = vor.u32 1.1754944e-38, %v4387_v23  ;;  %vm4386_vm10 = vcmp.eq.f32.partialorder %v4385_v50, 8.507059e+37  ;;  %2342 = vst.msk [vmem:[#allocation3 + $0x60] sm:$0xff] %vm9894_vm14, %v2310_v4 }
 0x248   : > { %5194 = vmatmul.msk.f32.gmra.mxu0 %vm1150_vm2, %v3858_v48  ;;  %5405 = vpow2.f32 %v5208_v20  ;;  %v3791_v48 = vmax.f32 %v3757_v38, %v8958_v55 }
 0x249   : > { %5138 = vmatmul.msk.f32.gmra.mxu2 %vm1150_vm2, %v9890_v6 }
 0x24a   : > { %v3827_v49 = vmax.f32 %v3791_v48, %v9098_v26 }
 0x24b   : > { %v5404_v57 = vpop.eup %5403  ;;  %5166 = vmatmul.msk.f32.gmra.mxu3 %vm1150_vm2, %v8800_v0  ;;  %v3826_v0 = vmax.f32 %v3790_v27, %v9078_v1  ;;  %v4029_v30 = vpop.f32.mrf.mxu0 }
 0x24c   : > { %v4377_v35 = vmul.f32 %v5404_v57, %v4344_v14  ;;  %vm4382_vm1 = vweird.f32 %v5404_v57  ;;  %v1372_v14 = vpop.f32.mrf.mxu1  ;;  %v4119_v61 = vadd.f32 %v4029_v30, %v3874_v60  ;;  %v2241_v38 = vpop.f32.mrf.mxu2  ;;  %v3760_v30 = vmax.f32 %v8981_v56, %v9001_v8 }
 0x24d   : > { %v4182_v15 = vld [vmem:[#allocation3 + $0x10] sm:$0xff]  ;;  %vm4383_vm7 = vmor %vm4381_vm6, %vm4382_vm1  ;;  %v3860_v52 = vmax.f32 %v3826_v0, %v9116_v25  ;;  %1426 = vst.msk [vmem:[#allocation3 + $0xa8] sm:$0xff] %vm9893_vm13, %v1372_v14  ;;  %v2066_v0 = vld [vmem:[#allocation3 + $0x68] sm:$0xff] }
 0x24e   : > { %v4378_v36 = vsub.f32 1.0, %v4377_v35  ;;  %v5406_v39 = vpop.eup %5405  ;;  %v9114_v28 = vadd.f32 %v8986_v40, %v4182_v15  ;;  %4151 = vst.msk [vmem:[#allocation3 + $0x18] sm:$0xff] %vm9898_vm15, %v4119_v61  ;;  %vm9900_vm1 = vmmov %vm9787_vm0 }
 0x24f   : > { %v9105_v54 = vadd.f32 1.0, %v5406_v39  ;;  %v3759_v39 = vmax.f32 %v8928_v12, %v8958_v55  ;;  %vm9901_vm6 = vmmov %vm9787_vm0 }
 0x250   : > { %v4379_v13 = vmul.f32 %v5404_v57, %v4378_v36  ;;  %5195 = vmatmul.msk.f32.gmra.mxu0 %vm1150_vm2, %v3859_v2  ;;  %v5209_v17 = vmul.f32 -1.442695, %v9114_v28  ;;  %vm9904_vm15 = vmmov %vm9787_vm0 }
 0x251   : > { %5139 = vmatmul.msk.f32.gmra.mxu2 %vm1150_vm2, %v8589_v21  ;;  %5407 = vrcp.f32 %v9105_v54  ;;  %v4402_v53 = vand.u32 2147483648, %v9105_v54  ;;  %vm4396_vm3 = vweird.f32 %v9105_v54  ;;  %v3793_v60 = vmax.f32 %v3759_v39, %v9046_v24 }
 0x252   : > { %v4380_v45 = vadd.f32 %v5404_v57, %v4379_v13  ;;  %5409 = vpow2.f32 %v5209_v17  ;;  %v3761_v39 = vmax.f32 %v8999_v58, %v9046_v24 }
 0x253   : > { %5167 = vmatmul.msk.f32.gmra.mxu3 %vm1150_vm2, %v8857_v7  ;;  %v2984_v7 = vld [vmem:[#allocation3 + $0x30] sm:$0xff]  ;;  %v3829_v48 = vmax.f32 %v3793_v60, %v9145_v59 }
 0x254   : > { %v4384_v21 = vsel %vm4383_vm7, %v5404_v57, %v4380_v45  ;;  %v3229_v22 = vadd.f32 %v3145_v43, %v2984_v7  ;;  %v3148_v45 = vpop.f32.mrf.mxu3  ;;  %v1375_v62 = vpop.f32.mrf.mxu1  ;;  %v9164_v7 = vld [vmem:[#allocation2 + $0xf8] sm:$0xff]  ;;  %vm9902_vm7 = vmmov %vm9787_vm0 }
 0x255   : > { %v4389_v37 = vsel %vm4386_vm10, %v4388_v3, %v4384_v21  ;;  %v4183_v23 = vld [vmem:[#allocation3 + $0x18] sm:$0xff]  ;;  %v2311_v3 = vadd.f32 %v2241_v38, %v2066_v0  ;;  %v4032_v43 = vpop.f32.mrf.mxu0  ;;  %1427 = vst.msk [vmem:[#allocation3 + $0xb0] sm:$0xff] %vm9787_vm0, %v1375_v62 }
 0x256   : > { %v4856_v19 = vmul.f32 %v4389_v37, %v9020_v31  ;;  %3261 = vst.msk [vmem:[#allocation3 + $0x30] sm:$0xff] %vm9897_vm12, %v3229_v22  ;;  %v3758_v31 = vmax.f32 %v8920_v11, %v8916_v41  ;;  %v4400_v41 = vand.u32 2147483647, %v9105_v54  ;;  %v3861_v11 = vmax.f32 %v3827_v49, %v9145_v59  ;;  %v2985_v21 = vld [vmem:[#allocation3 + $0x38] sm:$0xff]  ;;  %vm9903_vm12 = vmmov %vm9787_vm0 }
 0x257   : > { %v5408_v44 = vpop.eup %5407  ;;  %v9155_v50 = vadd.f32 %v8986_v40, %v4183_v23  ;;  %v3230_v37 = vadd.f32 %v3148_v45, %v2985_v21  ;;  %v4120_v4 = vadd.f32 %v4032_v43, %v3875_v63  ;;  %2343 = vst.msk [vmem:[#allocation3 + $0x68] sm:$0xff] %vm9899_vm5, %v2311_v3 }
 0x258   : > { %4888 = vst.msk [vmem:[%s9123_s23] sm:$0xff] %vm9895_vm11, %v4856_v19  ;;  %5196 = vmatmul.msk.f32.gmra.mxu0 %vm1150_vm2, %v3860_v52  ;;  %v4392_v20 = vmul.f32 %v5408_v44, %v9105_v54  ;;  %v3792_v57 = vmax.f32 %v3758_v31, %v9001_v8  ;;  %v5410_v35 = vpop.eup %5409  ;;  %vm4397_vm8 = vweird.f32 %v5408_v44  ;;  %vm4401_vm9 = vcmp.eq.f32.partialorder %v4400_v41, 8.507059e+37 }
 0x259   : > { %5140 = vmatmul.msk.f32.gmra.mxu2 %vm1150_vm2, %v9896_v10  ;;  %v4346_v36 = vadd.f32 1.0, %v5410_v35  ;;  %vm4398_vm4 = vmor %vm4396_vm3, %vm4397_vm8  ;;  %v5210_v55 = vmul.f32 -1.442695, %v9155_v50  ;;  %3262 = vst.msk [vmem:[#allocation3 + $0x38] sm:$0xff] %vm9901_vm6, %v3230_v37  ;;  %v3794_v31 = vmax.f32 %v3760_v30, %v9078_v1  ;;  %v9209_v37 = vld [vmem:[#allocation2 + $0x110] sm:$0xff] }
 0x25a   : > { %v4393_v6 = vsub.f32 1.0, %v4392_v20  ;;  %v3828_v54 = vmax.f32 %v3792_v57, %v9116_v25  ;;  %4152 = vst.msk [vmem:[#allocation3 + $0x20] sm:$0xff] %vm9902_vm7, %v4120_v4  ;;  %v2244_v57 = vpop.f32.mrf.mxu2  ;;  %vm9905_vm8 = vmmov %vm9787_vm0 }
 0x25b   : > { %5168 = vmatmul.msk.f32.gmra.mxu3 %vm1150_vm2, %v8898_v18  ;;  %v4403_v18 = vor.u32 1.1754944e-38, %v4402_v53  ;;  %5411 = vrcp.f32 %v4346_v36  ;;  %v4417_v19 = vand.u32 2147483648, %v4346_v36  ;;  %v4415_v61 = vand.u32 2147483647, %v4346_v36  ;;  %v2067_v53 = vld [vmem:[#allocation3 + $0x70] sm:$0xff]  ;;  %vm9906_vm3 = vmmov %vm9787_vm0 }
 0x25c   : > { %v4394_v27 = vmul.f32 %v5408_v44, %v4393_v6  ;;  %5413 = vpow2.f32 %v5210_v55  ;;  %v3862_v14 = vmax.f32 %v3828_v54, %v9164_v7  ;;  %vm4411_vm13 = vweird.f32 %v4346_v36  ;;  %v3151_v35 = vpop.f32.mrf.mxu3  ;;  %v9195_v54 = vld [vmem:[#allocation2 + $0x108] sm:$0xff]  ;;  %vm9908_vm6 = vmmov %vm9906_vm3 }
 0x25d   : > { %v4418_v8 = vor.u32 1.1754944e-38, %v4417_v19  ;;  %vm4416_vm11 = vcmp.eq.f32.partialorder %v4415_v61, 8.507059e+37  ;;  %v2312_v41 = vadd.f32 %v2244_v57, %v2067_v53  ;;  %v3830_v23 = vmax.f32 %v3794_v31, %v9164_v7  ;;  %v3877_v61 = vld [vmem:[#allocation3 + $0x30] sm:$0xff]  ;;  %vm9909_vm7 = vmmov %vm9906_vm3 }
 0x25e   : > { %v4395_v2 = vadd.f32 %v5408_v44, %v4394_v27 }
 0x25f   : > { %2344 = vst.msk [vmem:[#allocation3 + $0x70] sm:$0xff] %vm9904_vm15, %v2312_v41  ;;  %v3864_v24 = vmax.f32 %v3830_v23, %v9195_v54 }
 0x260   : > { %5197 = vmatmul.msk.f32.gmra.mxu0 %vm1150_vm2, %v3861_v11  ;;  %v4399_v13 = vsel %vm4398_vm4, %v5408_v44, %v4395_v2  ;;  %v9178_v44 = vld [vmem:[#allocation2 + $0x100] sm:$0xff]  ;;  %v3876_v2 = vld [vmem:[#allocation3 + $0x28] sm:$0xff]  ;;  %vm9907_vm4 = vmmov %vm9787_vm0 }
 0x261   : > { %v4404_v15 = vsel %vm4401_vm9, %v4403_v18, %v4399_v13  ;;  %v3863_v56 = vmax.f32 %v3829_v48, %v9178_v44  ;;  %v4184_v49 = vld [vmem:[#allocation3 + $0x20] sm:$0xff]  ;;  %v4035_v18 = vpop.f32.mrf.mxu0 }
 0x262   : > { %v4857_v12 = vmul.f32 %v4404_v15, %v9081_v9  ;;  %v2986_v11 = vld [vmem:[#allocation3 + $0x40] sm:$0xff]  ;;  %v4121_v45 = vadd.f32 %v4035_v18, %v3876_v2  ;;  %v2247_v30 = vpop.f32.mrf.mxu2 }
 0x263   : > { %5169 = vmatmul.msk.f32.gmra.mxu3 %vm1150_vm2, %v8911_v16  ;;  %v5412_v16 = vpop.eup %5411  ;;  %v3231_v38 = vadd.f32 %v3151_v35, %v2986_v11 }
 0x264   : > { %4889 = vst.msk [vmem:[%s9123_s23 + $0x8] sm:$0xff] %vm9900_vm1, %v4857_v12  ;;  %v4407_v9 = vmul.f32 %v5412_v16, %v4346_v36  ;;  %v5414_v17 = vpop.eup %5413  ;;  %vm4412_vm10 = vweird.f32 %v5412_v16  ;;  %v1378_v36 = vpop.f32.mrf.mxu1 }
 0x265   : > { %v4347_v10 = vadd.f32 1.0, %v5414_v17  ;;  %vm4413_vm14 = vmor %vm4411_vm13, %vm4412_vm10  ;;  %1428 = vst.msk [vmem:[#allocation3 + $0xb8] sm:$0xff] %vm9903_vm12, %v1378_v36  ;;  %v2987_v17 = vld [vmem:[#allocation3 + $0x48] sm:$0xff] }
 0x266   : > { %v4408_v52 = vsub.f32 1.0, %v4407_v9  ;;  %3263 = vst.msk [vmem:[#allocation3 + $0x40] sm:$0xff] %vm9906_vm3, %v3231_v38  ;;  %v2068_v9 = vld [vmem:[#allocation3 + $0x78] sm:$0xff]  ;;  %vm9910_vm10 = vmmov %vm9906_vm3 }
 0x267   : > { %5415 = vrcp.f32 %v4347_v10  ;;  %4153 = vst.msk [vmem:[#allocation3 + $0x28] sm:$0xff] %vm9907_vm4, %v4121_v45  ;;  %v4432_v21 = vand.u32 2147483648, %v4347_v10  ;;  %v4430_v43 = vand.u32 2147483647, %v4347_v10  ;;  %vm4426_vm0 = vweird.f32 %v4347_v10  ;;  %vm9911_vm13 = vmmov %vm9906_vm3 }
 0x268   : > { %5198 = vmatmul.msk.f32.gmra.mxu0 %vm1150_vm2, %v3862_v14  ;;  %v4409_v22 = vmul.f32 %v5412_v16, %v4408_v52  ;;  %v3154_v52 = vpop.f32.mrf.mxu3  ;;  %v2313_v19 = vadd.f32 %v2247_v30, %v2068_v9  ;;  %vm9913_vm4 = vmmov %vm9906_vm3  ;;  %v3804_v9 = vld [vmem:[#allocation2 + $0x128] sm:$0xff] }
 0x269   : > { %v4433_v14 = vor.u32 1.1754944e-38, %v4432_v21  ;;  %vm4431_vm1 = vcmp.eq.f32.partialorder %v4430_v43, 8.507059e+37  ;;  %v3878_v21 = vld [vmem:[#allocation3 + $0x38] sm:$0xff] }
 0x26a   : > { %v4410_v20 = vadd.f32 %v5412_v16, %v4409_v22  ;;  %2345 = vst.msk [vmem:[#allocation3 + $0x78] sm:$0xff] %vm9909_vm7, %v2313_v19 }
 0x26b   : > { %5170 = vmatmul.msk.f32.gmra.mxu3 %vm1150_vm2, %v8932_v33  ;;  %v9183_v33 = vadd.f32 %v8986_v40, %v4184_v49  ;;  %v3763_v49 = vmax.f32 %v9036_v5, %v9098_v26 }
 0x26c   : > { %v4414_v6 = vsel %vm4413_vm14, %v5412_v16, %v4410_v20  ;;  %v1381_v22 = vpop.f32.mrf.mxu1  ;;  %vm9912_vm14 = vmmov %vm9906_vm3 }
 0x26d   : > { %v4419_v27 = vsel %vm4416_vm11, %v4418_v8, %v4414_v6  ;;  %v5211_v0 = vmul.f32 -1.442695, %v9183_v33  ;;  %v5416_v15 = vpop.eup %5415  ;;  %1429 = vst.msk [vmem:[#allocation3 + $0xc0] sm:$0xff] %vm9908_vm6, %v1381_v22  ;;  %v3797_v35 = vmax.f32 %v3763_v49, %v9145_v59 }
 0x26e   : > { %v4858_v13 = vmul.f32 %v4419_v27, %v9114_v28  ;;  %v4422_v58 = vmul.f32 %v5416_v15, %v4347_v10  ;;  %v3795_v28 = vmax.f32 %v3761_v39, %v9098_v26  ;;  %vm4427_vm9 = vweird.f32 %v5416_v15  ;;  %v4185_v60 = vld [vmem:[#allocation3 + $0x28] sm:$0xff]  ;;  %v4038_v10 = vpop.f32.mrf.mxu0  ;;  %v9235_v39 = vld [vmem:[#allocation2 + $0x120] sm:$0xff] }
 0x26f   : > { %5417 = vpow2.f32 %v5211_v0  ;;  %vm4428_vm5 = vmor %vm4426_vm0, %vm4427_vm9  ;;  %v9213_v16 = vadd.f32 %v8986_v40, %v4185_v60  ;;  %v4122_v8 = vadd.f32 %v4038_v10, %v3877_v61  ;;  %v3833_v18 = vmax.f32 %v3797_v35, %v9209_v37 }
 0x270   : > { %5199 = vmatmul.msk.f32.gmra.mxu0 %vm1150_vm2, %v3863_v56  ;;  %4890 = vst.msk [vmem:[%s9123_s23 + $0x10] sm:$0xff] %vm9905_vm8, %v4858_v13  ;;  %v4423_v3 = vsub.f32 1.0, %v4422_v58  ;;  %v3831_v12 = vmax.f32 %v3795_v28, %v9178_v44  ;;  %v3232_v56 = vadd.f32 %v3154_v52, %v2987_v17  ;;  %v2250_v58 = vpop.f32.mrf.mxu2  ;;  %vm9914_vm9 = vmmov %vm9906_vm3  ;;  %v3766_v61 = vmax.f32 %v9060_v47, %v9164_v7 }
 0x271   : > { %v5212_v20 = vmul.f32 -1.442695, %v9213_v16  ;;  %4154 = vst.msk [vmem:[#allocation3 + $0x30] sm:$0xff] %vm9912_vm14, %v4122_v8  ;;  %vm9915_vm0 = vmmov %vm9906_vm3 }
 0x272   : > { %v4424_v63 = vmul.f32 %v5416_v15, %v4423_v3  ;;  %3264 = vst.msk [vmem:[#allocation3 + $0x48] sm:$0xff] %vm9911_vm13, %v3232_v56  ;;  %vm9917_vm13 = vmmov %vm9915_vm0 }
 0x273   : > { %5171 = vmatmul.msk.f32.gmra.mxu3 %vm1150_vm2, %v8940_v34  ;;  %v3762_v34 = vmax.f32 %v9040_v42, %v9078_v1  ;;  %vm9918_vm14 = vmmov %vm9915_vm0 }
 0x274   : > { %v4425_v4 = vadd.f32 %v5416_v15, %v4424_v63 }
 0x275   : > { %v5418_v62 = vpop.eup %5417  ;;  %v3796_v42 = vmax.f32 %v3762_v34, %v9116_v25 }
 0x276   : > { %v4348_v55 = vadd.f32 1.0, %v5418_v62  ;;  %v4429_v1 = vsel %vm4428_vm5, %v5416_v15, %v4425_v4  ;;  %v2069_v15 = vld [vmem:[#allocation3 + $0x80] sm:$0xff]  ;;  %v4041_v34 = vpop.f32.mrf.mxu0  ;;  %v3867_v62 = vmax.f32 %v3833_v18, %v9235_v39  ;;  %vm9916_vm5 = vmmov %vm9915_vm0 }
 0x277   : > { %v4434_v48 = vsel %vm4431_vm1, %v4433_v14, %v4429_v1  ;;  %v3832_v6 = vmax.f32 %v3796_v42, %v9195_v54  ;;  %v2314_v3 = vadd.f32 %v2250_v58, %v2069_v15  ;;  %v3765_v14 = vmax.f32 %v9048_v29, %v9145_v59 }
 0x278   : > { %5200 = vmatmul.msk.f32.gmra.mxu0 %vm1150_vm2, %v3864_v24  ;;  %5419 = vrcp.f32 %v4348_v55  ;;  %v4859_v31 = vmul.f32 %v4434_v48, %v9155_v50  ;;  %v3802_v50 = vld [vmem:[#allocation2 + $0x118] sm:$0xff]  ;;  %v4447_v5 = vand.u32 2147483648, %v4348_v55  ;;  %v4445_v36 = vand.u32 2147483647, %v4348_v55  ;;  %v4186_v0 = vld [vmem:[#allocation3 + $0x30] sm:$0xff]  ;;  %v3157_v24 = vpop.f32.mrf.mxu3 }
 0x279   : > { %5421 = vpow2.f32 %v5212_v20  ;;  %v3866_v41 = vmax.f32 %v3832_v6, %v3802_v50  ;;  %vm4441_vm12 = vweird.f32 %v4348_v55  ;;  %v9238_v45 = vadd.f32 %v8986_v40, %v4186_v0  ;;  %2346 = vst.msk [vmem:[#allocation3 + $0x80] sm:$0xff] %vm9913_vm4, %v2314_v3  ;;  %v2253_v20 = vpop.f32.mrf.mxu2 }
 0x27a   : > { %4891 = vst.msk [vmem:[%s9123_s23 + $0x18] sm:$0xff] %vm9910_vm10, %v4859_v31  ;;  %v4448_v13 = vor.u32 1.1754944e-38, %v4447_v5  ;;  %vm4446_vm8 = vcmp.eq.f32.partialorder %v4445_v36, 8.507059e+37  ;;  %v3799_v30 = vmax.f32 %v3765_v14, %v9178_v44  ;;  %v2070_v31 = vld [vmem:[#allocation3 + $0x88] sm:$0xff] }
 0x27b   : > { %5172 = vmatmul.msk.f32.gmra.mxu3 %vm1150_vm2, %v8882_v46  ;;  %v3865_v46 = vmax.f32 %v3831_v12, %v9209_v37  ;;  %v5213_v12 = vmul.f32 -1.442695, %v9238_v45  ;;  %v4123_v37 = vadd.f32 %v4041_v34, %v3878_v21  ;;  %v2315_v6 = vadd.f32 %v2253_v20, %v2070_v31 }
 0x27c   : > { %v3835_v8 = vmax.f32 %v3799_v30, %v9235_v39 }
 0x27d   : > { %4155 = vst.msk [vmem:[#allocation3 + $0x38] sm:$0xff] %vm9916_vm5, %v4123_v37  ;;  %vm9922_vm5 = vmmov %vm9915_vm0 }
 0x27e   : > { %v5420_v53 = vpop.eup %5419  ;;  %v4044_v35 = vpop.f32.mrf.mxu0  ;;  %2347 = vst.msk [vmem:[#allocation3 + $0x88] sm:$0xff] %vm9918_vm14, %v2315_v6 }
 0x27f   : > { %v4437_v57 = vmul.f32 %v5420_v53, %v4348_v55  ;;  %v5422_v26 = vpop.eup %5421  ;;  %vm4442_vm11 = vweird.f32 %v5420_v53 }
 0x280   : > { %5201 = vmatmul.msk.f32.gmra.mxu0 %vm1150_vm2, %v3865_v46  ;;  %v4349_v2 = vadd.f32 1.0, %v5422_v26  ;;  %vm4443_vm15 = vmor %vm4441_vm12, %vm4442_vm11  ;;  %v3160_v56 = vpop.f32.mrf.mxu3 }
 0x281   : > { %v4438_v27 = vsub.f32 1.0, %v4437_v57  ;;  %v3879_v57 = vld [vmem:[#allocation3 + $0x40] sm:$0xff]  ;;  %vm9919_vm11 = vmmov %vm9915_vm0 }
 0x282   : > { %5423 = vrcp.f32 %v4349_v2  ;;  %v4462_v1 = vand.u32 2147483648, %v4349_v2  ;;  %v4460_v48 = vand.u32 2147483647, %v4349_v2  ;;  %vm4456_vm6 = vweird.f32 %v4349_v2  ;;  %vm9920_vm12 = vmmov %vm9915_vm0 }
 0x283   : > { %5173 = vmatmul.msk.f32.gmra.mxu3 %vm1150_vm2, %v8946_v32  ;;  %v4439_v11 = vmul.f32 %v5420_v53, %v4438_v27  ;;  %v3764_v32 = vmax.f32 %v9054_v51, %v9116_v25  ;;  %v2988_v51 = vld [vmem:[#allocation3 + $0x50] sm:$0xff]  ;;  %v1384_v25 = vpop.f32.mrf.mxu1  ;;  %5425 = vpow2.f32 %v5213_v12  ;;  %v4124_v5 = vadd.f32 %v4044_v35, %v3879_v57  ;;  %v3880_v12 = vld [vmem:[#allocation3 + $0x48] sm:$0xff] }
 0x284   : > { %v3233_v55 = vadd.f32 %v3157_v24, %v2988_v51  ;;  %1430 = vst.msk [vmem:[#allocation3 + $0xc8] sm:$0xff] %vm9906_vm3, %v1384_v25  ;;  %v4463_v29 = vor.u32 1.1754944e-38, %v4462_v1  ;;  %v4187_v59 = vld [vmem:[#allocation3 + $0x38] sm:$0xff]  ;;  %vm4461_vm10 = vcmp.eq.f32.partialorder %v4460_v48, 8.507059e+37  ;;  %v3837_v27 = vld [vmem:[#allocation2 + $0x130] sm:$0xff]  ;;  %v2256_v25 = vpop.f32.mrf.mxu2 }
 0x285   : > { %v4440_v23 = vadd.f32 %v5420_v53, %v4439_v11  ;;  %v3798_v63 = vmax.f32 %v3764_v32, %v9164_v7  ;;  %v9258_v44 = vadd.f32 %v8986_v40, %v4187_v59  ;;  %v3869_v26 = vmax.f32 %v3835_v8, %v3837_v27  ;;  %v2071_v51 = vld [vmem:[#allocation3 + $0x90] sm:$0xff]  ;;  %v2072_v59 = vld [vmem:[#allocation3 + $0x98] sm:$0xff] }
 0x286   : > { %3265 = vst.msk [vmem:[#allocation3 + $0x50] sm:$0xff] %vm9915_vm0, %v3233_v55  ;;  %v3800_v11 = vmax.f32 %v3766_v61, %v9195_v54  ;;  %v4047_v55 = vpop.f32.mrf.mxu0 }
 0x287   : > { %v4444_v38 = vsel %vm4443_vm15, %v5420_v53, %v4440_v23  ;;  %v3834_v60 = vmax.f32 %v3798_v63, %v3802_v50  ;;  %v2989_v53 = vld [vmem:[#allocation3 + $0x58] sm:$0xff]  ;;  %v5214_v7 = vmul.f32 -1.442695, %v9258_v44  ;;  %vm9921_vm15 = vmmov %vm9915_vm0  ;;  %v2990_v63 = vld [vmem:[#allocation3 + $0x60] sm:$0xff] }
 0x288   : > { %5202 = vmatmul.msk.f32.gmra.mxu0 %vm1150_vm2, %v3866_v41  ;;  %v4449_v28 = vsel %vm4446_vm8, %v4448_v13, %v4444_v38  ;;  %v5424_v4 = vpop.eup %5423  ;;  %v3234_v41 = vadd.f32 %v3160_v56, %v2989_v53  ;;  %4156 = vst.msk [vmem:[#allocation3 + $0x40] sm:$0xff] %vm9921_vm15, %v4124_v5  ;;  %v3836_v18 = vmax.f32 %v3800_v11, %v3804_v9  ;;  %v3838_v23 = vld [vmem:[#allocation2 + $0x138] sm:$0xff]  ;;  %v3163_v21 = vpop.f32.mrf.mxu3  ;;  %v2991_v56 = vld [vmem:[#allocation3 + $0x68] sm:$0xff]  ;;  %vm9928_vm15 = vmmov %vm9915_vm0 }
 0x289   : > { %v4860_v43 = vmul.f32 %v4449_v28, %v9183_v33  ;;  %v4452_v33 = vmul.f32 %v5424_v4, %v4349_v2  ;;  %v5426_v52 = vpop.eup %5425  ;;  %vm4457_vm1 = vweird.f32 %v5424_v4  ;;  %v3868_v19 = vmax.f32 %v3834_v60, %v3804_v9 }
 0x28a   : > { %v4350_v17 = vadd.f32 1.0, %v5426_v52  ;;  %vm4458_vm7 = vmor %vm4456_vm6, %vm4457_vm1  ;;  %3266 = vst.msk [vmem:[#allocation3 + $0x58] sm:$0xff] %vm9920_vm12, %v3234_v41  ;;  %v3870_v54 = vmax.f32 %v3836_v18, %v3838_v23  ;;  %v3235_v14 = vadd.f32 %v3163_v21, %v2990_v63  ;;  %v9297_v18 = vld [vmem:[%s9559_s4] ss:$0 sm:$0xff] }
 0x28b   : > { %4892 = vst.msk [vmem:[%s9123_s23 + $0x20] sm:$0xff] %vm9914_vm9, %v4860_v43  ;;  %v4453_v42 = vsub.f32 1.0, %v4452_v33  ;;  %v1387_v50 = vpop.f32.mrf.mxu1  ;;  %v4125_v33 = vadd.f32 %v4047_v55, %v3880_v12  ;;  %vm9923_vm1 = vmmov %vm9915_vm0  ;;  %v2073_v23 = vld [vmem:[#allocation3 + $0xa0] sm:$0xff] }
 0x28c   : > { %5427 = vrcp.f32 %v4350_v17  ;;  %1431 = vst.msk [vmem:[#allocation3 + $0xd0] sm:$0xff] %vm9917_vm13, %v1387_v50  ;;  %v4477_v32 = vand.u32 2147483648, %v4350_v17  ;;  %v4475_v0 = vand.u32 2147483647, %v4350_v17  ;;  %vm4471_vm3 = vweird.f32 %v4350_v17  ;;  %vm9925_vm6 = vmmov %vm9915_vm0  ;;  %v2259_v61 = vpop.f32.mrf.mxu2 }
 0x28d   : > { %v4454_v46 = vmul.f32 %v5424_v4, %v4453_v42  ;;  %5429 = vpow2.f32 %v5214_v7  ;;  %4157 = vst.msk [vmem:[#allocation3 + $0x48] sm:$0xff] %vm9925_vm6, %v4125_v33  ;;  %v2317_v20 = vadd.f32 %v2259_v61, %v2072_v59  ;;  %vm9927_vm12 = vmmov %vm9915_vm0 }
 0x28e   : > { %v4478_v58 = vor.u32 1.1754944e-38, %v4477_v32  ;;  %vm4476_vm9 = vcmp.eq.f32.partialorder %v4475_v0, 8.507059e+37  ;;  %v4050_v6 = vpop.f32.mrf.mxu0  ;;  %vm9932_vm6 = vmmov %vm9923_vm1 }
 0x28f   : > { %v4455_v22 = vadd.f32 %v5424_v4, %v4454_v46  ;;  %v4188_v24 = vld [vmem:[#allocation3 + $0x40] sm:$0xff]  ;;  %2349 = vst.msk [vmem:[#allocation3 + $0x98] sm:$0xff] %vm9927_vm12, %v2317_v20 }
 0x290   : > { %5203 = vmatmul.msk.f32.gmra.mxu0 %vm1150_vm2, %v3867_v62  ;;  %v9272_v3 = vadd.f32 %v8986_v40, %v4188_v24  ;;  %v2316_v62 = vadd.f32 %v2256_v25, %v2071_v51 }
 0x291   : > { %v4459_v10 = vsel %vm4458_vm7, %v5424_v4, %v4455_v22 }
 0x292   : > { %v4464_v49 = vsel %vm4461_vm10, %v4463_v29, %v4459_v10  ;;  %v5428_v36 = vpop.eup %5427  ;;  %v5215_v4 = vmul.f32 -1.442695, %v9272_v3  ;;  %2348 = vst.msk [vmem:[#allocation3 + $0x90] sm:$0xff] %vm9922_vm5, %v2316_v62  ;;  %v3166_v10 = vpop.f32.mrf.mxu3 }
 0x293   : > { %v4861_v47 = vmul.f32 %v4464_v49, %v9213_v16  ;;  %v4467_v2 = vmul.f32 %v5428_v36, %v4350_v17  ;;  %v5430_v39 = vpop.eup %5429  ;;  %vm4472_vm8 = vweird.f32 %v5428_v36  ;;  %v1390_v43 = vpop.f32.mrf.mxu1  ;;  %v3881_v49 = vld [vmem:[#allocation3 + $0x50] sm:$0xff]  ;;  %v3236_v57 = vadd.f32 %v3166_v10, %v2991_v56 }
 0x294   : > { %v4351_v38 = vadd.f32 1.0, %v5430_v39  ;;  %vm4473_vm4 = vmor %vm4471_vm3, %vm4472_vm8  ;;  %1432 = vst.msk [vmem:[#allocation3 + $0xd8] sm:$0xff] %vm9915_vm0, %v1390_v43  ;;  %v4189_v17 = vld [vmem:[#allocation3 + $0x48] sm:$0xff]  ;;  %v4126_v35 = vadd.f32 %v4050_v6, %v3881_v49  ;;  %v2262_v39 = vpop.f32.mrf.mxu2 }
 0x295   : > { %4893 = vst.msk [vmem:[%s9123_s23 + $0x28] sm:$0xff] %vm9919_vm11, %v4861_v47  ;;  %v4468_v16 = vsub.f32 1.0, %v4467_v2  ;;  %v9284_v29 = vadd.f32 %v8986_v40, %v4189_v17  ;;  %vm9926_vm11 = vmmov %vm9915_vm0 }
 0x296   : > { %5431 = vrcp.f32 %v4351_v38  ;;  %v4492_v9 = vand.u32 2147483648, %v4351_v38  ;;  %v4490_v52 = vand.u32 2147483647, %v4351_v38  ;;  %vm4486_vm10 = vweird.f32 %v4351_v38  ;;  %vm9929_vm8 = vmmov %vm9915_vm0  ;;  %v4053_v24 = vpop.f32.mrf.mxu0 }
 0x297   : > { %v4469_v13 = vmul.f32 %v5428_v36, %v4468_v16  ;;  %5433 = vpow2.f32 %v5215_v4  ;;  %v5216_v50 = vmul.f32 -1.442695, %v9284_v29  ;;  %3268 = vst.msk [vmem:[#allocation3 + $0x68] sm:$0xff] %vm9929_vm8, %v3236_v57  ;;  %vm9930_vm3 = vmmov %vm9915_vm0 }
 0x298   : > { %5204 = vmatmul.msk.f32.gmra.mxu0 %vm1150_vm2, %v3868_v19  ;;  %v4493_v19 = vor.u32 1.1754944e-38, %v4492_v9  ;;  %vm4491_vm14 = vcmp.eq.f32.partialorder %v4490_v52, 8.507059e+37  ;;  %4158 = vst.msk [vmem:[#allocation3 + $0x50] sm:$0xff] %vm9930_vm3, %v4126_v35  ;;  %vm9936_vm8 = vmmov %vm9923_vm1 }
 0x299   : > { %v4470_v15 = vadd.f32 %v5428_v36, %v4469_v13  ;;  %vm9937_vm3 = vmmov %vm9923_vm1 }
 0x29a   : > { %v3169_v13 = vpop.f32.mrf.mxu3 }
 0x29b   : > { %v4474_v28 = vsel %vm4473_vm4, %v5428_v36, %v4470_v15  ;;  %v1393_v8 = vpop.f32.mrf.mxu1  ;;  %v2992_v15 = vld [vmem:[#allocation3 + $0x70] sm:$0xff] }
 0x29c   : > { %v4479_v34 = vsel %vm4476_vm9, %v4478_v58, %v4474_v28  ;;  %v5432_v60 = vpop.eup %5431  ;;  %1433 = vst.msk [vmem:[#allocation3 + $0xe0] sm:$0xff] %vm9926_vm11, %v1393_v8  ;;  %v3882_v58 = vld [vmem:[#allocation3 + $0x58] sm:$0xff]  ;;  %v3237_v25 = vadd.f32 %v3169_v13, %v2992_v15  ;;  %v2265_v9 = vpop.f32.mrf.mxu2 }
 0x29d   : > { %v4862_v37 = vmul.f32 %v4479_v34, %v9238_v45  ;;  %v4482_v42 = vmul.f32 %v5432_v60, %v4351_v38  ;;  %v5434_v45 = vpop.eup %5433  ;;  %vm4487_vm7 = vweird.f32 %v5432_v60  ;;  %v2318_v38 = vadd.f32 %v2262_v39, %v2073_v23 }
 0x29e   : > { %v4352_v46 = vadd.f32 1.0, %v5434_v45  ;;  %vm4488_vm13 = vmor %vm4486_vm10, %vm4487_vm7  ;;  %v4127_v21 = vadd.f32 %v4053_v24, %v3882_v58  ;;  %v4056_v17 = vpop.f32.mrf.mxu0 }
 0x29f   : > { %4894 = vst.msk [vmem:[%s9123_s23 + $0x30] sm:$0xff] %vm9923_vm1, %v4862_v37  ;;  %v4483_v1 = vsub.f32 1.0, %v4482_v42  ;;  %v4190_v2 = vld [vmem:[#allocation3 + $0x50] sm:$0xff]  ;;  %vm9933_vm7 = vmmov %vm9923_vm1 }
 0x2a0   : > { %5205 = vmatmul.msk.f32.gmra.mxu0 %vm1150_vm2, %v3869_v26  ;;  %5435 = vrcp.f32 %v4352_v46  ;;  %v4507_v7 = vand.u32 2147483648, %v4352_v46  ;;  %v4505_v5 = vand.u32 2147483647, %v4352_v46  ;;  %vm4501_vm9 = vweird.f32 %v4352_v46  ;;  %3269 = vst.msk [vmem:[#allocation3 + $0x70] sm:$0xff] %vm9933_vm7, %v3237_v25  ;;  %vm9934_vm10 = vmmov %vm9923_vm1 }
 0x2a1   : > { %v4484_v30 = vmul.f32 %v5432_v60, %v4483_v1  ;;  %5437 = vpow2.f32 %v5216_v50  ;;  %v9300_v32 = vadd.f32 %v9297_v18, %v4190_v2  ;;  %4159 = vst.msk [vmem:[#allocation3 + $0x58] sm:$0xff] %vm9934_vm10, %v4127_v21  ;;  %v2074_v1 = vld [vmem:[#allocation3 + $0xa8] sm:$0xff]  ;;  %vm9941_vm7 = vmmov %vm9937_vm3 }
 0x2a2   : > { %v4508_v36 = vor.u32 1.1754944e-38, %v4507_v7  ;;  %vm4506_vm5 = vcmp.eq.f32.partialorder %v4505_v5, 8.507059e+37  ;;  %v3172_v45 = vpop.f32.mrf.mxu3  ;;  %v2319_v52 = vadd.f32 %v2265_v9, %v2074_v1  ;;  %vm9942_vm10 = vmmov %vm9937_vm3 }
 0x2a3   : > { %v4485_v48 = vadd.f32 %v5432_v60, %v4484_v30  ;;  %v5217_v51 = vmul.f32 -1.442695, %v9300_v32 }
 0x2a4   : > { %2351 = vst.msk [vmem:[#allocation3 + $0xa8] sm:$0xff] %vm9936_vm8, %v2319_v52  ;;  %v2268_v7 = vpop.f32.mrf.mxu2 }
 0x2a5   : > { %v4489_v22 = vsel %vm4488_vm13, %v5432_v60, %v4485_v48 }
 0x2a6   : > { %v4494_v31 = vsel %vm4491_vm14, %v4493_v19, %v4489_v22  ;;  %v5436_v40 = vpop.eup %5435  ;;  %v4059_v2 = vpop.f32.mrf.mxu0 }
 0x2a7   : > { %v4863_v53 = vmul.f32 %v4494_v31, %v9258_v44  ;;  %v4497_v27 = vmul.f32 %v5436_v40, %v4352_v46  ;;  %v5438_v44 = vpop.eup %5437  ;;  %vm4502_vm4 = vweird.f32 %v5436_v40  ;;  %v2993_v46 = vld [vmem:[#allocation3 + $0x78] sm:$0xff] }
 0x2a8   : > { %5206 = vmatmul.msk.f32.gmra.mxu0 %vm1150_vm2, %v3870_v54  ;;  %vm9924_vm2 = vmmov %vm9915_vm0  ;;  %v4353_v26 = vadd.f32 1.0, %v5438_v44  ;;  %v1396_v54 = vpop.f32.mrf.mxu1  ;;  %v4191_v33 = vld [vmem:[#allocation3 + $0x58] sm:$0xff]  ;;  %v3238_v61 = vadd.f32 %v3172_v45, %v2993_v46 }
 0x2a9   : > { %3267 = vst.msk [vmem:[#allocation3 + $0x60] sm:$0xff] %vm9924_vm2, %v3235_v14  ;;  %v4498_v47 = vsub.f32 1.0, %v4497_v27  ;;  %vm4503_vm0 = vmor %vm4501_vm9, %vm4502_vm4  ;;  %v9311_v42 = vadd.f32 %v9297_v18, %v4191_v33 }
 0x2aa   : > { %4895 = vst.msk [vmem:[%s9123_s23 + $0x38] sm:$0xff] %vm9928_vm15, %v4863_v53  ;;  %5439 = vrcp.f32 %v4353_v26  ;;  %vm9931_vm2 = vmmov %vm9923_vm1  ;;  %v4522_v43 = vand.u32 2147483648, %v4353_v26  ;;  %v4520_v55 = vand.u32 2147483647, %v4353_v26  ;;  %vm4516_vm14 = vweird.f32 %v4353_v26  ;;  %v3175_v44 = vpop.f32.mrf.mxu3 }
 0x2ab   : > { %v4499_v41 = vmul.f32 %v5436_v40, %v4498_v47  ;;  %1434 = vst.msk [vmem:[#allocation3 + $0xe8] sm:$0xff] %vm9923_vm1, %v1396_v54  ;;  %5441 = vpow2.f32 %v5217_v51  ;;  %v5218_v59 = vmul.f32 -1.442695, %v9311_v42  ;;  %vm9935_vm15 = vmmov %vm9923_vm1  ;;  %v2075_v47 = vld [vmem:[#allocation3 + $0xb0] sm:$0xff] }
 0x2ac   : > { %2350 = vst.msk [vmem:[#allocation3 + $0xa0] sm:$0xff] %vm9931_vm2, %v2318_v38  ;;  %v4523_v14 = vor.u32 1.1754944e-38, %v4522_v43  ;;  %vm4521_vm12 = vcmp.eq.f32.partialorder %v4520_v55, 8.507059e+37  ;;  %vm9938_vm4 = vmmov %vm9923_vm1  ;;  %v2320_v5 = vadd.f32 %v2268_v7, %v2075_v47  ;;  %v2271_v43 = vpop.f32.mrf.mxu2 }
 0x2ad   : > { %v4500_v11 = vadd.f32 %v5436_v40, %v4499_v41  ;;  %3270 = vst.msk [vmem:[#allocation3 + $0x78] sm:$0xff] %vm9938_vm4, %v3238_v61  ;;  %vm9939_vm9 = vmmov %vm9923_vm1 }
 0x2ae   : > { %2352 = vst.msk [vmem:[#allocation3 + $0xb0] sm:$0xff] %vm9941_vm7, %v2320_v5  ;;  %vm9945_vm4 = vmmov %vm9937_vm3 }
 0x2af   : > { %v4504_v16 = vsel %vm4503_vm0, %v5436_v40, %v4500_v11 }
 0x2b0   : > { %v4509_v0 = vsel %vm4506_vm5, %v4508_v36, %v4504_v16  ;;  %v5440_v34 = vpop.eup %5439  ;;  %v1399_v48 = vpop.f32.mrf.mxu1  ;;  %v3883_v19 = vld [vmem:[#allocation3 + $0x60] sm:$0xff]  ;;  %v3884_v36 = vld [vmem:[#allocation3 + $0x68] sm:$0xff] }
 0x2b1   : > { %v4864_v28 = vmul.f32 %v4509_v0, %v9272_v3  ;;  %v4512_v62 = vmul.f32 %v5440_v34, %v4353_v26  ;;  %v5442_v3 = vpop.eup %5441  ;;  %vm4517_vm13 = vweird.f32 %v5440_v34  ;;  %1435 = vst.msk [vmem:[#allocation3 + $0xf0] sm:$0xff] %vm9935_vm15, %v1399_v48  ;;  %v4128_v10 = vadd.f32 %v4056_v17, %v3883_v19  ;;  %v2994_v26 = vld [vmem:[#allocation3 + $0x80] sm:$0xff] }
 0x2b2   : > { %v4354_v37 = vadd.f32 1.0, %v5442_v3  ;;  %vm4518_vm11 = vmor %vm4516_vm14, %vm4517_vm13  ;;  %v3239_v39 = vadd.f32 %v3175_v44, %v2994_v26  ;;  %v4129_v13 = vadd.f32 %v4059_v2, %v3884_v36  ;;  %v3178_v3 = vpop.f32.mrf.mxu3 }
 0x2b3   : > { %4896 = vst.msk [vmem:[%s9123_s23 + $0x40] sm:$0xff] %vm9932_vm6, %v4864_v28  ;;  %v4513_v63 = vsub.f32 1.0, %v4512_v62  ;;  %vm9940_vm6 = vmmov %vm9937_vm3 }
 0x2b4   : > { %5443 = vrcp.f32 %v4354_v37  ;;  %4160 = vst.msk [vmem:[#allocation3 + $0x60] sm:$0xff] %vm9939_vm9, %v4128_v10  ;;  %v4537_v8 = vand.u32 2147483648, %v4354_v37  ;;  %v4535_v6 = vand.u32 2147483647, %v4354_v37  ;;  %vm4531_vm5 = vweird.f32 %v4354_v37  ;;  %vm9943_vm13 = vmmov %vm9937_vm3 }
 0x2b5   : > { %v4514_v12 = vmul.f32 %v5440_v34, %v4513_v63  ;;  %5445 = vpow2.f32 %v5218_v59  ;;  %3271 = vst.msk [vmem:[#allocation3 + $0x80] sm:$0xff] %vm9943_vm13, %v3239_v39  ;;  %vm9944_vm14 = vmmov %vm9937_vm3  ;;  %v2076_v63 = vld [vmem:[#allocation3 + $0xb8] sm:$0xff] }
 0x2b6   : > { %v4538_v57 = vor.u32 1.1754944e-38, %v4537_v8  ;;  %vm4536_vm2 = vcmp.eq.f32.partialorder %v4535_v6, 8.507059e+37  ;;  %4161 = vst.msk [vmem:[#allocation3 + $0x68] sm:$0xff] %vm9944_vm14, %v4129_v13  ;;  %v2321_v55 = vadd.f32 %v2271_v43, %v2076_v63  ;;  %vm9946_vm9 = vmmov %vm9937_vm3  ;;  %v2996_v6 = vld [vmem:[#allocation3 + $0x90] sm:$0xff] }
 0x2b7   : > { %v4515_v4 = vadd.f32 %v5440_v34, %v4514_v12 }
 0x2b8   : > { %v1402_v11 = vpop.f32.mrf.mxu1  ;;  %2353 = vst.msk [vmem:[#allocation3 + $0xb8] sm:$0xff] %vm9937_vm3, %v2321_v55 }
 0x2b9   : > { %v4519_v60 = vsel %vm4518_vm11, %v5440_v34, %v4515_v4  ;;  %1436 = vst.msk [vmem:[#allocation3 + $0xf8] sm:$0xff] %vm9940_vm6, %v1402_v11  ;;  %v3885_v4 = vld [vmem:[#allocation3 + $0x70] sm:$0xff] }
 0x2ba   : > { %v4524_v30 = vsel %vm4521_vm12, %v4523_v14, %v4519_v60  ;;  %v5444_v31 = vpop.eup %5443  ;;  %v4062_v14 = vpop.f32.mrf.mxu0 }
 0x2bb   : > { %v4865_v22 = vmul.f32 %v4524_v30, %v9284_v29  ;;  %v4527_v20 = vmul.f32 %v5444_v31, %v4354_v37  ;;  %v5446_v29 = vpop.eup %5445  ;;  %vm4532_vm0 = vweird.f32 %v5444_v31  ;;  %v4192_v35 = vld [vmem:[#allocation3 + $0x60] sm:$0xff]  ;;  %v2995_v37 = vld [vmem:[#allocation3 + $0x88] sm:$0xff]  ;;  %v4130_v9 = vadd.f32 %v4062_v14, %v3885_v4  ;;  %v3181_v8 = vpop.f32.mrf.mxu3 }
 0x2bc   : > { %v4355_v53 = vadd.f32 1.0, %v5446_v29  ;;  %vm4533_vm1 = vmor %vm4531_vm5, %vm4532_vm0  ;;  %v9322_v27 = vadd.f32 %v9297_v18, %v4192_v35  ;;  %v3240_v1 = vadd.f32 %v3178_v3, %v2995_v37 }
 0x2bd   : > { %4897 = vst.msk [vmem:[%s9123_s23 + $0x48] sm:$0xff] %vm9937_vm3, %v4865_v22  ;;  %v4528_v56 = vsub.f32 1.0, %v4527_v20  ;;  %v4193_v21 = vld [vmem:[#allocation3 + $0x68] sm:$0xff]  ;;  %vm9947_vm0 = vmmov %vm9937_vm3  ;;  %v2077_v20 = vld [vmem:[#allocation3 + $0xc0] sm:$0xff] }
 0x2be   : > { %5447 = vrcp.f32 %v4355_v53  ;;  %v5219_v23 = vmul.f32 -1.442695, %v9322_v27  ;;  %v4552_v54 = vand.u32 2147483648, %v4355_v53  ;;  %v4550_v24 = vand.u32 2147483647, %v4355_v53  ;;  %3272 = vst.msk [vmem:[#allocation3 + $0x88] sm:$0xff] %vm9946_vm9, %v3240_v1  ;;  %vm9948_vm7 = vmmov %vm9947_vm0 }
 0x2bf   : > { %v4529_v49 = vmul.f32 %v5444_v31, %v4528_v56  ;;  %vm4546_vm12 = vweird.f32 %v4355_v53  ;;  %v9333_v62 = vadd.f32 %v9297_v18, %v4193_v21  ;;  %4162 = vst.msk [vmem:[#allocation3 + $0x70] sm:$0xff] %vm9947_vm0, %v4130_v9  ;;  %v2274_v56 = vpop.f32.mrf.mxu2  ;;  %vm9950_vm13 = vmmov %vm9947_vm0 }
 0x2c0   : > { %5449 = vpow2.f32 %v5219_v23  ;;  %v4553_v25 = vor.u32 1.1754944e-38, %v4552_v54  ;;  %vm4551_vm8 = vcmp.eq.f32.partialorder %v4550_v24, 8.507059e+37  ;;  %vm9951_vm14 = vmmov %vm9947_vm0  ;;  %v3887_v24 = vld [vmem:[#allocation3 + $0x80] sm:$0xff] }
 0x2c1   : > { %v4530_v50 = vadd.f32 %v5444_v31, %v4529_v49  ;;  %v5220_v60 = vmul.f32 -1.442695, %v9333_v62  ;;  %v2322_v49 = vadd.f32 %v2274_v56, %v2077_v20  ;;  %vm9952_vm3 = vmmov %vm9947_vm0 }
 0x2c2   : > { %vm9954_vm9 = vmmov %vm9947_vm0 }
 0x2c3   : > { %v4534_v40 = vsel %vm4533_vm1, %v5444_v31, %v4530_v50  ;;  %v4065_v50 = vpop.f32.mrf.mxu0  ;;  %2354 = vst.msk [vmem:[#allocation3 + $0xc0] sm:$0xff] %vm9948_vm7, %v2322_v49  ;;  %vm9955_vm7 = vmmov %vm9947_vm0 }
 0x2c4   : > { %v4539_v41 = vsel %vm4536_vm2, %v4538_v57, %v4534_v40  ;;  %v5448_v0 = vpop.eup %5447  ;;  %v3241_v40 = vadd.f32 %v3181_v8, %v2996_v6 }
 0x2c5   : > { %v4866_v16 = vmul.f32 %v4539_v41, %v9300_v32  ;;  %v4542_v38 = vmul.f32 %v5448_v0, %v4355_v53  ;;  %vm4547_vm11 = vweird.f32 %v5448_v0  ;;  %v3886_v53 = vld [vmem:[#allocation3 + $0x78] sm:$0xff] }
 0x2c6   : > { %v5450_v32 = vpop.eup %5449  ;;  %vm4548_vm15 = vmor %vm4546_vm12, %vm4547_vm11  ;;  %v4194_v61 = vld [vmem:[#allocation3 + $0x70] sm:$0xff]  ;;  %v4131_v47 = vadd.f32 %v4065_v50, %v3886_v53  ;;  %3273 = vst.msk [vmem:[#allocation3 + $0x90] sm:$0xff] %vm9950_vm13, %v3241_v40 }
 0x2c7   : > { %4898 = vst.msk [vmem:[%s9123_s23 + $0x50] sm:$0xff] %vm9942_vm10, %v4866_v16  ;;  %v4543_v15 = vsub.f32 1.0, %v4542_v38  ;;  %v4356_v28 = vadd.f32 1.0, %v5450_v32  ;;  %v9343_v31 = vadd.f32 %v9297_v18, %v4194_v61  ;;  %vm9949_vm10 = vmmov %vm9947_vm0  ;;  %v2277_v38 = vpop.f32.mrf.mxu2 }
 0x2c8   : > { %4163 = vst.msk [vmem:[#allocation3 + $0x78] sm:$0xff] %vm9951_vm14, %v4131_v47  ;;  %vm9957_vm13 = vmmov %vm9947_vm0 }
 0x2c9   : > { %v4544_v58 = vmul.f32 %v5448_v0, %v4543_v15  ;;  %5451 = vrcp.f32 %v4356_v28  ;;  %v4567_v46 = vand.u32 2147483648, %v4356_v28  ;;  %vm4561_vm1 = vweird.f32 %v4356_v28  ;;  %v3184_v15 = vpop.f32.mrf.mxu3  ;;  %vm9958_vm14 = vmmov %vm9947_vm0 }
 0x2ca   : > { %5453 = vpow2.f32 %v5220_v60  ;;  %v5221_v35 = vmul.f32 -1.442695, %v9343_v31 }
 0x2cb   : > { %v4545_v51 = vadd.f32 %v5448_v0, %v4544_v58  ;;  %v4568_v59 = vor.u32 1.1754944e-38, %v4567_v46  ;;  %v2997_v58 = vld [vmem:[#allocation3 + $0x98] sm:$0xff] }
 0x2cc   : > { %v3242_v21 = vadd.f32 %v3184_v15, %v2997_v58 }
 0x2cd   : > { %v4549_v34 = vsel %vm4548_vm15, %v5448_v0, %v4545_v51  ;;  %v2078_v0 = vld [vmem:[#allocation3 + $0xc8] sm:$0xff] }
 0x2ce   : > { %v4554_v12 = vsel %vm4551_vm8, %v4553_v25, %v4549_v34  ;;  %v2323_v32 = vadd.f32 %v2277_v38, %v2078_v0  ;;  %3274 = vst.msk [vmem:[#allocation3 + $0x98] sm:$0xff] %vm9954_vm9, %v3242_v21  ;;  %vm9961_vm9 = vmmov %vm9947_vm0 }
 0x2cf   : > { %v4867_v33 = vmul.f32 %v4554_v12, %v9311_v42  ;;  %v5452_v45 = vpop.eup %5451  ;;  %v4565_v42 = vand.u32 2147483647, %v4356_v28  ;;  %v4195_v23 = vld [vmem:[#allocation3 + $0x78] sm:$0xff] }
 0x2d0   : > { %v4557_v30 = vmul.f32 %v5452_v45, %v4356_v28  ;;  %v5454_v48 = vpop.eup %5453  ;;  %vm4562_vm5 = vweird.f32 %v5452_v45  ;;  %v9353_v13 = vadd.f32 %v9297_v18, %v4195_v23  ;;  %v4068_v28 = vpop.f32.mrf.mxu0  ;;  %2355 = vst.msk [vmem:[#allocation3 + $0xc8] sm:$0xff] %vm9952_vm3, %v2323_v32  ;;  %vm9959_vm3 = vmmov %vm9947_vm0 }
 0x2d1   : > { %4899 = vst.msk [vmem:[%s9123_s23 + $0x58] sm:$0xff] %vm9945_vm4, %v4867_v33  ;;  %v4357_v17 = vadd.f32 1.0, %v5454_v48  ;;  %vm4563_vm2 = vmor %vm4561_vm1, %vm4562_vm5  ;;  %vm4566_vm6 = vcmp.eq.f32.partialorder %v4565_v42, 8.507059e+37  ;;  %v4132_v34 = vadd.f32 %v4068_v28, %v3887_v24  ;;  %v3888_v42 = vld [vmem:[#allocation3 + $0x88] sm:$0xff] }
 0x2d2   : > { %v4558_v52 = vsub.f32 1.0, %v4557_v30  ;;  %v5222_v25 = vmul.f32 -1.442695, %v9353_v13  ;;  %vm9953_vm4 = vmmov %vm9947_vm0  ;;  %v2280_v30 = vpop.f32.mrf.mxu2 }
 0x2d3   : > { %5455 = vrcp.f32 %v4357_v17  ;;  %v4582_v5 = vand.u32 2147483648, %v4357_v17  ;;  %vm4576_vm12 = vweird.f32 %v4357_v17  ;;  %4164 = vst.msk [vmem:[#allocation3 + $0x80] sm:$0xff] %vm9947_vm0, %v4132_v34 }
 0x2d4   : > { %v4559_v19 = vmul.f32 %v5452_v45, %v4558_v52  ;;  %5457 = vpow2.f32 %v5221_v35  ;;  %v3187_v52 = vpop.f32.mrf.mxu3 }
 0x2d5   : > { %v4583_v16 = vor.u32 1.1754944e-38, %v4582_v5 }
 0x2d6   : > { %v4560_v22 = vadd.f32 %v5452_v45, %v4559_v19  ;;  %v2998_v19 = vld [vmem:[#allocation3 + $0xa0] sm:$0xff] }
 0x2d7   : > { %v3243_v61 = vadd.f32 %v3187_v52, %v2998_v19 }
 0x2d8   : > { %v4564_v10 = vsel %vm4563_vm2, %v5452_v45, %v4560_v22  ;;  %v2079_v45 = vld [vmem:[#allocation3 + $0xd0] sm:$0xff] }
 0x2d9   : > { %v4569_v29 = vsel %vm4566_vm6, %v4568_v59, %v4564_v10  ;;  %v5456_v7 = vpop.eup %5455  ;;  %v2324_v48 = vadd.f32 %v2280_v30, %v2079_v45  ;;  %3275 = vst.msk [vmem:[#allocation3 + $0xa0] sm:$0xff] %vm9957_vm13, %v3243_v61  ;;  %vm9964_vm13 = vmmov %vm9947_vm0 }
 0x2da   : > { %v4868_v57 = vmul.f32 %v4569_v29, %v9322_v27  ;;  %v4572_v44 = vmul.f32 %v5456_v7, %v4357_v17  ;;  %v5458_v26 = vpop.eup %5457  ;;  %vm4577_vm11 = vweird.f32 %v5456_v7  ;;  %v4580_v27 = vand.u32 2147483647, %v4357_v17  ;;  %v4196_v60 = vld [vmem:[#allocation3 + $0x80] sm:$0xff]  ;;  %v4071_v17 = vpop.f32.mrf.mxu0 }
 0x2db   : > { %v4358_v36 = vadd.f32 1.0, %v5458_v26  ;;  %vm4578_vm15 = vmor %vm4576_vm12, %vm4577_vm11  ;;  %v9363_v9 = vadd.f32 %v9297_v18, %v4196_v60  ;;  %v4133_v10 = vadd.f32 %v4071_v17, %v3888_v42  ;;  %2356 = vst.msk [vmem:[#allocation3 + $0xd0] sm:$0xff] %vm9955_vm7, %v2324_v48  ;;  %v2082_v42 = vld [vmem:[#allocation3 + $0xe8] sm:$0xff] }
 0x2dc   : > { %4900 = vst.msk [vmem:[%s9123_s23 + $0x60] sm:$0xff] %vm9949_vm10, %v4868_v57  ;;  %v4573_v41 = vsub.f32 1.0, %v4572_v44  ;;  %vm4581_vm8 = vcmp.eq.f32.partialorder %v4580_v27, 8.507059e+37  ;;  %vm9956_vm10 = vmmov %vm9947_vm0  ;;  %v2283_v44 = vpop.f32.mrf.mxu2  ;;  %v3889_v27 = vld [vmem:[#allocation3 + $0x90] sm:$0xff] }
 0x2dd   : > { %5459 = vrcp.f32 %v4358_v36  ;;  %v4597_v12 = vand.u32 2147483648, %v4358_v36  ;;  %vm4591_vm1 = vweird.f32 %v4358_v36  ;;  %v5223_v59 = vmul.f32 -1.442695, %v9363_v9  ;;  %4165 = vst.msk [vmem:[#allocation3 + $0x88] sm:$0xff] %vm9958_vm14, %v4133_v10  ;;  %vm9962_vm7 = vmmov %vm9947_vm0 }
 0x2de   : > { %v4574_v11 = vmul.f32 %v5456_v7, %v4573_v41  ;;  %5461 = vpow2.f32 %v5222_v25  ;;  %v3190_v41 = vpop.f32.mrf.mxu3  ;;  %vm9965_vm14 = vmmov %vm9947_vm0 }
 0x2df   : > { %v4598_v33 = vor.u32 1.1754944e-38, %v4597_v12 }
 0x2e0   : > { %v4575_v2 = vadd.f32 %v5456_v7, %v4574_v11  ;;  %v2999_v11 = vld [vmem:[#allocation3 + $0xa8] sm:$0xff] }
 0x2e1   : > { %v3244_v23 = vadd.f32 %v3190_v41, %v2999_v11  ;;  %v3002_v41 = vld [vmem:[#allocation3 + $0xc0] sm:$0xff] }
 0x2e2   : > { %v4579_v39 = vsel %vm4578_vm15, %v5456_v7, %v4575_v2  ;;  %v2080_v7 = vld [vmem:[#allocation3 + $0xd8] sm:$0xff] }
 0x2e3   : > { %v4584_v54 = vsel %vm4581_vm8, %v4583_v16, %v4579_v39  ;;  %v5460_v63 = vpop.eup %5459  ;;  %v2325_v26 = vadd.f32 %v2283_v44, %v2080_v7  ;;  %3276 = vst.msk [vmem:[#allocation3 + $0xa8] sm:$0xff] %vm9961_vm9, %v3244_v23  ;;  %vm9968_vm9 = vmmov %vm9947_vm0  ;;  %v2083_v7 = vld [vmem:[#allocation3 + $0xf0] sm:$0xff] }
 0x2e4   : > { %v4869_v51 = vmul.f32 %v4584_v54, %v9333_v62  ;;  %v4587_v43 = vmul.f32 %v5460_v63, %v4358_v36  ;;  %v5462_v55 = vpop.eup %5461  ;;  %vm4592_vm5 = vweird.f32 %v5460_v63  ;;  %v4595_v62 = vand.u32 2147483647, %v4358_v36  ;;  %v4197_v35 = vld [vmem:[#allocation3 + $0x88] sm:$0xff]  ;;  %v4074_v36 = vpop.f32.mrf.mxu0 }
 0x2e5   : > { %v4359_v4 = vadd.f32 1.0, %v5462_v55  ;;  %vm4593_vm2 = vmor %vm4591_vm1, %vm4592_vm5  ;;  %v9373_v47 = vadd.f32 %v9297_v18, %v4197_v35  ;;  %v4134_v39 = vadd.f32 %v4074_v36, %v3889_v27  ;;  %2357 = vst.msk [vmem:[#allocation3 + $0xd8] sm:$0xff] %vm9959_vm3, %v2325_v26 }
 0x2e6   : > { %4901 = vst.msk [vmem:[%s9123_s23 + $0x68] sm:$0xff] %vm9953_vm4, %v4869_v51  ;;  %v4588_v3 = vsub.f32 1.0, %v4587_v43  ;;  %vm4596_vm6 = vcmp.eq.f32.partialorder %v4595_v62, 8.507059e+37  ;;  %vm9960_vm4 = vmmov %vm9947_vm0  ;;  %v2286_v43 = vpop.f32.mrf.mxu2  ;;  %v3890_v62 = vld [vmem:[#allocation3 + $0x98] sm:$0xff] }
 0x2e7   : > { %5463 = vrcp.f32 %v4359_v4  ;;  %v4612_v29 = vand.u32 2147483648, %v4359_v4  ;;  %vm4606_vm12 = vweird.f32 %v4359_v4  ;;  %v5224_v16 = vmul.f32 -1.442695, %v9373_v47  ;;  %4166 = vst.msk [vmem:[#allocation3 + $0x90] sm:$0xff] %vm9947_vm0, %v4134_v39 }
 0x2e8   : > { %v4589_v37 = vmul.f32 %v5460_v63, %v4588_v3  ;;  %5465 = vpow2.f32 %v5223_v59  ;;  %v3193_v3 = vpop.f32.mrf.mxu3 }
 0x2e9   : > { %v4613_v57 = vor.u32 1.1754944e-38, %v4612_v29 }
 0x2ea   : > { %v4590_v14 = vadd.f32 %v5460_v63, %v4589_v37  ;;  %v3000_v37 = vld [vmem:[#allocation3 + $0xb0] sm:$0xff] }
 0x2eb   : > { %v3245_v60 = vadd.f32 %v3193_v3, %v3000_v37 }
 0x2ec   : > { %v4594_v1 = vsel %vm4593_vm2, %v5460_v63, %v4590_v14  ;;  %v2081_v63 = vld [vmem:[#allocation3 + $0xe0] sm:$0xff] }
 0x2ed   : > { %v4599_v46 = vsel %vm4596_vm6, %v4598_v33, %v4594_v1  ;;  %v5464_v20 = vpop.eup %5463  ;;  %v2326_v55 = vadd.f32 %v2286_v43, %v2081_v63  ;;  %3277 = vst.msk [vmem:[#allocation3 + $0xb0] sm:$0xff] %vm9964_vm13, %v3245_v60  ;;  %v3003_v63 = vld [vmem:[#allocation3 + $0xc8] sm:$0xff] }
 0x2ee   : > { %v4870_v22 = vmul.f32 %v4599_v46, %v9343_v31  ;;  %v4602_v56 = vmul.f32 %v5464_v20, %v4359_v4  ;;  %v5466_v49 = vpop.eup %5465  ;;  %vm4607_vm11 = vweird.f32 %v5464_v20  ;;  %v4610_v31 = vand.u32 2147483647, %v4359_v4  ;;  %v4198_v25 = vld [vmem:[#allocation3 + $0x90] sm:$0xff]  ;;  %v4077_v4 = vpop.f32.mrf.mxu0 }
 0x2ef   : > { %v4360_v53 = vadd.f32 1.0, %v5466_v49  ;;  %vm4608_vm15 = vmor %vm4606_vm12, %vm4607_vm11  ;;  %v9383_v34 = vadd.f32 %v9297_v18, %v4198_v25  ;;  %v4135_v1 = vadd.f32 %v4077_v4, %v3890_v62  ;;  %2358 = vst.msk [vmem:[#allocation3 + $0xe0] sm:$0xff] %vm9962_vm7, %v2326_v55  ;;  %v2289_v17 = vpop.f32.mrf.mxu2 }
 0x2f0   : > { %4902 = vst.msk [vmem:[%s9123_s23 + $0x70] sm:$0xff] %vm9956_vm10, %v4870_v22  ;;  %v4603_v8 = vsub.f32 1.0, %v4602_v56  ;;  %vm4611_vm8 = vcmp.eq.f32.partialorder %v4610_v31, 8.507059e+37  ;;  %vm9963_vm10 = vmmov %vm9947_vm0  ;;  %v3001_v22 = vld [vmem:[#allocation3 + $0xb8] sm:$0xff]  ;;  %v3196_v59 = vpop.f32.mrf.mxu3  ;;  %v2327_v10 = vadd.f32 %v2289_v17, %v2082_v42 }
 0x2f1   : > { %5467 = vrcp.f32 %v4360_v53  ;;  %v4627_v54 = vand.u32 2147483648, %v4360_v53  ;;  %vm4621_vm1 = vweird.f32 %v4360_v53  ;;  %v5225_v33 = vmul.f32 -1.442695, %v9383_v34  ;;  %4167 = vst.msk [vmem:[#allocation3 + $0x98] sm:$0xff] %vm9965_vm14, %v4135_v1  ;;  %vm9972_vm14 = vmmov %vm9947_vm0 }
 0x2f2   : > { %v4604_v6 = vmul.f32 %v5464_v20, %v4603_v8  ;;  %5469 = vpow2.f32 %v5224_v16 }
 0x2f3   : > { %v4628_v51 = vor.u32 1.1754944e-38, %v4627_v54 }
 0x2f4   : > { %v4605_v50 = vadd.f32 %v5464_v20, %v4604_v6  ;;  %v3891_v6 = vld [vmem:[#allocation3 + $0xa0] sm:$0xff]  ;;  %v3893_v55 = vld [vmem:[#allocation3 + $0xb0] sm:$0xff] }
 0x2f6   : > { %v4609_v40 = vsel %vm4608_vm15, %v5464_v20, %v4605_v50  ;;  %v3246_v20 = vadd.f32 %v3196_v59, %v3001_v22  ;;  %v4080_v8 = vpop.f32.mrf.mxu0 }
 0x2f7   : > { %v4614_v5 = vsel %vm4611_vm8, %v4613_v57, %v4609_v40  ;;  %v5468_v0 = vpop.eup %5467  ;;  %vm9966_vm8 = vmmov %vm9947_vm0  ;;  %v4136_v50 = vadd.f32 %v4080_v8, %v3891_v6  ;;  %v2292_v44 = vpop.f32.mrf.mxu2 }
 0x2f8   : > { %v4871_v2 = vmul.f32 %v4614_v5, %v9353_v13  ;;  %v4617_v38 = vmul.f32 %v5468_v0, %v4360_v53  ;;  %v5470_v32 = vpop.eup %5469  ;;  %vm4622_vm5 = vweird.f32 %v5468_v0  ;;  %v4625_v13 = vand.u32 2147483647, %v4360_v53  ;;  %v4199_v49 = vld [vmem:[#allocation3 + $0x98] sm:$0xff]  ;;  %2359 = vst.msk [vmem:[#allocation3 + $0xe8] sm:$0xff] %vm9966_vm8, %v2327_v10  ;;  %v3199_v5 = vpop.f32.mrf.mxu3  ;;  %vm9976_vm8 = vmmov %vm9947_vm0 }
 0x2f9   : > { %v4361_v24 = vadd.f32 1.0, %v5470_v32  ;;  %vm4623_vm2 = vmor %vm4621_vm1, %vm4622_vm5  ;;  %v9394_v53 = vadd.f32 %v9297_v18, %v4199_v49  ;;  %4168 = vst.msk [vmem:[#allocation3 + $0xa0] sm:$0xff] %vm9968_vm9, %v4136_v50  ;;  %v2328_v11 = vadd.f32 %v2292_v44, %v2083_v7  ;;  %v3247_v27 = vadd.f32 %v3199_v5, %v3002_v41  ;;  %v3005_v50 = vld [vmem:[#allocation3 + $0xd8] sm:$0xff] }
 0x2fa   : > { %4903 = vst.msk [vmem:[%s9123_s23 + $0x78] sm:$0xff] %vm9960_vm4, %v4871_v2  ;;  %v4618_v15 = vsub.f32 1.0, %v4617_v38  ;;  %vm4626_vm6 = vcmp.eq.f32.partialorder %v4625_v13, 8.507059e+37  ;;  %vm9967_vm4 = vmmov %vm9947_vm0  ;;  %v3892_v2 = vld [vmem:[#allocation3 + $0xa8] sm:$0xff] }
 0x2fb   : > { %5471 = vrcp.f32 %v4361_v24  ;;  %v4642_v46 = vand.u32 2147483648, %v4361_v24  ;;  %vm4636_vm12 = vweird.f32 %v4361_v24  ;;  %3278 = vst.msk [vmem:[#allocation3 + $0xb8] sm:$0xff] %vm9967_vm4, %v3246_v20  ;;  %v5226_v40 = vmul.f32 -1.442695, %v9394_v53  ;;  %vm9969_vm5 = vmmov %vm9947_vm0 }
 0x2fc   : > { %v4619_v58 = vmul.f32 %v5468_v0, %v4618_v15  ;;  %5473 = vpow2.f32 %v5225_v33  ;;  %2360 = vst.msk [vmem:[#allocation3 + $0xf0] sm:$0xff] %vm9969_vm5, %v2328_v11  ;;  %vm9970_vm1 = vmmov %vm9947_vm0 }
 0x2fd   : > { %v4643_v29 = vor.u32 1.1754944e-38, %v4642_v46  ;;  %3279 = vst.msk [vmem:[#allocation3 + $0xc0] sm:$0xff] %vm9970_vm1, %v3247_v27  ;;  %v3004_v46 = vld [vmem:[#allocation3 + $0xd0] sm:$0xff]  ;;  %vm9977_vm9 = vmmov %vm9947_vm0 }
 0x2fe   : > { %v4620_v28 = vadd.f32 %v5468_v0, %v4619_v58  ;;  %v4083_v16 = vpop.f32.mrf.mxu0 }
 0x300   : > { %v4624_v21 = vsel %vm4623_vm2, %v5468_v0, %v4620_v28  ;;  %v4200_v38 = vld [vmem:[#allocation3 + $0xa0] sm:$0xff]  ;;  %vm9971_vm2 = vmmov %vm9947_vm0  ;;  %v2295_v28 = vpop.f32.mrf.mxu2 }
 0x301   : > { %v4629_v12 = vsel %vm4626_vm6, %v4628_v51, %v4624_v21  ;;  %v5472_v45 = vpop.eup %5471  ;;  %v9406_v32 = vadd.f32 %v9297_v18, %v4200_v38  ;;  %v3202_v51 = vpop.f32.mrf.mxu3  ;;  %v2084_v21 = vld [vmem:[#allocation3 + $0xf8] sm:$0xff] }
 0x302   : > { %v4872_v14 = vmul.f32 %v4629_v12, %v9363_v9  ;;  %v4632_v30 = vmul.f32 %v5472_v45, %v4361_v24  ;;  %v5474_v48 = vpop.eup %5473  ;;  %vm4637_vm11 = vweird.f32 %v5472_v45  ;;  %v4640_v9 = vand.u32 2147483647, %v4361_v24  ;;  %v3894_v22 = vld [vmem:[#allocation3 + $0xb8] sm:$0xff] }
 0x303   : > { %v4362_v61 = vadd.f32 1.0, %v5474_v48  ;;  %vm4638_vm15 = vmor %vm4636_vm12, %vm4637_vm11  ;;  %v5227_v24 = vmul.f32 -1.442695, %v9406_v32  ;;  %v2329_v3 = vadd.f32 %v2295_v28, %v2084_v21  ;;  %v3248_v12 = vadd.f32 %v3202_v51, %v3003_v63 }
 0x304   : > { %4904 = vst.msk [vmem:[%s9123_s23 + $0x80] sm:$0xff] %vm9963_vm10, %v4872_v14  ;;  %v4633_v52 = vsub.f32 1.0, %v4632_v30  ;;  %vm4641_vm3 = vcmp.eq.f32.partialorder %v4640_v9, 8.507059e+37  ;;  %vm9973_vm11 = vmmov %vm9947_vm0  ;;  %v3895_v11 = vld [vmem:[#allocation3 + $0xc0] sm:$0xff] }
 0x305   : > { %5475 = vrcp.f32 %v4362_v61  ;;  %v4655_v39 = vand.u32 2147483647, %v4362_v61  ;;  %v4657_v0 = vand.u32 2147483648, %v4362_v61  ;;  %vm4651_vm7 = vweird.f32 %v4362_v61  ;;  %2361 = vst.msk [vmem:[#allocation3 + $0xf8] sm:$0xff] %vm9972_vm14, %v2329_v3  ;;  %vm9974_vm12 = vmmov %vm9947_vm0 }
 0x306   : > { %v4634_v19 = vmul.f32 %v5472_v45, %v4633_v52  ;;  %5477 = vpow2.f32 %v5226_v40  ;;  %v4086_v37 = vpop.f32.mrf.mxu0  ;;  %3280 = vst.msk [vmem:[#allocation3 + $0xc8] sm:$0xff] %vm9973_vm11, %v3248_v12  ;;  %vm9980_vm11 = vmmov %vm9970_vm1 }
 0x307   : > { %vm4656_vm13 = vcmp.eq.f32.partialorder %v4655_v39, 8.507059e+37  ;;  %v4658_v25 = vor.u32 1.1754944e-38, %v4657_v0  ;;  %v4138_v4 = vadd.f32 %v4086_v37, %v3893_v55 }
 0x308   : > { %v4635_v56 = vadd.f32 %v5472_v45, %v4634_v19 }
 0x309   : > { %v3205_v48 = vpop.f32.mrf.mxu3 }
 0x30a   : > { %v4639_v31 = vsel %vm4638_vm15, %v5472_v45, %v4635_v56  ;;  %vm9975_vm15 = vmmov %vm9947_vm0  ;;  %v3249_v19 = vadd.f32 %v3205_v48, %v3004_v46 }
 0x30b   : > { %v4644_v57 = vsel %vm4641_vm3, %v4643_v29, %v4639_v31  ;;  %v5476_v26 = vpop.eup %5475  ;;  %4170 = vst.msk [vmem:[#allocation3 + $0xb0] sm:$0xff] %vm9975_vm15, %v4138_v4  ;;  %vm9981_vm15 = vmmov %vm9970_vm1 }
 0x30c   : > { %v4873_v35 = vmul.f32 %v4644_v57, %v9373_v47  ;;  %v4647_v36 = vmul.f32 %v5476_v26, %v4362_v61  ;;  %v4137_v47 = vadd.f32 %v4083_v16, %v3892_v2  ;;  %v5478_v15 = vpop.eup %5477  ;;  %vm4652_vm6 = vweird.f32 %v5476_v26  ;;  %3281 = vst.msk [vmem:[#allocation3 + $0xd0] sm:$0xff] %vm9976_vm8, %v3249_v19  ;;  %vm9982_vm8 = vmmov %vm9970_vm1 }
 0x30d   : > { %v4363_v58 = vadd.f32 1.0, %v5478_v15  ;;  %vm4653_vm10 = vmor %vm4651_vm7, %vm4652_vm6  ;;  %v3006_v15 = vld [vmem:[#allocation3 + $0xe0] sm:$0xff]  ;;  %v3896_v21 = vld [vmem:[#allocation3 + $0xc8] sm:$0xff] }
 0x30e   : > { %4905 = vst.msk [vmem:[%s9123_s23 + $0x88] sm:$0xff] %vm9947_vm0, %v4873_v35  ;;  %v4648_v23 = vsub.f32 1.0, %v4647_v36  ;;  %v4089_v42 = vpop.f32.mrf.mxu0  ;;  %vm9979_vm7 = vmmov %vm9970_vm1 }
 0x30f   : > { %4169 = vst.msk [vmem:[#allocation3 + $0xa8] sm:$0xff] %vm9971_vm2, %v4137_v47  ;;  %5479 = vrcp.f32 %v4363_v58  ;;  %v4672_v17 = vand.u32 2147483648, %v4363_v58  ;;  %v4670_v61 = vand.u32 2147483647, %v4363_v58  ;;  %v4139_v10 = vadd.f32 %v4089_v42, %v3894_v22  ;;  %vm9978_vm2 = vmmov %vm9970_vm1 }
 0x310   : > { %v4649_v54 = vmul.f32 %v5476_v26, %v4648_v23  ;;  %5481 = vpow2.f32 %v5227_v24  ;;  %vm4666_vm4 = vweird.f32 %v4363_v58 }
 0x311   : > { %4171 = vst.msk [vmem:[#allocation3 + $0xb8] sm:$0xff] %vm9977_vm9, %v4139_v10  ;;  %v4673_v29 = vor.u32 1.1754944e-38, %v4672_v17  ;;  %vm4671_vm5 = vcmp.eq.f32.partialorder %v4670_v61, 8.507059e+37  ;;  %v3208_v57 = vpop.f32.mrf.mxu3 }
 0x312   : > { %v4650_v13 = vadd.f32 %v5476_v26, %v4649_v54  ;;  %v4202_v56 = vld [vmem:[#allocation3 + $0xb0] sm:$0xff]  ;;  %v3250_v44 = vadd.f32 %v3208_v57, %v3005_v50 }
 0x313   : > { %v9422_v49 = vadd.f32 %v9297_v18, %v4202_v56  ;;  %v3897_v61 = vld [vmem:[#allocation3 + $0xd0] sm:$0xff] }
 0x314   : > { %v4654_v43 = vsel %vm4653_vm10, %v5476_v26, %v4650_v13  ;;  %3282 = vst.msk [vmem:[#allocation3 + $0xd8] sm:$0xff] %vm9970_vm1, %v3250_v44  ;;  %v3008_v57 = vld [vmem:[#allocation3 + $0xf0] sm:$0xff] }
 0x315   : > { %v4659_v62 = vsel %vm4656_vm13, %v4658_v25, %v4654_v43  ;;  %v5480_v1 = vpop.eup %5479  ;;  %v5229_v7 = vmul.f32 -1.442695, %v9422_v49 }
 0x316   : > { %v4874_v14 = vmul.f32 %v4659_v62, %v9383_v34  ;;  %v4201_v33 = vld [vmem:[#allocation3 + $0xa8] sm:$0xff]  ;;  %v5482_v30 = vpop.eup %5481  ;;  %v4662_v52 = vmul.f32 %v5480_v1, %v4363_v58  ;;  %vm4667_vm3 = vweird.f32 %v5480_v1  ;;  %v4092_v26 = vpop.f32.mrf.mxu0 }
 0x317   : > { %v9412_v60 = vadd.f32 %v9297_v18, %v4201_v33  ;;  %v4364_v34 = vadd.f32 1.0, %v5482_v30  ;;  %vm4668_vm0 = vmor %vm4666_vm4, %vm4667_vm3  ;;  %v4140_v36 = vadd.f32 %v4092_v26, %v3895_v11 }
 0x318   : > { %4906 = vst.msk [vmem:[%s9123_s23 + $0x90] sm:$0xff] %vm9974_vm12, %v4874_v14  ;;  %v4663_v9 = vsub.f32 1.0, %v4662_v52  ;;  %v4203_v16 = vld [vmem:[#allocation3 + $0xb8] sm:$0xff]  ;;  %v3007_v52 = vld [vmem:[#allocation3 + $0xe8] sm:$0xff] }
 0x319   : > { %v5228_v45 = vmul.f32 -1.442695, %v9412_v60  ;;  %v4687_v2 = vand.u32 2147483648, %v4364_v34  ;;  %v4685_v23 = vand.u32 2147483647, %v4364_v34  ;;  %v9433_v39 = vadd.f32 %v9297_v18, %v4203_v16  ;;  %4172 = vst.msk [vmem:[#allocation3 + $0xc0] sm:$0xff] %vm9979_vm7, %v4140_v36  ;;  %v3211_v54 = vpop.f32.mrf.mxu3 }
 0x31a   : > { %v4664_v59 = vmul.f32 %v5480_v1, %v4663_v9  ;;  %vm4681_vm10 = vweird.f32 %v4364_v34  ;;  %v3251_v28 = vadd.f32 %v3211_v54, %v3006_v15  ;;  %v9480_v15 = vld [vmem:[%s9559_s4] ss:$0 sm:$0xff] }
 0x31b   : > { %5483 = vpow2.f32 %v5228_v45  ;;  %v5230_v38 = vmul.f32 -1.442695, %v9433_v39  ;;  %v4688_v13 = vor.u32 1.1754944e-38, %v4687_v2  ;;  %vm4686_vm14 = vcmp.eq.f32.partialorder %v4685_v23, 8.507059e+37 }
 0x31c   : > { %5485 = vrcp.f32 %v4364_v34  ;;  %v4665_v20 = vadd.f32 %v5480_v1, %v4664_v59  ;;  %3283 = vst.msk [vmem:[#allocation3 + $0xe0] sm:$0xff] %vm9980_vm11, %v3251_v28  ;;  %v3009_v28 = vld [vmem:[#allocation3 + $0xf8] sm:$0xff] }
 0x31e   : > { %v4669_v6 = vsel %vm4668_vm0, %v5480_v1, %v4665_v20  ;;  %v4095_v63 = vpop.f32.mrf.mxu0  ;;  %vm9983_vm0 = vmmov %vm9970_vm1 }
 0x31f   : > { %v4674_v40 = vsel %vm4671_vm5, %v4673_v29, %v4669_v6  ;;  %v4141_v12 = vadd.f32 %v4095_v63, %v3896_v21  ;;  %vm9984_vm5 = vmmov %vm9983_vm0 }
 0x320   : > { %v4875_v41 = vmul.f32 %v4674_v40, %v9394_v53  ;;  %v4204_v14 = vld [vmem:[#allocation3 + $0xc0] sm:$0xff]  ;;  %vm9985_vm1 = vmmov %vm9983_vm0 }
 0x321   : > { %v5484_v8 = vpop.eup %5483  ;;  %4173 = vst.msk [vmem:[#allocation3 + $0xc8] sm:$0xff] %vm9981_vm15, %v4141_v12  ;;  %v9449_v33 = vadd.f32 %v9297_v18, %v4204_v14  ;;  %v3214_v46 = vpop.f32.mrf.mxu3  ;;  %vm9987_vm11 = vmmov %vm9983_vm0 }
 0x322   : > { %v9424_v31 = vadd.f32 1.0, %v5484_v8  ;;  %v5486_v35 = vpop.eup %5485  ;;  %4907 = vst.msk [vmem:[%s9123_s23 + $0x98] sm:$0xff] %vm9978_vm2, %v4875_v41  ;;  %v3252_v19 = vadd.f32 %v3214_v46, %v3007_v52 }
 0x323   : > { %v4677_v5 = vmul.f32 %v5486_v35, %v4364_v34  ;;  %vm4682_vm6 = vweird.f32 %v5486_v35  ;;  %v5231_v30 = vmul.f32 -1.442695, %v9449_v33 }
 0x324   : > { %5487 = vrcp.f32 %v9424_v31  ;;  %vm4683_vm13 = vmor %vm4681_vm10, %vm4682_vm6  ;;  %v4702_v37 = vand.u32 2147483648, %v9424_v31  ;;  %v4700_v4 = vand.u32 2147483647, %v9424_v31  ;;  %vm4696_vm3 = vweird.f32 %v9424_v31  ;;  %3284 = vst.msk [vmem:[#allocation3 + $0xe8] sm:$0xff] %vm9983_vm0, %v3252_v19 }
 0x325   : > { %5489 = vpow2.f32 %v5229_v7  ;;  %v4678_v27 = vsub.f32 1.0, %v4677_v5 }
 0x326   : > { %5491 = vpow2.f32 %v5230_v38  ;;  %v4703_v45 = vor.u32 1.1754944e-38, %v4702_v37  ;;  %vm4701_vm9 = vcmp.eq.f32.partialorder %v4700_v4, 8.507059e+37  ;;  %v4098_v17 = vpop.f32.mrf.mxu0  ;;  %v3899_v37 = vld [vmem:[#allocation3 + $0xe0] sm:$0xff] }
 0x327   : > { %v4679_v47 = vmul.f32 %v5486_v35, %v4678_v27  ;;  %v4142_v20 = vadd.f32 %v4098_v17, %v3897_v61  ;;  %v3898_v27 = vld [vmem:[#allocation3 + $0xd8] sm:$0xff] }
 0x328   : > { %v4205_v10 = vld [vmem:[#allocation3 + $0xc8] sm:$0xff] }
 0x329   : > { %v4680_v0 = vadd.f32 %v5486_v35, %v4679_v47  ;;  %v9462_v8 = vadd.f32 %v9297_v18, %v4205_v10  ;;  %4174 = vst.msk [vmem:[#allocation3 + $0xd0] sm:$0xff] %vm9985_vm1, %v4142_v20 }
 0x32a   : > { %v5488_v53 = vpop.eup %5487 }
 0x32b   : > { %v5490_v58 = vpop.eup %5489  ;;  %v4692_v24 = vmul.f32 %v5488_v53, %v9424_v31  ;;  %v4684_v51 = vsel %vm4683_vm13, %v5486_v35, %v4680_v0  ;;  %vm4697_vm12 = vweird.f32 %v5488_v53  ;;  %v5232_v31 = vmul.f32 -1.442695, %v9462_v8  ;;  %v3217_v35 = vpop.f32.mrf.mxu3  ;;  %vm9986_vm13 = vmmov %vm9983_vm0  ;;  %v3900_v17 = vld [vmem:[#allocation3 + $0xe8] sm:$0xff] }
 0x32c   : > { %v9438_v25 = vadd.f32 1.0, %v5490_v58  ;;  %v4689_v43 = vsel %vm4686_vm14, %v4688_v13, %v4684_v51  ;;  %vm4698_vm4 = vmor %vm4696_vm3, %vm4697_vm12  ;;  %v3253_v18 = vadd.f32 %v3217_v35, %v3008_v57 }
 0x32d   : > { %v4693_v3 = vsub.f32 1.0, %v4692_v24  ;;  %v4876_v55 = vmul.f32 %v4689_v43, %v9406_v32  ;;  %v5492_v32 = vpop.eup %5491  ;;  %vm9988_vm12 = vmmov %vm9983_vm0 }
 0x32e   : > { %5493 = vrcp.f32 %v9438_v25  ;;  %v9453_v34 = vadd.f32 1.0, %v5492_v32  ;;  %v4717_v29 = vand.u32 2147483648, %v9438_v25  ;;  %v4715_v6 = vand.u32 2147483647, %v9438_v25  ;;  %v4101_v26 = vpop.f32.mrf.mxu0  ;;  %3285 = vst.msk [vmem:[#allocation3 + $0xf0] sm:$0xff] %vm9986_vm13, %v3253_v18 }
 0x32f   : > { %v4694_v62 = vmul.f32 %v5488_v53, %v4693_v3  ;;  %4908 = vst.msk [vmem:[%s9123_s23 + $0xa0] sm:$0xff] %vm9982_vm8, %v4876_v55  ;;  %5495 = vpow2.f32 %v5231_v30  ;;  %vm4711_vm6 = vweird.f32 %v9438_v25  ;;  %v4143_v16 = vadd.f32 %v4101_v26, %v3898_v27 }
 0x330   : > { %5497 = vrcp.f32 %v9453_v34  ;;  %v4718_v41 = vor.u32 1.1754944e-38, %v4717_v29  ;;  %vm4716_vm10 = vcmp.eq.f32.partialorder %v4715_v6, 8.507059e+37  ;;  %v4732_v23 = vand.u32 2147483648, %v9453_v34 }
 0x331   : > { %v4695_v1 = vadd.f32 %v5488_v53, %v4694_v62  ;;  %5499 = vpow2.f32 %v5232_v31  ;;  %v4730_v38 = vand.u32 2147483647, %v9453_v34  ;;  %4175 = vst.msk [vmem:[#allocation3 + $0xd8] sm:$0xff] %vm9987_vm11, %v4143_v16  ;;  %vm4726_vm15 = vweird.f32 %v9453_v34 }
 0x332   : > { %v4733_v21 = vor.u32 1.1754944e-38, %v4732_v23 }
 0x333   : > { %v4699_v48 = vsel %vm4698_vm4, %v5488_v53, %v4695_v1  ;;  %v4206_v53 = vld [vmem:[#allocation3 + $0xd0] sm:$0xff]  ;;  %v3220_v51 = vpop.f32.mrf.mxu3  ;;  %vm4731_vm3 = vcmp.eq.f32.partialorder %v4730_v38, 8.507059e+37  ;;  %vm9989_vm4 = vmmov %vm9983_vm0 }
 0x334   : > { %v5494_v9 = vpop.eup %5493  ;;  %v4704_v42 = vsel %vm4701_vm9, %v4703_v45, %v4699_v48  ;;  %v9483_v54 = vadd.f32 %v9480_v15, %v4206_v53  ;;  %v3254_v63 = vadd.f32 %v3220_v51, %v3009_v28  ;;  %vm9990_vm9 = vmmov %vm9983_vm0 }
 0x335   : > { %v4877_v22 = vmul.f32 %v4704_v42, %v9412_v60  ;;  %v4707_v59 = vmul.f32 %v5494_v9, %v9438_v25  ;;  %vm4712_vm2 = vweird.f32 %v5494_v9  ;;  %v5496_v50 = vpop.eup %5495  ;;  %vm9993_vm13 = vmmov %vm9989_vm4 }
 0x336   : > { %v5498_v40 = vpop.eup %5497  ;;  %v9469_v44 = vadd.f32 1.0, %v5496_v50  ;;  %vm4713_vm7 = vmor %vm4711_vm6, %vm4712_vm2  ;;  %v5233_v24 = vmul.f32 -1.442695, %v9483_v54  ;;  %v4104_v12 = vpop.f32.mrf.mxu0  ;;  %3286 = vst.msk [vmem:[#allocation3 + $0xf8] sm:$0xff] %vm9989_vm4, %v3254_v63 }
 0x337   : > { %4909 = vst.msk [vmem:[%s9123_s23 + $0xa8] sm:$0xff] %vm9984_vm5, %v4877_v22  ;;  %v4708_v56 = vsub.f32 1.0, %v4707_v59  ;;  %v4722_v5 = vmul.f32 %v5498_v40, %v9453_v34  ;;  %vm4727_vm14 = vweird.f32 %v5498_v40  ;;  %v5500_v58 = vpop.eup %5499  ;;  %v4144_v14 = vadd.f32 %v4104_v12, %v3899_v37  ;;  %vm9991_vm5 = vmmov %vm9985_vm1 }
 0x338   : > { %5501 = vrcp.f32 %v9469_v44  ;;  %v4369_v13 = vadd.f32 1.0, %v5500_v58  ;;  %vm4728_vm8 = vmor %vm4726_vm15, %vm4727_vm14  ;;  %v4747_v1 = vand.u32 2147483648, %v9469_v44  ;;  %v4207_v32 = vld [vmem:[#allocation3 + $0xd8] sm:$0xff]  ;;  %v4745_v30 = vand.u32 2147483647, %v9469_v44 }
 0x339   : > { %v4709_v60 = vmul.f32 %v5494_v9, %v4708_v56  ;;  %v4723_v2 = vsub.f32 1.0, %v4722_v5  ;;  %v9498_v52 = vadd.f32 %v9480_v15, %v4207_v32  ;;  %4176 = vst.msk [vmem:[#allocation3 + $0xe0] sm:$0xff] %vm9991_vm5, %v4144_v14  ;;  %vm4741_vm1 = vweird.f32 %v9469_v44  ;;  %vm9994_vm15 = vmmov %vm9989_vm4 }
 0x33a   : > { %5503 = vrcp.f32 %v4369_v13  ;;  %v4748_v34 = vor.u32 1.1754944e-38, %v4747_v1  ;;  %vm4746_vm6 = vcmp.eq.f32.partialorder %v4745_v30, 8.507059e+37  ;;  %v4762_v29 = vand.u32 2147483648, %v4369_v13 }
 0x33b   : > { %v4710_v7 = vadd.f32 %v5494_v9, %v4709_v60  ;;  %v4724_v0 = vmul.f32 %v5498_v40, %v4723_v2  ;;  %5505 = vpow2.f32 %v5233_v24  ;;  %v4760_v6 = vand.u32 2147483647, %v4369_v13 }
 0x33c   : > { %vm4756_vm14 = vweird.f32 %v4369_v13 }
 0x33d   : > { %v4714_v11 = vsel %vm4713_vm7, %v5494_v9, %v4710_v7  ;;  %v3902_v24 = vld [vmem:[#allocation3 + $0xf8] sm:$0xff] }
 0x33e   : > { %v4719_v36 = vsel %vm4716_vm10, %v4718_v41, %v4714_v11  ;;  %v5502_v25 = vpop.eup %5501  ;;  %v4107_v22 = vpop.f32.mrf.mxu0  ;;  %vm9992_vm10 = vmmov %vm9989_vm4 }
 0x33f   : > { %v4878_v47 = vmul.f32 %v4719_v36, %v9422_v49  ;;  %v4725_v49 = vadd.f32 %v5498_v40, %v4724_v0  ;;  %v4737_v3 = vmul.f32 %v5502_v25, %v9469_v44  ;;  %vm4742_vm0 = vweird.f32 %v5502_v25  ;;  %v3901_v36 = vld [vmem:[#allocation3 + $0xf0] sm:$0xff] }
 0x340   : > { %v5504_v46 = vpop.eup %5503  ;;  %vm4743_vm2 = vmor %vm4741_vm1, %vm4742_vm0  ;;  %v4145_v20 = vadd.f32 %v4107_v22, %v3900_v17  ;;  %v4208_v31 = vld [vmem:[#allocation3 + $0xe0] sm:$0xff] }
 0x341   : > { %4910 = vst.msk [vmem:[%s9123_s23 + $0xb0] sm:$0xff] %vm9988_vm12, %v4878_v47  ;;  %v4729_v43 = vsel %vm4728_vm8, %v5498_v40, %v4725_v49  ;;  %v4738_v4 = vsub.f32 1.0, %v4737_v3  ;;  %v4752_v19 = vmul.f32 %v5504_v46, %v4369_v13  ;;  %v5506_v9 = vpop.eup %5505  ;;  %vm4757_vm7 = vweird.f32 %v5504_v46  ;;  %vm9995_vm8 = vmmov %vm9989_vm4 }
 0x342   : > { %v4734_v55 = vsel %vm4731_vm3, %v4733_v21, %v4729_v43  ;;  %v4370_v10 = vadd.f32 1.0, %v5506_v9  ;;  %4177 = vst.msk [vmem:[#allocation3 + $0xe8] sm:$0xff] %vm9992_vm10, %v4145_v20  ;;  %v9508_v57 = vadd.f32 %v9480_v15, %v4208_v31  ;;  %vm4758_vm11 = vmor %vm4756_vm14, %vm4757_vm7  ;;  %v4763_v40 = vor.u32 1.1754944e-38, %v4762_v29 }
 0x343   : > { %v4879_v62 = vmul.f32 %v4734_v55, %v9433_v39  ;;  %v4739_v45 = vmul.f32 %v5502_v25, %v4738_v4  ;;  %v5234_v39 = vmul.f32 -1.442695, %v9498_v52  ;;  %v4753_v61 = vsub.f32 1.0, %v4752_v19 }
 0x344   : > { %vm4761_vm12 = vcmp.eq.f32.partialorder %v4760_v6, 8.507059e+37  ;;  %v5235_v44 = vmul.f32 -1.442695, %v9508_v57  ;;  %v4777_v23 = vand.u32 2147483648, %v4370_v10  ;;  %vm4771_vm4 = vweird.f32 %v4370_v10 }
 0x345   : > { %4911 = vst.msk [vmem:[%s9123_s23 + $0xb8] sm:$0xff] %vm9990_vm9, %v4879_v62  ;;  %v4740_v48 = vadd.f32 %v5502_v25, %v4739_v45  ;;  %5507 = vpow2.f32 %v5234_v39  ;;  %v4754_v60 = vmul.f32 %v5504_v46, %v4753_v61 }
 0x346   : > { %5509 = vrcp.f32 %v4370_v10  ;;  %v4110_v41 = vpop.f32.mrf.mxu0  ;;  %v4778_v51 = vor.u32 1.1754944e-38, %v4777_v23 }
 0x347   : > { %v4744_v42 = vsel %vm4743_vm2, %v5502_v25, %v4740_v48  ;;  %v4755_v50 = vadd.f32 %v5504_v46, %v4754_v60  ;;  %v4146_v16 = vadd.f32 %v4110_v41, %v3901_v36  ;;  %vm9996_vm2 = vmmov %vm9991_vm5 }
 0x348   : > { %v4749_v59 = vsel %vm4746_vm6, %v4748_v34, %v4744_v42 }
 0x349   : > { %v4880_v56 = vmul.f32 %v4749_v59, %v9449_v33  ;;  %v4759_v33 = vsel %vm4758_vm11, %v5504_v46, %v4755_v50  ;;  %v4209_v27 = vld [vmem:[#allocation3 + $0xe8] sm:$0xff]  ;;  %4178 = vst.msk [vmem:[#allocation3 + $0xf0] sm:$0xff] %vm9995_vm8, %v4146_v16 }
 0x34a   : > { %v4764_v18 = vsel %vm4761_vm12, %v4763_v40, %v4759_v33  ;;  %v9515_v2 = vadd.f32 %v9480_v15, %v4209_v27 }
 0x34b   : > { %4912 = vst.msk [vmem:[%s9123_s23 + $0xc0] sm:$0xff] %vm9993_vm13, %v4880_v56  ;;  %v5508_v35 = vpop.eup %5507  ;;  %v4881_v26 = vmul.f32 %v4764_v18, %v9462_v8  ;;  %v4775_v8 = vand.u32 2147483647, %v4370_v10  ;;  %vm9997_vm13 = vmmov %vm9996_vm2 }
 0x34c   : > { %v4371_v7 = vadd.f32 1.0, %v5508_v35  ;;  %v5510_v5 = vpop.eup %5509  ;;  %v5236_v53 = vmul.f32 -1.442695, %v9515_v2 }
 0x34d   : > { %v4767_v11 = vmul.f32 %v5510_v5, %v4370_v10  ;;  %4913 = vst.msk [vmem:[%s9123_s23 + $0xc8] sm:$0xff] %vm9994_vm15, %v4881_v26  ;;  %vm4772_vm3 = vweird.f32 %v5510_v5  ;;  %vm4776_vm0 = vcmp.eq.f32.partialorder %v4775_v8, 8.507059e+37 }
 0x34e   : > { %5511 = vrcp.f32 %v4371_v7  ;;  %v4113_v28 = vpop.f32.mrf.mxu0  ;;  %vm4773_vm9 = vmor %vm4771_vm4, %vm4772_vm3  ;;  %v4792_v12 = vand.u32 2147483648, %v4371_v7  ;;  %v4790_v62 = vand.u32 2147483647, %v4371_v7  ;;  %vm4786_vm6 = vweird.f32 %v4371_v7 }
 0x34f   : > { %5513 = vpow2.f32 %v5235_v44  ;;  %v4768_v47 = vsub.f32 1.0, %v4767_v11  ;;  %v4147_v21 = vadd.f32 %v4113_v28, %v3902_v24  ;;  %vm9998_vm4 = vmmov %vm9996_vm2 }
 0x350   : > { %5515 = vpow2.f32 %v5236_v53  ;;  %v4210_v4 = vld [vmem:[#allocation3 + $0xf0] sm:$0xff]  ;;  %v4793_v30 = vor.u32 1.1754944e-38, %v4792_v12  ;;  %vm4791_vm10 = vcmp.eq.f32.partialorder %v4790_v62, 8.507059e+37 }
 0x351   : > { %v4769_v0 = vmul.f32 %v5510_v5, %v4768_v47  ;;  %4179 = vst.msk [vmem:[#allocation3 + $0xf8] sm:$0xff] %vm9991_vm5, %v4147_v21  ;;  %v9522_v1 = vadd.f32 %v9480_v15, %v4210_v4  ;;  %vm9999_vm5 = vmmov %vm9996_vm2 }
 0x353   : > { %v4770_v49 = vadd.f32 %v5510_v5, %v4769_v0  ;;  %v5237_v46 = vmul.f32 -1.442695, %v9522_v1 }
 0x354   : > { %v5512_v38 = vpop.eup %5511 }
 0x355   : > { %v5514_v58 = vpop.eup %5513  ;;  %v4782_v13 = vmul.f32 %v5512_v38, %v4371_v7  ;;  %v4774_v63 = vsel %vm4773_vm9, %v5510_v5, %v4770_v49  ;;  %vm4787_vm1 = vweird.f32 %v5512_v38 }
 0x356   : > { %v4372_v25 = vadd.f32 1.0, %v5514_v58  ;;  %v4779_v3 = vsel %vm4776_vm0, %v4778_v51, %v4774_v63  ;;  %v5516_v14 = vpop.eup %5515  ;;  %vm4788_vm7 = vmor %vm4786_vm6, %vm4787_vm1 }
 0x357   : > { %v4783_v43 = vsub.f32 1.0, %v4782_v13  ;;  %v4882_v55 = vmul.f32 %v4779_v3, %v9483_v54  ;;  %v4373_v45 = vadd.f32 1.0, %v5516_v14 }
 0x358   : > { %5517 = vrcp.f32 %v4372_v25  ;;  %v4211_v9 = vld [vmem:[#allocation3 + $0xf8] sm:$0xff]  ;;  %v4807_v22 = vand.u32 2147483648, %v4372_v25  ;;  %v4805_v20 = vand.u32 2147483647, %v4372_v25  ;;  %vm4801_vm11 = vweird.f32 %v4372_v25 }
 0x359   : > { %v4784_v37 = vmul.f32 %v5512_v38, %v4783_v43  ;;  %4914 = vst.msk [vmem:[%s9123_s23 + $0xd0] sm:$0xff] %vm9996_vm2, %v4882_v55  ;;  %5519 = vrcp.f32 %v4373_v45  ;;  %v9529_v42 = vadd.f32 %v9480_v15, %v4211_v9  ;;  %v4822_v50 = vand.u32 2147483648, %v4373_v45 }
 0x35a   : > { %5521 = vpow2.f32 %v5237_v46  ;;  %v4808_v15 = vor.u32 1.1754944e-38, %v4807_v22  ;;  %vm4806_vm15 = vcmp.eq.f32.partialorder %v4805_v20, 8.507059e+37  ;;  %v4820_v33 = vand.u32 2147483647, %v4373_v45 }
 0x35b   : > { %v4785_v32 = vadd.f32 %v5512_v38, %v4784_v37  ;;  %v5238_v59 = vmul.f32 -1.442695, %v9529_v42  ;;  %vm4816_vm3 = vweird.f32 %v4373_v45  ;;  %v4823_v41 = vor.u32 1.1754944e-38, %v4822_v50 }
 0x35c   : > { %vm4821_vm0 = vcmp.eq.f32.partialorder %v4820_v33, 8.507059e+37 }
 0x35d   : > { %v4789_v48 = vsel %vm4788_vm7, %v5512_v38, %v4785_v32  ;;  %5523 = vpow2.f32 %v5238_v59 }
 0x35e   : > { %v5518_v54 = vpop.eup %5517  ;;  %v4794_v39 = vsel %vm4791_vm10, %v4793_v30, %v4789_v48 }
 0x35f   : > { %v4883_v34 = vmul.f32 %v4794_v39, %v9498_v52  ;;  %v4797_v19 = vmul.f32 %v5518_v54, %v4372_v25  ;;  %v5520_v61 = vpop.eup %5519  ;;  %vm4802_vm14 = vweird.f32 %v5518_v54 }
 0x360   : > { %v5522_v56 = vpop.eup %5521  ;;  %v4812_v29 = vmul.f32 %v5520_v61, %v4373_v45  ;;  %vm4803_vm12 = vmor %vm4801_vm11, %vm4802_vm14  ;;  %vm4817_vm8 = vweird.f32 %v5520_v61 }
 0x361   : > { %4915 = vst.msk [vmem:[%s9123_s23 + $0xd8] sm:$0xff] %vm9997_vm13, %v4883_v34  ;;  %v4798_v17 = vsub.f32 1.0, %v4797_v19  ;;  %v4374_v52 = vadd.f32 1.0, %v5522_v56  ;;  %vm4818_vm9 = vmor %vm4816_vm3, %vm4817_vm8 }
 0x362   : > { %v4813_v6 = vsub.f32 1.0, %v4812_v29  ;;  %vm10000_vm13 = vmmov %vm9998_vm4 }
 0x363   : > { %v4799_v10 = vmul.f32 %v5518_v54, %v4798_v17  ;;  %5525 = vrcp.f32 %v4374_v52  ;;  %v5524_v44 = vpop.eup %5523  ;;  %v4835_v53 = vand.u32 2147483647, %v4374_v52  ;;  %vm4831_vm2 = vweird.f32 %v4374_v52 }
 0x364   : > { %v4814_v40 = vmul.f32 %v5520_v61, %v4813_v6  ;;  %v4375_v5 = vadd.f32 1.0, %v5524_v44 }
 0x365   : > { %v4800_v60 = vadd.f32 %v5518_v54, %v4799_v10  ;;  %vm4836_vm7 = vcmp.eq.f32.partialorder %v4835_v53, 8.507059e+37 }
 0x366   : > { %v4815_v18 = vadd.f32 %v5520_v61, %v4814_v40  ;;  %5527 = vrcp.f32 %v4375_v5  ;;  %v4852_v24 = vand.u32 2147483648, %v4375_v5  ;;  %v4850_v25 = vand.u32 2147483647, %v4375_v5 }
 0x367   : > { %v4804_v31 = vsel %vm4803_vm12, %v5518_v54, %v4800_v60  ;;  %vm4846_vm14 = vweird.f32 %v4375_v5 }
 0x368   : > { %v4809_v35 = vsel %vm4806_vm15, %v4808_v15, %v4804_v31  ;;  %v4819_v26 = vsel %vm4818_vm9, %v5520_v61, %v4815_v18  ;;  %v4853_v63 = vor.u32 1.1754944e-38, %v4852_v24  ;;  %vm4851_vm12 = vcmp.eq.f32.partialorder %v4850_v25, 8.507059e+37  ;;  %vm10001_vm15 = vmmov %vm9998_vm4 }
 0x369   : > { %v4884_v7 = vmul.f32 %v4809_v35, %v9508_v57  ;;  %v5526_v11 = vpop.eup %5525  ;;  %v4824_v27 = vsel %vm4821_vm0, %v4823_v41, %v4819_v26  ;;  %v4837_v57 = vand.u32 2147483648, %v4374_v52 }
 0x36a   : > { %v4885_v36 = vmul.f32 %v4824_v27, %v9515_v2  ;;  %v4827_v16 = vmul.f32 %v5526_v11, %v4374_v52  ;;  %vm4832_vm1 = vweird.f32 %v5526_v11 }
 0x36b   : > { %4916 = vst.msk [vmem:[%s9123_s23 + $0xe0] sm:$0xff] %vm9998_vm4, %v4884_v7  ;;  %vm4833_vm6 = vmor %vm4831_vm2, %vm4832_vm1  ;;  %v4838_v58 = vor.u32 1.1754944e-38, %v4837_v57 }
 0x36c   : > { %4917 = vst.msk [vmem:[%s9123_s23 + $0xe8] sm:$0xff] %vm9999_vm5, %v4885_v36  ;;  %v4828_v47 = vsub.f32 1.0, %v4827_v16  ;;  %v5528_v0 = vpop.eup %5527 }
 0x36d   : > { %v4842_v38 = vmul.f32 %v5528_v0, %v4375_v5  ;;  %vm4847_vm10 = vweird.f32 %v5528_v0 }
 0x36e   : > { %v4829_v23 = vmul.f32 %v5526_v11, %v4828_v47  ;;  %vm4848_vm11 = vmor %vm4846_vm14, %vm4847_vm10 }
 0x36f   : > { %v4843_v13 = vsub.f32 1.0, %v4842_v38 }
 0x370   : > { %v4830_v8 = vadd.f32 %v5526_v11, %v4829_v23 }
 0x371   : > { %v4844_v51 = vmul.f32 %v5528_v0, %v4843_v13 }
 0x372   : > { %v4834_v49 = vsel %vm4833_vm6, %v5526_v11, %v4830_v8 }
 0x373   : > { %v4839_v2 = vsel %vm4836_vm7, %v4838_v58, %v4834_v49  ;;  %v4845_v21 = vadd.f32 %v5528_v0, %v4844_v51 }
 0x374   : > { %v4886_v28 = vmul.f32 %v4839_v2, %v9522_v1 }
 0x375   : > { %v4849_v43 = vsel %vm4848_vm11, %v5528_v0, %v4845_v21 }
 0x376   : > { %4918 = vst.msk [vmem:[%s9123_s23 + $0xf0] sm:$0xff] %vm10000_vm13, %v4886_v28  ;;  %v4854_v3 = vsel %vm4851_vm12, %v4853_v63, %v4849_v43 }
 0x377   : > { %v4887_v12 = vmul.f32 %v4854_v3, %v9529_v42 }
 0x379   : > { %4919 = vst.msk [vmem:[%s9123_s23 + $0xf8] sm:$0xff] %vm10001_vm15, %v4887_v12 }
 0x37a PF: > { %s15_s20 = sadd.s32 1, %s5558_s20   ;;  %s10002_s18 = smov %s5554_s19 }
 0x37b   : > { %p12_p5 = scmp.ge.s32.totalorder %s15_s20, 4   ;;  %s10003_s19 = smov %s10005_s21 }
 0x37d   :  { %14 = sbr.rel (!%p12_p5) target bundleno = 2 (0x2), region = 70 }

</bundles_post_ra>
